<compile_context>
chip_gen: v7x
topology: tpu7x:2x2x1
jax: 0.10.0
libtpu: 0.0.40
codegen_flags: <defaults>
</compile_context>

<pallas_src>
import functools

import jax
import jax.numpy as jnp
from jax.experimental import pallas as pl
from jax.experimental.pallas import tpu as pltpu


# ----------------------------------------------------------------------------- #
# small helpers
# ----------------------------------------------------------------------------- #
def _round_up(v, m):
    return ((v + m - 1) // m) * m


def _pick_tile(m_out, cap=256):
    """Row tile: multiple of 8, <= cap, small enough for >=2 grid steps (v7x 2 TCs)."""
    return min(cap, max(8, _round_up(-(-m_out // 2), 8)))


# ----------------------------------------------------------------------------- #
# Pallas kernels
# ----------------------------------------------------------------------------- #
def _conv_kernel(x_ref, w_ref, b_ref, o_ref, *, offs, tile_m, act):
    """One output row-tile of a conv as kh*kw shifted matmuls (fused im2col).

    x_ref: (Mx, Cin)  whole flattened padded canvas, resident in VMEM
    w_ref: (ntaps, Cin, Cout);  b_ref: (1, Cout);  o_ref: (tile_m, Cout)
    """
    base = pl.program_id(0) * tile_m
    acc = jnp.zeros((tile_m, o_ref.shape[-1]), jnp.float32)
    for t, off in enumerate(offs):                       # static unroll, <= 9 taps
        a = x_ref[pl.ds(base + off, tile_m), :]
        acc = acc + jnp.dot(a, w_ref[t], preferred_element_type=jnp.float32)
    acc = acc + b_ref[...]
    if act == "swish":
        acc = acc * jax.nn.sigmoid(acc)                  # SiLU epilogue (exp -> EUP)
    o_ref[...] = acc.astype(o_ref.dtype)


def _conv_sample_kernel(x_ref, wm_ref, wl_ref, bm_ref, bl_ref, eps_ref, wq_ref, bq_ref,
                        z_ref, mean_ref, logvar_ref, *, offs, tile_m):
    """enc3 (folded with 1x1 quant_conv) + posterior sample + 1x1 post_quant_conv.

    Weights are pre-split into mean / logvar halves so no lane-slicing is needed.
    Outputs: post_quant(z), mean, logvar for this row tile.
    """
    base = pl.program_id(0) * tile_m
    zc = z_ref.shape[-1]
    acc_m = jnp.zeros((tile_m, zc), jnp.float32)
    acc_l = jnp.zeros((tile_m, zc), jnp.float32)
    for t, off in enumerate(offs):
        a = x_ref[pl.ds(base + off, tile_m), :]
        acc_m = acc_m + jnp.dot(a, wm_ref[t], preferred_element_type=jnp.float32)
        acc_l = acc_l + jnp.dot(a, wl_ref[t], preferred_element_type=jnp.float32)
    mean = acc_m + bm_ref[...]
    logvar = acc_l + bl_ref[...]
    mean_ref[...] = mean
    logvar_ref[...] = logvar
    lv = jnp.clip(logvar, -30.0, 20.0)
    z = mean + jnp.exp(0.5 * lv) * eps_ref[...]          # reparameterized sample
    z_ref[...] = (jnp.dot(z, wq_ref[...], preferred_element_type=jnp.float32)
                  + bq_ref[...])                         # fused post_quant 1x1


def _loss_kernel(x_ref, xr_ref, mu_ref, lv_ref, o_ref, rec_acc, kl_acc,
                 *, kl_weight, inv_batch):
    """Tiled, lane-dense reduction: loss = (sum|x-xrec| + kl_w * sum KL) / B."""
    i = pl.program_id(0)

    @pl.when(i == 0)
    def _():
        rec_acc[...] = jnp.zeros_like(rec_acc)
        kl_acc[...] = jnp.zeros_like(kl_acc)

    rec_acc[...] += jnp.sum(jnp.abs(x_ref[...] - xr_ref[...]))
    lv = jnp.clip(lv_ref[...], -30.0, 20.0)
    mu = mu_ref[...]
    kl_acc[...] += 0.5 * jnp.sum(mu * mu + jnp.exp(lv) - 1.0 - lv)

    @pl.when(i == pl.num_programs(0) - 1)
    def _():
        o_ref[...] = (rec_acc[...] + kl_weight * kl_acc[...]) * inv_batch


# ----------------------------------------------------------------------------- #
# Pallas wrappers
# ----------------------------------------------------------------------------- #
def _conv_flat(x_canvas, w, b, valid_hw, act="none", tile_cap=256):
    """Generic fused conv: out[b,y,x] = sum_{i,j} canvas[b,y+i,x+j] @ w[i,j] + b.

    The canvas is flattened so every tap is a constant row offset (i*Wc + j);
    extra canvas rows (y>=Hv or x>=Wv) produce garbage that is cropped afterwards.
    """
    N, Hc, Wc, Cin = x_canvas.shape
    th, tw, _, Cout = w.shape
    Hv, Wv = valid_hw
    M_out = N * Hc * Wc
    tile_m = _pick_tile(M_out, tile_cap)
    Mp = _round_up(M_out, tile_m)
    max_off = (th - 1) * Wc + (tw - 1)
    x_flat = jnp.pad(x_canvas.reshape(M_out, Cin), ((0, Mp + max_off - M_out), (0, 0)))
    w_flat = w.reshape(th * tw, Cin, Cout).astype(jnp.float32)
    offs = tuple(i * Wc + j for i in range(th) for j in range(tw))

    out = pl.pallas_call(
        functools.partial(_conv_kernel, offs=offs, tile_m=tile_m, act=act),
        out_shape=jax.ShapeDtypeStruct((Mp, Cout), jnp.float32),
        grid=(Mp // tile_m,),
        in_specs=[
            pl.BlockSpec((Mp + max_off, Cin), lambda i: (0, 0)),   # resident canvas
            pl.BlockSpec((th * tw, Cin, Cout), lambda i: (0, 0, 0)),
            pl.BlockSpec((1, Cout), lambda i: (0, 0)),
        ],
        out_specs=pl.BlockSpec((tile_m, Cout), lambda i: (i, 0)),
        compiler_params=pltpu.CompilerParams(dimension_semantics=("parallel",)),
    )(x_flat, w_flat, b.reshape(1, Cout).astype(jnp.float32))
    return out[:M_out].reshape(N, Hc, Wc, Cout)[:, :Hv, :Wv, :]


def conv_same(x, w, b, act="none"):
    """3x3 (or kxk) stride-1 'same' conv, NHWC."""
    kh, kw, _, _ = w.shape
    pad = kh // 2
    N, H, W, _ = x.shape
    xc = jnp.pad(x, ((0, 0), (pad, pad), (pad, pad), (0, 0)))
    return _conv_flat(xc, w, b, (H, W), act=act)


def conv_down2(x, w, b, act="none"):
    """3x3 stride-2 pad-1 conv, rewritten exactly as a 2x2 stride-1 conv on the
    space-to-depth(2) rearrangement of the padded input (no data blow-up)."""
    kh, kw, cin, cout = w.shape
    N, H, W, _ = x.shape
    xc = jnp.pad(x, ((0, 0), (1, 1), (1, 1), (0, 0)))              # (N, H+2, W+2, cin)
    Hc, Wc = H + 2, W + 2
    xs = (xc.reshape(N, Hc // 2, 2, Wc // 2, 2, cin)
            .transpose(0, 1, 3, 2, 4, 5)
            .reshape(N, Hc // 2, Wc // 2, 4 * cin))
    # rearranged 2x2 kernel over the 4*cin space-to-depth channels
    w_pad = jnp.pad(w, ((0, 1), (0, 1), (0, 0), (0, 0)))           # (4,4,cin,cout)
    w2 = (w_pad.reshape(2, 2, 2, 2, cin, cout)
              .transpose(0, 2, 1, 3, 4, 5)                         # (a, b, p, q, ci, co)
              .reshape(2, 2, 4 * cin, cout))
    return _conv_flat(xs, w2, b, (H // 2, W // 2), act=act)


def conv_moments_sample(x, w_m, b_m, eps, w_pq, b_pq, tile_cap=256):
    """Fused enc3∘quant conv + posterior sample + post_quant, single pallas_call.

    Returns (post_quant(z), mean, logvar), each NHWC at the latent resolution.
    """
    N, H, W, Cin = x.shape
    th, tw, _, C2 = w_m.shape
    zc = C2 // 2
    pad = th // 2
    xc = jnp.pad(x, ((0, 0), (pad, pad), (pad, pad), (0, 0)))
    Hc, Wc = H + 2 * pad, W + 2 * pad
    M_out = N * Hc * Wc
    tile_m = _pick_tile(M_out, tile_cap)
    Mp = _round_up(M_out, tile_m)
    max_off = (th - 1) * Wc + (tw - 1)
    x_flat = jnp.pad(xc.reshape(M_out, Cin), ((0, Mp + max_off - M_out), (0, 0)))
    offs = tuple(i * Wc + j for i in range(th) for j in range(tw))

    # weights / biases split into mean- and logvar-halves (avoids lane slicing)
    wm = w_m[..., :zc].reshape(th * tw, Cin, zc).astype(jnp.float32)
    wl = w_m[..., zc:].reshape(th * tw, Cin, zc).astype(jnp.float32)
    bm = b_m[:zc].reshape(1, zc).astype(jnp.float32)
    bl = b_m[zc:].reshape(1, zc).astype(jnp.float32)

    # eps in the same padded-canvas flattened row order as the conv output tiles
    eps_c = jnp.pad(eps, ((0, 0), (pad, pad), (pad, pad), (0, 0))).reshape(M_out, zc)
    eps_flat = jnp.pad(eps_c, ((0, Mp - M_out), (0, 0))).astype(jnp.float32)

    zq, mean, logvar = pl.pallas_call(
        functools.partial(_conv_sample_kernel, offs=offs, tile_m=tile_m),
        out_shape=(jax.ShapeDtypeStruct((Mp, zc), jnp.float32),
                   jax.ShapeDtypeStruct((Mp, zc), jnp.float32),
                   jax.ShapeDtypeStruct((Mp, zc), jnp.float32)),
        grid=(Mp // tile_m,),
        in_specs=[
            pl.BlockSpec((Mp + max_off, Cin), lambda i: (0, 0)),   # resident canvas
            pl.BlockSpec((th * tw, Cin, zc), lambda i: (0, 0, 0)),
            pl.BlockSpec((th * tw, Cin, zc), lambda i: (0, 0, 0)),
            pl.BlockSpec((1, zc), lambda i: (0, 0)),
            pl.BlockSpec((1, zc), lambda i: (0, 0)),
            pl.BlockSpec((tile_m, zc), lambda i: (i, 0)),
            pl.BlockSpec((zc, zc), lambda i: (0, 0)),
            pl.BlockSpec((1, zc), lambda i: (0, 0)),
        ],
        out_specs=(pl.BlockSpec((tile_m, zc), lambda i: (i, 0)),
                   pl.BlockSpec((tile_m, zc), lambda i: (i, 0)),
                   pl.BlockSpec((tile_m, zc), lambda i: (i, 0))),
        compiler_params=pltpu.CompilerParams(dimension_semantics=("parallel",)),
    )(x_flat, wm, wl, bm, bl, eps_flat,
      w_pq.astype(jnp.float32), b_pq.reshape(1, zc).astype(jnp.float32))

    def crop(a):
        return a[:M_out].reshape(N, Hc, Wc, zc)[:, :H, :W, :]

    return crop(zq), crop(mean), crop(logvar)


def compute_loss(x, xrec, mean, logvar, kl_weight, batch, tile_rows=8):
    """Tiled lane-dense reduction: (sum|x-xrec| + kl_w * sum KL) / B.

    All slabs are flattened to (rows, 128); zero padding contributes 0 to both sums.
    """
    r_rec = -(-x.size // 128)
    r_kl = -(-mean.size // 128)
    n_tiles = max(-(-r_rec // tile_rows), -(-r_kl // tile_rows), 1)
    rows = n_tiles * tile_rows

    def to_slab(a):
        flat = a.reshape(-1).astype(jnp.float32)
        return jnp.pad(flat, (0, rows * 128 - flat.size)).reshape(rows, 128)

    out = pl.pallas_call(
        functools.partial(_loss_kernel, kl_weight=float(kl_weight),
                          inv_batch=1.0 / float(batch)),
        out_shape=jax.ShapeDtypeStruct((1, 1), jnp.float32),
        grid=(n_tiles,),
        in_specs=[
            pl.BlockSpec((tile_rows, 128), lambda i: (i, 0)),
            pl.BlockSpec((tile_rows, 128), lambda i: (i, 0)),
            pl.BlockSpec((tile_rows, 128), lambda i: (i, 0)),
            pl.BlockSpec((tile_rows, 128), lambda i: (i, 0)),
        ],
        out_specs=pl.BlockSpec((1, 1), lambda i: (0, 0)),
        scratch_shapes=[pltpu.VMEM((1, 1), jnp.float32),
                        pltpu.VMEM((1, 1), jnp.float32)],
        compiler_params=pltpu.CompilerParams(dimension_semantics=("arbitrary",)),
    )(to_slab(x), to_slab(xrec), to_slab(mean), to_slab(logvar))
    return out[0, 0]


# ----------------------------------------------------------------------------- #
# Parameters (deterministic synthetic init — no checkpoint loading)
# ----------------------------------------------------------------------------- #
def init_params(key, in_ch=3, hidden=32, z_ch=4):
    ks = jax.random.split(key, 8)

    def cw(k, kh, kw, cin, cout):
        return 0.05 * jax.random.normal(k, (kh, kw, cin, cout), jnp.float32)

    p = {}
    p["enc1_w"], p["enc1_b"] = cw(ks[0], 3, 3, in_ch, hidden), jnp.zeros((hidden,), jnp.float32)
    p["enc2_w"], p["enc2_b"] = cw(ks[1], 3, 3, hidden, hidden), jnp.zeros((hidden,), jnp.float32)
    p["enc3_w"], p["enc3_b"] = cw(ks[2], 3, 3, hidden, 2 * z_ch), jnp.zeros((2 * z_ch,), jnp.float32)
    p["quant_w"], p["quant_b"] = cw(ks[3], 1, 1, 2 * z_ch, 2 * z_ch), jnp.zeros((2 * z_ch,), jnp.float32)
    p["post_w"], p["post_b"] = cw(ks[4], 1, 1, z_ch, z_ch), jnp.zeros((z_ch,), jnp.float32)
    p["dec1_w"], p["dec1_b"] = cw(ks[5], 3, 3, z_ch, hidden), jnp.zeros((hidden,), jnp.float32)
    p["dec2_w"], p["dec2_b"] = cw(ks[6], 3, 3, hidden, hidden), jnp.zeros((hidden,), jnp.float32)
    p["dec3_w"], p["dec3_b"] = cw(ks[7], 3, 3, hidden, in_ch), jnp.zeros((in_ch,), jnp.float32)
    return p


# ----------------------------------------------------------------------------- #
# VAE forward (== training_step loss with optimizer_idx=0, no discriminator)
# ----------------------------------------------------------------------------- #
def vae_forward(params, x_nchw, eps, kl_weight=1e-6):
    x = jnp.transpose(x_nchw, (0, 2, 3, 1)).astype(jnp.float32)     # NCHW -> NHWC
    B = x.shape[0]

    # --- encoder ---
    h = conv_same(x, params["enc1_w"], params["enc1_b"], act="swish")
    h = conv_down2(h, params["enc2_w"], params["enc2_b"], act="swish")

    # enc3 ∘ quant_conv folded exactly (1x1 after 3x3); sample + post_quant fused in-kernel
    wq = params["quant_w"][0, 0]
    w_m = jnp.einsum("ijab,bc->ijac", params["enc3_w"], wq)
    b_m = params["enc3_b"] @ wq + params["quant_b"]
    zq, mean, logvar = conv_moments_sample(
        h, w_m, b_m, eps, params["post_w"][0, 0], params["post_b"])

    # --- decoder ---
    d = conv_same(zq, params["dec1_w"], params["dec1_b"], act="swish")
    d = jnp.repeat(jnp.repeat(d, 2, axis=1), 2, axis=2)             # nearest 2x upsample
    d = conv_same(d, params["dec2_w"], params["dec2_b"], act="swish")
    xrec = conv_same(d, params["dec3_w"], params["dec3_b"], act="none")

    # --- loss (rec L1 + KL), tiled lane-dense Pallas reduction ---
    return compute_loss(x, xrec, mean, logvar, kl_weight, B)


# ----------------------------------------------------------------------------- #
# main
# ----------------------------------------------------------------------------- #
if __name__ == "__main__":
    B, C, H, W = 2, 3, 16, 16
    HIDDEN, Z = 32, 4

    key = jax.random.PRNGKey(0)
    k_params, k_x, k_eps = jax.random.split(key, 3)

    params = init_params(k_params, in_ch=C, hidden=HIDDEN, z_ch=Z)
    x = jax.random.normal(k_x, (B, C, H, W), jnp.float32)                # NCHW (PyTorch)
    eps = jax.random.normal(k_eps, (B, H // 2, W // 2, Z), jnp.float32)  # reparam noise

    fwd = jax.jit(functools.partial(vae_forward, kl_weight=1e-6))
    loss = fwd(params, x, eps)
    loss = jax.block_until_ready(loss)

    assert loss.shape == () and jnp.isfinite(loss), f"bad loss: {loss}"
    print("KERNEL_OK")
</pallas_src>

<mosaic_0001>
module attributes {stable_mosaic.version = 11 : i64} {
  func.func @_conv_kernel(%arg0: i32, %arg1: memref<806x3xf32, #tpu.memory_space<vmem>>, %arg2: memref<9x3x32xf32, #tpu.memory_space<vmem>>, %arg3: memref<1x32xf32, #tpu.memory_space<vmem>>, %arg4: memref<256x32xf32, #tpu.memory_space<vmem>>) attributes {dimension_semantics = [#tpu.dimension_semantics<parallel>], iteration_bounds = array<i64: 3>, scalar_prefetch = 0 : i64, scratch_operands = 0 : i64, tpu.core_type = #tpu.core_type<tc>, window_params = [{pipeline_mode = #tpu.pipeline_mode<synchronous>, transform_indices = @transform_0, window_bounds = array<i64: 806, 3>}, {pipeline_mode = #tpu.pipeline_mode<synchronous>, transform_indices = @transform_1, window_bounds = array<i64: 9, 3, 32>}, {pipeline_mode = #tpu.pipeline_mode<synchronous>, transform_indices = @transform_2, window_bounds = array<i64: 1, 32>}, {transform_indices = @transform_3, window_bounds = array<i64: 256, 32>}]} {
    %c256_i32 = arith.constant 256 : i32
    %0 = arith.muli %arg0, %c256_i32 : i32
    %cst = arith.constant 0.000000e+00 : f32
    %1 = vector.broadcast %cst : f32 to vector<256x32xf32>
    %c0_i32 = arith.constant 0 : i32
    %2 = arith.addi %0, %c0_i32 : i32
    %3 = arith.index_cast %2 : i32 to index
    %c0 = arith.constant 0 : index
    %4 = vector.load %arg1[%3, %c0] : memref<806x3xf32, #tpu.memory_space<vmem>>, vector<256x3xf32>
    %c0_0 = arith.constant 0 : index
    %c0_1 = arith.constant 0 : index
    %c0_2 = arith.constant 0 : index
    %5 = vector.load %arg2[%c0_0, %c0_1, %c0_2] : memref<9x3x32xf32, #tpu.memory_space<vmem>>, vector<1x3x32xf32>
    %6 = vector.shape_cast %5 : vector<1x3x32xf32> to vector<3x32xf32>
    %cst_3 = arith.constant dense<0.000000e+00> : vector<256x32xf32>
    %7 = tpu.matmul %4, %6, %cst_3 {dimension_numbers = #tpu.dot_dimension_numbers<[1], [0], [0], [1], [0, 0, 1, 1], [], []>} : vector<256x3xf32>, vector<3x32xf32>, vector<256x32xf32> -> vector<256x32xf32>
    %8 = arith.addf %1, %7 : vector<256x32xf32>
    %c1_i32 = arith.constant 1 : i32
    %9 = arith.addi %0, %c1_i32 : i32
    %10 = arith.index_cast %9 : i32 to index
    %c0_4 = arith.constant 0 : index
    %11 = vector.load %arg1[%10, %c0_4] : memref<806x3xf32, #tpu.memory_space<vmem>>, vector<256x3xf32>
    %c1 = arith.constant 1 : index
    %c0_5 = arith.constant 0 : index
    %c0_6 = arith.constant 0 : index
    %12 = vector.load %arg2[%c1, %c0_5, %c0_6] : memref<9x3x32xf32, #tpu.memory_space<vmem>>, vector<1x3x32xf32>
    %13 = vector.shape_cast %12 : vector<1x3x32xf32> to vector<3x32xf32>
    %cst_7 = arith.constant dense<0.000000e+00> : vector<256x32xf32>
    %14 = tpu.matmul %11, %13, %cst_7 {dimension_numbers = #tpu.dot_dimension_numbers<[1], [0], [0], [1], [0, 0, 1, 1], [], []>} : vector<256x3xf32>, vector<3x32xf32>, vector<256x32xf32> -> vector<256x32xf32>
    %15 = arith.addf %8, %14 : vector<256x32xf32>
    %c2_i32 = arith.constant 2 : i32
    %16 = arith.addi %0, %c2_i32 : i32
    %17 = arith.index_cast %16 : i32 to index
    %c0_8 = arith.constant 0 : index
    %18 = vector.load %arg1[%17, %c0_8] : memref<806x3xf32, #tpu.memory_space<vmem>>, vector<256x3xf32>
    %c2 = arith.constant 2 : index
    %c0_9 = arith.constant 0 : index
    %c0_10 = arith.constant 0 : index
    %19 = vector.load %arg2[%c2, %c0_9, %c0_10] : memref<9x3x32xf32, #tpu.memory_space<vmem>>, vector<1x3x32xf32>
    %20 = vector.shape_cast %19 : vector<1x3x32xf32> to vector<3x32xf32>
    %cst_11 = arith.constant dense<0.000000e+00> : vector<256x32xf32>
    %21 = tpu.matmul %18, %20, %cst_11 {dimension_numbers = #tpu.dot_dimension_numbers<[1], [0], [0], [1], [0, 0, 1, 1], [], []>} : vector<256x3xf32>, vector<3x32xf32>, vector<256x32xf32> -> vector<256x32xf32>
    %22 = arith.addf %15, %21 : vector<256x32xf32>
    %c18_i32 = arith.constant 18 : i32
    %23 = arith.addi %0, %c18_i32 : i32
    %24 = arith.index_cast %23 : i32 to index
    %c0_12 = arith.constant 0 : index
    %25 = vector.load %arg1[%24, %c0_12] : memref<806x3xf32, #tpu.memory_space<vmem>>, vector<256x3xf32>
    %c3 = arith.constant 3 : index
    %c0_13 = arith.constant 0 : index
    %c0_14 = arith.constant 0 : index
    %26 = vector.load %arg2[%c3, %c0_13, %c0_14] : memref<9x3x32xf32, #tpu.memory_space<vmem>>, vector<1x3x32xf32>
    %27 = vector.shape_cast %26 : vector<1x3x32xf32> to vector<3x32xf32>
    %cst_15 = arith.constant dense<0.000000e+00> : vector<256x32xf32>
    %28 = tpu.matmul %25, %27, %cst_15 {dimension_numbers = #tpu.dot_dimension_numbers<[1], [0], [0], [1], [0, 0, 1, 1], [], []>} : vector<256x3xf32>, vector<3x32xf32>, vector<256x32xf32> -> vector<256x32xf32>
    %29 = arith.addf %22, %28 : vector<256x32xf32>
    %c19_i32 = arith.constant 19 : i32
    %30 = arith.addi %0, %c19_i32 : i32
    %31 = arith.index_cast %30 : i32 to index
    %c0_16 = arith.constant 0 : index
    %32 = vector.load %arg1[%31, %c0_16] : memref<806x3xf32, #tpu.memory_space<vmem>>, vector<256x3xf32>
    %c4 = arith.constant 4 : index
    %c0_17 = arith.constant 0 : index
    %c0_18 = arith.constant 0 : index
    %33 = vector.load %arg2[%c4, %c0_17, %c0_18] : memref<9x3x32xf32, #tpu.memory_space<vmem>>, vector<1x3x32xf32>
    %34 = vector.shape_cast %33 : vector<1x3x32xf32> to vector<3x32xf32>
    %cst_19 = arith.constant dense<0.000000e+00> : vector<256x32xf32>
    %35 = tpu.matmul %32, %34, %cst_19 {dimension_numbers = #tpu.dot_dimension_numbers<[1], [0], [0], [1], [0, 0, 1, 1], [], []>} : vector<256x3xf32>, vector<3x32xf32>, vector<256x32xf32> -> vector<256x32xf32>
    %36 = arith.addf %29, %35 : vector<256x32xf32>
    %c20_i32 = arith.constant 20 : i32
    %37 = arith.addi %0, %c20_i32 : i32
    %38 = arith.index_cast %37 : i32 to index
    %c0_20 = arith.constant 0 : index
    %39 = vector.load %arg1[%38, %c0_20] : memref<806x3xf32, #tpu.memory_space<vmem>>, vector<256x3xf32>
    %c5 = arith.constant 5 : index
    %c0_21 = arith.constant 0 : index
    %c0_22 = arith.constant 0 : index
    %40 = vector.load %arg2[%c5, %c0_21, %c0_22] : memref<9x3x32xf32, #tpu.memory_space<vmem>>, vector<1x3x32xf32>
    %41 = vector.shape_cast %40 : vector<1x3x32xf32> to vector<3x32xf32>
    %cst_23 = arith.constant dense<0.000000e+00> : vector<256x32xf32>
    %42 = tpu.matmul %39, %41, %cst_23 {dimension_numbers = #tpu.dot_dimension_numbers<[1], [0], [0], [1], [0, 0, 1, 1], [], []>} : vector<256x3xf32>, vector<3x32xf32>, vector<256x32xf32> -> vector<256x32xf32>
    %43 = arith.addf %36, %42 : vector<256x32xf32>
    %c36_i32 = arith.constant 36 : i32
    %44 = arith.addi %0, %c36_i32 : i32
    %45 = arith.index_cast %44 : i32 to index
    %c0_24 = arith.constant 0 : index
    %46 = vector.load %arg1[%45, %c0_24] : memref<806x3xf32, #tpu.memory_space<vmem>>, vector<256x3xf32>
    %c6 = arith.constant 6 : index
    %c0_25 = arith.constant 0 : index
    %c0_26 = arith.constant 0 : index
    %47 = vector.load %arg2[%c6, %c0_25, %c0_26] : memref<9x3x32xf32, #tpu.memory_space<vmem>>, vector<1x3x32xf32>
    %48 = vector.shape_cast %47 : vector<1x3x32xf32> to vector<3x32xf32>
    %cst_27 = arith.constant dense<0.000000e+00> : vector<256x32xf32>
    %49 = tpu.matmul %46, %48, %cst_27 {dimension_numbers = #tpu.dot_dimension_numbers<[1], [0], [0], [1], [0, 0, 1, 1], [], []>} : vector<256x3xf32>, vector<3x32xf32>, vector<256x32xf32> -> vector<256x32xf32>
    %50 = arith.addf %43, %49 : vector<256x32xf32>
    %c37_i32 = arith.constant 37 : i32
    %51 = arith.addi %0, %c37_i32 : i32
    %52 = arith.index_cast %51 : i32 to index
    %c0_28 = arith.constant 0 : index
    %53 = vector.load %arg1[%52, %c0_28] : memref<806x3xf32, #tpu.memory_space<vmem>>, vector<256x3xf32>
    %c7 = arith.constant 7 : index
    %c0_29 = arith.constant 0 : index
    %c0_30 = arith.constant 0 : index
    %54 = vector.load %arg2[%c7, %c0_29, %c0_30] : memref<9x3x32xf32, #tpu.memory_space<vmem>>, vector<1x3x32xf32>
    %55 = vector.shape_cast %54 : vector<1x3x32xf32> to vector<3x32xf32>
    %cst_31 = arith.constant dense<0.000000e+00> : vector<256x32xf32>
    %56 = tpu.matmul %53, %55, %cst_31 {dimension_numbers = #tpu.dot_dimension_numbers<[1], [0], [0], [1], [0, 0, 1, 1], [], []>} : vector<256x3xf32>, vector<3x32xf32>, vector<256x32xf32> -> vector<256x32xf32>
    %57 = arith.addf %50, %56 : vector<256x32xf32>
    %c38_i32 = arith.constant 38 : i32
    %58 = arith.addi %0, %c38_i32 : i32
    %59 = arith.index_cast %58 : i32 to index
    %c0_32 = arith.constant 0 : index
    %60 = vector.load %arg1[%59, %c0_32] : memref<806x3xf32, #tpu.memory_space<vmem>>, vector<256x3xf32>
    %c8 = arith.constant 8 : index
    %c0_33 = arith.constant 0 : index
    %c0_34 = arith.constant 0 : index
    %61 = vector.load %arg2[%c8, %c0_33, %c0_34] : memref<9x3x32xf32, #tpu.memory_space<vmem>>, vector<1x3x32xf32>
    %62 = vector.shape_cast %61 : vector<1x3x32xf32> to vector<3x32xf32>
    %cst_35 = arith.constant dense<0.000000e+00> : vector<256x32xf32>
    %63 = tpu.matmul %60, %62, %cst_35 {dimension_numbers = #tpu.dot_dimension_numbers<[1], [0], [0], [1], [0, 0, 1, 1], [], []>} : vector<256x3xf32>, vector<3x32xf32>, vector<256x32xf32> -> vector<256x32xf32>
    %64 = arith.addf %57, %63 : vector<256x32xf32>
    %c0_36 = arith.constant 0 : index
    %c0_37 = arith.constant 0 : index
    %65 = vector.load %arg3[%c0_36, %c0_37] : memref<1x32xf32, #tpu.memory_space<vmem>>, vector<1x32xf32>
    %66 = vector.broadcast %65 : vector<1x32xf32> to vector<256x32xf32>
    %67 = arith.addf %64, %66 : vector<256x32xf32>
    %68 = arith.negf %67 : vector<256x32xf32>
    %69 = math.exp %68 : vector<256x32xf32>
    %cst_38 = arith.constant 1.000000e+00 : f32
    %70 = vector.broadcast %cst_38 : f32 to vector<256x32xf32>
    %71 = arith.addf %70, %69 : vector<256x32xf32>
    %72 = arith.divf %70, %71 : vector<256x32xf32>
    %73 = arith.mulf %67, %72 : vector<256x32xf32>
    %c0_39 = arith.constant 0 : index
    %c0_40 = arith.constant 0 : index
    %74 = vector.load %arg4[%c0_39, %c0_40] : memref<256x32xf32, #tpu.memory_space<vmem>>, vector<256x32xf32>
    tpu.vector_store %arg4[%c0_39, %c0_40], %73 {strides = array<i32>} : memref<256x32xf32, #tpu.memory_space<vmem>>, vector<256x32xf32>,
    return
  }
  func.func @transform_0(%arg0: i32) -> (i32, i32) {
    %c0_i32 = arith.constant 0 : i32
    %c0_i32_0 = arith.constant 0 : i32
    %c0_i32_1 = arith.constant 0 : i32
    return %c0_i32, %c0_i32_0 : i32, i32
  }
  func.func @transform_1(%arg0: i32) -> (i32, i32, i32) {
    %c0_i32 = arith.constant 0 : i32
    %c0_i32_0 = arith.constant 0 : i32
    %c0_i32_1 = arith.constant 0 : i32
    %c0_i32_2 = arith.constant 0 : i32
    return %c0_i32, %c0_i32_0, %c0_i32_1 : i32, i32, i32
  }
  func.func @transform_2(%arg0: i32) -> (i32, i32) {
    %c0_i32 = arith.constant 0 : i32
    %c0_i32_0 = arith.constant 0 : i32
    %c0_i32_1 = arith.constant 0 : i32
    return %c0_i32, %c0_i32_0 : i32, i32
  }
  func.func @transform_3(%arg0: i32) -> (i32, i32) {
    %c0_i32 = arith.constant 0 : i32
    %c0_i32_0 = arith.constant 0 : i32
    return %arg0, %c0_i32 : i32, i32
  }
}

module attributes {stable_mosaic.version = 11 : i64} {
  func.func @_conv_kernel(%arg0: i32, %arg1: memref<186x128xf32, #tpu.memory_space<vmem>>, %arg2: memref<4x128x32xf32, #tpu.memory_space<vmem>>, %arg3: memref<1x32xf32, #tpu.memory_space<vmem>>, %arg4: memref<88x32xf32, #tpu.memory_space<vmem>>) attributes {dimension_semantics = [#tpu.dimension_semantics<parallel>], iteration_bounds = array<i64: 2>, scalar_prefetch = 0 : i64, scratch_operands = 0 : i64, tpu.core_type = #tpu.core_type<tc>, window_params = [{pipeline_mode = #tpu.pipeline_mode<synchronous>, transform_indices = @transform_0, window_bounds = array<i64: 186, 128>}, {pipeline_mode = #tpu.pipeline_mode<synchronous>, transform_indices = @transform_1, window_bounds = array<i64: 4, 128, 32>}, {pipeline_mode = #tpu.pipeline_mode<synchronous>, transform_indices = @transform_2, window_bounds = array<i64: 1, 32>}, {transform_indices = @transform_3, window_bounds = array<i64: 88, 32>}]} {
    %c88_i32 = arith.constant 88 : i32
    %0 = arith.muli %arg0, %c88_i32 : i32
    %cst = arith.constant 0.000000e+00 : f32
    %1 = vector.broadcast %cst : f32 to vector<88x32xf32>
    %c0_i32 = arith.constant 0 : i32
    %2 = arith.addi %0, %c0_i32 : i32
    %3 = arith.index_cast %2 : i32 to index
    %c0 = arith.constant 0 : index
    %4 = vector.load %arg1[%3, %c0] : memref<186x128xf32, #tpu.memory_space<vmem>>, vector<88x128xf32>
    %c0_0 = arith.constant 0 : index
    %c0_1 = arith.constant 0 : index
    %c0_2 = arith.constant 0 : index
    %5 = vector.load %arg2[%c0_0, %c0_1, %c0_2] : memref<4x128x32xf32, #tpu.memory_space<vmem>>, vector<1x128x32xf32>
    %6 = vector.shape_cast %5 : vector<1x128x32xf32> to vector<128x32xf32>
    %cst_3 = arith.constant dense<0.000000e+00> : vector<88x32xf32>
    %7 = tpu.matmul %4, %6, %cst_3 {dimension_numbers = #tpu.dot_dimension_numbers<[1], [0], [0], [1], [0, 0, 1, 1], [], []>} : vector<88x128xf32>, vector<128x32xf32>, vector<88x32xf32> -> vector<88x32xf32>
    %8 = arith.addf %1, %7 : vector<88x32xf32>
    %c1_i32 = arith.constant 1 : i32
    %9 = arith.addi %0, %c1_i32 : i32
    %10 = arith.index_cast %9 : i32 to index
    %c0_4 = arith.constant 0 : index
    %11 = vector.load %arg1[%10, %c0_4] : memref<186x128xf32, #tpu.memory_space<vmem>>, vector<88x128xf32>
    %c1 = arith.constant 1 : index
    %c0_5 = arith.constant 0 : index
    %c0_6 = arith.constant 0 : index
    %12 = vector.load %arg2[%c1, %c0_5, %c0_6] : memref<4x128x32xf32, #tpu.memory_space<vmem>>, vector<1x128x32xf32>
    %13 = vector.shape_cast %12 : vector<1x128x32xf32> to vector<128x32xf32>
    %cst_7 = arith.constant dense<0.000000e+00> : vector<88x32xf32>
    %14 = tpu.matmul %11, %13, %cst_7 {dimension_numbers = #tpu.dot_dimension_numbers<[1], [0], [0], [1], [0, 0, 1, 1], [], []>} : vector<88x128xf32>, vector<128x32xf32>, vector<88x32xf32> -> vector<88x32xf32>
    %15 = arith.addf %8, %14 : vector<88x32xf32>
    %c9_i32 = arith.constant 9 : i32
    %16 = arith.addi %0, %c9_i32 : i32
    %17 = arith.index_cast %16 : i32 to index
    %c0_8 = arith.constant 0 : index
    %18 = vector.load %arg1[%17, %c0_8] : memref<186x128xf32, #tpu.memory_space<vmem>>, vector<88x128xf32>
    %c2 = arith.constant 2 : index
    %c0_9 = arith.constant 0 : index
    %c0_10 = arith.constant 0 : index
    %19 = vector.load %arg2[%c2, %c0_9, %c0_10] : memref<4x128x32xf32, #tpu.memory_space<vmem>>, vector<1x128x32xf32>
    %20 = vector.shape_cast %19 : vector<1x128x32xf32> to vector<128x32xf32>
    %cst_11 = arith.constant dense<0.000000e+00> : vector<88x32xf32>
    %21 = tpu.matmul %18, %20, %cst_11 {dimension_numbers = #tpu.dot_dimension_numbers<[1], [0], [0], [1], [0, 0, 1, 1], [], []>} : vector<88x128xf32>, vector<128x32xf32>, vector<88x32xf32> -> vector<88x32xf32>
    %22 = arith.addf %15, %21 : vector<88x32xf32>
    %c10_i32 = arith.constant 10 : i32
    %23 = arith.addi %0, %c10_i32 : i32
    %24 = arith.index_cast %23 : i32 to index
    %c0_12 = arith.constant 0 : index
    %25 = vector.load %arg1[%24, %c0_12] : memref<186x128xf32, #tpu.memory_space<vmem>>, vector<88x128xf32>
    %c3 = arith.constant 3 : index
    %c0_13 = arith.constant 0 : index
    %c0_14 = arith.constant 0 : index
    %26 = vector.load %arg2[%c3, %c0_13, %c0_14] : memref<4x128x32xf32, #tpu.memory_space<vmem>>, vector<1x128x32xf32>
    %27 = vector.shape_cast %26 : vector<1x128x32xf32> to vector<128x32xf32>
    %cst_15 = arith.constant dense<0.000000e+00> : vector<88x32xf32>
    %28 = tpu.matmul %25, %27, %cst_15 {dimension_numbers = #tpu.dot_dimension_numbers<[1], [0], [0], [1], [0, 0, 1, 1], [], []>} : vector<88x128xf32>, vector<128x32xf32>, vector<88x32xf32> -> vector<88x32xf32>
    %29 = arith.addf %22, %28 : vector<88x32xf32>
    %c0_16 = arith.constant 0 : index
    %c0_17 = arith.constant 0 : index
    %30 = vector.load %arg3[%c0_16, %c0_17] : memref<1x32xf32, #tpu.memory_space<vmem>>, vector<1x32xf32>
    %31 = vector.broadcast %30 : vector<1x32xf32> to vector<88x32xf32>
    %32 = arith.addf %29, %31 : vector<88x32xf32>
    %33 = arith.negf %32 : vector<88x32xf32>
    %34 = math.exp %33 : vector<88x32xf32>
    %cst_18 = arith.constant 1.000000e+00 : f32
    %35 = vector.broadcast %cst_18 : f32 to vector<88x32xf32>
    %36 = arith.addf %35, %34 : vector<88x32xf32>
    %37 = arith.divf %35, %36 : vector<88x32xf32>
    %38 = arith.mulf %32, %37 : vector<88x32xf32>
    %c0_19 = arith.constant 0 : index
    %c0_20 = arith.constant 0 : index
    %39 = vector.load %arg4[%c0_19, %c0_20] : memref<88x32xf32, #tpu.memory_space<vmem>>, vector<88x32xf32>
    tpu.vector_store %arg4[%c0_19, %c0_20], %38 {strides = array<i32>} : memref<88x32xf32, #tpu.memory_space<vmem>>, vector<88x32xf32>,
    return
  }
  func.func @transform_0(%arg0: i32) -> (i32, i32) {
    %c0_i32 = arith.constant 0 : i32
    %c0_i32_0 = arith.constant 0 : i32
    %c0_i32_1 = arith.constant 0 : i32
    return %c0_i32, %c0_i32_0 : i32, i32
  }
  func.func @transform_1(%arg0: i32) -> (i32, i32, i32) {
    %c0_i32 = arith.constant 0 : i32
    %c0_i32_0 = arith.constant 0 : i32
    %c0_i32_1 = arith.constant 0 : i32
    %c0_i32_2 = arith.constant 0 : i32
    return %c0_i32, %c0_i32_0, %c0_i32_1 : i32, i32, i32
  }
  func.func @transform_2(%arg0: i32) -> (i32, i32) {
    %c0_i32 = arith.constant 0 : i32
    %c0_i32_0 = arith.constant 0 : i32
    %c0_i32_1 = arith.constant 0 : i32
    return %c0_i32, %c0_i32_0 : i32, i32
  }
  func.func @transform_3(%arg0: i32) -> (i32, i32) {
    %c0_i32 = arith.constant 0 : i32
    %c0_i32_0 = arith.constant 0 : i32
    return %arg0, %c0_i32 : i32, i32
  }
}

module attributes {stable_mosaic.version = 11 : i64} {
  func.func @_conv_sample_kernel(%arg0: i32, %arg1: memref<230x32xf32, #tpu.memory_space<vmem>>, %arg2: memref<9x32x4xf32, #tpu.memory_space<vmem>>, %arg3: memref<9x32x4xf32, #tpu.memory_space<vmem>>, %arg4: memref<1x4xf32, #tpu.memory_space<vmem>>, %arg5: memref<1x4xf32, #tpu.memory_space<vmem>>, %arg6: memref<104x4xf32, #tpu.memory_space<vmem>>, %arg7: memref<4x4xf32, #tpu.memory_space<vmem>>, %arg8: memref<1x4xf32, #tpu.memory_space<vmem>>, %arg9: memref<104x4xf32, #tpu.memory_space<vmem>>, %arg10: memref<104x4xf32, #tpu.memory_space<vmem>>, %arg11: memref<104x4xf32, #tpu.memory_space<vmem>>) attributes {dimension_semantics = [#tpu.dimension_semantics<parallel>], iteration_bounds = array<i64: 2>, scalar_prefetch = 0 : i64, scratch_operands = 0 : i64, tpu.core_type = #tpu.core_type<tc>, window_params = [{pipeline_mode = #tpu.pipeline_mode<synchronous>, transform_indices = @transform_0, window_bounds = array<i64: 230, 32>}, {pipeline_mode = #tpu.pipeline_mode<synchronous>, transform_indices = @transform_1, window_bounds = array<i64: 9, 32, 4>}, {pipeline_mode = #tpu.pipeline_mode<synchronous>, transform_indices = @transform_2, window_bounds = array<i64: 9, 32, 4>}, {pipeline_mode = #tpu.pipeline_mode<synchronous>, transform_indices = @transform_3, window_bounds = array<i64: 1, 4>}, {pipeline_mode = #tpu.pipeline_mode<synchronous>, transform_indices = @transform_4, window_bounds = array<i64: 1, 4>}, {transform_indices = @transform_5, window_bounds = array<i64: 104, 4>}, {pipeline_mode = #tpu.pipeline_mode<synchronous>, transform_indices = @transform_6, window_bounds = array<i64: 4, 4>}, {pipeline_mode = #tpu.pipeline_mode<synchronous>, transform_indices = @transform_7, window_bounds = array<i64: 1, 4>}, {transform_indices = @transform_8, window_bounds = array<i64: 104, 4>}, {transform_indices = @transform_9, window_bounds = array<i64: 104, 4>}, {transform_indices = @transform_10, window_bounds = array<i64: 104, 4>}]} {
    %c104_i32 = arith.constant 104 : i32
    %0 = arith.muli %arg0, %c104_i32 : i32
    %cst = arith.constant 0.000000e+00 : f32
    %1 = vector.broadcast %cst : f32 to vector<104x4xf32>
    %cst_0 = arith.constant 0.000000e+00 : f32
    %2 = vector.broadcast %cst_0 : f32 to vector<104x4xf32>
    %c0_i32 = arith.constant 0 : i32
    %3 = arith.addi %0, %c0_i32 : i32
    %4 = arith.index_cast %3 : i32 to index
    %c0 = arith.constant 0 : index
    %5 = vector.load %arg1[%4, %c0] : memref<230x32xf32, #tpu.memory_space<vmem>>, vector<104x32xf32>
    %c0_1 = arith.constant 0 : index
    %c0_2 = arith.constant 0 : index
    %c0_3 = arith.constant 0 : index
    %6 = vector.load %arg2[%c0_1, %c0_2, %c0_3] : memref<9x32x4xf32, #tpu.memory_space<vmem>>, vector<1x32x4xf32>
    %7 = vector.shape_cast %6 : vector<1x32x4xf32> to vector<32x4xf32>
    %cst_4 = arith.constant dense<0.000000e+00> : vector<104x4xf32>
    %8 = tpu.matmul %5, %7, %cst_4 {dimension_numbers = #tpu.dot_dimension_numbers<[1], [0], [0], [1], [0, 0, 1, 1], [], []>} : vector<104x32xf32>, vector<32x4xf32>, vector<104x4xf32> -> vector<104x4xf32>
    %9 = arith.addf %1, %8 : vector<104x4xf32>
    %c0_5 = arith.constant 0 : index
    %c0_6 = arith.constant 0 : index
    %c0_7 = arith.constant 0 : index
    %10 = vector.load %arg3[%c0_5, %c0_6, %c0_7] : memref<9x32x4xf32, #tpu.memory_space<vmem>>, vector<1x32x4xf32>
    %11 = vector.shape_cast %10 : vector<1x32x4xf32> to vector<32x4xf32>
    %cst_8 = arith.constant dense<0.000000e+00> : vector<104x4xf32>
    %12 = tpu.matmul %5, %11, %cst_8 {dimension_numbers = #tpu.dot_dimension_numbers<[1], [0], [0], [1], [0, 0, 1, 1], [], []>} : vector<104x32xf32>, vector<32x4xf32>, vector<104x4xf32> -> vector<104x4xf32>
    %13 = arith.addf %2, %12 : vector<104x4xf32>
    %c1_i32 = arith.constant 1 : i32
    %14 = arith.addi %0, %c1_i32 : i32
    %15 = arith.index_cast %14 : i32 to index
    %c0_9 = arith.constant 0 : index
    %16 = vector.load %arg1[%15, %c0_9] : memref<230x32xf32, #tpu.memory_space<vmem>>, vector<104x32xf32>
    %c1 = arith.constant 1 : index
    %c0_10 = arith.constant 0 : index
    %c0_11 = arith.constant 0 : index
    %17 = vector.load %arg2[%c1, %c0_10, %c0_11] : memref<9x32x4xf32, #tpu.memory_space<vmem>>, vector<1x32x4xf32>
    %18 = vector.shape_cast %17 : vector<1x32x4xf32> to vector<32x4xf32>
    %cst_12 = arith.constant dense<0.000000e+00> : vector<104x4xf32>
    %19 = tpu.matmul %16, %18, %cst_12 {dimension_numbers = #tpu.dot_dimension_numbers<[1], [0], [0], [1], [0, 0, 1, 1], [], []>} : vector<104x32xf32>, vector<32x4xf32>, vector<104x4xf32> -> vector<104x4xf32>
    %20 = arith.addf %9, %19 : vector<104x4xf32>
    %c1_13 = arith.constant 1 : index
    %c0_14 = arith.constant 0 : index
    %c0_15 = arith.constant 0 : index
    %21 = vector.load %arg3[%c1_13, %c0_14, %c0_15] : memref<9x32x4xf32, #tpu.memory_space<vmem>>, vector<1x32x4xf32>
    %22 = vector.shape_cast %21 : vector<1x32x4xf32> to vector<32x4xf32>
    %cst_16 = arith.constant dense<0.000000e+00> : vector<104x4xf32>
    %23 = tpu.matmul %16, %22, %cst_16 {dimension_numbers = #tpu.dot_dimension_numbers<[1], [0], [0], [1], [0, 0, 1, 1], [], []>} : vector<104x32xf32>, vector<32x4xf32>, vector<104x4xf32> -> vector<104x4xf32>
    %24 = arith.addf %13, %23 : vector<104x4xf32>
    %c2_i32 = arith.constant 2 : i32
    %25 = arith.addi %0, %c2_i32 : i32
    %26 = arith.index_cast %25 : i32 to index
    %c0_17 = arith.constant 0 : index
    %27 = vector.load %arg1[%26, %c0_17] : memref<230x32xf32, #tpu.memory_space<vmem>>, vector<104x32xf32>
    %c2 = arith.constant 2 : index
    %c0_18 = arith.constant 0 : index
    %c0_19 = arith.constant 0 : index
    %28 = vector.load %arg2[%c2, %c0_18, %c0_19] : memref<9x32x4xf32, #tpu.memory_space<vmem>>, vector<1x32x4xf32>
    %29 = vector.shape_cast %28 : vector<1x32x4xf32> to vector<32x4xf32>
    %cst_20 = arith.constant dense<0.000000e+00> : vector<104x4xf32>
    %30 = tpu.matmul %27, %29, %cst_20 {dimension_numbers = #tpu.dot_dimension_numbers<[1], [0], [0], [1], [0, 0, 1, 1], [], []>} : vector<104x32xf32>, vector<32x4xf32>, vector<104x4xf32> -> vector<104x4xf32>
    %31 = arith.addf %20, %30 : vector<104x4xf32>
    %c2_21 = arith.constant 2 : index
    %c0_22 = arith.constant 0 : index
    %c0_23 = arith.constant 0 : index
    %32 = vector.load %arg3[%c2_21, %c0_22, %c0_23] : memref<9x32x4xf32, #tpu.memory_space<vmem>>, vector<1x32x4xf32>
    %33 = vector.shape_cast %32 : vector<1x32x4xf32> to vector<32x4xf32>
    %cst_24 = arith.constant dense<0.000000e+00> : vector<104x4xf32>
    %34 = tpu.matmul %27, %33, %cst_24 {dimension_numbers = #tpu.dot_dimension_numbers<[1], [0], [0], [1], [0, 0, 1, 1], [], []>} : vector<104x32xf32>, vector<32x4xf32>, vector<104x4xf32> -> vector<104x4xf32>
    %35 = arith.addf %24, %34 : vector<104x4xf32>
    %c10_i32 = arith.constant 10 : i32
    %36 = arith.addi %0, %c10_i32 : i32
    %37 = arith.index_cast %36 : i32 to index
    %c0_25 = arith.constant 0 : index
    %38 = vector.load %arg1[%37, %c0_25] : memref<230x32xf32, #tpu.memory_space<vmem>>, vector<104x32xf32>
    %c3 = arith.constant 3 : index
    %c0_26 = arith.constant 0 : index
    %c0_27 = arith.constant 0 : index
    %39 = vector.load %arg2[%c3, %c0_26, %c0_27] : memref<9x32x4xf32, #tpu.memory_space<vmem>>, vector<1x32x4xf32>
    %40 = vector.shape_cast %39 : vector<1x32x4xf32> to vector<32x4xf32>
    %cst_28 = arith.constant dense<0.000000e+00> : vector<104x4xf32>
    %41 = tpu.matmul %38, %40, %cst_28 {dimension_numbers = #tpu.dot_dimension_numbers<[1], [0], [0], [1], [0, 0, 1, 1], [], []>} : vector<104x32xf32>, vector<32x4xf32>, vector<104x4xf32> -> vector<104x4xf32>
    %42 = arith.addf %31, %41 : vector<104x4xf32>
    %c3_29 = arith.constant 3 : index
    %c0_30 = arith.constant 0 : index
    %c0_31 = arith.constant 0 : index
    %43 = vector.load %arg3[%c3_29, %c0_30, %c0_31] : memref<9x32x4xf32, #tpu.memory_space<vmem>>, vector<1x32x4xf32>
    %44 = vector.shape_cast %43 : vector<1x32x4xf32> to vector<32x4xf32>
    %cst_32 = arith.constant dense<0.000000e+00> : vector<104x4xf32>
    %45 = tpu.matmul %38, %44, %cst_32 {dimension_numbers = #tpu.dot_dimension_numbers<[1], [0], [0], [1], [0, 0, 1, 1], [], []>} : vector<104x32xf32>, vector<32x4xf32>, vector<104x4xf32> -> vector<104x4xf32>
    %46 = arith.addf %35, %45 : vector<104x4xf32>
    %c11_i32 = arith.constant 11 : i32
    %47 = arith.addi %0, %c11_i32 : i32
    %48 = arith.index_cast %47 : i32 to index
    %c0_33 = arith.constant 0 : index
    %49 = vector.load %arg1[%48, %c0_33] : memref<230x32xf32, #tpu.memory_space<vmem>>, vector<104x32xf32>
    %c4 = arith.constant 4 : index
    %c0_34 = arith.constant 0 : index
    %c0_35 = arith.constant 0 : index
    %50 = vector.load %arg2[%c4, %c0_34, %c0_35] : memref<9x32x4xf32, #tpu.memory_space<vmem>>, vector<1x32x4xf32>
    %51 = vector.shape_cast %50 : vector<1x32x4xf32> to vector<32x4xf32>
    %cst_36 = arith.constant dense<0.000000e+00> : vector<104x4xf32>
    %52 = tpu.matmul %49, %51, %cst_36 {dimension_numbers = #tpu.dot_dimension_numbers<[1], [0], [0], [1], [0, 0, 1, 1], [], []>} : vector<104x32xf32>, vector<32x4xf32>, vector<104x4xf32> -> vector<104x4xf32>
    %53 = arith.addf %42, %52 : vector<104x4xf32>
    %c4_37 = arith.constant 4 : index
    %c0_38 = arith.constant 0 : index
    %c0_39 = arith.constant 0 : index
    %54 = vector.load %arg3[%c4_37, %c0_38, %c0_39] : memref<9x32x4xf32, #tpu.memory_space<vmem>>, vector<1x32x4xf32>
    %55 = vector.shape_cast %54 : vector<1x32x4xf32> to vector<32x4xf32>
    %cst_40 = arith.constant dense<0.000000e+00> : vector<104x4xf32>
    %56 = tpu.matmul %49, %55, %cst_40 {dimension_numbers = #tpu.dot_dimension_numbers<[1], [0], [0], [1], [0, 0, 1, 1], [], []>} : vector<104x32xf32>, vector<32x4xf32>, vector<104x4xf32> -> vector<104x4xf32>
    %57 = arith.addf %46, %56 : vector<104x4xf32>
    %c12_i32 = arith.constant 12 : i32
    %58 = arith.addi %0, %c12_i32 : i32
    %59 = arith.index_cast %58 : i32 to index
    %c0_41 = arith.constant 0 : index
    %60 = vector.load %arg1[%59, %c0_41] : memref<230x32xf32, #tpu.memory_space<vmem>>, vector<104x32xf32>
    %c5 = arith.constant 5 : index
    %c0_42 = arith.constant 0 : index
    %c0_43 = arith.constant 0 : index
    %61 = vector.load %arg2[%c5, %c0_42, %c0_43] : memref<9x32x4xf32, #tpu.memory_space<vmem>>, vector<1x32x4xf32>
    %62 = vector.shape_cast %61 : vector<1x32x4xf32> to vector<32x4xf32>
    %cst_44 = arith.constant dense<0.000000e+00> : vector<104x4xf32>
    %63 = tpu.matmul %60, %62, %cst_44 {dimension_numbers = #tpu.dot_dimension_numbers<[1], [0], [0], [1], [0, 0, 1, 1], [], []>} : vector<104x32xf32>, vector<32x4xf32>, vector<104x4xf32> -> vector<104x4xf32>
    %64 = arith.addf %53, %63 : vector<104x4xf32>
    %c5_45 = arith.constant 5 : index
    %c0_46 = arith.constant 0 : index
    %c0_47 = arith.constant 0 : index
    %65 = vector.load %arg3[%c5_45, %c0_46, %c0_47] : memref<9x32x4xf32, #tpu.memory_space<vmem>>, vector<1x32x4xf32>
    %66 = vector.shape_cast %65 : vector<1x32x4xf32> to vector<32x4xf32>
    %cst_48 = arith.constant dense<0.000000e+00> : vector<104x4xf32>
    %67 = tpu.matmul %60, %66, %cst_48 {dimension_numbers = #tpu.dot_dimension_numbers<[1], [0], [0], [1], [0, 0, 1, 1], [], []>} : vector<104x32xf32>, vector<32x4xf32>, vector<104x4xf32> -> vector<104x4xf32>
    %68 = arith.addf %57, %67 : vector<104x4xf32>
    %c20_i32 = arith.constant 20 : i32
    %69 = arith.addi %0, %c20_i32 : i32
    %70 = arith.index_cast %69 : i32 to index
    %c0_49 = arith.constant 0 : index
    %71 = vector.load %arg1[%70, %c0_49] : memref<230x32xf32, #tpu.memory_space<vmem>>, vector<104x32xf32>
    %c6 = arith.constant 6 : index
    %c0_50 = arith.constant 0 : index
    %c0_51 = arith.constant 0 : index
    %72 = vector.load %arg2[%c6, %c0_50, %c0_51] : memref<9x32x4xf32, #tpu.memory_space<vmem>>, vector<1x32x4xf32>
    %73 = vector.shape_cast %72 : vector<1x32x4xf32> to vector<32x4xf32>
    %cst_52 = arith.constant dense<0.000000e+00> : vector<104x4xf32>
    %74 = tpu.matmul %71, %73, %cst_52 {dimension_numbers = #tpu.dot_dimension_numbers<[1], [0], [0], [1], [0, 0, 1, 1], [], []>} : vector<104x32xf32>, vector<32x4xf32>, vector<104x4xf32> -> vector<104x4xf32>
    %75 = arith.addf %64, %74 : vector<104x4xf32>
    %c6_53 = arith.constant 6 : index
    %c0_54 = arith.constant 0 : index
    %c0_55 = arith.constant 0 : index
    %76 = vector.load %arg3[%c6_53, %c0_54, %c0_55] : memref<9x32x4xf32, #tpu.memory_space<vmem>>, vector<1x32x4xf32>
    %77 = vector.shape_cast %76 : vector<1x32x4xf32> to vector<32x4xf32>
    %cst_56 = arith.constant dense<0.000000e+00> : vector<104x4xf32>
    %78 = tpu.matmul %71, %77, %cst_56 {dimension_numbers = #tpu.dot_dimension_numbers<[1], [0], [0], [1], [0, 0, 1, 1], [], []>} : vector<104x32xf32>, vector<32x4xf32>, vector<104x4xf32> -> vector<104x4xf32>
    %79 = arith.addf %68, %78 : vector<104x4xf32>
    %c21_i32 = arith.constant 21 : i32
    %80 = arith.addi %0, %c21_i32 : i32
    %81 = arith.index_cast %80 : i32 to index
    %c0_57 = arith.constant 0 : index
    %82 = vector.load %arg1[%81, %c0_57] : memref<230x32xf32, #tpu.memory_space<vmem>>, vector<104x32xf32>
    %c7 = arith.constant 7 : index
    %c0_58 = arith.constant 0 : index
    %c0_59 = arith.constant 0 : index
    %83 = vector.load %arg2[%c7, %c0_58, %c0_59] : memref<9x32x4xf32, #tpu.memory_space<vmem>>, vector<1x32x4xf32>
    %84 = vector.shape_cast %83 : vector<1x32x4xf32> to vector<32x4xf32>
    %cst_60 = arith.constant dense<0.000000e+00> : vector<104x4xf32>
    %85 = tpu.matmul %82, %84, %cst_60 {dimension_numbers = #tpu.dot_dimension_numbers<[1], [0], [0], [1], [0, 0, 1, 1], [], []>} : vector<104x32xf32>, vector<32x4xf32>, vector<104x4xf32> -> vector<104x4xf32>
    %86 = arith.addf %75, %85 : vector<104x4xf32>
    %c7_61 = arith.constant 7 : index
    %c0_62 = arith.constant 0 : index
    %c0_63 = arith.constant 0 : index
    %87 = vector.load %arg3[%c7_61, %c0_62, %c0_63] : memref<9x32x4xf32, #tpu.memory_space<vmem>>, vector<1x32x4xf32>
    %88 = vector.shape_cast %87 : vector<1x32x4xf32> to vector<32x4xf32>
    %cst_64 = arith.constant dense<0.000000e+00> : vector<104x4xf32>
    %89 = tpu.matmul %82, %88, %cst_64 {dimension_numbers = #tpu.dot_dimension_numbers<[1], [0], [0], [1], [0, 0, 1, 1], [], []>} : vector<104x32xf32>, vector<32x4xf32>, vector<104x4xf32> -> vector<104x4xf32>
    %90 = arith.addf %79, %89 : vector<104x4xf32>
    %c22_i32 = arith.constant 22 : i32
    %91 = arith.addi %0, %c22_i32 : i32
    %92 = arith.index_cast %91 : i32 to index
    %c0_65 = arith.constant 0 : index
    %93 = vector.load %arg1[%92, %c0_65] : memref<230x32xf32, #tpu.memory_space<vmem>>, vector<104x32xf32>
    %c8 = arith.constant 8 : index
    %c0_66 = arith.constant 0 : index
    %c0_67 = arith.constant 0 : index
    %94 = vector.load %arg2[%c8, %c0_66, %c0_67] : memref<9x32x4xf32, #tpu.memory_space<vmem>>, vector<1x32x4xf32>
    %95 = vector.shape_cast %94 : vector<1x32x4xf32> to vector<32x4xf32>
    %cst_68 = arith.constant dense<0.000000e+00> : vector<104x4xf32>
    %96 = tpu.matmul %93, %95, %cst_68 {dimension_numbers = #tpu.dot_dimension_numbers<[1], [0], [0], [1], [0, 0, 1, 1], [], []>} : vector<104x32xf32>, vector<32x4xf32>, vector<104x4xf32> -> vector<104x4xf32>
    %97 = arith.addf %86, %96 : vector<104x4xf32>
    %c8_69 = arith.constant 8 : index
    %c0_70 = arith.constant 0 : index
    %c0_71 = arith.constant 0 : index
    %98 = vector.load %arg3[%c8_69, %c0_70, %c0_71] : memref<9x32x4xf32, #tpu.memory_space<vmem>>, vector<1x32x4xf32>
    %99 = vector.shape_cast %98 : vector<1x32x4xf32> to vector<32x4xf32>
    %cst_72 = arith.constant dense<0.000000e+00> : vector<104x4xf32>
    %100 = tpu.matmul %93, %99, %cst_72 {dimension_numbers = #tpu.dot_dimension_numbers<[1], [0], [0], [1], [0, 0, 1, 1], [], []>} : vector<104x32xf32>, vector<32x4xf32>, vector<104x4xf32> -> vector<104x4xf32>
    %101 = arith.addf %90, %100 : vector<104x4xf32>
    %c0_73 = arith.constant 0 : index
    %c0_74 = arith.constant 0 : index
    %102 = vector.load %arg4[%c0_73, %c0_74] : memref<1x4xf32, #tpu.memory_space<vmem>>, vector<1x4xf32>
    %103 = vector.broadcast %102 : vector<1x4xf32> to vector<104x4xf32>
    %104 = arith.addf %97, %103 : vector<104x4xf32>
    %c0_75 = arith.constant 0 : index
    %c0_76 = arith.constant 0 : index
    %105 = vector.load %arg5[%c0_75, %c0_76] : memref<1x4xf32, #tpu.memory_space<vmem>>, vector<1x4xf32>
    %106 = vector.broadcast %105 : vector<1x4xf32> to vector<104x4xf32>
    %107 = arith.addf %101, %106 : vector<104x4xf32>
    %c0_77 = arith.constant 0 : index
    %c0_78 = arith.constant 0 : index
    %108 = vector.load %arg10[%c0_77, %c0_78] : memref<104x4xf32, #tpu.memory_space<vmem>>, vector<104x4xf32>
    tpu.vector_store %arg10[%c0_77, %c0_78], %104 {strides = array<i32>} : memref<104x4xf32, #tpu.memory_space<vmem>>, vector<104x4xf32>,
    %c0_79 = arith.constant 0 : index
    %c0_80 = arith.constant 0 : index
    %109 = vector.load %arg11[%c0_79, %c0_80] : memref<104x4xf32, #tpu.memory_space<vmem>>, vector<104x4xf32>
    tpu.vector_store %arg11[%c0_79, %c0_80], %107 {strides = array<i32>} : memref<104x4xf32, #tpu.memory_space<vmem>>, vector<104x4xf32>,
    %cst_81 = arith.constant -3.000000e+01 : f32
    %cst_82 = arith.constant 2.000000e+01 : f32
    %110 = vector.broadcast %cst_81 : f32 to vector<104x4xf32>
    %111 = arith.maximumf %110, %107 : vector<104x4xf32>
    %112 = vector.broadcast %cst_82 : f32 to vector<104x4xf32>
    %113 = arith.minimumf %112, %111 : vector<104x4xf32>
    %cst_83 = arith.constant 5.000000e-01 : f32
    %114 = vector.broadcast %cst_83 : f32 to vector<104x4xf32>
    %115 = arith.mulf %114, %113 : vector<104x4xf32>
    %116 = math.exp %115 : vector<104x4xf32>
    %c0_84 = arith.constant 0 : index
    %c0_85 = arith.constant 0 : index
    %117 = vector.load %arg6[%c0_84, %c0_85] : memref<104x4xf32, #tpu.memory_space<vmem>>, vector<104x4xf32>
    %118 = arith.mulf %116, %117 : vector<104x4xf32>
    %119 = arith.addf %104, %118 : vector<104x4xf32>
    %c0_86 = arith.constant 0 : index
    %c0_87 = arith.constant 0 : index
    %120 = vector.load %arg7[%c0_86, %c0_87] : memref<4x4xf32, #tpu.memory_space<vmem>>, vector<4x4xf32>
    %cst_88 = arith.constant dense<0.000000e+00> : vector<104x4xf32>
    %121 = tpu.matmul %119, %120, %cst_88 {dimension_numbers = #tpu.dot_dimension_numbers<[1], [0], [0], [1], [0, 0, 1, 1], [], []>} : vector<104x4xf32>, vector<4x4xf32>, vector<104x4xf32> -> vector<104x4xf32>
    %c0_89 = arith.constant 0 : index
    %c0_90 = arith.constant 0 : index
    %122 = vector.load %arg8[%c0_89, %c0_90] : memref<1x4xf32, #tpu.memory_space<vmem>>, vector<1x4xf32>
    %123 = vector.broadcast %122 : vector<1x4xf32> to vector<104x4xf32>
    %124 = arith.addf %121, %123 : vector<104x4xf32>
    %c0_91 = arith.constant 0 : index
    %c0_92 = arith.constant 0 : index
    %125 = vector.load %arg9[%c0_91, %c0_92] : memref<104x4xf32, #tpu.memory_space<vmem>>, vector<104x4xf32>
    tpu.vector_store %arg9[%c0_91, %c0_92], %124 {strides = array<i32>} : memref<104x4xf32, #tpu.memory_space<vmem>>, vector<104x4xf32>,
    return
  }
  func.func @transform_0(%arg0: i32) -> (i32, i32) {
    %c0_i32 = arith.constant 0 : i32
    %c0_i32_0 = arith.constant 0 : i32
    %c0_i32_1 = arith.constant 0 : i32
    return %c0_i32, %c0_i32_0 : i32, i32
  }
  func.func @transform_1(%arg0: i32) -> (i32, i32, i32) {
    %c0_i32 = arith.constant 0 : i32
    %c0_i32_0 = arith.constant 0 : i32
    %c0_i32_1 = arith.constant 0 : i32
    %c0_i32_2 = arith.constant 0 : i32
    return %c0_i32, %c0_i32_0, %c0_i32_1 : i32, i32, i32
  }
  func.func @transform_2(%arg0: i32) -> (i32, i32, i32) {
    %c0_i32 = arith.constant 0 : i32
    %c0_i32_0 = arith.constant 0 : i32
    %c0_i32_1 = arith.constant 0 : i32
    %c0_i32_2 = arith.constant 0 : i32
    return %c0_i32, %c0_i32_0, %c0_i32_1 : i32, i32, i32
  }
  func.func @transform_3(%arg0: i32) -> (i32, i32) {
    %c0_i32 = arith.constant 0 : i32
    %c0_i32_0 = arith.constant 0 : i32
    %c0_i32_1 = arith.constant 0 : i32
    return %c0_i32, %c0_i32_0 : i32, i32
  }
  func.func @transform_4(%arg0: i32) -> (i32, i32) {
    %c0_i32 = arith.constant 0 : i32
    %c0_i32_0 = arith.constant 0 : i32
    %c0_i32_1 = arith.constant 0 : i32
    return %c0_i32, %c0_i32_0 : i32, i32
  }
  func.func @transform_5(%arg0: i32) -> (i32, i32) {
    %c0_i32 = arith.constant 0 : i32
    %c0_i32_0 = arith.constant 0 : i32
    return %arg0, %c0_i32 : i32, i32
  }
  func.func @transform_6(%arg0: i32) -> (i32, i32) {
    %c0_i32 = arith.constant 0 : i32
    %c0_i32_0 = arith.constant 0 : i32
    %c0_i32_1 = arith.constant 0 : i32
    return %c0_i32, %c0_i32_0 : i32, i32
  }
  func.func @transform_7(%arg0: i32) -> (i32, i32) {
    %c0_i32 = arith.constant 0 : i32
    %c0_i32_0 = arith.constant 0 : i32
    %c0_i32_1 = arith.constant 0 : i32
    return %c0_i32, %c0_i32_0 : i32, i32
  }
  func.func @transform_8(%arg0: i32) -> (i32, i32) {
    %c0_i32 = arith.constant 0 : i32
    %c0_i32_0 = arith.constant 0 : i32
    return %arg0, %c0_i32 : i32, i32
  }
  func.func @transform_9(%arg0: i32) -> (i32, i32) {
    %c0_i32 = arith.constant 0 : i32
    %c0_i32_0 = arith.constant 0 : i32
    return %arg0, %c0_i32 : i32, i32
  }
  func.func @transform_10(%arg0: i32) -> (i32, i32) {
    %c0_i32 = arith.constant 0 : i32
    %c0_i32_0 = arith.constant 0 : i32
    return %arg0, %c0_i32 : i32, i32
  }
}

module attributes {stable_mosaic.version = 11 : i64} {
  func.func @_conv_kernel(%arg0: i32, %arg1: memref<230x4xf32, #tpu.memory_space<vmem>>, %arg2: memref<9x4x32xf32, #tpu.memory_space<vmem>>, %arg3: memref<1x32xf32, #tpu.memory_space<vmem>>, %arg4: memref<104x32xf32, #tpu.memory_space<vmem>>) attributes {dimension_semantics = [#tpu.dimension_semantics<parallel>], iteration_bounds = array<i64: 2>, scalar_prefetch = 0 : i64, scratch_operands = 0 : i64, tpu.core_type = #tpu.core_type<tc>, window_params = [{pipeline_mode = #tpu.pipeline_mode<synchronous>, transform_indices = @transform_0, window_bounds = array<i64: 230, 4>}, {pipeline_mode = #tpu.pipeline_mode<synchronous>, transform_indices = @transform_1, window_bounds = array<i64: 9, 4, 32>}, {pipeline_mode = #tpu.pipeline_mode<synchronous>, transform_indices = @transform_2, window_bounds = array<i64: 1, 32>}, {transform_indices = @transform_3, window_bounds = array<i64: 104, 32>}]} {
    %c104_i32 = arith.constant 104 : i32
    %0 = arith.muli %arg0, %c104_i32 : i32
    %cst = arith.constant 0.000000e+00 : f32
    %1 = vector.broadcast %cst : f32 to vector<104x32xf32>
    %c0_i32 = arith.constant 0 : i32
    %2 = arith.addi %0, %c0_i32 : i32
    %3 = arith.index_cast %2 : i32 to index
    %c0 = arith.constant 0 : index
    %4 = vector.load %arg1[%3, %c0] : memref<230x4xf32, #tpu.memory_space<vmem>>, vector<104x4xf32>
    %c0_0 = arith.constant 0 : index
    %c0_1 = arith.constant 0 : index
    %c0_2 = arith.constant 0 : index
    %5 = vector.load %arg2[%c0_0, %c0_1, %c0_2] : memref<9x4x32xf32, #tpu.memory_space<vmem>>, vector<1x4x32xf32>
    %6 = vector.shape_cast %5 : vector<1x4x32xf32> to vector<4x32xf32>
    %cst_3 = arith.constant dense<0.000000e+00> : vector<104x32xf32>
    %7 = tpu.matmul %4, %6, %cst_3 {dimension_numbers = #tpu.dot_dimension_numbers<[1], [0], [0], [1], [0, 0, 1, 1], [], []>} : vector<104x4xf32>, vector<4x32xf32>, vector<104x32xf32> -> vector<104x32xf32>
    %8 = arith.addf %1, %7 : vector<104x32xf32>
    %c1_i32 = arith.constant 1 : i32
    %9 = arith.addi %0, %c1_i32 : i32
    %10 = arith.index_cast %9 : i32 to index
    %c0_4 = arith.constant 0 : index
    %11 = vector.load %arg1[%10, %c0_4] : memref<230x4xf32, #tpu.memory_space<vmem>>, vector<104x4xf32>
    %c1 = arith.constant 1 : index
    %c0_5 = arith.constant 0 : index
    %c0_6 = arith.constant 0 : index
    %12 = vector.load %arg2[%c1, %c0_5, %c0_6] : memref<9x4x32xf32, #tpu.memory_space<vmem>>, vector<1x4x32xf32>
    %13 = vector.shape_cast %12 : vector<1x4x32xf32> to vector<4x32xf32>
    %cst_7 = arith.constant dense<0.000000e+00> : vector<104x32xf32>
    %14 = tpu.matmul %11, %13, %cst_7 {dimension_numbers = #tpu.dot_dimension_numbers<[1], [0], [0], [1], [0, 0, 1, 1], [], []>} : vector<104x4xf32>, vector<4x32xf32>, vector<104x32xf32> -> vector<104x32xf32>
    %15 = arith.addf %8, %14 : vector<104x32xf32>
    %c2_i32 = arith.constant 2 : i32
    %16 = arith.addi %0, %c2_i32 : i32
    %17 = arith.index_cast %16 : i32 to index
    %c0_8 = arith.constant 0 : index
    %18 = vector.load %arg1[%17, %c0_8] : memref<230x4xf32, #tpu.memory_space<vmem>>, vector<104x4xf32>
    %c2 = arith.constant 2 : index
    %c0_9 = arith.constant 0 : index
    %c0_10 = arith.constant 0 : index
    %19 = vector.load %arg2[%c2, %c0_9, %c0_10] : memref<9x4x32xf32, #tpu.memory_space<vmem>>, vector<1x4x32xf32>
    %20 = vector.shape_cast %19 : vector<1x4x32xf32> to vector<4x32xf32>
    %cst_11 = arith.constant dense<0.000000e+00> : vector<104x32xf32>
    %21 = tpu.matmul %18, %20, %cst_11 {dimension_numbers = #tpu.dot_dimension_numbers<[1], [0], [0], [1], [0, 0, 1, 1], [], []>} : vector<104x4xf32>, vector<4x32xf32>, vector<104x32xf32> -> vector<104x32xf32>
    %22 = arith.addf %15, %21 : vector<104x32xf32>
    %c10_i32 = arith.constant 10 : i32
    %23 = arith.addi %0, %c10_i32 : i32
    %24 = arith.index_cast %23 : i32 to index
    %c0_12 = arith.constant 0 : index
    %25 = vector.load %arg1[%24, %c0_12] : memref<230x4xf32, #tpu.memory_space<vmem>>, vector<104x4xf32>
    %c3 = arith.constant 3 : index
    %c0_13 = arith.constant 0 : index
    %c0_14 = arith.constant 0 : index
    %26 = vector.load %arg2[%c3, %c0_13, %c0_14] : memref<9x4x32xf32, #tpu.memory_space<vmem>>, vector<1x4x32xf32>
    %27 = vector.shape_cast %26 : vector<1x4x32xf32> to vector<4x32xf32>
    %cst_15 = arith.constant dense<0.000000e+00> : vector<104x32xf32>
    %28 = tpu.matmul %25, %27, %cst_15 {dimension_numbers = #tpu.dot_dimension_numbers<[1], [0], [0], [1], [0, 0, 1, 1], [], []>} : vector<104x4xf32>, vector<4x32xf32>, vector<104x32xf32> -> vector<104x32xf32>
    %29 = arith.addf %22, %28 : vector<104x32xf32>
    %c11_i32 = arith.constant 11 : i32
    %30 = arith.addi %0, %c11_i32 : i32
    %31 = arith.index_cast %30 : i32 to index
    %c0_16 = arith.constant 0 : index
    %32 = vector.load %arg1[%31, %c0_16] : memref<230x4xf32, #tpu.memory_space<vmem>>, vector<104x4xf32>
    %c4 = arith.constant 4 : index
    %c0_17 = arith.constant 0 : index
    %c0_18 = arith.constant 0 : index
    %33 = vector.load %arg2[%c4, %c0_17, %c0_18] : memref<9x4x32xf32, #tpu.memory_space<vmem>>, vector<1x4x32xf32>
    %34 = vector.shape_cast %33 : vector<1x4x32xf32> to vector<4x32xf32>
    %cst_19 = arith.constant dense<0.000000e+00> : vector<104x32xf32>
    %35 = tpu.matmul %32, %34, %cst_19 {dimension_numbers = #tpu.dot_dimension_numbers<[1], [0], [0], [1], [0, 0, 1, 1], [], []>} : vector<104x4xf32>, vector<4x32xf32>, vector<104x32xf32> -> vector<104x32xf32>
    %36 = arith.addf %29, %35 : vector<104x32xf32>
    %c12_i32 = arith.constant 12 : i32
    %37 = arith.addi %0, %c12_i32 : i32
    %38 = arith.index_cast %37 : i32 to index
    %c0_20 = arith.constant 0 : index
    %39 = vector.load %arg1[%38, %c0_20] : memref<230x4xf32, #tpu.memory_space<vmem>>, vector<104x4xf32>
    %c5 = arith.constant 5 : index
    %c0_21 = arith.constant 0 : index
    %c0_22 = arith.constant 0 : index
    %40 = vector.load %arg2[%c5, %c0_21, %c0_22] : memref<9x4x32xf32, #tpu.memory_space<vmem>>, vector<1x4x32xf32>
    %41 = vector.shape_cast %40 : vector<1x4x32xf32> to vector<4x32xf32>
    %cst_23 = arith.constant dense<0.000000e+00> : vector<104x32xf32>
    %42 = tpu.matmul %39, %41, %cst_23 {dimension_numbers = #tpu.dot_dimension_numbers<[1], [0], [0], [1], [0, 0, 1, 1], [], []>} : vector<104x4xf32>, vector<4x32xf32>, vector<104x32xf32> -> vector<104x32xf32>
    %43 = arith.addf %36, %42 : vector<104x32xf32>
    %c20_i32 = arith.constant 20 : i32
    %44 = arith.addi %0, %c20_i32 : i32
    %45 = arith.index_cast %44 : i32 to index
    %c0_24 = arith.constant 0 : index
    %46 = vector.load %arg1[%45, %c0_24] : memref<230x4xf32, #tpu.memory_space<vmem>>, vector<104x4xf32>
    %c6 = arith.constant 6 : index
    %c0_25 = arith.constant 0 : index
    %c0_26 = arith.constant 0 : index
    %47 = vector.load %arg2[%c6, %c0_25, %c0_26] : memref<9x4x32xf32, #tpu.memory_space<vmem>>, vector<1x4x32xf32>
    %48 = vector.shape_cast %47 : vector<1x4x32xf32> to vector<4x32xf32>
    %cst_27 = arith.constant dense<0.000000e+00> : vector<104x32xf32>
    %49 = tpu.matmul %46, %48, %cst_27 {dimension_numbers = #tpu.dot_dimension_numbers<[1], [0], [0], [1], [0, 0, 1, 1], [], []>} : vector<104x4xf32>, vector<4x32xf32>, vector<104x32xf32> -> vector<104x32xf32>
    %50 = arith.addf %43, %49 : vector<104x32xf32>
    %c21_i32 = arith.constant 21 : i32
    %51 = arith.addi %0, %c21_i32 : i32
    %52 = arith.index_cast %51 : i32 to index
    %c0_28 = arith.constant 0 : index
    %53 = vector.load %arg1[%52, %c0_28] : memref<230x4xf32, #tpu.memory_space<vmem>>, vector<104x4xf32>
    %c7 = arith.constant 7 : index
    %c0_29 = arith.constant 0 : index
    %c0_30 = arith.constant 0 : index
    %54 = vector.load %arg2[%c7, %c0_29, %c0_30] : memref<9x4x32xf32, #tpu.memory_space<vmem>>, vector<1x4x32xf32>
    %55 = vector.shape_cast %54 : vector<1x4x32xf32> to vector<4x32xf32>
    %cst_31 = arith.constant dense<0.000000e+00> : vector<104x32xf32>
    %56 = tpu.matmul %53, %55, %cst_31 {dimension_numbers = #tpu.dot_dimension_numbers<[1], [0], [0], [1], [0, 0, 1, 1], [], []>} : vector<104x4xf32>, vector<4x32xf32>, vector<104x32xf32> -> vector<104x32xf32>
    %57 = arith.addf %50, %56 : vector<104x32xf32>
    %c22_i32 = arith.constant 22 : i32
    %58 = arith.addi %0, %c22_i32 : i32
    %59 = arith.index_cast %58 : i32 to index
    %c0_32 = arith.constant 0 : index
    %60 = vector.load %arg1[%59, %c0_32] : memref<230x4xf32, #tpu.memory_space<vmem>>, vector<104x4xf32>
    %c8 = arith.constant 8 : index
    %c0_33 = arith.constant 0 : index
    %c0_34 = arith.constant 0 : index
    %61 = vector.load %arg2[%c8, %c0_33, %c0_34] : memref<9x4x32xf32, #tpu.memory_space<vmem>>, vector<1x4x32xf32>
    %62 = vector.shape_cast %61 : vector<1x4x32xf32> to vector<4x32xf32>
    %cst_35 = arith.constant dense<0.000000e+00> : vector<104x32xf32>
    %63 = tpu.matmul %60, %62, %cst_35 {dimension_numbers = #tpu.dot_dimension_numbers<[1], [0], [0], [1], [0, 0, 1, 1], [], []>} : vector<104x4xf32>, vector<4x32xf32>, vector<104x32xf32> -> vector<104x32xf32>
    %64 = arith.addf %57, %63 : vector<104x32xf32>
    %c0_36 = arith.constant 0 : index
    %c0_37 = arith.constant 0 : index
    %65 = vector.load %arg3[%c0_36, %c0_37] : memref<1x32xf32, #tpu.memory_space<vmem>>, vector<1x32xf32>
    %66 = vector.broadcast %65 : vector<1x32xf32> to vector<104x32xf32>
    %67 = arith.addf %64, %66 : vector<104x32xf32>
    %68 = arith.negf %67 : vector<104x32xf32>
    %69 = math.exp %68 : vector<104x32xf32>
    %cst_38 = arith.constant 1.000000e+00 : f32
    %70 = vector.broadcast %cst_38 : f32 to vector<104x32xf32>
    %71 = arith.addf %70, %69 : vector<104x32xf32>
    %72 = arith.divf %70, %71 : vector<104x32xf32>
    %73 = arith.mulf %67, %72 : vector<104x32xf32>
    %c0_39 = arith.constant 0 : index
    %c0_40 = arith.constant 0 : index
    %74 = vector.load %arg4[%c0_39, %c0_40] : memref<104x32xf32, #tpu.memory_space<vmem>>, vector<104x32xf32>
    tpu.vector_store %arg4[%c0_39, %c0_40], %73 {strides = array<i32>} : memref<104x32xf32, #tpu.memory_space<vmem>>, vector<104x32xf32>,
    return
  }
  func.func @transform_0(%arg0: i32) -> (i32, i32) {
    %c0_i32 = arith.constant 0 : i32
    %c0_i32_0 = arith.constant 0 : i32
    %c0_i32_1 = arith.constant 0 : i32
    return %c0_i32, %c0_i32_0 : i32, i32
  }
  func.func @transform_1(%arg0: i32) -> (i32, i32, i32) {
    %c0_i32 = arith.constant 0 : i32
    %c0_i32_0 = arith.constant 0 : i32
    %c0_i32_1 = arith.constant 0 : i32
    %c0_i32_2 = arith.constant 0 : i32
    return %c0_i32, %c0_i32_0, %c0_i32_1 : i32, i32, i32
  }
  func.func @transform_2(%arg0: i32) -> (i32, i32) {
    %c0_i32 = arith.constant 0 : i32
    %c0_i32_0 = arith.constant 0 : i32
    %c0_i32_1 = arith.constant 0 : i32
    return %c0_i32, %c0_i32_0 : i32, i32
  }
  func.func @transform_3(%arg0: i32) -> (i32, i32) {
    %c0_i32 = arith.constant 0 : i32
    %c0_i32_0 = arith.constant 0 : i32
    return %arg0, %c0_i32 : i32, i32
  }
}

module attributes {stable_mosaic.version = 11 : i64} {
  func.func @_conv_kernel(%arg0: i32, %arg1: memref<806x32xf32, #tpu.memory_space<vmem>>, %arg2: memref<9x32x32xf32, #tpu.memory_space<vmem>>, %arg3: memref<1x32xf32, #tpu.memory_space<vmem>>, %arg4: memref<256x32xf32, #tpu.memory_space<vmem>>) attributes {dimension_semantics = [#tpu.dimension_semantics<parallel>], iteration_bounds = array<i64: 3>, scalar_prefetch = 0 : i64, scratch_operands = 0 : i64, tpu.core_type = #tpu.core_type<tc>, window_params = [{pipeline_mode = #tpu.pipeline_mode<synchronous>, transform_indices = @transform_0, window_bounds = array<i64: 806, 32>}, {pipeline_mode = #tpu.pipeline_mode<synchronous>, transform_indices = @transform_1, window_bounds = array<i64: 9, 32, 32>}, {pipeline_mode = #tpu.pipeline_mode<synchronous>, transform_indices = @transform_2, window_bounds = array<i64: 1, 32>}, {transform_indices = @transform_3, window_bounds = array<i64: 256, 32>}]} {
    %c256_i32 = arith.constant 256 : i32
    %0 = arith.muli %arg0, %c256_i32 : i32
    %cst = arith.constant 0.000000e+00 : f32
    %1 = vector.broadcast %cst : f32 to vector<256x32xf32>
    %c0_i32 = arith.constant 0 : i32
    %2 = arith.addi %0, %c0_i32 : i32
    %3 = arith.index_cast %2 : i32 to index
    %c0 = arith.constant 0 : index
    %4 = vector.load %arg1[%3, %c0] : memref<806x32xf32, #tpu.memory_space<vmem>>, vector<256x32xf32>
    %c0_0 = arith.constant 0 : index
    %c0_1 = arith.constant 0 : index
    %c0_2 = arith.constant 0 : index
    %5 = vector.load %arg2[%c0_0, %c0_1, %c0_2] : memref<9x32x32xf32, #tpu.memory_space<vmem>>, vector<1x32x32xf32>
    %6 = vector.shape_cast %5 : vector<1x32x32xf32> to vector<32x32xf32>
    %cst_3 = arith.constant dense<0.000000e+00> : vector<256x32xf32>
    %7 = tpu.matmul %4, %6, %cst_3 {dimension_numbers = #tpu.dot_dimension_numbers<[1], [0], [0], [1], [0, 0, 1, 1], [], []>} : vector<256x32xf32>, vector<32x32xf32>, vector<256x32xf32> -> vector<256x32xf32>
    %8 = arith.addf %1, %7 : vector<256x32xf32>
    %c1_i32 = arith.constant 1 : i32
    %9 = arith.addi %0, %c1_i32 : i32
    %10 = arith.index_cast %9 : i32 to index
    %c0_4 = arith.constant 0 : index
    %11 = vector.load %arg1[%10, %c0_4] : memref<806x32xf32, #tpu.memory_space<vmem>>, vector<256x32xf32>
    %c1 = arith.constant 1 : index
    %c0_5 = arith.constant 0 : index
    %c0_6 = arith.constant 0 : index
    %12 = vector.load %arg2[%c1, %c0_5, %c0_6] : memref<9x32x32xf32, #tpu.memory_space<vmem>>, vector<1x32x32xf32>
    %13 = vector.shape_cast %12 : vector<1x32x32xf32> to vector<32x32xf32>
    %cst_7 = arith.constant dense<0.000000e+00> : vector<256x32xf32>
    %14 = tpu.matmul %11, %13, %cst_7 {dimension_numbers = #tpu.dot_dimension_numbers<[1], [0], [0], [1], [0, 0, 1, 1], [], []>} : vector<256x32xf32>, vector<32x32xf32>, vector<256x32xf32> -> vector<256x32xf32>
    %15 = arith.addf %8, %14 : vector<256x32xf32>
    %c2_i32 = arith.constant 2 : i32
    %16 = arith.addi %0, %c2_i32 : i32
    %17 = arith.index_cast %16 : i32 to index
    %c0_8 = arith.constant 0 : index
    %18 = vector.load %arg1[%17, %c0_8] : memref<806x32xf32, #tpu.memory_space<vmem>>, vector<256x32xf32>
    %c2 = arith.constant 2 : index
    %c0_9 = arith.constant 0 : index
    %c0_10 = arith.constant 0 : index
    %19 = vector.load %arg2[%c2, %c0_9, %c0_10] : memref<9x32x32xf32, #tpu.memory_space<vmem>>, vector<1x32x32xf32>
    %20 = vector.shape_cast %19 : vector<1x32x32xf32> to vector<32x32xf32>
    %cst_11 = arith.constant dense<0.000000e+00> : vector<256x32xf32>
    %21 = tpu.matmul %18, %20, %cst_11 {dimension_numbers = #tpu.dot_dimension_numbers<[1], [0], [0], [1], [0, 0, 1, 1], [], []>} : vector<256x32xf32>, vector<32x32xf32>, vector<256x32xf32> -> vector<256x32xf32>
    %22 = arith.addf %15, %21 : vector<256x32xf32>
    %c18_i32 = arith.constant 18 : i32
    %23 = arith.addi %0, %c18_i32 : i32
    %24 = arith.index_cast %23 : i32 to index
    %c0_12 = arith.constant 0 : index
    %25 = vector.load %arg1[%24, %c0_12] : memref<806x32xf32, #tpu.memory_space<vmem>>, vector<256x32xf32>
    %c3 = arith.constant 3 : index
    %c0_13 = arith.constant 0 : index
    %c0_14 = arith.constant 0 : index
    %26 = vector.load %arg2[%c3, %c0_13, %c0_14] : memref<9x32x32xf32, #tpu.memory_space<vmem>>, vector<1x32x32xf32>
    %27 = vector.shape_cast %26 : vector<1x32x32xf32> to vector<32x32xf32>
    %cst_15 = arith.constant dense<0.000000e+00> : vector<256x32xf32>
    %28 = tpu.matmul %25, %27, %cst_15 {dimension_numbers = #tpu.dot_dimension_numbers<[1], [0], [0], [1], [0, 0, 1, 1], [], []>} : vector<256x32xf32>, vector<32x32xf32>, vector<256x32xf32> -> vector<256x32xf32>
    %29 = arith.addf %22, %28 : vector<256x32xf32>
    %c19_i32 = arith.constant 19 : i32
    %30 = arith.addi %0, %c19_i32 : i32
    %31 = arith.index_cast %30 : i32 to index
    %c0_16 = arith.constant 0 : index
    %32 = vector.load %arg1[%31, %c0_16] : memref<806x32xf32, #tpu.memory_space<vmem>>, vector<256x32xf32>
    %c4 = arith.constant 4 : index
    %c0_17 = arith.constant 0 : index
    %c0_18 = arith.constant 0 : index
    %33 = vector.load %arg2[%c4, %c0_17, %c0_18] : memref<9x32x32xf32, #tpu.memory_space<vmem>>, vector<1x32x32xf32>
    %34 = vector.shape_cast %33 : vector<1x32x32xf32> to vector<32x32xf32>
    %cst_19 = arith.constant dense<0.000000e+00> : vector<256x32xf32>
    %35 = tpu.matmul %32, %34, %cst_19 {dimension_numbers = #tpu.dot_dimension_numbers<[1], [0], [0], [1], [0, 0, 1, 1], [], []>} : vector<256x32xf32>, vector<32x32xf32>, vector<256x32xf32> -> vector<256x32xf32>
    %36 = arith.addf %29, %35 : vector<256x32xf32>
    %c20_i32 = arith.constant 20 : i32
    %37 = arith.addi %0, %c20_i32 : i32
    %38 = arith.index_cast %37 : i32 to index
    %c0_20 = arith.constant 0 : index
    %39 = vector.load %arg1[%38, %c0_20] : memref<806x32xf32, #tpu.memory_space<vmem>>, vector<256x32xf32>
    %c5 = arith.constant 5 : index
    %c0_21 = arith.constant 0 : index
    %c0_22 = arith.constant 0 : index
    %40 = vector.load %arg2[%c5, %c0_21, %c0_22] : memref<9x32x32xf32, #tpu.memory_space<vmem>>, vector<1x32x32xf32>
    %41 = vector.shape_cast %40 : vector<1x32x32xf32> to vector<32x32xf32>
    %cst_23 = arith.constant dense<0.000000e+00> : vector<256x32xf32>
    %42 = tpu.matmul %39, %41, %cst_23 {dimension_numbers = #tpu.dot_dimension_numbers<[1], [0], [0], [1], [0, 0, 1, 1], [], []>} : vector<256x32xf32>, vector<32x32xf32>, vector<256x32xf32> -> vector<256x32xf32>
    %43 = arith.addf %36, %42 : vector<256x32xf32>
    %c36_i32 = arith.constant 36 : i32
    %44 = arith.addi %0, %c36_i32 : i32
    %45 = arith.index_cast %44 : i32 to index
    %c0_24 = arith.constant 0 : index
    %46 = vector.load %arg1[%45, %c0_24] : memref<806x32xf32, #tpu.memory_space<vmem>>, vector<256x32xf32>
    %c6 = arith.constant 6 : index
    %c0_25 = arith.constant 0 : index
    %c0_26 = arith.constant 0 : index
    %47 = vector.load %arg2[%c6, %c0_25, %c0_26] : memref<9x32x32xf32, #tpu.memory_space<vmem>>, vector<1x32x32xf32>
    %48 = vector.shape_cast %47 : vector<1x32x32xf32> to vector<32x32xf32>
    %cst_27 = arith.constant dense<0.000000e+00> : vector<256x32xf32>
    %49 = tpu.matmul %46, %48, %cst_27 {dimension_numbers = #tpu.dot_dimension_numbers<[1], [0], [0], [1], [0, 0, 1, 1], [], []>} : vector<256x32xf32>, vector<32x32xf32>, vector<256x32xf32> -> vector<256x32xf32>
    %50 = arith.addf %43, %49 : vector<256x32xf32>
    %c37_i32 = arith.constant 37 : i32
    %51 = arith.addi %0, %c37_i32 : i32
    %52 = arith.index_cast %51 : i32 to index
    %c0_28 = arith.constant 0 : index
    %53 = vector.load %arg1[%52, %c0_28] : memref<806x32xf32, #tpu.memory_space<vmem>>, vector<256x32xf32>
    %c7 = arith.constant 7 : index
    %c0_29 = arith.constant 0 : index
    %c0_30 = arith.constant 0 : index
    %54 = vector.load %arg2[%c7, %c0_29, %c0_30] : memref<9x32x32xf32, #tpu.memory_space<vmem>>, vector<1x32x32xf32>
    %55 = vector.shape_cast %54 : vector<1x32x32xf32> to vector<32x32xf32>
    %cst_31 = arith.constant dense<0.000000e+00> : vector<256x32xf32>
    %56 = tpu.matmul %53, %55, %cst_31 {dimension_numbers = #tpu.dot_dimension_numbers<[1], [0], [0], [1], [0, 0, 1, 1], [], []>} : vector<256x32xf32>, vector<32x32xf32>, vector<256x32xf32> -> vector<256x32xf32>
    %57 = arith.addf %50, %56 : vector<256x32xf32>
    %c38_i32 = arith.constant 38 : i32
    %58 = arith.addi %0, %c38_i32 : i32
    %59 = arith.index_cast %58 : i32 to index
    %c0_32 = arith.constant 0 : index
    %60 = vector.load %arg1[%59, %c0_32] : memref<806x32xf32, #tpu.memory_space<vmem>>, vector<256x32xf32>
    %c8 = arith.constant 8 : index
    %c0_33 = arith.constant 0 : index
    %c0_34 = arith.constant 0 : index
    %61 = vector.load %arg2[%c8, %c0_33, %c0_34] : memref<9x32x32xf32, #tpu.memory_space<vmem>>, vector<1x32x32xf32>
    %62 = vector.shape_cast %61 : vector<1x32x32xf32> to vector<32x32xf32>
    %cst_35 = arith.constant dense<0.000000e+00> : vector<256x32xf32>
    %63 = tpu.matmul %60, %62, %cst_35 {dimension_numbers = #tpu.dot_dimension_numbers<[1], [0], [0], [1], [0, 0, 1, 1], [], []>} : vector<256x32xf32>, vector<32x32xf32>, vector<256x32xf32> -> vector<256x32xf32>
    %64 = arith.addf %57, %63 : vector<256x32xf32>
    %c0_36 = arith.constant 0 : index
    %c0_37 = arith.constant 0 : index
    %65 = vector.load %arg3[%c0_36, %c0_37] : memref<1x32xf32, #tpu.memory_space<vmem>>, vector<1x32xf32>
    %66 = vector.broadcast %65 : vector<1x32xf32> to vector<256x32xf32>
    %67 = arith.addf %64, %66 : vector<256x32xf32>
    %68 = arith.negf %67 : vector<256x32xf32>
    %69 = math.exp %68 : vector<256x32xf32>
    %cst_38 = arith.constant 1.000000e+00 : f32
    %70 = vector.broadcast %cst_38 : f32 to vector<256x32xf32>
    %71 = arith.addf %70, %69 : vector<256x32xf32>
    %72 = arith.divf %70, %71 : vector<256x32xf32>
    %73 = arith.mulf %67, %72 : vector<256x32xf32>
    %c0_39 = arith.constant 0 : index
    %c0_40 = arith.constant 0 : index
    %74 = vector.load %arg4[%c0_39, %c0_40] : memref<256x32xf32, #tpu.memory_space<vmem>>, vector<256x32xf32>
    tpu.vector_store %arg4[%c0_39, %c0_40], %73 {strides = array<i32>} : memref<256x32xf32, #tpu.memory_space<vmem>>, vector<256x32xf32>,
    return
  }
  func.func @transform_0(%arg0: i32) -> (i32, i32) {
    %c0_i32 = arith.constant 0 : i32
    %c0_i32_0 = arith.constant 0 : i32
    %c0_i32_1 = arith.constant 0 : i32
    return %c0_i32, %c0_i32_0 : i32, i32
  }
  func.func @transform_1(%arg0: i32) -> (i32, i32, i32) {
    %c0_i32 = arith.constant 0 : i32
    %c0_i32_0 = arith.constant 0 : i32
    %c0_i32_1 = arith.constant 0 : i32
    %c0_i32_2 = arith.constant 0 : i32
    return %c0_i32, %c0_i32_0, %c0_i32_1 : i32, i32, i32
  }
  func.func @transform_2(%arg0: i32) -> (i32, i32) {
    %c0_i32 = arith.constant 0 : i32
    %c0_i32_0 = arith.constant 0 : i32
    %c0_i32_1 = arith.constant 0 : i32
    return %c0_i32, %c0_i32_0 : i32, i32
  }
  func.func @transform_3(%arg0: i32) -> (i32, i32) {
    %c0_i32 = arith.constant 0 : i32
    %c0_i32_0 = arith.constant 0 : i32
    return %arg0, %c0_i32 : i32, i32
  }
}

module attributes {stable_mosaic.version = 11 : i64} {
  func.func @_conv_kernel(%arg0: i32, %arg1: memref<806x32xf32, #tpu.memory_space<vmem>>, %arg2: memref<9x32x3xf32, #tpu.memory_space<vmem>>, %arg3: memref<1x3xf32, #tpu.memory_space<vmem>>, %arg4: memref<256x3xf32, #tpu.memory_space<vmem>>) attributes {dimension_semantics = [#tpu.dimension_semantics<parallel>], iteration_bounds = array<i64: 3>, scalar_prefetch = 0 : i64, scratch_operands = 0 : i64, tpu.core_type = #tpu.core_type<tc>, window_params = [{pipeline_mode = #tpu.pipeline_mode<synchronous>, transform_indices = @transform_0, window_bounds = array<i64: 806, 32>}, {pipeline_mode = #tpu.pipeline_mode<synchronous>, transform_indices = @transform_1, window_bounds = array<i64: 9, 32, 3>}, {pipeline_mode = #tpu.pipeline_mode<synchronous>, transform_indices = @transform_2, window_bounds = array<i64: 1, 3>}, {transform_indices = @transform_3, window_bounds = array<i64: 256, 3>}]} {
    %c256_i32 = arith.constant 256 : i32
    %0 = arith.muli %arg0, %c256_i32 : i32
    %cst = arith.constant 0.000000e+00 : f32
    %1 = vector.broadcast %cst : f32 to vector<256x3xf32>
    %c0_i32 = arith.constant 0 : i32
    %2 = arith.addi %0, %c0_i32 : i32
    %3 = arith.index_cast %2 : i32 to index
    %c0 = arith.constant 0 : index
    %4 = vector.load %arg1[%3, %c0] : memref<806x32xf32, #tpu.memory_space<vmem>>, vector<256x32xf32>
    %c0_0 = arith.constant 0 : index
    %c0_1 = arith.constant 0 : index
    %c0_2 = arith.constant 0 : index
    %5 = vector.load %arg2[%c0_0, %c0_1, %c0_2] : memref<9x32x3xf32, #tpu.memory_space<vmem>>, vector<1x32x3xf32>
    %6 = vector.shape_cast %5 : vector<1x32x3xf32> to vector<32x3xf32>
    %cst_3 = arith.constant dense<0.000000e+00> : vector<256x3xf32>
    %7 = tpu.matmul %4, %6, %cst_3 {dimension_numbers = #tpu.dot_dimension_numbers<[1], [0], [0], [1], [0, 0, 1, 1], [], []>} : vector<256x32xf32>, vector<32x3xf32>, vector<256x3xf32> -> vector<256x3xf32>
    %8 = arith.addf %1, %7 : vector<256x3xf32>
    %c1_i32 = arith.constant 1 : i32
    %9 = arith.addi %0, %c1_i32 : i32
    %10 = arith.index_cast %9 : i32 to index
    %c0_4 = arith.constant 0 : index
    %11 = vector.load %arg1[%10, %c0_4] : memref<806x32xf32, #tpu.memory_space<vmem>>, vector<256x32xf32>
    %c1 = arith.constant 1 : index
    %c0_5 = arith.constant 0 : index
    %c0_6 = arith.constant 0 : index
    %12 = vector.load %arg2[%c1, %c0_5, %c0_6] : memref<9x32x3xf32, #tpu.memory_space<vmem>>, vector<1x32x3xf32>
    %13 = vector.shape_cast %12 : vector<1x32x3xf32> to vector<32x3xf32>
    %cst_7 = arith.constant dense<0.000000e+00> : vector<256x3xf32>
    %14 = tpu.matmul %11, %13, %cst_7 {dimension_numbers = #tpu.dot_dimension_numbers<[1], [0], [0], [1], [0, 0, 1, 1], [], []>} : vector<256x32xf32>, vector<32x3xf32>, vector<256x3xf32> -> vector<256x3xf32>
    %15 = arith.addf %8, %14 : vector<256x3xf32>
    %c2_i32 = arith.constant 2 : i32
    %16 = arith.addi %0, %c2_i32 : i32
    %17 = arith.index_cast %16 : i32 to index
    %c0_8 = arith.constant 0 : index
    %18 = vector.load %arg1[%17, %c0_8] : memref<806x32xf32, #tpu.memory_space<vmem>>, vector<256x32xf32>
    %c2 = arith.constant 2 : index
    %c0_9 = arith.constant 0 : index
    %c0_10 = arith.constant 0 : index
    %19 = vector.load %arg2[%c2, %c0_9, %c0_10] : memref<9x32x3xf32, #tpu.memory_space<vmem>>, vector<1x32x3xf32>
    %20 = vector.shape_cast %19 : vector<1x32x3xf32> to vector<32x3xf32>
    %cst_11 = arith.constant dense<0.000000e+00> : vector<256x3xf32>
    %21 = tpu.matmul %18, %20, %cst_11 {dimension_numbers = #tpu.dot_dimension_numbers<[1], [0], [0], [1], [0, 0, 1, 1], [], []>} : vector<256x32xf32>, vector<32x3xf32>, vector<256x3xf32> -> vector<256x3xf32>
    %22 = arith.addf %15, %21 : vector<256x3xf32>
    %c18_i32 = arith.constant 18 : i32
    %23 = arith.addi %0, %c18_i32 : i32
    %24 = arith.index_cast %23 : i32 to index
    %c0_12 = arith.constant 0 : index
    %25 = vector.load %arg1[%24, %c0_12] : memref<806x32xf32, #tpu.memory_space<vmem>>, vector<256x32xf32>
    %c3 = arith.constant 3 : index
    %c0_13 = arith.constant 0 : index
    %c0_14 = arith.constant 0 : index
    %26 = vector.load %arg2[%c3, %c0_13, %c0_14] : memref<9x32x3xf32, #tpu.memory_space<vmem>>, vector<1x32x3xf32>
    %27 = vector.shape_cast %26 : vector<1x32x3xf32> to vector<32x3xf32>
    %cst_15 = arith.constant dense<0.000000e+00> : vector<256x3xf32>
    %28 = tpu.matmul %25, %27, %cst_15 {dimension_numbers = #tpu.dot_dimension_numbers<[1], [0], [0], [1], [0, 0, 1, 1], [], []>} : vector<256x32xf32>, vector<32x3xf32>, vector<256x3xf32> -> vector<256x3xf32>
    %29 = arith.addf %22, %28 : vector<256x3xf32>
    %c19_i32 = arith.constant 19 : i32
    %30 = arith.addi %0, %c19_i32 : i32
    %31 = arith.index_cast %30 : i32 to index
    %c0_16 = arith.constant 0 : index
    %32 = vector.load %arg1[%31, %c0_16] : memref<806x32xf32, #tpu.memory_space<vmem>>, vector<256x32xf32>
    %c4 = arith.constant 4 : index
    %c0_17 = arith.constant 0 : index
    %c0_18 = arith.constant 0 : index
    %33 = vector.load %arg2[%c4, %c0_17, %c0_18] : memref<9x32x3xf32, #tpu.memory_space<vmem>>, vector<1x32x3xf32>
    %34 = vector.shape_cast %33 : vector<1x32x3xf32> to vector<32x3xf32>
    %cst_19 = arith.constant dense<0.000000e+00> : vector<256x3xf32>
    %35 = tpu.matmul %32, %34, %cst_19 {dimension_numbers = #tpu.dot_dimension_numbers<[1], [0], [0], [1], [0, 0, 1, 1], [], []>} : vector<256x32xf32>, vector<32x3xf32>, vector<256x3xf32> -> vector<256x3xf32>
    %36 = arith.addf %29, %35 : vector<256x3xf32>
    %c20_i32 = arith.constant 20 : i32
    %37 = arith.addi %0, %c20_i32 : i32
    %38 = arith.index_cast %37 : i32 to index
    %c0_20 = arith.constant 0 : index
    %39 = vector.load %arg1[%38, %c0_20] : memref<806x32xf32, #tpu.memory_space<vmem>>, vector<256x32xf32>
    %c5 = arith.constant 5 : index
    %c0_21 = arith.constant 0 : index
    %c0_22 = arith.constant 0 : index
    %40 = vector.load %arg2[%c5, %c0_21, %c0_22] : memref<9x32x3xf32, #tpu.memory_space<vmem>>, vector<1x32x3xf32>
    %41 = vector.shape_cast %40 : vector<1x32x3xf32> to vector<32x3xf32>
    %cst_23 = arith.constant dense<0.000000e+00> : vector<256x3xf32>
    %42 = tpu.matmul %39, %41, %cst_23 {dimension_numbers = #tpu.dot_dimension_numbers<[1], [0], [0], [1], [0, 0, 1, 1], [], []>} : vector<256x32xf32>, vector<32x3xf32>, vector<256x3xf32> -> vector<256x3xf32>
    %43 = arith.addf %36, %42 : vector<256x3xf32>
    %c36_i32 = arith.constant 36 : i32
    %44 = arith.addi %0, %c36_i32 : i32
    %45 = arith.index_cast %44 : i32 to index
    %c0_24 = arith.constant 0 : index
    %46 = vector.load %arg1[%45, %c0_24] : memref<806x32xf32, #tpu.memory_space<vmem>>, vector<256x32xf32>
    %c6 = arith.constant 6 : index
    %c0_25 = arith.constant 0 : index
    %c0_26 = arith.constant 0 : index
    %47 = vector.load %arg2[%c6, %c0_25, %c0_26] : memref<9x32x3xf32, #tpu.memory_space<vmem>>, vector<1x32x3xf32>
    %48 = vector.shape_cast %47 : vector<1x32x3xf32> to vector<32x3xf32>
    %cst_27 = arith.constant dense<0.000000e+00> : vector<256x3xf32>
    %49 = tpu.matmul %46, %48, %cst_27 {dimension_numbers = #tpu.dot_dimension_numbers<[1], [0], [0], [1], [0, 0, 1, 1], [], []>} : vector<256x32xf32>, vector<32x3xf32>, vector<256x3xf32> -> vector<256x3xf32>
    %50 = arith.addf %43, %49 : vector<256x3xf32>
    %c37_i32 = arith.constant 37 : i32
    %51 = arith.addi %0, %c37_i32 : i32
    %52 = arith.index_cast %51 : i32 to index
    %c0_28 = arith.constant 0 : index
    %53 = vector.load %arg1[%52, %c0_28] : memref<806x32xf32, #tpu.memory_space<vmem>>, vector<256x32xf32>
    %c7 = arith.constant 7 : index
    %c0_29 = arith.constant 0 : index
    %c0_30 = arith.constant 0 : index
    %54 = vector.load %arg2[%c7, %c0_29, %c0_30] : memref<9x32x3xf32, #tpu.memory_space<vmem>>, vector<1x32x3xf32>
    %55 = vector.shape_cast %54 : vector<1x32x3xf32> to vector<32x3xf32>
    %cst_31 = arith.constant dense<0.000000e+00> : vector<256x3xf32>
    %56 = tpu.matmul %53, %55, %cst_31 {dimension_numbers = #tpu.dot_dimension_numbers<[1], [0], [0], [1], [0, 0, 1, 1], [], []>} : vector<256x32xf32>, vector<32x3xf32>, vector<256x3xf32> -> vector<256x3xf32>
    %57 = arith.addf %50, %56 : vector<256x3xf32>
    %c38_i32 = arith.constant 38 : i32
    %58 = arith.addi %0, %c38_i32 : i32
    %59 = arith.index_cast %58 : i32 to index
    %c0_32 = arith.constant 0 : index
    %60 = vector.load %arg1[%59, %c0_32] : memref<806x32xf32, #tpu.memory_space<vmem>>, vector<256x32xf32>
    %c8 = arith.constant 8 : index
    %c0_33 = arith.constant 0 : index
    %c0_34 = arith.constant 0 : index
    %61 = vector.load %arg2[%c8, %c0_33, %c0_34] : memref<9x32x3xf32, #tpu.memory_space<vmem>>, vector<1x32x3xf32>
    %62 = vector.shape_cast %61 : vector<1x32x3xf32> to vector<32x3xf32>
    %cst_35 = arith.constant dense<0.000000e+00> : vector<256x3xf32>
    %63 = tpu.matmul %60, %62, %cst_35 {dimension_numbers = #tpu.dot_dimension_numbers<[1], [0], [0], [1], [0, 0, 1, 1], [], []>} : vector<256x32xf32>, vector<32x3xf32>, vector<256x3xf32> -> vector<256x3xf32>
    %64 = arith.addf %57, %63 : vector<256x3xf32>
    %c0_36 = arith.constant 0 : index
    %c0_37 = arith.constant 0 : index
    %65 = vector.load %arg3[%c0_36, %c0_37] : memref<1x3xf32, #tpu.memory_space<vmem>>, vector<1x3xf32>
    %66 = vector.broadcast %65 : vector<1x3xf32> to vector<256x3xf32>
    %67 = arith.addf %64, %66 : vector<256x3xf32>
    %c0_38 = arith.constant 0 : index
    %c0_39 = arith.constant 0 : index
    %68 = vector.load %arg4[%c0_38, %c0_39] : memref<256x3xf32, #tpu.memory_space<vmem>>, vector<256x3xf32>
    tpu.vector_store %arg4[%c0_38, %c0_39], %67 {strides = array<i32>} : memref<256x3xf32, #tpu.memory_space<vmem>>, vector<256x3xf32>,
    return
  }
  func.func @transform_0(%arg0: i32) -> (i32, i32) {
    %c0_i32 = arith.constant 0 : i32
    %c0_i32_0 = arith.constant 0 : i32
    %c0_i32_1 = arith.constant 0 : i32
    return %c0_i32, %c0_i32_0 : i32, i32
  }
  func.func @transform_1(%arg0: i32) -> (i32, i32, i32) {
    %c0_i32 = arith.constant 0 : i32
    %c0_i32_0 = arith.constant 0 : i32
    %c0_i32_1 = arith.constant 0 : i32
    %c0_i32_2 = arith.constant 0 : i32
    return %c0_i32, %c0_i32_0, %c0_i32_1 : i32, i32, i32
  }
  func.func @transform_2(%arg0: i32) -> (i32, i32) {
    %c0_i32 = arith.constant 0 : i32
    %c0_i32_0 = arith.constant 0 : i32
    %c0_i32_1 = arith.constant 0 : i32
    return %c0_i32, %c0_i32_0 : i32, i32
  }
  func.func @transform_3(%arg0: i32) -> (i32, i32) {
    %c0_i32 = arith.constant 0 : i32
    %c0_i32_0 = arith.constant 0 : i32
    return %arg0, %c0_i32 : i32, i32
  }
}

module attributes {stable_mosaic.version = 11 : i64} {
  func.func @_loss_kernel(%arg0: i32, %arg1: memref<8x128xf32, #tpu.memory_space<vmem>>, %arg2: memref<8x128xf32, #tpu.memory_space<vmem>>, %arg3: memref<8x128xf32, #tpu.memory_space<vmem>>, %arg4: memref<8x128xf32, #tpu.memory_space<vmem>>, %arg5: memref<1x1xf32, #tpu.memory_space<vmem>>, %arg6: memref<1x1xf32, #tpu.memory_space<vmem>>, %arg7: memref<1x1xf32, #tpu.memory_space<vmem>>) attributes {dimension_semantics = [#tpu.dimension_semantics<arbitrary>], iteration_bounds = array<i64: 2>, scalar_prefetch = 0 : i64, scratch_operands = 2 : i64, tpu.core_type = #tpu.core_type<tc>, window_params = [{transform_indices = @transform_0, window_bounds = array<i64: 8, 128>}, {transform_indices = @transform_1, window_bounds = array<i64: 8, 128>}, {transform_indices = @transform_2, window_bounds = array<i64: 8, 128>}, {transform_indices = @transform_3, window_bounds = array<i64: 8, 128>}, {pipeline_mode = #tpu.pipeline_mode<synchronous>, transform_indices = @transform_4, window_bounds = array<i64: 1, 1>}]} {
    %c0_i32 = arith.constant 0 : i32
    %0 = arith.cmpi eq, %arg0, %c0_i32 : i32
    %1 = arith.extui %0 : i1 to i32
    %c0_i32_0 = arith.constant 0 : i32
    %2 = arith.cmpi ne, %1, %c0_i32_0 : i32
    scf.if %2 {
      %cst_22 = arith.constant 0.000000e+00 : f32
      %39 = vector.broadcast %cst_22 : f32 to vector<1x1xf32>
      %c0_23 = arith.constant 0 : index
      %c0_24 = arith.constant 0 : index
      %40 = vector.load %arg6[%c0_23, %c0_24] : memref<1x1xf32, #tpu.memory_space<vmem>>, vector<1x1xf32>
      tpu.vector_store %arg6[%c0_23, %c0_24], %39 {strides = array<i32>} : memref<1x1xf32, #tpu.memory_space<vmem>>, vector<1x1xf32>,
      %cst_25 = arith.constant 0.000000e+00 : f32
      %41 = vector.broadcast %cst_25 : f32 to vector<1x1xf32>
      %c0_26 = arith.constant 0 : index
      %c0_27 = arith.constant 0 : index
      %42 = vector.load %arg7[%c0_26, %c0_27] : memref<1x1xf32, #tpu.memory_space<vmem>>, vector<1x1xf32>
      tpu.vector_store %arg7[%c0_26, %c0_27], %41 {strides = array<i32>} : memref<1x1xf32, #tpu.memory_space<vmem>>, vector<1x1xf32>,
    } else {
    }
    %c0 = arith.constant 0 : index
    %c0_1 = arith.constant 0 : index
    %3 = vector.load %arg6[%c0, %c0_1] : memref<1x1xf32, #tpu.memory_space<vmem>>, vector<1x1xf32>
    %c0_2 = arith.constant 0 : index
    %c0_3 = arith.constant 0 : index
    %4 = vector.load %arg1[%c0_2, %c0_3] : memref<8x128xf32, #tpu.memory_space<vmem>>, vector<8x128xf32>
    %c0_4 = arith.constant 0 : index
    %c0_5 = arith.constant 0 : index
    %5 = vector.load %arg2[%c0_4, %c0_5] : memref<8x128xf32, #tpu.memory_space<vmem>>, vector<8x128xf32>
    %6 = arith.subf %4, %5 : vector<8x128xf32>
    %7 = math.absf %6 : vector<8x128xf32>
    %8 = vector.shape_cast %7 : vector<8x128xf32> to vector<1x8x128xf32>
    %cst = arith.constant dense<0.000000e+00> : vector<1xf32>
    %9 = vector.multi_reduction <add>, %8, %cst [1, 2] : vector<1x8x128xf32> to vector<1xf32>
    %10 = vector.shape_cast %9 : vector<1xf32> to vector<1x1x1xf32>
    %11 = vector.extract %10[0, 0, 0] : f32 from vector<1x1x1xf32>
    %12 = vector.broadcast %11 : f32 to vector<1x1xf32>
    %13 = arith.addf %3, %12 : vector<1x1xf32>
    %c0_6 = arith.constant 0 : index
    %c0_7 = arith.constant 0 : index
    %14 = vector.load %arg6[%c0_6, %c0_7] : memref<1x1xf32, #tpu.memory_space<vmem>>, vector<1x1xf32>
    tpu.vector_store %arg6[%c0_6, %c0_7], %13 {strides = array<i32>} : memref<1x1xf32, #tpu.memory_space<vmem>>, vector<1x1xf32>,
    %c0_8 = arith.constant 0 : index
    %c0_9 = arith.constant 0 : index
    %15 = vector.load %arg4[%c0_8, %c0_9] : memref<8x128xf32, #tpu.memory_space<vmem>>, vector<8x128xf32>
    %cst_10 = arith.constant -3.000000e+01 : f32
    %cst_11 = arith.constant 2.000000e+01 : f32
    %16 = vector.broadcast %cst_10 : f32 to vector<8x128xf32>
    %17 = arith.maximumf %16, %15 : vector<8x128xf32>
    %18 = vector.broadcast %cst_11 : f32 to vector<8x128xf32>
    %19 = arith.minimumf %18, %17 : vector<8x128xf32>
    %c0_12 = arith.constant 0 : index
    %c0_13 = arith.constant 0 : index
    %20 = vector.load %arg3[%c0_12, %c0_13] : memref<8x128xf32, #tpu.memory_space<vmem>>, vector<8x128xf32>
    %c0_14 = arith.constant 0 : index
    %c0_15 = arith.constant 0 : index
    %21 = vector.load %arg7[%c0_14, %c0_15] : memref<1x1xf32, #tpu.memory_space<vmem>>, vector<1x1xf32>
    %22 = arith.mulf %20, %20 : vector<8x128xf32>
    %23 = math.exp %19 : vector<8x128xf32>
    %24 = arith.addf %22, %23 : vector<8x128xf32>
    %cst_16 = arith.constant 1.000000e+00 : f32
    %25 = vector.broadcast %cst_16 : f32 to vector<8x128xf32>
    %26 = arith.subf %24, %25 : vector<8x128xf32>
    %27 = arith.subf %26, %19 : vector<8x128xf32>
    %28 = vector.shape_cast %27 : vector<8x128xf32> to vector<1x8x128xf32>
    %cst_17 = arith.constant dense<0.000000e+00> : vector<1xf32>
    %29 = vector.multi_reduction <add>, %28, %cst_17 [1, 2] : vector<1x8x128xf32> to vector<1xf32>
    %30 = vector.shape_cast %29 : vector<1xf32> to vector<1x1x1xf32>
    %31 = vector.extract %30[0, 0, 0] : f32 from vector<1x1x1xf32>
    %cst_18 = arith.constant 5.000000e-01 : f32
    %32 = arith.mulf %cst_18, %31 : f32
    %33 = vector.broadcast %32 : f32 to vector<1x1xf32>
    %34 = arith.addf %21, %33 : vector<1x1xf32>
    %c0_19 = arith.constant 0 : index
    %c0_20 = arith.constant 0 : index
    %35 = vector.load %arg7[%c0_19, %c0_20] : memref<1x1xf32, #tpu.memory_space<vmem>>, vector<1x1xf32>
    tpu.vector_store %arg7[%c0_19, %c0_20], %34 {strides = array<i32>} : memref<1x1xf32, #tpu.memory_space<vmem>>, vector<1x1xf32>,
    %c1_i32 = arith.constant 1 : i32
    %36 = arith.cmpi eq, %arg0, %c1_i32 : i32
    %37 = arith.extui %36 : i1 to i32
    %c0_i32_21 = arith.constant 0 : i32
    %38 = arith.cmpi ne, %37, %c0_i32_21 : i32
    scf.if %38 {
      %c0_22 = arith.constant 0 : index
      %c0_23 = arith.constant 0 : index
      %39 = vector.load %arg6[%c0_22, %c0_23] : memref<1x1xf32, #tpu.memory_space<vmem>>, vector<1x1xf32>
      %c0_24 = arith.constant 0 : index
      %c0_25 = arith.constant 0 : index
      %40 = vector.load %arg7[%c0_24, %c0_25] : memref<1x1xf32, #tpu.memory_space<vmem>>, vector<1x1xf32>
      %cst_26 = arith.constant 9.99999997E-7 : f32
      %41 = vector.broadcast %cst_26 : f32 to vector<1x1xf32>
      %42 = arith.mulf %41, %40 : vector<1x1xf32>
      %43 = arith.addf %39, %42 : vector<1x1xf32>
      %cst_27 = arith.constant 5.000000e-01 : f32
      %44 = vector.broadcast %cst_27 : f32 to vector<1x1xf32>
      %45 = arith.mulf %43, %44 : vector<1x1xf32>
      %c0_28 = arith.constant 0 : index
      %c0_29 = arith.constant 0 : index
      %46 = vector.load %arg5[%c0_28, %c0_29] : memref<1x1xf32, #tpu.memory_space<vmem>>, vector<1x1xf32>
      tpu.vector_store %arg5[%c0_28, %c0_29], %45 {strides = array<i32>} : memref<1x1xf32, #tpu.memory_space<vmem>>, vector<1x1xf32>,
    } else {
    }
    return
  }
  func.func @transform_0(%arg0: i32) -> (i32, i32) {
    %c0_i32 = arith.constant 0 : i32
    %c0_i32_0 = arith.constant 0 : i32
    return %arg0, %c0_i32 : i32, i32
  }
  func.func @transform_1(%arg0: i32) -> (i32, i32) {
    %c0_i32 = arith.constant 0 : i32
    %c0_i32_0 = arith.constant 0 : i32
    return %arg0, %c0_i32 : i32, i32
  }
  func.func @transform_2(%arg0: i32) -> (i32, i32) {
    %c0_i32 = arith.constant 0 : i32
    %c0_i32_0 = arith.constant 0 : i32
    return %arg0, %c0_i32 : i32, i32
  }
  func.func @transform_3(%arg0: i32) -> (i32, i32) {
    %c0_i32 = arith.constant 0 : i32
    %c0_i32_0 = arith.constant 0 : i32
    return %arg0, %c0_i32 : i32, i32
  }
  func.func @transform_4(%arg0: i32) -> (i32, i32) {
    %c0_i32 = arith.constant 0 : i32
    %c0_i32_0 = arith.constant 0 : i32
    %c0_i32_1 = arith.constant 0 : i32
    return %c0_i32, %c0_i32_0 : i32, i32
  }
}

</mosaic_0001>

<bundles_post_ra>
// kernel: vae_forward.8
= control target key start
LH: loop header
LB: loop body
LE: loop exit
PB: predicated region body
PF: predicated region fallthrough
CT: control target
= control target key end

     0   :  { %s1585_s12 = smov 0   ;;  %s2078_s0 = inlined_call_operand.vmem [shape: f32[186,128], index: 0, kind: input, shape index: {}]   ;;  %s2079_s1 = inlined_call_operand.vmem [shape: f32[4,128,32], index: 1, kind: input, shape index: {}]   ;;  %s2080_s2 = inlined_call_operand.vmem [shape: f32[1,32], index: 2, kind: input, shape index: {}]   ;;  %s2081_s3 = inlined_call_operand.vmem [shape: f32[176,32], index: 3, kind: output, shape index: {}]  }
   0x1 LB: > { %s935_s13 = sadd.s32 4294967295, %s1560_s12   ;;  %p938_p0 = scmp.ge.s32.totalorder %s1560_s12, 1  ;;  %s1560_s12 = sphi %s1585_s12, %s13_s12  }
   0x2   : > { %p127_p1 = scmp.lt.s32.totalorder %s1560_s12, 3 }
   0x4   : > { %p128_p2 = pnand %p938_p0, %p127_p1 }
   0x5   : > { %v951_v0 = vld [vmem:[%s2079_s1 + $0x80] sm:$0xff] (!%p128_p2)  ;;  %v952_v1 = vld [vmem:[%s2079_s1 + $0x88] sm:$0xff] (!%p128_p2)  ;;  %v1562_v3 = vmov (!%p128_p2), 0.0|0.0   ;;  %v953_v6 = vld [vmem:[%s2079_s1 + $0x90] sm:$0xff] (!%p128_p2)  ;;  %vm1563_vm0 = vmmov (!%p128_p2), 0   ;;  %v1564_v11 = vmov (!%p128_p2), 0.0  }
   0x6   : > { %131 = sbr.rel (%p128_p2) target bundleno = 370 (0x172), region = 32  ;;  %v165_v2 = vld [vmem:[%s2079_s1] sm:$0xff] (!%p128_p2)  ;;  %1403 = vmatprep.subr.bf16.mxu0 (!%p128_p2), %v1562_v3  ;;  %v1404_v4 = vpack.c.bf16 (!%p128_p2), %v952_v1, %v951_v0  ;;  %1427 = vmatprep.subr.bf16.mxu1 (!%p128_p2), %v1562_v3  ;;  %v166_v5 = vld [vmem:[%s2079_s1 + $0x8] sm:$0xff] (!%p128_p2)  ;;  %v954_v7 = vld [vmem:[%s2079_s1 + $0x98] sm:$0xff] (!%p128_p2)  ;;  %vm868_vm1 = vcmask (!%p128_p2), 261120  }
   0x7   : > { %v1428_v8 = vpack.c.bf16 (!%p128_p2), %v166_v5, %v165_v2  ;;  %v167_v9 = vld [vmem:[%s2079_s1 + $0x10] sm:$0xff] (!%p128_p2)  ;;  %v168_v10 = vld [vmem:[%s2079_s1 + $0x18] sm:$0xff] (!%p128_p2)  ;;  %1175 = vmatprep.mubr.msk.f32.mxu0 (!%p128_p2), %vm1563_vm0, %v1564_v11  ;;  %1240 = vmatprep.mubr.msk.f32.mxu1 (!%p128_p2), %vm1563_vm0, %v1564_v11  ;;  %v1407_v12 = vpack.c.bf16 (!%p128_p2), %v954_v7, %v953_v6  ;;  %v955_v14 = vld [vmem:[%s2079_s1 + $0xa0] sm:$0xff] (!%p128_p2)  ;;  %s152_s24 = smul.u32 (!%p128_p2), 88, %s935_s13 }
   0x8   : > { %1405 = vmatpush3.bf16.msra.mxu0 (!%p128_p2), %v1404_v4  ;;  %v1431_v13 = vpack.c.bf16 (!%p128_p2), %v168_v10, %v167_v9  ;;  %v956_v15 = vld [vmem:[%s2079_s1 + $0xa8] sm:$0xff] (!%p128_p2)  ;;  %v169_v16 = vld [vmem:[%s2079_s1 + $0x20] sm:$0xff] (!%p128_p2)  ;;  %v957_v20 = vld [vmem:[%s2079_s1 + $0xb0] sm:$0xff] (!%p128_p2) }
   0x9   : > { %1429 = vmatpush3.bf16.msra.mxu1 (!%p128_p2), %v1428_v8  ;;  %1406 = vmatprep.subr.bf16.mxu0 (!%p128_p2), %v1562_v3  ;;  %v170_v17 = vld [vmem:[%s2079_s1 + $0x28] sm:$0xff] (!%p128_p2)  ;;  %v1410_v18 = vpack.c.bf16 (!%p128_p2), %v956_v15, %v955_v14  ;;  %v958_v21 = vld [vmem:[%s2079_s1 + $0xb8] sm:$0xff] (!%p128_p2)  ;;  %v171_v22 = vld [vmem:[%s2079_s1 + $0x30] sm:$0xff] (!%p128_p2)  ;;  %s1713_s4 = scalar_lea.vmem (!%p128_p2), %s2078_s0, %s152_s24  ;;  %s146_s24 = smul.u32 (!%p128_p2), 11, %s935_s13 }
   0xa   : > { %1430 = vmatprep.subr.bf16.mxu1 (!%p128_p2), %v1562_v3  ;;  %v1434_v19 = vpack.c.bf16 (!%p128_p2), %v170_v17, %v169_v16  ;;  %v172_v23 = vld [vmem:[%s2079_s1 + $0x38] sm:$0xff] (!%p128_p2)  ;;  %v1413_v24 = vpack.c.bf16 (!%p128_p2), %v958_v21, %v957_v20  ;;  %v959_v26 = vld [vmem:[%s2079_s1 + $0xc0] sm:$0xff] (!%p128_p2)  ;;  %v960_v27 = vld [vmem:[%s2079_s1 + $0xc8] sm:$0xff] (!%p128_p2) }
   0xb   : > { %v1437_v25 = vpack.c.bf16 (!%p128_p2), %v172_v23, %v171_v22  ;;  %v173_v28 = vld [vmem:[%s2079_s1 + $0x40] sm:$0xff] (!%p128_p2)  ;;  %v174_v29 = vld [vmem:[%s2079_s1 + $0x48] sm:$0xff] (!%p128_p2)  ;;  %v1416_v30 = vpack.c.bf16 (!%p128_p2), %v960_v27, %v959_v26  ;;  %v961_v32 = vld [vmem:[%s2079_s1 + $0xd0] sm:$0xff] (!%p128_p2)  ;;  %p147_p3 = scmp.lt.s32.totalorder (!%p128_p2), %s146_s24, 21 }
   0xc   : > { %1408 = vmatpush3.bf16.msra.mxu0 (!%p128_p2), %v1407_v12  ;;  %v1440_v31 = vpack.c.bf16 (!%p128_p2), %v174_v29, %v173_v28  ;;  %v962_v33 = vld [vmem:[%s2079_s1 + $0xd8] sm:$0xff] (!%p128_p2)  ;;  %v175_v34 = vld [vmem:[%s2079_s1 + $0x50] sm:$0xff] (!%p128_p2)  ;;  %v963_v38 = vld [vmem:[%s2079_s1 + $0xe0] sm:$0xff] (!%p128_p2) }
   0xd   : > { %1432 = vmatpush3.bf16.msra.mxu1 %v1431_v13  ;;  %1409 = vmatprep.subr.bf16.mxu0 %v1562_v3  ;;  %v176_v35 = vld [vmem:[%s2079_s1 + $0x58] sm:$0xff]  ;;  %v1419_v36 = vpack.c.bf16 %v962_v33, %v961_v32  ;;  %v964_v39 = vld [vmem:[%s2079_s1 + $0xe8] sm:$0xff]  ;;  %v177_v40 = vld [vmem:[%s2079_s1 + $0x60] sm:$0xff]  ;;  %s2083_s24 = smov (!%p147_p3, %s146_s24), 21 }
   0xe   : > { %1433 = vmatprep.subr.bf16.mxu1 %v1562_v3  ;;  %v1443_v37 = vpack.c.bf16 %v176_v35, %v175_v34  ;;  %v178_v41 = vld [vmem:[%s2079_s1 + $0x68] sm:$0xff]  ;;  %v1422_v42 = vpack.c.bf16 %v964_v39, %v963_v38  ;;  %v965_v44 = vld [vmem:[%s2079_s1 + $0xf0] sm:$0xff]  ;;  %v966_v45 = vld [vmem:[%s2079_s1 + $0xf8] sm:$0xff]  ;;  %s939_s13 = sshll.u32 %s2083_s24, 3 }
   0xf   : > { %v1446_v43 = vpack.c.bf16 %v178_v41, %v177_v40  ;;  %v179_v46 = vld [vmem:[%s2079_s1 + $0x70] sm:$0xff]  ;;  %v180_v47 = vld [vmem:[%s2079_s1 + $0x78] sm:$0xff]  ;;  %v1425_v48 = vpack.c.bf16 %v966_v45, %v965_v44  ;;  %v978_v50 = vld [vmem:[%s2079_s1 + $0x100] sm:$0xff]  ;;  %s2033_s27 = scalar_lea.vmem %s2081_s3, %s939_s13 }
  0x10   : > { %1411 = vmatpush3.bf16.msra.mxu0 %v1410_v18  ;;  %v1449_v49 = vpack.c.bf16 %v180_v47, %v179_v46  ;;  %v979_v51 = vld [vmem:[%s2079_s1 + $0x108] sm:$0xff]  ;;  %v1005_v52 = vld [vmem:[%s2079_s1 + $0x180] sm:$0xff]  ;;  %v980_v58 = vld [vmem:[%s2079_s1 + $0x110] sm:$0xff] }
  0x11   : > { %1435 = vmatpush3.bf16.msra.mxu1 %v1434_v19  ;;  %1412 = vmatprep.subr.bf16.mxu0 %v1562_v3  ;;  %v1006_v53 = vld [vmem:[%s2079_s1 + $0x188] sm:$0xff]  ;;  %v1452_v55 = vpack.c.bf16 %v979_v51, %v978_v50  ;;  %v154_v56 = vld [vmem:[%s1713_s4] sm:$0xff]  ;;  %v981_v59 = vld [vmem:[%s2079_s1 + $0x118] sm:$0xff] }
  0x12   : > { %1436 = vmatprep.subr.bf16.mxu1 %v1562_v3  ;;  %v940_v54 = vld [vmem:[%s1713_s4 + $0x1] sm:$0xff]  ;;  %v1476_v57 = vpack.c.bf16 %v1006_v53, %v1005_v52  ;;  %v1007_v60 = vld [vmem:[%s2079_s1 + $0x190] sm:$0xff]  ;;  %v1008_v61 = vld [vmem:[%s2079_s1 + $0x198] sm:$0xff]  ;;  %v1455_v0 = vpack.c.bf16 %v981_v59, %v980_v58 }
  0x13   : > { %v1745_v62 = vld [vmem:[%s1713_s4 + $0x9] sm:$0xff]  ;;  %v1479_v1 = vpack.c.bf16 %v1008_v61, %v1007_v60  ;;  %v982_v2 = vld [vmem:[%s2079_s1 + $0x120] sm:$0xff]  ;;  %v1770_v7 = vld [vmem:[%s1713_s4 + $0x11] sm:$0xff] }
  0x14   : > { %1414 = vmatpush3.bf16.msra.mxu0 %v1413_v24  ;;  %v155_v63 = vld [vmem:[%s1713_s4 + $0x8] sm:$0xff]  ;;  %v1009_v5 = vld [vmem:[%s2079_s1 + $0x1a0] sm:$0xff]  ;;  %v156_v8 = vld [vmem:[%s1713_s4 + $0x10] sm:$0xff] }
  0x15   : > { %1438 = vmatpush3.bf16.msra.mxu1 %v1437_v25  ;;  %1415 = vmatprep.subr.bf16.mxu0 %v1562_v3  ;;  %v983_v4 = vld [vmem:[%s2079_s1 + $0x128] sm:$0xff]  ;;  %v984_v12 = vld [vmem:[%s2079_s1 + $0x130] sm:$0xff]  ;;  %v985_v13 = vld [vmem:[%s2079_s1 + $0x138] sm:$0xff] }
  0x16   : > { %1439 = vmatprep.subr.bf16.mxu1 %v1562_v3  ;;  %v1010_v6 = vld [vmem:[%s2079_s1 + $0x1a8] sm:$0xff]  ;;  %v1458_v9 = vpack.c.bf16 %v983_v4, %v982_v2  ;;  %v1011_v14 = vld [vmem:[%s2079_s1 + $0x1b0] sm:$0xff]  ;;  %v1012_v15 = vld [vmem:[%s2079_s1 + $0x1b8] sm:$0xff]  ;;  %v1461_v18 = vpack.c.bf16 %v985_v13, %v984_v12 }
  0x17   : > { %v1482_v10 = vpack.c.bf16 %v1010_v6, %v1009_v5  ;;  %v1793_v16 = vld [vmem:[%s1713_s4 + $0x19] sm:$0xff]  ;;  %v1485_v19 = vpack.c.bf16 %v1012_v15, %v1011_v14  ;;  %v987_v21 = vld [vmem:[%s2079_s1 + $0x148] sm:$0xff]  ;;  %v988_v28 = vld [vmem:[%s2079_s1 + $0x150] sm:$0xff] }
  0x18   : > { %1417 = vmatpush3.bf16.msra.mxu0 %v1416_v30  ;;  %v157_v17 = vld [vmem:[%s1713_s4 + $0x18] sm:$0xff]  ;;  %v986_v20 = vld [vmem:[%s2079_s1 + $0x140] sm:$0xff]  ;;  %v1014_v23 = vld [vmem:[%s2079_s1 + $0x1c8] sm:$0xff] }
  0x19   : > { %1441 = vmatpush3.bf16.msra.mxu1 %v1440_v31  ;;  %1418 = vmatprep.subr.bf16.mxu0 %v1562_v3  ;;  %v1013_v22 = vld [vmem:[%s2079_s1 + $0x1c0] sm:$0xff]  ;;  %v1464_v26 = vpack.c.bf16 %v987_v21, %v986_v20  ;;  %v989_v29 = vld [vmem:[%s2079_s1 + $0x158] sm:$0xff]  ;;  %v1015_v30 = vld [vmem:[%s2079_s1 + $0x1d0] sm:$0xff] }
  0x1a   : > { %1442 = vmatprep.subr.bf16.mxu1 %v1562_v3  ;;  %v1816_v24 = vld [vmem:[%s1713_s4 + $0x21] sm:$0xff]  ;;  %v1488_v27 = vpack.c.bf16 %v1014_v23, %v1013_v22  ;;  %v1016_v31 = vld [vmem:[%s2079_s1 + $0x1d8] sm:$0xff]  ;;  %v1839_v32 = vld [vmem:[%s1713_s4 + $0x29] sm:$0xff]  ;;  %v1467_v34 = vpack.c.bf16 %v989_v29, %v988_v28 }
  0x1b   : > { %v158_v25 = vld [vmem:[%s1713_s4 + $0x20] sm:$0xff]  ;;  %v159_v33 = vld [vmem:[%s1713_s4 + $0x28] sm:$0xff]  ;;  %v1491_v35 = vpack.c.bf16 %v1016_v31, %v1015_v30  ;;  %v1862_v40 = vld [vmem:[%s1713_s4 + $0x31] sm:$0xff] }
  0x1c   : > { %1420 = vmatpush3.bf16.msra.mxu0 %v1419_v36  ;;  %v990_v36 = vld [vmem:[%s2079_s1 + $0x160] sm:$0xff]  ;;  %v1018_v39 = vld [vmem:[%s2079_s1 + $0x1e8] sm:$0xff]  ;;  %v160_v41 = vld [vmem:[%s1713_s4 + $0x30] sm:$0xff] }
  0x1d   : > { %1444 = vmatpush3.bf16.msra.mxu1 %v1443_v37  ;;  %1421 = vmatprep.subr.bf16.mxu0 %v1562_v3  ;;  %v991_v37 = vld [vmem:[%s2079_s1 + $0x168] sm:$0xff]  ;;  %v1017_v38 = vld [vmem:[%s2079_s1 + $0x1e0] sm:$0xff]  ;;  %v992_v44 = vld [vmem:[%s2079_s1 + $0x170] sm:$0xff] }
  0x1e   : > { %1445 = vmatprep.subr.bf16.mxu1 %v1562_v3  ;;  %v993_v45 = vld [vmem:[%s2079_s1 + $0x178] sm:$0xff]  ;;  %v1019_v46 = vld [vmem:[%s2079_s1 + $0x1f0] sm:$0xff]  ;;  %v948_v52 = vld [vmem:[%s1713_s4 + $0x41] sm:$0xff] }
  0x1f   : > { %v1020_v47 = vld [vmem:[%s2079_s1 + $0x1f8] sm:$0xff]  ;;  %v1473_v50 = vpack.c.bf16 %v993_v45, %v992_v44  ;;  %v162_v53 = vld [vmem:[%s1713_s4 + $0x40] sm:$0xff]  ;;  %v998_v61 = vld [vmem:[%s1713_s4 + $0x2a] sm:$0xff] }
  0x20   : > { %1423 = vmatpush3.bf16.msra.mxu0 %v1422_v42  ;;  %v1470_v42 = vpack.c.bf16 %v991_v37, %v990_v36  ;;  %v1497_v51 = vpack.c.bf16 %v1020_v47, %v1019_v46  ;;  %v995_v58 = vld [vmem:[%s1713_s4 + $0x12] sm:$0xff]  ;;  %v996_v59 = vld [vmem:[%s1713_s4 + $0x1a] sm:$0xff]  ;;  %v997_v60 = vld [vmem:[%s1713_s4 + $0x22] sm:$0xff] }
  0x21   : > { %1447 = vmatpush3.bf16.msra.mxu1 %v1446_v43  ;;  %1424 = vmatprep.subr.bf16.mxu0 %v1562_v3  ;;  %v1494_v43 = vpack.c.bf16 %v1018_v39, %v1017_v38  ;;  %v1003_v2 = vld [vmem:[%s1713_s4 + $0x52] sm:$0xff]  ;;  %v1004_v5 = vld [vmem:[%s1713_s4 + $0x5a] sm:$0xff] }
  0x22   : > { %1448 = vmatprep.subr.bf16.mxu1 %v1562_v3  ;;  %v977_v4 = vld [vmem:[%s1713_s4 + $0x59] sm:$0xff] }
  0x24   : > { %1426 = vmatpush3.bf16.msra.mxu0 %v1425_v48  ;;  %v1885_v48 = vld [vmem:[%s1713_s4 + $0x39] sm:$0xff] }
  0x25   : > { %1450 = vmatpush3.bf16.msra.mxu1 %v1449_v49  ;;  %1451 = vmatprep.subr.bf16.mxu0 %v1562_v3  ;;  %v161_v49 = vld [vmem:[%s1713_s4 + $0x38] sm:$0xff] }
  0x26   : > { %1475 = vmatprep.subr.bf16.mxu1 %v1562_v3 }
  0x27   : > { %1176 = vmatmul.mubr.f32.vlgmr.msra.gmra.mrb[0].mxu0 %v940_v54  ;;  %v163_v54 = vld [vmem:[%s1713_s4 + $0x48] sm:$0xff] }
  0x28   : > { %1241 = vmatmul.mubr.f32.vlgmr.msra.gmra.mrb[0].mxu1 %v154_v56  ;;  %1453 = vmatpush3.bf16.msra.mxu0 %v1452_v55  ;;  %v950_v55 = vld [vmem:[%s1713_s4 + $0x51] sm:$0xff] }
  0x29   : > { %1178 = vmatprep.mubr.msk.f32.mxu0 %vm1563_vm0, %v1564_v11  ;;  %1477 = vmatpush3.bf16.msra.mxu1 %v1476_v57  ;;  %v164_v56 = vld [vmem:[%s1713_s4 + $0x50] sm:$0xff] }
  0x2a   : > { %1243 = vmatprep.mubr.msk.f32.mxu1 %vm1563_vm0, %v1564_v11  ;;  %1454 = vmatprep.subr.bf16.mxu0 %v1562_v3  ;;  %v994_v57 = vld [vmem:[%s1713_s4 + $0xa] sm:$0xff] }
  0x2b   : > { %1179 = vmatmul.mubr.f32.gmra.mrb[2].mxu0 %v1745_v62  ;;  %1478 = vmatprep.subr.bf16.mxu1 %v1562_v3 }
  0x2c   : > { %1244 = vmatmul.mubr.f32.gmra.mrb[2].mxu1 %v155_v63  ;;  %1181 = vmatprep.mubr.msk.f32.mxu0 %vm1563_vm0, %v1564_v11  ;;  %v1000_v63 = vld [vmem:[%s1713_s4 + $0x3a] sm:$0xff] }
  0x2d   : > { %1456 = vmatpush3.bf16.msra.mxu0 %v1455_v0  ;;  %1246 = vmatprep.mubr.msk.f32.mxu1 %vm1563_vm0, %v1564_v11  ;;  %v1001_v0 = vld [vmem:[%s1713_s4 + $0x42] sm:$0xff] }
  0x2e   : > { %1480 = vmatpush3.bf16.msra.mxu1 %v1479_v1  ;;  %1457 = vmatprep.subr.bf16.mxu0 %v1562_v3  ;;  %v1002_v1 = vld [vmem:[%s1713_s4 + $0x4a] sm:$0xff] }
  0x2f   : > { %1182 = vmatmul.mubr.f32.gmra.mrb[4].mxu0 %v1770_v7  ;;  %1481 = vmatprep.subr.bf16.mxu1 %v1562_v3 }
  0x30   : > { %1247 = vmatmul.mubr.f32.gmra.mrb[4].mxu1 %v156_v8  ;;  %1184 = vmatprep.mubr.msk.f32.mxu0 %vm1563_vm0, %v1564_v11 }
  0x31   : > { %1249 = vmatprep.mubr.msk.f32.mxu1 %vm1563_vm0, %v1564_v11  ;;  %1459 = vmatpush3.bf16.msra.mxu0 %v1458_v9 }
  0x32   : > { %1483 = vmatpush3.bf16.msra.mxu1 %v1482_v10  ;;  %1460 = vmatprep.subr.bf16.mxu0 %v1562_v3 }
  0x33   : > { %1185 = vmatmul.mubr.f32.gmra.mrb[6].mxu0 %v1793_v16  ;;  %1484 = vmatprep.subr.bf16.mxu1 %v1562_v3 }
  0x34   : > { %1250 = vmatmul.mubr.f32.gmra.mrb[6].mxu1 %v157_v17  ;;  %1187 = vmatprep.mubr.msk.f32.mxu0 %vm1563_vm0, %v1564_v11 }
  0x35   : > { %1252 = vmatprep.mubr.msk.f32.mxu1 %vm1563_vm0, %v1564_v11  ;;  %1462 = vmatpush3.bf16.msra.mxu0 %v1461_v18 }
  0x36   : > { %1486 = vmatpush3.bf16.msra.mxu1 %v1485_v19  ;;  %1463 = vmatprep.subr.bf16.mxu0 %v1562_v3 }
  0x37   : > { %1188 = vmatmul.mubr.f32.gmra.mrb[8].mxu0 %v1816_v24  ;;  %1487 = vmatprep.subr.bf16.mxu1 %v1562_v3 }
  0x38   : > { %1253 = vmatmul.mubr.f32.gmra.mrb[8].mxu1 %v158_v25  ;;  %1190 = vmatprep.mubr.msk.f32.mxu0 %vm1563_vm0, %v1564_v11 }
  0x39   : > { %1255 = vmatprep.mubr.msk.f32.mxu1 %vm1563_vm0, %v1564_v11  ;;  %1465 = vmatpush3.bf16.msra.mxu0 %v1464_v26 }
  0x3a   : > { %1489 = vmatpush3.bf16.msra.mxu1 %v1488_v27  ;;  %1466 = vmatprep.subr.bf16.mxu0 %v1562_v3 }
  0x3b   : > { %1191 = vmatmul.mubr.f32.gmra.mrb[10].mxu0 %v1839_v32  ;;  %1490 = vmatprep.subr.bf16.mxu1 %v1562_v3 }
  0x3c   : > { %1256 = vmatmul.mubr.f32.gmra.mrb[10].mxu1 %v159_v33  ;;  %1193 = vmatprep.mubr.msk.f32.mxu0 %vm1563_vm0, %v1564_v11 }
  0x3d   : > { %1258 = vmatprep.mubr.msk.f32.mxu1 %vm1563_vm0, %v1564_v11  ;;  %1468 = vmatpush3.bf16.msra.mxu0 %v1467_v34 }
  0x3e   : > { %1492 = vmatpush3.bf16.msra.mxu1 %v1491_v35  ;;  %1469 = vmatprep.subr.bf16.mxu0 %v1562_v3 }
  0x3f   : > { %1194 = vmatmul.mubr.f32.gmra.mrb[12].mxu0 %v1862_v40  ;;  %1493 = vmatprep.subr.bf16.mxu1 %v1562_v3 }
  0x40   : > { %1259 = vmatmul.mubr.f32.gmra.mrb[12].mxu1 %v160_v41  ;;  %1196 = vmatprep.mubr.msk.f32.mxu0 %vm1563_vm0, %v1564_v11 }
  0x41   : > { %1261 = vmatprep.mubr.msk.f32.mxu1 %vm1563_vm0, %v1564_v11  ;;  %1471 = vmatpush3.bf16.msra.mxu0 %v1470_v42 }
  0x42   : > { %1495 = vmatpush3.bf16.msra.mxu1 %v1494_v43  ;;  %1472 = vmatprep.subr.bf16.mxu0 %v1562_v3 }
  0x43   : > { %1197 = vmatmul.mubr.f32.gmra.mrb[14].mxu0 %v1885_v48  ;;  %1496 = vmatprep.subr.bf16.mxu1 %v1562_v3  ;;  %v949_v3 = vld [vmem:[%s1713_s4 + $0x49] sm:$0xff] }
  0x44   : > { %1262 = vmatmul.mubr.f32.gmra.mrb[14].mxu1 %v161_v49  ;;  %1199 = vmatprep.mubr.msk.f32.mxu0 %vm1563_vm0, %v1564_v11 }
  0x45   : > { %1264 = vmatprep.mubr.msk.f32.mxu1 %vm1563_vm0, %v1564_v11  ;;  %1474 = vmatpush3.bf16.msra.mxu0 %v1473_v50 }
  0x46   : > { %1498 = vmatpush3.bf16.msra.mxu1 %v1497_v51 }
  0x47   : > { %1200 = vmatmul.mubr.f32.gmra.mrb[16].mxu0 %v948_v52 }
  0x48   : > { %1265 = vmatmul.mubr.f32.gmra.mrb[16].mxu1 %v162_v53  ;;  %1202 = vmatprep.mubr.msk.f32.mxu0 %vm1563_vm0, %v1564_v11 }
  0x49   : > { %1267 = vmatprep.mubr.msk.f32.mxu1 %vm1563_vm0, %v1564_v11 }
  0x4b   : > { %1203 = vmatmul.mubr.f32.gmra.mrb[18].mxu0 %v949_v3 }
  0x4c   : > { %1268 = vmatmul.mubr.f32.gmra.mrb[18].mxu1 %v163_v54  ;;  %1205 = vmatprep.mubr.msk.f32.mxu0 %vm1563_vm0, %v1564_v11 }
  0x4d   : > { %1270 = vmatprep.mubr.msk.f32.mxu1 %vm1563_vm0, %v1564_v11 }
  0x4f   : > { %1206 = vmatmul.mubr.f32.gmra.mrb[20].mxu0 %v950_v55 }
  0x50   : > { %1271 = vmatmul.mubr.f32.gmra.mrb[20].mxu1 %v164_v56  ;;  %1305 = vmatprep.mubr.msk.f32.mxu0 %vm1563_vm0, %v1564_v11 }
  0x51   : > { %1370 = vmatprep.mubr.msk.f32.mxu1 %vm1563_vm0, %v1564_v11 }
  0x53   : > { %1306 = vmatmul.mubr.f32.vlgmr.msra.gmra.mrb[22].mxu0 %v1745_v62  ;;  %v999_v62 = vld [vmem:[%s1713_s4 + $0x32] sm:$0xff] }
  0x54   : > { %1371 = vmatmul.mubr.f32.vlgmr.msra.gmra.mrb[22].mxu1 %v994_v57  ;;  %1308 = vmatprep.mubr.msk.f32.mxu0 %vm1563_vm0, %v1564_v11 }
  0x55   : > { %1373 = vmatprep.mubr.msk.f32.mxu1 %vm1563_vm0, %v1564_v11 }
  0x57   : > { %1309 = vmatmul.mubr.f32.gmra.mrb[24].mxu0 %v1770_v7 }
  0x58   : > { %1374 = vmatmul.mubr.f32.gmra.mrb[24].mxu1 %v995_v58  ;;  %1311 = vmatprep.mubr.msk.f32.mxu0 %vm1563_vm0, %v1564_v11 }
  0x59   : > { %1376 = vmatprep.mubr.msk.f32.mxu1 %vm1563_vm0, %v1564_v11 }
  0x5b   : > { %1312 = vmatmul.mubr.f32.gmra.mrb[26].mxu0 %v1793_v16 }
  0x5c   : > { %1377 = vmatmul.mubr.f32.gmra.mrb[26].mxu1 %v996_v59  ;;  %1314 = vmatprep.mubr.msk.f32.mxu0 %vm1563_vm0, %v1564_v11 }
  0x5d   : > { %1379 = vmatprep.mubr.msk.f32.mxu1 %vm1563_vm0, %v1564_v11 }
  0x5f   : > { %1315 = vmatmul.mubr.f32.gmra.mrb[28].mxu0 %v1816_v24 }
  0x60   : > { %1380 = vmatmul.mubr.f32.gmra.mrb[28].mxu1 %v997_v60  ;;  %1317 = vmatprep.mubr.msk.f32.mxu0 %vm1563_vm0, %v1564_v11 }
  0x61   : > { %1382 = vmatprep.mubr.msk.f32.mxu1 %vm1563_vm0, %v1564_v11 }
  0x63   : > { %1318 = vmatmul.mubr.f32.gmra.mrb[30].mxu0 %v1839_v32 }
  0x64   : > { %1383 = vmatmul.mubr.f32.gmra.mrb[30].mxu1 %v998_v61  ;;  %1320 = vmatprep.mubr.msk.f32.mxu0 %vm1563_vm0, %v1564_v11 }
  0x65   : > { %1385 = vmatprep.mubr.msk.f32.mxu1 %vm1563_vm0, %v1564_v11 }
  0x67   : > { %1321 = vmatmul.mubr.f32.gmra.mrb[32].mxu0 %v1862_v40 }
  0x68   : > { %1386 = vmatmul.mubr.f32.gmra.mrb[32].mxu1 %v999_v62  ;;  %1323 = vmatprep.mubr.msk.f32.mxu0 %vm1563_vm0, %v1564_v11 }
  0x69   : > { %1388 = vmatprep.mubr.msk.f32.mxu1 %vm1563_vm0, %v1564_v11 }
  0x6b   : > { %1324 = vmatmul.mubr.f32.gmra.mrb[34].mxu0 %v1885_v48 }
  0x6c   : > { %1389 = vmatmul.mubr.f32.gmra.mrb[34].mxu1 %v1000_v63  ;;  %1326 = vmatprep.mubr.msk.f32.mxu0 %vm1563_vm0, %v1564_v11 }
  0x6d   : > { %1391 = vmatprep.mubr.msk.f32.mxu1 %vm1563_vm0, %v1564_v11 }
  0x6f   : > { %1327 = vmatmul.mubr.f32.gmra.mrb[36].mxu0 %v948_v52 }
  0x70   : > { %1392 = vmatmul.mubr.f32.gmra.mrb[36].mxu1 %v1001_v0  ;;  %1329 = vmatprep.mubr.msk.f32.mxu0 %vm1563_vm0, %v1564_v11  ;;  %v1993_v0 = vld [vmem:[%s2080_s2] ss:$0 sm:$0xff] }
  0x71   : > { %1394 = vmatprep.mubr.msk.f32.mxu1 %vm1563_vm0, %v1564_v11 }
  0x73   : > { %1330 = vmatmul.mubr.f32.gmra.mrb[38].mxu0 %v949_v3 }
  0x74   : > { %1395 = vmatmul.mubr.f32.gmra.mrb[38].mxu1 %v1002_v1  ;;  %1332 = vmatprep.mubr.msk.f32.mxu0 %vm1563_vm0, %v1564_v11 }
  0x75   : > { %1397 = vmatprep.mubr.msk.f32.mxu1 %vm1563_vm0, %v1564_v11 }
  0x77   : > { %1333 = vmatmul.mubr.f32.gmra.mrb[40].mxu0 %v950_v55 }
  0x78   : > { %1398 = vmatmul.mubr.f32.gmra.mrb[40].mxu1 %v1003_v2  ;;  %1335 = vmatprep.mubr.msk.f32.mxu0 %vm1563_vm0, %v1564_v11 }
  0x79   : > { %1400 = vmatprep.mubr.msk.f32.mxu1 %vm1563_vm0, %v1564_v11 }
  0x7b   : > { %1336 = vmatmul.mubr.f32.gmra.mrb[42].mxu0 %v977_v4 }
  0x7c   : > { %1401 = vmatmul.mubr.f32.gmra.mrb[42].mxu1 %v1004_v5 }
  0xfa   : > { %v277_v6 = vpop.f32.mrb[0].mxu0 }
  0xfb   : > { %v1177_v7 = vpop.f32.mrb[1].mxu0  ;;  %v397_v8 = vpop.f32.mrb[0].mxu1 }
  0xfc   : > { %v398_v9 = vadd.f32 %v397_v8, %v277_v6  ;;  %v1242_v10 = vpop.f32.mrb[1].mxu1 }
  0xfe   : > { %v282_v12 = vpop.f32.mrb[2].mxu0 }
  0xff   : > { %v1180_v13 = vpop.f32.mrb[3].mxu0  ;;  %v402_v14 = vpop.f32.mrb[2].mxu1 }
 0x100   : > { %v403_v15 = vadd.f32 %v402_v14, %v282_v12  ;;  %v1245_v16 = vpop.f32.mrb[3].mxu1 }
 0x102   : > { %v287_v17 = vpop.f32.mrb[4].mxu0 }
 0x103   : > { %v1183_v18 = vpop.f32.mrb[5].mxu0  ;;  %v407_v19 = vpop.f32.mrb[4].mxu1 }
 0x104   : > { %v408_v20 = vadd.f32 %v407_v19, %v287_v17  ;;  %v1248_v21 = vpop.f32.mrb[5].mxu1 }
 0x106   : > { %v292_v22 = vpop.f32.mrb[6].mxu0 }
 0x107   : > { %v1186_v11 = vpop.f32.mrb[7].mxu0  ;;  %v412_v23 = vpop.f32.mrb[6].mxu1 }
 0x108   : > { %v1974_v24 = vadd.f32 %v412_v23, %v292_v22  ;;  %v1251_v25 = vpop.f32.mrb[7].mxu1 }
 0x10a   : > { %v297_v26 = vpop.f32.mrb[8].mxu0 }
 0x10b   : > { %v1189_v27 = vpop.f32.mrb[9].mxu0  ;;  %v417_v28 = vpop.f32.mrb[8].mxu1 }
 0x10c   : > { %v1976_v29 = vadd.f32 %v417_v28, %v297_v26  ;;  %v1254_v30 = vpop.f32.mrb[9].mxu1 }
 0x10e   : > { %v302_v31 = vpop.f32.mrb[10].mxu0 }
 0x10f   : > { %v1192_v32 = vpop.f32.mrb[11].mxu0  ;;  %v422_v33 = vpop.f32.mrb[10].mxu1 }
 0x110   : > { %v1978_v34 = vadd.f32 %v422_v33, %v302_v31  ;;  %v1257_v35 = vpop.f32.mrb[11].mxu1 }
 0x112   : > { %v307_v36 = vpop.f32.mrb[12].mxu0 }
 0x113   : > { %v1195_v37 = vpop.f32.mrb[13].mxu0  ;;  %v427_v38 = vpop.f32.mrb[12].mxu1 }
 0x114   : > { %v1980_v39 = vadd.f32 %v427_v38, %v307_v36  ;;  %v1260_v40 = vpop.f32.mrb[13].mxu1 }
 0x116   : > { %v312_v41 = vpop.f32.mrb[14].mxu0 }
 0x117   : > { %v1198_v42 = vpop.f32.mrb[15].mxu0  ;;  %v432_v43 = vpop.f32.mrb[14].mxu1 }
 0x118   : > { %v1982_v44 = vadd.f32 %v432_v43, %v312_v41  ;;  %v1263_v45 = vpop.f32.mrb[15].mxu1 }
 0x11a   : > { %v317_v46 = vpop.f32.mrb[16].mxu0 }
 0x11b   : > { %v1201_v47 = vpop.f32.mrb[17].mxu0  ;;  %v437_v48 = vpop.f32.mrb[16].mxu1 }
 0x11c   : > { %v1984_v49 = vadd.f32 %v437_v48, %v317_v46  ;;  %v1266_v50 = vpop.f32.mrb[17].mxu1 }
 0x11e   : > { %v322_v51 = vpop.f32.mrb[18].mxu0 }
 0x11f   : > { %v1204_v52 = vpop.f32.mrb[19].mxu0  ;;  %v442_v53 = vpop.f32.mrb[18].mxu1 }
 0x120   : > { %v1986_v3 = vadd.f32 %v442_v53, %v322_v51  ;;  %v1269_v54 = vpop.f32.mrb[19].mxu1 }
 0x122   : > { %v327_v55 = vpop.f32.mrb[20].mxu0 }
 0x123   : > { %v1207_v56 = vpop.f32.mrb[21].mxu0  ;;  %v447_v57 = vpop.f32.mrb[20].mxu1 }
 0x124   : > { %v1988_v58 = vadd.f32 %v447_v57, %v327_v55  ;;  %v1272_v59 = vpop.f32.mrb[21].mxu1 }
 0x126   : > { %v547_v60 = vpop.f32.mrb[22].mxu0 }
 0x127   : > { %v601_v61 = vadd.f32 %v547_v60, %v398_v9  ;;  %v1307_v62 = vpop.f32.mrb[23].mxu0  ;;  %v708_v63 = vpop.f32.mrb[22].mxu1 }
 0x128   : > { %v1372_v1 = vpop.f32.mrb[23].mxu1 }
 0x129   : > { %v762_v2 = vadd.f32 %v708_v63, %v601_v61 }
 0x12a   : > { %v552_v4 = vpop.f32.mrb[24].mxu0 }
 0x12b   : > { %v1996_v5 = vadd.f32 %v1993_v0, %v762_v2  ;;  %v602_v6 = vadd.f32 %v552_v4, %v403_v15  ;;  %v1310_v7 = vpop.f32.mrb[25].mxu0  ;;  %v713_v8 = vpop.f32.mrb[24].mxu1 }
 0x12c   : > { %v1375_v10 = vpop.f32.mrb[25].mxu1 }
 0x12d   : > { %v1022_v12 = vmul.f32 -1.442695, %v1996_v5  ;;  %v763_v9 = vadd.f32 %v713_v8, %v602_v6 }
 0x12e   : > { %v557_v13 = vpop.f32.mrb[26].mxu0 }
 0x12f   : > { %1510 = vpow2.f32 %v1022_v12  ;;  %v2000_v14 = vadd.f32 %v1993_v0, %v763_v9  ;;  %v603_v16 = vadd.f32 %v557_v13, %v408_v20  ;;  %v1313_v17 = vpop.f32.mrb[27].mxu0  ;;  %v718_v18 = vpop.f32.mrb[26].mxu1 }
 0x130   : > { %v1378_v19 = vpop.f32.mrb[27].mxu1 }
 0x131   : > { %v1023_v21 = vmul.f32 -1.442695, %v2000_v14  ;;  %v764_v22 = vadd.f32 %v718_v18, %v603_v16 }
 0x132   : > { %v562_v15 = vpop.f32.mrb[28].mxu0 }
 0x133   : > { %1512 = vpow2.f32 %v1023_v21  ;;  %v2004_v11 = vadd.f32 %v1993_v0, %v764_v22  ;;  %v604_v23 = vadd.f32 %v562_v15, %v1974_v24  ;;  %v1316_v25 = vpop.f32.mrb[29].mxu0  ;;  %v723_v26 = vpop.f32.mrb[28].mxu1 }
 0x134   : > { %v1381_v27 = vpop.f32.mrb[29].mxu1 }
 0x135   : > { %v1024_v28 = vmul.f32 -1.442695, %v2004_v11  ;;  %v765_v20 = vadd.f32 %v723_v26, %v604_v23 }
 0x136   : > { %v567_v30 = vpop.f32.mrb[30].mxu0 }
 0x137   : > { %1514 = vpow2.f32 %v1024_v28  ;;  %v2011_v31 = vadd.f32 %v1993_v0, %v765_v20  ;;  %v605_v32 = vadd.f32 %v567_v30, %v1976_v29  ;;  %v1319_v33 = vpop.f32.mrb[31].mxu0  ;;  %v728_v35 = vpop.f32.mrb[30].mxu1 }
 0x138   : > { %v1384_v36 = vpop.f32.mrb[31].mxu1 }
 0x139   : > { %v1511_v37 = vpop.eup %1510  ;;  %v1025_v24 = vmul.f32 -1.442695, %v2011_v31  ;;  %v766_v38 = vadd.f32 %v728_v35, %v605_v32 }
 0x13a   : > { %v824_v40 = vadd.f32 1.0, %v1511_v37  ;;  %v572_v41 = vpop.f32.mrb[32].mxu0 }
 0x13b   : > { %1516 = vpow2.f32 %v1025_v24  ;;  %v2016_v42 = vadd.f32 %v1993_v0, %v766_v38  ;;  %v606_v43 = vadd.f32 %v572_v41, %v1978_v34  ;;  %v1322_v45 = vpop.f32.mrb[33].mxu0  ;;  %v733_v46 = vpop.f32.mrb[32].mxu1 }
 0x13c   : > { %1518 = vrcp.f32 %v824_v40  ;;  %v1387_v29 = vpop.f32.mrb[33].mxu1 }
 0x13d   : > { %v1513_v47 = vpop.eup %1512  ;;  %v1026_v48 = vmul.f32 -1.442695, %v2016_v42  ;;  %v767_v50 = vadd.f32 %v733_v46, %v606_v43 }
 0x13e   : > { %v825_v51 = vadd.f32 1.0, %v1513_v47  ;;  %v577_v52 = vpop.f32.mrb[34].mxu0 }
 0x13f   : > { %1520 = vpow2.f32 %v1026_v48  ;;  %v2021_v53 = vadd.f32 %v1993_v0, %v767_v50  ;;  %v607_v54 = vadd.f32 %v577_v52, %v1980_v39  ;;  %v1325_v55 = vpop.f32.mrb[35].mxu0  ;;  %v738_v56 = vpop.f32.mrb[34].mxu1 }
 0x140   : > { %1522 = vrcp.f32 %v825_v51  ;;  %v1390_v34 = vpop.f32.mrb[35].mxu1 }
 0x141   : > { %v1515_v57 = vpop.eup %1514  ;;  %v1027_v59 = vmul.f32 -1.442695, %v2021_v53  ;;  %v768_v60 = vadd.f32 %v738_v56, %v607_v54 }
 0x142   : > { %v826_v61 = vadd.f32 1.0, %v1515_v57  ;;  %v582_v62 = vpop.f32.mrb[36].mxu0 }
 0x143   : > { %1524 = vpow2.f32 %v1027_v59  ;;  %v2026_v63 = vadd.f32 %v1993_v0, %v768_v60  ;;  %v608_v1 = vadd.f32 %v582_v62, %v1982_v44  ;;  %v1328_v2 = vpop.f32.mrb[37].mxu0  ;;  %v743_v4 = vpop.f32.mrb[36].mxu1 }
 0x144   : > { %1526 = vrcp.f32 %v826_v61  ;;  %v1393_v39 = vpop.f32.mrb[37].mxu1 }
 0x145   : > { %v1517_v6 = vpop.eup %1516  ;;  %v1028_v7 = vmul.f32 -1.442695, %v2026_v63  ;;  %v769_v8 = vadd.f32 %v743_v4, %v608_v1 }
 0x146   : > { %v1519_v10 = vpop.eup %1518  ;;  %v827_v12 = vadd.f32 1.0, %v1517_v6  ;;  %v587_v9 = vpop.f32.mrb[38].mxu0 }
 0x147   : > { %v857_v44 = vmul.f32 %v1519_v10, %v1996_v5  ;;  %1528 = vpow2.f32 %v1028_v7  ;;  %v2037_v13 = vadd.f32 %v1993_v0, %v769_v8  ;;  %v609_v16 = vadd.f32 %v587_v9, %v1984_v49  ;;  %v1331_v17 = vpop.f32.mrb[39].mxu0  ;;  %v748_v18 = vpop.f32.mrb[38].mxu1 }
 0x148   : > { %1530 = vrcp.f32 %v827_v12  ;;  %v1396_v19 = vpop.f32.mrb[39].mxu1 }
 0x149   : > { %v1521_v21 = vpop.eup %1520  ;;  %869 = vst.msk [vmem:[%s2033_s27] sm:$0xff] %vm868_vm1, %v857_v44  ;;  %v1029_v22 = vmul.f32 -1.442695, %v2037_v13  ;;  %v770_v15 = vadd.f32 %v748_v18, %v609_v16 }
 0x14a   : > { %v1523_v23 = vpop.eup %1522  ;;  %v828_v25 = vadd.f32 1.0, %v1521_v21  ;;  %v592_v5 = vpop.f32.mrb[40].mxu0 }
 0x14b   : > { %v858_v26 = vmul.f32 %v1523_v23, %v2000_v14  ;;  %1532 = vpow2.f32 %v1029_v22  ;;  %v788_v27 = vadd.f32 %v1993_v0, %v770_v15  ;;  %v610_v49 = vadd.f32 %v592_v5, %v1986_v3  ;;  %v1334_v28 = vpop.f32.mrb[41].mxu0  ;;  %v753_v20 = vpop.f32.mrb[40].mxu1 }
 0x14c   : > { %1534 = vrcp.f32 %v828_v25  ;;  %v1399_v30 = vpop.f32.mrb[41].mxu1 }
 0x14d   : > { %v1525_v32 = vpop.eup %1524  ;;  %870 = vst.msk [vmem:[%s2033_s27 + $0x8] sm:$0xff] %vm868_vm1, %v858_v26  ;;  %v1030_v33 = vmul.f32 -1.442695, %v788_v27  ;;  %v771_v35 = vadd.f32 %v753_v20, %v610_v49 }
 0x14e   : > { %v1527_v36 = vpop.eup %1526  ;;  %v829_v37 = vadd.f32 1.0, %v1525_v32  ;;  %v597_v24 = vpop.f32.mrb[42].mxu0 }
 0x14f   : > { %v859_v14 = vmul.f32 %v1527_v36, %v2004_v11  ;;  %1536 = vpow2.f32 %v1030_v33  ;;  %v789_v38 = vadd.f32 %v1993_v0, %v771_v35  ;;  %v611_v3 = vadd.f32 %v597_v24, %v1988_v58  ;;  %v1337_v40 = vpop.f32.mrb[43].mxu0  ;;  %v758_v41 = vpop.f32.mrb[42].mxu1 }
 0x150   : > { %1538 = vrcp.f32 %v829_v37  ;;  %v1402_v43 = vpop.f32.mrb[43].mxu1 }
 0x151   : > { %v1529_v45 = vpop.eup %1528  ;;  %871 = vst.msk [vmem:[%s2033_s27 + $0x10] sm:$0xff] %vm868_vm1, %v859_v14  ;;  %v1031_v46 = vmul.f32 -1.442695, %v789_v38  ;;  %v772_v29 = vadd.f32 %v758_v41, %v611_v3 }
 0x152   : > { %v1531_v47 = vpop.eup %1530  ;;  %v830_v48 = vadd.f32 1.0, %v1529_v45 }
 0x153   : > { %v860_v11 = vmul.f32 %v1531_v47, %v2011_v31  ;;  %1540 = vpow2.f32 %v1031_v46  ;;  %v790_v50 = vadd.f32 %v1993_v0, %v772_v29 }
 0x154   : > { %1542 = vrcp.f32 %v830_v48 }
 0x155   : > { %v1533_v58 = vpop.eup %1532  ;;  %872 = vst.msk [vmem:[%s2033_s27 + $0x18] sm:$0xff] %vm868_vm1, %v860_v11  ;;  %v1032_v51 = vmul.f32 -1.442695, %v790_v50 }
 0x156   : > { %v1535_v52 = vpop.eup %1534  ;;  %v831_v54 = vadd.f32 1.0, %v1533_v58 }
 0x157   : > { %v861_v55 = vmul.f32 %v1535_v52, %v2016_v42  ;;  %1544 = vpow2.f32 %v1032_v51 }
 0x158   : > { %1546 = vrcp.f32 %v831_v54 }
 0x159   : > { %v1537_v56 = vpop.eup %1536  ;;  %873 = vst.msk [vmem:[%s2033_s27 + $0x20] sm:$0xff] %vm868_vm1, %v861_v55 }
 0x15a   : > { %v1539_v31 = vpop.eup %1538  ;;  %v832_v34 = vadd.f32 1.0, %v1537_v56 }
 0x15b   : > { %v862_v0 = vmul.f32 %v1539_v31, %v2021_v53 }
 0x15c   : > { %1548 = vrcp.f32 %v832_v34 }
 0x15d   : > { %v1541_v57 = vpop.eup %1540  ;;  %874 = vst.msk [vmem:[%s2033_s27 + $0x28] sm:$0xff] %vm868_vm1, %v862_v0 }
 0x15e   : > { %v1543_v59 = vpop.eup %1542  ;;  %v833_v60 = vadd.f32 1.0, %v1541_v57 }
 0x15f   : > { %v863_v42 = vmul.f32 %v1543_v59, %v2026_v63 }
 0x160   : > { %1550 = vrcp.f32 %v833_v60 }
 0x161   : > { %v1545_v61 = vpop.eup %1544  ;;  %875 = vst.msk [vmem:[%s2033_s27 + $0x30] sm:$0xff] %vm868_vm1, %v863_v42 }
 0x162   : > { %v1547_v62 = vpop.eup %1546  ;;  %v834_v1 = vadd.f32 1.0, %v1545_v61 }
 0x163   : > { %v864_v2 = vmul.f32 %v1547_v62, %v2037_v13 }
 0x164   : > { %1552 = vrcp.f32 %v834_v1 }
 0x165   : > { %876 = vst.msk [vmem:[%s2033_s27 + $0x38] sm:$0xff] %vm868_vm1, %v864_v2 }
 0x166   : > { %v1549_v53 = vpop.eup %1548 }
 0x167   : > { %v865_v4 = vmul.f32 %v1549_v53, %v788_v27 }
 0x169   : > { %877 = vst.msk [vmem:[%s2033_s27 + $0x40] sm:$0xff] %vm868_vm1, %v865_v4 }
 0x16a   : > { %v1551_v39 = vpop.eup %1550 }
 0x16b   : > { %v866_v6 = vmul.f32 %v1551_v39, %v789_v38 }
 0x16d   : > { %878 = vst.msk [vmem:[%s2033_s27 + $0x48] sm:$0xff] %vm868_vm1, %v866_v6 }
 0x16e   : > { %v1553_v63 = vpop.eup %1552 }
 0x16f   : > { %v867_v7 = vmul.f32 %v1553_v63, %v790_v50 }
 0x171   : > { %879 = vst.msk [vmem:[%s2033_s27 + $0x50] sm:$0xff] %vm868_vm1, %v867_v7 }
 0x172 PF: > { %s13_s12 = sadd.s32 1, %s1560_s12  }
 0x173   : > { %p10_p4 = scmp.ge.s32.totalorder %s13_s12, 4  }
 0x175   :  { %12 = sbr.rel (!%p10_p4) target bundleno = 1 (0x1), region = 66 }

// kernel: vae_forward.7
= control target key start
LH: loop header
LB: loop body
LE: loop exit
PB: predicated region body
PF: predicated region fallthrough
CT: control target
= control target key end

     0   :  { %s5763_s12 = smov 0   ;;  %s6864_s0 = inlined_call_operand.vmem [shape: f32[806,3], index: 0, kind: input, shape index: {}]   ;;  %s6865_s1 = inlined_call_operand.vmem [shape: f32[9,3,32], index: 1, kind: input, shape index: {}]   ;;  %s6866_s2 = inlined_call_operand.vmem [shape: f32[1,32], index: 2, kind: input, shape index: {}]   ;;  %s6867_s3 = inlined_call_operand.vmem [shape: f32[768,32], index: 3, kind: output, shape index: {}]  }
   0x1 LB: > { %s3983_s13 = sadd.s32 4294967295, %s5741_s12   ;;  %p3986_p0 = scmp.ge.s32.totalorder %s5741_s12, 1  ;;  %s5741_s12 = sphi %s5763_s12, %s13_s12  }
   0x2   : > { %p127_p1 = scmp.lt.s32.totalorder %s5741_s12, 4 }
   0x4   : > { %p128_p2 = pnand %p3986_p0, %p127_p1 }
   0x5   : > { %v4023_v0 = vld [vmem:[%s6865_s1 + $0x4] sm:$0x7] (!%p128_p2)  ;;  %vm320_vm0 = vcmask (!%p128_p2), 1042432   ;;  %v5777_v1 = vld [vmem:[%s6865_s1 + $0x10] sm:$0x7] (!%p128_p2)  ;;  %s3989_s18 = sshll.u32 (!%p128_p2), %s3983_s13, 8 }
   0x6   : > { %131 = sbr.rel (%p128_p2) target bundleno = 545 (0x221), region = 32  ;;  %4891 = vmatprep.subr.msk.mxu1 (!%p128_p2), %vm320_vm0, %v4023_v0  ;;  %5091 = vmatprep.subr.msk.mxu0 (!%p128_p2), %vm320_vm0, %v5777_v1  ;;  %s5787_s21 = scalar_lea.vmem (!%p128_p2), %s6864_s0, %s3989_s18  ;;  %vm223_vm1 = vcmask (!%p128_p2), 23552   ;;  %v186_v2 = vld [vmem:[%s6865_s1] sm:$0x7] (!%p128_p2)  ;;  %v4324_v3 = vld [vmem:[%s6865_s1 + $0x14] sm:$0x7] (!%p128_p2) }
   0x7   : > { %4892 = vmatpush3.msk.msra.mxu1 (!%p128_p2), %vm320_vm0, %v4023_v0  ;;  %5092 = vmatpush3.msk.msra.mxu0 (!%p128_p2), %vm320_vm0, %v5777_v1  ;;  %v3991_v4 = vld [vmem:[%s5787_s21 + $0x1] sm:$0xff] (!%p128_p2)  ;;  %v4225_v5 = vld [vmem:[%s5787_s21 + $0x13] sm:$0xff] (!%p128_p2)  ;;  %v3992_v6 = vld [vmem:[%s5787_s21 + $0x9] sm:$0xff] (!%p128_p2)  ;;  %s3987_s11 = sshll.u32 (!%p128_p2), %s3983_s13, 5  ;;  %vm3880_vm2 = vcmask (!%p128_p2), 261120  }
   0x8   : > { %4893 = vmatprep.mubr.msk.f32.mxu1 (!%p128_p2), %vm223_vm1, %v3991_v4  ;;  %4941 = vmatprep.subr.msk.mxu1 (!%p128_p2), %vm320_vm0, %v186_v2  ;;  %v4226_v7 = vld [vmem:[%s5787_s21 + $0x1b] sm:$0xff] (!%p128_p2)  ;;  %v3993_v8 = vld [vmem:[%s5787_s21 + $0x11] sm:$0xff] (!%p128_p2)  ;;  %v4227_v9 = vld [vmem:[%s5787_s21 + $0x23] sm:$0xff] (!%p128_p2)  ;;  %p147_p3 = scmp.lt.s32.totalorder (!%p128_p2), %s3987_s11, 95 }
   0x9   : > { %5093 = vmatprep.mubr.msk.f32.mxu0 (!%p128_p2), %vm223_vm1, %v4225_v5  ;;  %5141 = vmatprep.subr.msk.mxu0 (!%p128_p2), %vm320_vm0, %v4324_v3  ;;  %v3994_v10 = vld [vmem:[%s5787_s21 + $0x19] sm:$0xff] (!%p128_p2)  ;;  %v4228_v11 = vld [vmem:[%s5787_s21 + $0x2b] sm:$0xff] (!%p128_p2)  ;;  %v3995_v12 = vld [vmem:[%s5787_s21 + $0x21] sm:$0xff] (!%p128_p2) }
   0xa   : > { %4894 = vmatmul.mubr.msk.f32.vlgmr.msra.gmra.mrb[0].mxu1 (!%p128_p2), %vm223_vm1, %v3992_v6  ;;  %5094 = vmatmul.mubr.msk.f32.vlgmr.msra.gmra.mrb[0].mxu0 (!%p128_p2), %vm223_vm1, %v4226_v7  ;;  %v4229_v13 = vld [vmem:[%s5787_s21 + $0x33] sm:$0xff] (!%p128_p2)  ;;  %v3996_v14 = vld [vmem:[%s5787_s21 + $0x29] sm:$0xff] (!%p128_p2)  ;;  %v4230_v15 = vld [vmem:[%s5787_s21 + $0x3b] sm:$0xff] (!%p128_p2) }
   0xb   : > { %4942 = vmatpush3.msk.msra.mxu1 (!%p128_p2), %vm320_vm0, %v186_v2  ;;  %5142 = vmatpush3.msk.msra.mxu0 (!%p128_p2), %vm320_vm0, %v4324_v3  ;;  %v3997_v16 = vld [vmem:[%s5787_s21 + $0x31] sm:$0xff] (!%p128_p2)  ;;  %v4231_v17 = vld [vmem:[%s5787_s21 + $0x43] sm:$0xff] (!%p128_p2)  ;;  %v3998_v19 = vld [vmem:[%s5787_s21 + $0x39] sm:$0xff] (!%p128_p2) }
   0xc   : > { %4896 = vmatprep.mubr.msk.f32.mxu1 (!%p128_p2), %vm223_vm1, %v3993_v8  ;;  %5096 = vmatprep.mubr.msk.f32.mxu0 (!%p128_p2), %vm223_vm1, %v4227_v9  ;;  %v4391_v18 = vld [vmem:[%s6865_s1 + $0x18] sm:$0x7] (!%p128_p2)  ;;  %v4232_v20 = vld [vmem:[%s5787_s21 + $0x4b] sm:$0xff] (!%p128_p2)  ;;  %v3999_v21 = vld [vmem:[%s5787_s21 + $0x41] sm:$0xff] (!%p128_p2) }
   0xd   : > { %v4233_v22 = vld [vmem:[%s5787_s21 + $0x53] sm:$0xff]  ;;  %5191 = vmatprep.subr.msk.mxu0 %vm320_vm0, %v4391_v18  ;;  %v4000_v23 = vld [vmem:[%s5787_s21 + $0x49] sm:$0xff]  ;;  %v4234_v24 = vld [vmem:[%s5787_s21 + $0x5b] sm:$0xff]  ;;  %s6869_s11 = smov (!%p147_p3, %s3987_s11), 95 }
   0xe   : > { %4897 = vmatmul.mubr.msk.f32.gmra.mrb[2].mxu1 %vm223_vm1, %v3994_v10  ;;  %5097 = vmatmul.mubr.msk.f32.gmra.mrb[2].mxu0 %vm223_vm1, %v4228_v11  ;;  %v4001_v25 = vld [vmem:[%s5787_s21 + $0x51] sm:$0xff]  ;;  %v4235_v26 = vld [vmem:[%s5787_s21 + $0x63] sm:$0xff]  ;;  %v4002_v27 = vld [vmem:[%s5787_s21 + $0x59] sm:$0xff]  ;;  %s3988_s13 = sshll.u32 %s6869_s11, 3 }
   0xf   : > { %4899 = vmatprep.mubr.msk.f32.mxu1 %vm223_vm1, %v3995_v12  ;;  %5099 = vmatprep.mubr.msk.f32.mxu0 %vm223_vm1, %v4229_v13  ;;  %v4236_v28 = vld [vmem:[%s5787_s21 + $0x6b] sm:$0xff]  ;;  %v4003_v29 = vld [vmem:[%s5787_s21 + $0x61] sm:$0xff]  ;;  %v4237_v30 = vld [vmem:[%s5787_s21 + $0x73] sm:$0xff]  ;;  %s6689_s16 = scalar_lea.vmem %s6867_s3, %s3988_s13 }
  0x10   : > { %v5857_v31 = vld [vmem:[%s6865_s1 + $0x8] sm:$0x7]  ;;  %v4238_v33 = vld [vmem:[%s5787_s21 + $0x7b] sm:$0xff]  ;;  %v4005_v34 = vld [vmem:[%s5787_s21 + $0x71] sm:$0xff] }
  0x11   : > { %v4004_v32 = vld [vmem:[%s5787_s21 + $0x69] sm:$0xff]  ;;  %4991 = vmatprep.subr.msk.mxu1 %vm320_vm0, %v5857_v31  ;;  %v4006_v36 = vld [vmem:[%s5787_s21 + $0x79] sm:$0xff]  ;;  %v4007_v38 = vld [vmem:[%s5787_s21 + $0x81] sm:$0xff] }
  0x12   : > { %4900 = vmatmul.mubr.msk.f32.gmra.mrb[4].mxu1 %vm223_vm1, %v3996_v14  ;;  %5100 = vmatmul.mubr.msk.f32.gmra.mrb[4].mxu0 %vm223_vm1, %v4230_v15  ;;  %v4239_v35 = vld [vmem:[%s5787_s21 + $0x83] sm:$0xff]  ;;  %v4240_v37 = vld [vmem:[%s5787_s21 + $0x8b] sm:$0xff]  ;;  %v4292_v39 = vld [vmem:[%s5787_s21 + $0x14] sm:$0xff] }
  0x13   : > { %4902 = vmatprep.mubr.msk.f32.mxu1 %vm223_vm1, %v3997_v16  ;;  %5102 = vmatprep.mubr.msk.f32.mxu0 %vm223_vm1, %v4231_v17  ;;  %v4008_v40 = vld [vmem:[%s5787_s21 + $0x89] sm:$0xff]  ;;  %v4293_v41 = vld [vmem:[%s5787_s21 + $0x1c] sm:$0xff]  ;;  %v4009_v42 = vld [vmem:[%s5787_s21 + $0x91] sm:$0xff] }
  0x14   : > { %v5885_v43 = vld [vmem:[%s5787_s21 + $0x24] sm:$0xff]  ;;  %v5890_v44 = vld [vmem:[%s6865_s1 + $0x1c] sm:$0x7]  ;;  %v5898_v46 = vld [vmem:[%s5787_s21 + $0x2c] sm:$0xff] }
  0x15   : > { %v4010_v45 = vld [vmem:[%s5787_s21 + $0x99] sm:$0xff]  ;;  %v4011_v47 = vld [vmem:[%s5787_s21 + $0xa1] sm:$0xff]  ;;  %v4012_v49 = vld [vmem:[%s5787_s21 + $0xa9] sm:$0xff] }
  0x16   : > { %4903 = vmatmul.mubr.msk.f32.gmra.mrb[6].mxu1 %vm223_vm1, %v3998_v19  ;;  %5103 = vmatmul.mubr.msk.f32.gmra.mrb[6].mxu0 %vm223_vm1, %v4232_v20  ;;  %v5904_v48 = vld [vmem:[%s5787_s21 + $0x34] sm:$0xff]  ;;  %v5916_v50 = vld [vmem:[%s5787_s21 + $0x3c] sm:$0xff]  ;;  %v5920_v52 = vld [vmem:[%s5787_s21 + $0x44] sm:$0xff] }
  0x17   : > { %4905 = vmatprep.mubr.msk.f32.mxu1 %vm223_vm1, %v3999_v21  ;;  %5105 = vmatprep.mubr.msk.f32.mxu0 %vm223_vm1, %v4233_v22  ;;  %v4013_v51 = vld [vmem:[%s5787_s21 + $0xb1] sm:$0xff]  ;;  %v4014_v53 = vld [vmem:[%s5787_s21 + $0xb9] sm:$0xff]  ;;  %v4015_v55 = vld [vmem:[%s5787_s21 + $0xc1] sm:$0xff] }
  0x18   : > { %v5930_v54 = vld [vmem:[%s5787_s21 + $0x4c] sm:$0xff]  ;;  %v5934_v56 = vld [vmem:[%s5787_s21 + $0x54] sm:$0xff]  ;;  %v5944_v58 = vld [vmem:[%s5787_s21 + $0x5c] sm:$0xff] }
  0x19   : > { %v4016_v57 = vld [vmem:[%s5787_s21 + $0xc9] sm:$0xff]  ;;  %v4017_v59 = vld [vmem:[%s5787_s21 + $0xd1] sm:$0xff]  ;;  %v4018_v61 = vld [vmem:[%s5787_s21 + $0xd9] sm:$0xff] }
  0x1a   : > { %4906 = vmatmul.mubr.msk.f32.gmra.mrb[8].mxu1 %vm223_vm1, %v4000_v23  ;;  %5106 = vmatmul.mubr.msk.f32.gmra.mrb[8].mxu0 %vm223_vm1, %v4234_v24  ;;  %v5948_v60 = vld [vmem:[%s5787_s21 + $0x64] sm:$0xff]  ;;  %v5958_v62 = vld [vmem:[%s5787_s21 + $0x6c] sm:$0xff]  ;;  %v5962_v0 = vld [vmem:[%s5787_s21 + $0x74] sm:$0xff] }
  0x1b   : > { %4908 = vmatprep.mubr.msk.f32.mxu1 %vm223_vm1, %v4001_v25  ;;  %5108 = vmatprep.mubr.msk.f32.mxu0 %vm223_vm1, %v4235_v26  ;;  %v4019_v63 = vld [vmem:[%s5787_s21 + $0xe1] sm:$0xff]  ;;  %v4020_v2 = vld [vmem:[%s5787_s21 + $0xe9] sm:$0xff]  ;;  %v4021_v4 = vld [vmem:[%s5787_s21 + $0xf1] sm:$0xff] }
  0x1c   : > { %v5972_v3 = vld [vmem:[%s5787_s21 + $0x7c] sm:$0xff]  ;;  %v5976_v5 = vld [vmem:[%s5787_s21 + $0x84] sm:$0xff]  ;;  %v5986_v7 = vld [vmem:[%s5787_s21 + $0x8c] sm:$0xff] }
  0x1d   : > { %v4022_v6 = vld [vmem:[%s5787_s21 + $0xf9] sm:$0xff]  ;;  %v155_v10 = vld [vmem:[%s5787_s21 + $0x8] sm:$0xff]  ;;  %v156_v12 = vld [vmem:[%s5787_s21 + $0x10] sm:$0xff] }
  0x1e   : > { %4909 = vmatmul.mubr.msk.f32.gmra.mrb[10].mxu1 %vm223_vm1, %v4002_v27  ;;  %5109 = vmatmul.mubr.msk.f32.gmra.mrb[10].mxu0 %vm223_vm1, %v4236_v28  ;;  %v154_v8 = vld [vmem:[%s5787_s21] sm:$0xff]  ;;  %v5990_v9 = vld [vmem:[%s5787_s21 + $0x94] sm:$0xff]  ;;  %v6009_v14 = vld [vmem:[%s6865_s1 + $0xc] sm:$0x7] }
  0x1f   : > { %4911 = vmatprep.mubr.msk.f32.mxu1 %vm223_vm1, %v4003_v29  ;;  %5111 = vmatprep.mubr.msk.f32.mxu0 %vm223_vm1, %v4237_v30  ;;  %v6000_v11 = vld [vmem:[%s5787_s21 + $0x9c] sm:$0xff]  ;;  %v6004_v13 = vld [vmem:[%s5787_s21 + $0xa4] sm:$0xff]  ;;  %v6019_v16 = vld [vmem:[%s5787_s21 + $0xac] sm:$0xff] }
  0x20   : > { %v157_v15 = vld [vmem:[%s5787_s21 + $0x18] sm:$0xff]  ;;  %v158_v17 = vld [vmem:[%s5787_s21 + $0x20] sm:$0xff]  ;;  %v159_v19 = vld [vmem:[%s5787_s21 + $0x28] sm:$0xff] }
  0x21   : > { %v6037_v20 = vld [vmem:[%s5787_s21 + $0xbc] sm:$0xff]  ;;  %v160_v21 = vld [vmem:[%s5787_s21 + $0x30] sm:$0xff]  ;;  %v6041_v22 = vld [vmem:[%s5787_s21 + $0xc4] sm:$0xff] }
  0x22   : > { %4912 = vmatmul.mubr.msk.f32.gmra.mrb[12].mxu1 %vm223_vm1, %v4004_v32  ;;  %5112 = vmatmul.mubr.msk.f32.gmra.mrb[12].mxu0 %vm223_vm1, %v4238_v33  ;;  %v161_v23 = vld [vmem:[%s5787_s21 + $0x38] sm:$0xff]  ;;  %v6051_v24 = vld [vmem:[%s5787_s21 + $0xcc] sm:$0xff]  ;;  %v162_v25 = vld [vmem:[%s5787_s21 + $0x40] sm:$0xff] }
  0x23   : > { %4914 = vmatprep.mubr.msk.f32.mxu1 %vm223_vm1, %v4005_v34  ;;  %5114 = vmatprep.mubr.msk.f32.mxu0 %vm223_vm1, %v4239_v35  ;;  %v6055_v26 = vld [vmem:[%s5787_s21 + $0xd4] sm:$0xff]  ;;  %v163_v27 = vld [vmem:[%s5787_s21 + $0x48] sm:$0xff]  ;;  %v6065_v28 = vld [vmem:[%s5787_s21 + $0xdc] sm:$0xff] }
  0x24   : > { %v164_v29 = vld [vmem:[%s5787_s21 + $0x50] sm:$0xff]  ;;  %v6069_v30 = vld [vmem:[%s5787_s21 + $0xe4] sm:$0xff] }
  0x25   : > { %v6079_v32 = vld [vmem:[%s5787_s21 + $0xec] sm:$0xff]  ;;  %v166_v33 = vld [vmem:[%s5787_s21 + $0x60] sm:$0xff]  ;;  %v6083_v34 = vld [vmem:[%s5787_s21 + $0xf4] sm:$0xff] }
  0x26   : > { %4915 = vmatmul.mubr.msk.f32.gmra.mrb[14].mxu1 %vm223_vm1, %v4006_v36  ;;  %5115 = vmatmul.mubr.msk.f32.gmra.mrb[14].mxu0 %vm223_vm1, %v4240_v37  ;;  %v167_v35 = vld [vmem:[%s5787_s21 + $0x68] sm:$0xff]  ;;  %v6093_v36 = vld [vmem:[%s5787_s21 + $0xfc] sm:$0xff]  ;;  %v168_v37 = vld [vmem:[%s5787_s21 + $0x70] sm:$0xff] }
  0x27   : > { %4917 = vmatprep.mubr.msk.f32.mxu1 %vm223_vm1, %v4007_v38  ;;  %5143 = vmatprep.mubr.msk.f32.mxu0 %vm223_vm1, %v4292_v39  ;;  %v6097_v38 = vld [vmem:[%s5787_s21 + $0x104] sm:$0xff]  ;;  %v169_v39 = vld [vmem:[%s5787_s21 + $0x78] sm:$0xff] }
  0x2a   : > { %4918 = vmatmul.mubr.msk.f32.gmra.mrb[16].mxu1 %vm223_vm1, %v4008_v40  ;;  %5144 = vmatmul.mubr.msk.f32.vlgmr.msra.gmra.mrb[0].mxu0 %vm223_vm1, %v4293_v41  ;;  %v6107_v40 = vld [vmem:[%s5787_s21 + $0x10c] sm:$0xff]  ;;  %v170_v41 = vld [vmem:[%s5787_s21 + $0x80] sm:$0xff] }
  0x2b   : > { %5192 = vmatpush3.msk.msra.mxu0 %vm320_vm0, %v4391_v18  ;;  %4920 = vmatprep.mubr.msk.f32.mxu1 %vm223_vm1, %v4009_v42  ;;  %v6025_v18 = vld [vmem:[%s5787_s21 + $0xb4] sm:$0xff]  ;;  %v171_v42 = vld [vmem:[%s5787_s21 + $0x88] sm:$0xff] }
  0x2c   : > { %5146 = vmatprep.mubr.msk.f32.mxu0 %vm223_vm1, %v5885_v43  ;;  %5241 = vmatprep.subr.msk.mxu0 %vm320_vm0, %v5890_v44 }
  0x2e   : > { %4921 = vmatmul.mubr.msk.f32.gmra.mrb[18].mxu1 %vm223_vm1, %v4010_v45  ;;  %5147 = vmatmul.mubr.msk.f32.gmra.mrb[2].mxu0 %vm223_vm1, %v5898_v46  ;;  %v172_v45 = vld [vmem:[%s5787_s21 + $0x90] sm:$0xff] }
  0x2f   : > { %4923 = vmatprep.mubr.msk.f32.mxu1 %vm223_vm1, %v4011_v47  ;;  %5149 = vmatprep.mubr.msk.f32.mxu0 %vm223_vm1, %v5904_v48  ;;  %v6121_v47 = vld [vmem:[%s6865_s1 + $0x20] sm:$0x7] }
  0x32   : > { %4924 = vmatmul.mubr.msk.f32.gmra.mrb[20].mxu1 %vm223_vm1, %v4012_v49  ;;  %5150 = vmatmul.mubr.msk.f32.gmra.mrb[4].mxu0 %vm223_vm1, %v5916_v50  ;;  %v174_v49 = vld [vmem:[%s5787_s21 + $0xa0] sm:$0xff] }
  0x33   : > { %4926 = vmatprep.mubr.msk.f32.mxu1 %vm223_vm1, %v4013_v51  ;;  %5152 = vmatprep.mubr.msk.f32.mxu0 %vm223_vm1, %v5920_v52  ;;  %v179_v51 = vld [vmem:[%s5787_s21 + $0xc8] sm:$0xff] }
  0x36   : > { %4927 = vmatmul.mubr.msk.f32.gmra.mrb[22].mxu1 %vm223_vm1, %v4014_v53  ;;  %5153 = vmatmul.mubr.msk.f32.gmra.mrb[6].mxu0 %vm223_vm1, %v5930_v54  ;;  %v181_v53 = vld [vmem:[%s5787_s21 + $0xd8] sm:$0xff] }
  0x37   : > { %4929 = vmatprep.mubr.msk.f32.mxu1 %vm223_vm1, %v4015_v55  ;;  %5155 = vmatprep.mubr.msk.f32.mxu0 %vm223_vm1, %v5934_v56  ;;  %v183_v55 = vld [vmem:[%s5787_s21 + $0xe8] sm:$0xff] }
  0x3a   : > { %4930 = vmatmul.mubr.msk.f32.gmra.mrb[24].mxu1 %vm223_vm1, %v4016_v57  ;;  %5156 = vmatmul.mubr.msk.f32.gmra.mrb[8].mxu0 %vm223_vm1, %v5944_v58  ;;  %v185_v57 = vld [vmem:[%s5787_s21 + $0xf8] sm:$0xff] }
  0x3b   : > { %4932 = vmatprep.mubr.msk.f32.mxu1 %vm223_vm1, %v4017_v59  ;;  %5158 = vmatprep.mubr.msk.f32.mxu0 %vm223_vm1, %v5948_v60  ;;  %v4092_v59 = vld [vmem:[%s5787_s21 + $0xa] sm:$0xff] }
  0x3e   : > { %4933 = vmatmul.mubr.msk.f32.gmra.mrb[26].mxu1 %vm223_vm1, %v4018_v61  ;;  %5159 = vmatmul.mubr.msk.f32.gmra.mrb[10].mxu0 %vm223_vm1, %v5958_v62  ;;  %v6201_v61 = vld [vmem:[%s5787_s21 + $0x1a] sm:$0xff] }
  0x3f   : > { %4935 = vmatprep.mubr.msk.f32.mxu1 %vm223_vm1, %v4019_v63  ;;  %5161 = vmatprep.mubr.msk.f32.mxu0 %vm223_vm1, %v5962_v0  ;;  %v6219_v63 = vld [vmem:[%s5787_s21 + $0x2a] sm:$0xff] }
  0x42   : > { %4936 = vmatmul.mubr.msk.f32.gmra.mrb[28].mxu1 %vm223_vm1, %v4020_v2  ;;  %5162 = vmatmul.mubr.msk.f32.gmra.mrb[12].mxu0 %vm223_vm1, %v5972_v3  ;;  %v6233_v2 = vld [vmem:[%s5787_s21 + $0x3a] sm:$0xff] }
  0x43   : > { %4938 = vmatprep.mubr.msk.f32.mxu1 %vm223_vm1, %v4021_v4  ;;  %5164 = vmatprep.mubr.msk.f32.mxu0 %vm223_vm1, %v5976_v5  ;;  %v6247_v4 = vld [vmem:[%s5787_s21 + $0x4a] sm:$0xff] }
  0x46   : > { %4939 = vmatmul.mubr.msk.f32.gmra.mrb[30].mxu1 %vm223_vm1, %v4022_v6  ;;  %5165 = vmatmul.mubr.msk.f32.gmra.mrb[14].mxu0 %vm223_vm1, %v5986_v7  ;;  %v6261_v6 = vld [vmem:[%s5787_s21 + $0x5a] sm:$0xff] }
  0x47   : > { %4943 = vmatprep.mubr.msk.f32.mxu1 %vm223_vm1, %v154_v8  ;;  %5167 = vmatprep.mubr.msk.f32.mxu0 %vm223_vm1, %v5990_v9  ;;  %v6275_v8 = vld [vmem:[%s5787_s21 + $0x6a] sm:$0xff] }
  0x4a   : > { %4944 = vmatmul.mubr.msk.f32.vlgmr.msra.gmra.mrb[0].mxu1 %vm223_vm1, %v155_v10  ;;  %5168 = vmatmul.mubr.msk.f32.gmra.mrb[16].mxu0 %vm223_vm1, %v6000_v11  ;;  %v4389_v10 = vld [vmem:[%s5787_s21 + $0x114] sm:$0xff] }
  0x4b   : > { %4992 = vmatpush3.msk.msra.mxu1 %vm320_vm0, %v5857_v31  ;;  %4946 = vmatprep.mubr.msk.f32.mxu1 %vm223_vm1, %v156_v12  ;;  %v165_v31 = vld [vmem:[%s5787_s21 + $0x58] sm:$0xff] }
  0x4c   : > { %5170 = vmatprep.mubr.msk.f32.mxu0 %vm223_vm1, %v6004_v13  ;;  %5041 = vmatprep.subr.msk.mxu1 %vm320_vm0, %v6009_v14  ;;  %v4390_v12 = vld [vmem:[%s5787_s21 + $0x11c] sm:$0xff] }
  0x4e   : > { %4947 = vmatmul.mubr.msk.f32.gmra.mrb[2].mxu1 %vm223_vm1, %v157_v15  ;;  %5171 = vmatmul.mubr.msk.f32.gmra.mrb[18].mxu0 %vm223_vm1, %v6019_v16  ;;  %v6303_v15 = vld [vmem:[%s5787_s21 + $0x8a] sm:$0xff] }
  0x4f   : > { %4949 = vmatprep.mubr.msk.f32.mxu1 %vm223_vm1, %v158_v17  ;;  %5173 = vmatprep.mubr.msk.f32.mxu0 %vm223_vm1, %v6025_v18  ;;  %v6307_v17 = vld [vmem:[%s5787_s21 + $0x92] sm:$0xff] }
  0x52   : > { %4950 = vmatmul.mubr.msk.f32.gmra.mrb[4].mxu1 %vm223_vm1, %v159_v19  ;;  %5174 = vmatmul.mubr.msk.f32.gmra.mrb[20].mxu0 %vm223_vm1, %v6037_v20  ;;  %v6318_v19 = vld [vmem:[%s5787_s21 + $0x9a] sm:$0xff] }
  0x53   : > { %4952 = vmatprep.mubr.msk.f32.mxu1 %vm223_vm1, %v160_v21  ;;  %5176 = vmatprep.mubr.msk.f32.mxu0 %vm223_vm1, %v6041_v22  ;;  %v6323_v21 = vld [vmem:[%s5787_s21 + $0xa2] sm:$0xff] }
  0x56   : > { %4953 = vmatmul.mubr.msk.f32.gmra.mrb[6].mxu1 %vm223_vm1, %v161_v23  ;;  %5177 = vmatmul.mubr.msk.f32.gmra.mrb[22].mxu0 %vm223_vm1, %v6051_v24  ;;  %v6333_v23 = vld [vmem:[%s5787_s21 + $0xaa] sm:$0xff] }
  0x57   : > { %4955 = vmatprep.mubr.msk.f32.mxu1 %vm223_vm1, %v162_v25  ;;  %5179 = vmatprep.mubr.msk.f32.mxu0 %vm223_vm1, %v6055_v26  ;;  %v6337_v25 = vld [vmem:[%s5787_s21 + $0xb2] sm:$0xff] }
  0x5a   : > { %4956 = vmatmul.mubr.msk.f32.gmra.mrb[8].mxu1 %vm223_vm1, %v163_v27  ;;  %5180 = vmatmul.mubr.msk.f32.gmra.mrb[24].mxu0 %vm223_vm1, %v6065_v28  ;;  %v6347_v27 = vld [vmem:[%s5787_s21 + $0xba] sm:$0xff] }
  0x5b   : > { %4958 = vmatprep.mubr.msk.f32.mxu1 %vm223_vm1, %v164_v29  ;;  %5182 = vmatprep.mubr.msk.f32.mxu0 %vm223_vm1, %v6069_v30  ;;  %v6351_v29 = vld [vmem:[%s5787_s21 + $0xc2] sm:$0xff] }
  0x5e   : > { %4959 = vmatmul.mubr.msk.f32.gmra.mrb[10].mxu1 %vm223_vm1, %v165_v31  ;;  %5183 = vmatmul.mubr.msk.f32.gmra.mrb[26].mxu0 %vm223_vm1, %v6079_v32  ;;  %v6361_v31 = vld [vmem:[%s5787_s21 + $0xca] sm:$0xff] }
  0x5f   : > { %4961 = vmatprep.mubr.msk.f32.mxu1 %vm223_vm1, %v166_v33  ;;  %5185 = vmatprep.mubr.msk.f32.mxu0 %vm223_vm1, %v6083_v34  ;;  %v6365_v33 = vld [vmem:[%s5787_s21 + $0xd2] sm:$0xff] }
  0x62   : > { %4962 = vmatmul.mubr.msk.f32.gmra.mrb[12].mxu1 %vm223_vm1, %v167_v35  ;;  %5186 = vmatmul.mubr.msk.f32.gmra.mrb[28].mxu0 %vm223_vm1, %v6093_v36  ;;  %v6375_v35 = vld [vmem:[%s5787_s21 + $0xda] sm:$0xff] }
  0x63   : > { %4964 = vmatprep.mubr.msk.f32.mxu1 %vm223_vm1, %v168_v37  ;;  %5188 = vmatprep.mubr.msk.f32.mxu0 %vm223_vm1, %v6097_v38  ;;  %v6379_v37 = vld [vmem:[%s5787_s21 + $0xe2] sm:$0xff] }
  0x66   : > { %4965 = vmatmul.mubr.msk.f32.gmra.mrb[14].mxu1 %vm223_vm1, %v169_v39  ;;  %5189 = vmatmul.mubr.msk.f32.gmra.mrb[30].mxu0 %vm223_vm1, %v6107_v40  ;;  %v6389_v39 = vld [vmem:[%s5787_s21 + $0xea] sm:$0xff] }
  0x67   : > { %4967 = vmatprep.mubr.msk.f32.mxu1 %vm223_vm1, %v170_v41  ;;  %5193 = vmatprep.mubr.msk.f32.mxu0 %vm223_vm1, %v5885_v43  ;;  %v173_v43 = vld [vmem:[%s5787_s21 + $0x98] sm:$0xff] }
  0x68   : > { %v6393_v41 = vld [vmem:[%s5787_s21 + $0xf2] sm:$0xff] }
  0x6a   : > { %4968 = vmatmul.mubr.msk.f32.gmra.mrb[16].mxu1 %vm223_vm1, %v171_v42  ;;  %5194 = vmatmul.mubr.msk.f32.vlgmr.msra.gmra.mrb[0].mxu0 %vm223_vm1, %v5898_v46  ;;  %v176_v46 = vld [vmem:[%s5787_s21 + $0xb0] sm:$0xff] }
  0x6b   : > { %5242 = vmatpush3.msk.msra.mxu0 %vm320_vm0, %v5890_v44  ;;  %4970 = vmatprep.mubr.msk.f32.mxu1 %vm223_vm1, %v172_v45  ;;  %v175_v44 = vld [vmem:[%s5787_s21 + $0xa8] sm:$0xff]  ;;  %v4440_v42 = vld [vmem:[%s5787_s21 + $0x95] sm:$0xff] }
  0x6c   : > { %5196 = vmatprep.mubr.msk.f32.mxu0 %vm223_vm1, %v5904_v48  ;;  %5291 = vmatprep.subr.msk.mxu0 %vm320_vm0, %v6121_v47  ;;  %v177_v48 = vld [vmem:[%s5787_s21 + $0xb8] sm:$0xff] }
  0x6d   : > { %v6403_v45 = vld [vmem:[%s5787_s21 + $0xfa] sm:$0xff] }
  0x6e   : > { %4971 = vmatmul.mubr.msk.f32.gmra.mrb[18].mxu1 %vm223_vm1, %v173_v43  ;;  %5197 = vmatmul.mubr.msk.f32.gmra.mrb[2].mxu0 %vm223_vm1, %v5916_v50  ;;  %v178_v50 = vld [vmem:[%s5787_s21 + $0xc0] sm:$0xff] }
  0x6f   : > { %4973 = vmatprep.mubr.msk.f32.mxu1 %vm223_vm1, %v174_v49  ;;  %5199 = vmatprep.mubr.msk.f32.mxu0 %vm223_vm1, %v5920_v52  ;;  %v180_v52 = vld [vmem:[%s5787_s21 + $0xd0] sm:$0xff]  ;;  %v4442_v43 = vld [vmem:[%s5787_s21 + $0xa5] sm:$0xff] }
  0x70   : > { %v4443_v49 = vld [vmem:[%s5787_s21 + $0xad] sm:$0xff] }
  0x72   : > { %4974 = vmatmul.mubr.msk.f32.gmra.mrb[20].mxu1 %vm223_vm1, %v175_v44  ;;  %5200 = vmatmul.mubr.msk.f32.gmra.mrb[4].mxu0 %vm223_vm1, %v5930_v54  ;;  %v182_v54 = vld [vmem:[%s5787_s21 + $0xe0] sm:$0xff]  ;;  %v4444_v44 = vld [vmem:[%s5787_s21 + $0xb5] sm:$0xff] }
  0x73   : > { %4976 = vmatprep.mubr.msk.f32.mxu1 %vm223_vm1, %v176_v46  ;;  %5202 = vmatprep.mubr.msk.f32.mxu0 %vm223_vm1, %v5934_v56  ;;  %v184_v56 = vld [vmem:[%s5787_s21 + $0xf0] sm:$0xff]  ;;  %v4445_v46 = vld [vmem:[%s5787_s21 + $0xbd] sm:$0xff] }
  0x76   : > { %4977 = vmatmul.mubr.msk.f32.gmra.mrb[22].mxu1 %vm223_vm1, %v177_v48  ;;  %5203 = vmatmul.mubr.msk.f32.gmra.mrb[6].mxu0 %vm223_vm1, %v5944_v58  ;;  %v4091_v58 = vld [vmem:[%s5787_s21 + $0x2] sm:$0xff] }
  0x77   : > { %4979 = vmatprep.mubr.msk.f32.mxu1 %vm223_vm1, %v178_v50  ;;  %5205 = vmatprep.mubr.msk.f32.mxu0 %vm223_vm1, %v5948_v60  ;;  %v6191_v60 = vld [vmem:[%s5787_s21 + $0x12] sm:$0xff]  ;;  %v4446_v48 = vld [vmem:[%s5787_s21 + $0xc5] sm:$0xff] }
  0x78   : > { %v4448_v50 = vld [vmem:[%s5787_s21 + $0xd5] sm:$0xff] }
  0x7a   : > { %4980 = vmatmul.mubr.msk.f32.gmra.mrb[24].mxu1 %vm223_vm1, %v179_v51  ;;  %5206 = vmatmul.mubr.msk.f32.gmra.mrb[8].mxu0 %vm223_vm1, %v5958_v62  ;;  %v6206_v62 = vld [vmem:[%s5787_s21 + $0x22] sm:$0xff] }
  0x7b   : > { %4982 = vmatprep.mubr.msk.f32.mxu1 %vm223_vm1, %v180_v52  ;;  %5208 = vmatprep.mubr.msk.f32.mxu0 %vm223_vm1, %v5962_v0  ;;  %v6222_v0 = vld [vmem:[%s5787_s21 + $0x32] sm:$0xff]  ;;  %v4449_v51 = vld [vmem:[%s5787_s21 + $0xdd] sm:$0xff]  ;;  %v4450_v52 = vld [vmem:[%s5787_s21 + $0xe5] sm:$0xff] }
  0x7e   : > { %4983 = vmatmul.mubr.msk.f32.gmra.mrb[26].mxu1 %vm223_vm1, %v181_v53  ;;  %5209 = vmatmul.mubr.msk.f32.gmra.mrb[10].mxu0 %vm223_vm1, %v5972_v3  ;;  %v6236_v3 = vld [vmem:[%s5787_s21 + $0x42] sm:$0xff]  ;;  %v4451_v53 = vld [vmem:[%s5787_s21 + $0xed] sm:$0xff] }
  0x7f   : > { %4985 = vmatprep.mubr.msk.f32.mxu1 %vm223_vm1, %v182_v54  ;;  %5211 = vmatprep.mubr.msk.f32.mxu0 %vm223_vm1, %v5976_v5  ;;  %v6250_v5 = vld [vmem:[%s5787_s21 + $0x52] sm:$0xff] }
  0x80   : > { %v4452_v54 = vld [vmem:[%s5787_s21 + $0xf5] sm:$0xff] }
  0x82   : > { %4986 = vmatmul.mubr.msk.f32.gmra.mrb[28].mxu1 %vm223_vm1, %v183_v55  ;;  %5212 = vmatmul.mubr.msk.f32.gmra.mrb[12].mxu0 %vm223_vm1, %v5986_v7  ;;  %v6264_v7 = vld [vmem:[%s5787_s21 + $0x62] sm:$0xff] }
  0x83   : > { %4988 = vmatprep.mubr.msk.f32.mxu1 %vm223_vm1, %v184_v56  ;;  %5214 = vmatprep.mubr.msk.f32.mxu0 %vm223_vm1, %v5990_v9  ;;  %v6278_v9 = vld [vmem:[%s5787_s21 + $0x72] sm:$0xff]  ;;  %v4453_v55 = vld [vmem:[%s5787_s21 + $0xfd] sm:$0xff]  ;;  %v4454_v56 = vld [vmem:[%s5787_s21 + $0x105] sm:$0xff] }
  0x86   : > { %4989 = vmatmul.mubr.msk.f32.gmra.mrb[30].mxu1 %vm223_vm1, %v185_v57  ;;  %5215 = vmatmul.mubr.msk.f32.gmra.mrb[14].mxu0 %vm223_vm1, %v6000_v11  ;;  %v6289_v11 = vld [vmem:[%s5787_s21 + $0x7a] sm:$0xff]  ;;  %v4455_v57 = vld [vmem:[%s5787_s21 + $0x10d] sm:$0xff] }
  0x87   : > { %4993 = vmatprep.mubr.msk.f32.mxu1 %vm223_vm1, %v4091_v58  ;;  %5217 = vmatprep.mubr.msk.f32.mxu0 %vm223_vm1, %v6004_v13  ;;  %v6293_v13 = vld [vmem:[%s5787_s21 + $0x82] sm:$0xff]  ;;  %v4456_v58 = vld [vmem:[%s5787_s21 + $0x115] sm:$0xff] }
  0x8a   : > { %4994 = vmatmul.mubr.msk.f32.vlgmr.msra.gmra.mrb[0].mxu1 %vm223_vm1, %v4092_v59  ;;  %5218 = vmatmul.mubr.msk.f32.gmra.mrb[16].mxu0 %vm223_vm1, %v6019_v16  ;;  %v4427_v16 = vld [vmem:[%s5787_s21 + $0x2d] sm:$0xff]  ;;  %v4457_v59 = vld [vmem:[%s5787_s21 + $0x11d] sm:$0xff] }
  0x8b   : > { %5042 = vmatpush3.msk.msra.mxu1 %vm320_vm0, %v6009_v14  ;;  %4996 = vmatprep.mubr.msk.f32.mxu1 %vm223_vm1, %v6191_v60  ;;  %v4426_v14 = vld [vmem:[%s5787_s21 + $0x25] sm:$0xff] }
  0x8c   : > { %5220 = vmatprep.mubr.msk.f32.mxu0 %vm223_vm1, %v6025_v18  ;;  %5341 = vmatprep.subr.msk.mxu1 %vm320_vm0, %v5777_v1  ;;  %v4428_v18 = vld [vmem:[%s5787_s21 + $0x35] sm:$0xff] }
  0x8e   : > { %4997 = vmatmul.mubr.msk.f32.gmra.mrb[2].mxu1 %vm223_vm1, %v6201_v61  ;;  %5221 = vmatmul.mubr.msk.f32.gmra.mrb[18].mxu0 %vm223_vm1, %v6037_v20  ;;  %v4429_v20 = vld [vmem:[%s5787_s21 + $0x3d] sm:$0xff] }
  0x8f   : > { %4999 = vmatprep.mubr.msk.f32.mxu1 %vm223_vm1, %v6206_v62  ;;  %5223 = vmatprep.mubr.msk.f32.mxu0 %vm223_vm1, %v6041_v22  ;;  %v4430_v22 = vld [vmem:[%s5787_s21 + $0x45] sm:$0xff] }
  0x92   : > { %5000 = vmatmul.mubr.msk.f32.gmra.mrb[4].mxu1 %vm223_vm1, %v6219_v63  ;;  %5224 = vmatmul.mubr.msk.f32.gmra.mrb[20].mxu0 %vm223_vm1, %v6051_v24  ;;  %v4431_v24 = vld [vmem:[%s5787_s21 + $0x4d] sm:$0xff] }
  0x93   : > { %5002 = vmatprep.mubr.msk.f32.mxu1 %vm223_vm1, %v6222_v0  ;;  %5226 = vmatprep.mubr.msk.f32.mxu0 %vm223_vm1, %v6055_v26  ;;  %v4432_v26 = vld [vmem:[%s5787_s21 + $0x55] sm:$0xff] }
  0x96   : > { %5003 = vmatmul.mubr.msk.f32.gmra.mrb[6].mxu1 %vm223_vm1, %v6233_v2  ;;  %5227 = vmatmul.mubr.msk.f32.gmra.mrb[22].mxu0 %vm223_vm1, %v6065_v28  ;;  %v4433_v28 = vld [vmem:[%s5787_s21 + $0x5d] sm:$0xff] }
  0x97   : > { %5005 = vmatprep.mubr.msk.f32.mxu1 %vm223_vm1, %v6236_v3  ;;  %5229 = vmatprep.mubr.msk.f32.mxu0 %vm223_vm1, %v6069_v30  ;;  %v4434_v30 = vld [vmem:[%s5787_s21 + $0x65] sm:$0xff] }
  0x9a   : > { %5006 = vmatmul.mubr.msk.f32.gmra.mrb[8].mxu1 %vm223_vm1, %v6247_v4  ;;  %5230 = vmatmul.mubr.msk.f32.gmra.mrb[24].mxu0 %vm223_vm1, %v6079_v32  ;;  %v4435_v32 = vld [vmem:[%s5787_s21 + $0x6d] sm:$0xff] }
  0x9b   : > { %5008 = vmatprep.mubr.msk.f32.mxu1 %vm223_vm1, %v6250_v5  ;;  %5232 = vmatprep.mubr.msk.f32.mxu0 %vm223_vm1, %v6083_v34  ;;  %v4436_v34 = vld [vmem:[%s5787_s21 + $0x75] sm:$0xff] }
  0x9e   : > { %5009 = vmatmul.mubr.msk.f32.gmra.mrb[10].mxu1 %vm223_vm1, %v6261_v6  ;;  %5233 = vmatmul.mubr.msk.f32.gmra.mrb[26].mxu0 %vm223_vm1, %v6093_v36  ;;  %v4437_v36 = vld [vmem:[%s5787_s21 + $0x7d] sm:$0xff] }
  0x9f   : > { %5011 = vmatprep.mubr.msk.f32.mxu1 %vm223_vm1, %v6264_v7  ;;  %5235 = vmatprep.mubr.msk.f32.mxu0 %vm223_vm1, %v6097_v38  ;;  %v4438_v38 = vld [vmem:[%s5787_s21 + $0x85] sm:$0xff] }
  0xa2   : > { %5012 = vmatmul.mubr.msk.f32.gmra.mrb[12].mxu1 %vm223_vm1, %v6275_v8  ;;  %5236 = vmatmul.mubr.msk.f32.gmra.mrb[28].mxu0 %vm223_vm1, %v6107_v40  ;;  %v4439_v40 = vld [vmem:[%s5787_s21 + $0x8d] sm:$0xff] }
  0xa3   : > { %5014 = vmatprep.mubr.msk.f32.mxu1 %vm223_vm1, %v6278_v9  ;;  %5238 = vmatprep.mubr.msk.f32.mxu0 %vm223_vm1, %v4389_v10  ;;  %v4506_v10 = vld [vmem:[%s5787_s21 + $0x8e] sm:$0xff] }
  0xa6   : > { %5015 = vmatmul.mubr.msk.f32.gmra.mrb[14].mxu1 %vm223_vm1, %v6289_v11  ;;  %5239 = vmatmul.mubr.msk.f32.gmra.mrb[30].mxu0 %vm223_vm1, %v4390_v12  ;;  %v4507_v12 = vld [vmem:[%s5787_s21 + $0x96] sm:$0xff] }
  0xa7   : > { %5017 = vmatprep.mubr.msk.f32.mxu1 %vm223_vm1, %v6293_v13  ;;  %5243 = vmatprep.mubr.msk.f32.mxu0 %vm223_vm1, %v4426_v14  ;;  %v4508_v14 = vld [vmem:[%s5787_s21 + $0x9e] sm:$0xff] }
  0xaa   : > { %5018 = vmatmul.mubr.msk.f32.gmra.mrb[16].mxu1 %vm223_vm1, %v6303_v15  ;;  %5244 = vmatmul.mubr.msk.f32.vlgmr.msra.gmra.mrb[0].mxu0 %vm223_vm1, %v4427_v16  ;;  %v4509_v16 = vld [vmem:[%s5787_s21 + $0xa6] sm:$0xff] }
  0xab   : > { %5292 = vmatpush3.msk.msra.mxu0 %vm320_vm0, %v6121_v47  ;;  %5020 = vmatprep.mubr.msk.f32.mxu1 %vm223_vm1, %v6307_v17  ;;  %v4441_v47 = vld [vmem:[%s5787_s21 + $0x9d] sm:$0xff] }
  0xac   : > { %5246 = vmatprep.mubr.msk.f32.mxu0 %vm223_vm1, %v4428_v18  ;;  %v4510_v18 = vld [vmem:[%s5787_s21 + $0xae] sm:$0xff] }
  0xae   : > { %5021 = vmatmul.mubr.msk.f32.gmra.mrb[18].mxu1 %vm223_vm1, %v6318_v19  ;;  %5247 = vmatmul.mubr.msk.f32.gmra.mrb[2].mxu0 %vm223_vm1, %v4429_v20  ;;  %v4511_v20 = vld [vmem:[%s5787_s21 + $0xb6] sm:$0xff] }
  0xaf   : > { %5023 = vmatprep.mubr.msk.f32.mxu1 %vm223_vm1, %v6323_v21  ;;  %5249 = vmatprep.mubr.msk.f32.mxu0 %vm223_vm1, %v4430_v22  ;;  %v4512_v22 = vld [vmem:[%s5787_s21 + $0xbe] sm:$0xff] }
  0xb2   : > { %5024 = vmatmul.mubr.msk.f32.gmra.mrb[20].mxu1 %vm223_vm1, %v6333_v23  ;;  %5250 = vmatmul.mubr.msk.f32.gmra.mrb[4].mxu0 %vm223_vm1, %v4431_v24  ;;  %v4513_v24 = vld [vmem:[%s5787_s21 + $0xc6] sm:$0xff] }
  0xb3   : > { %5026 = vmatprep.mubr.msk.f32.mxu1 %vm223_vm1, %v6337_v25  ;;  %5252 = vmatprep.mubr.msk.f32.mxu0 %vm223_vm1, %v4432_v26  ;;  %v4514_v26 = vld [vmem:[%s5787_s21 + $0xce] sm:$0xff] }
  0xb6   : > { %5027 = vmatmul.mubr.msk.f32.gmra.mrb[22].mxu1 %vm223_vm1, %v6347_v27  ;;  %5253 = vmatmul.mubr.msk.f32.gmra.mrb[6].mxu0 %vm223_vm1, %v4433_v28  ;;  %v4515_v28 = vld [vmem:[%s5787_s21 + $0xd6] sm:$0xff] }
  0xb7   : > { %5029 = vmatprep.mubr.msk.f32.mxu1 %vm223_vm1, %v6351_v29  ;;  %5255 = vmatprep.mubr.msk.f32.mxu0 %vm223_vm1, %v4434_v30  ;;  %v4516_v30 = vld [vmem:[%s5787_s21 + $0xde] sm:$0xff] }
  0xba   : > { %5030 = vmatmul.mubr.msk.f32.gmra.mrb[24].mxu1 %vm223_vm1, %v6361_v31  ;;  %5256 = vmatmul.mubr.msk.f32.gmra.mrb[8].mxu0 %vm223_vm1, %v4435_v32  ;;  %v4517_v32 = vld [vmem:[%s5787_s21 + $0xe6] sm:$0xff] }
  0xbb   : > { %5032 = vmatprep.mubr.msk.f32.mxu1 %vm223_vm1, %v6365_v33  ;;  %5258 = vmatprep.mubr.msk.f32.mxu0 %vm223_vm1, %v4436_v34  ;;  %v4518_v34 = vld [vmem:[%s5787_s21 + $0xee] sm:$0xff] }
  0xbe   : > { %5033 = vmatmul.mubr.msk.f32.gmra.mrb[26].mxu1 %vm223_vm1, %v6375_v35  ;;  %5259 = vmatmul.mubr.msk.f32.gmra.mrb[10].mxu0 %vm223_vm1, %v4437_v36  ;;  %v4519_v36 = vld [vmem:[%s5787_s21 + $0xf6] sm:$0xff] }
  0xbf   : > { %5035 = vmatprep.mubr.msk.f32.mxu1 %vm223_vm1, %v6379_v37  ;;  %5261 = vmatprep.mubr.msk.f32.mxu0 %vm223_vm1, %v4438_v38  ;;  %v4520_v38 = vld [vmem:[%s5787_s21 + $0xfe] sm:$0xff] }
  0xc2   : > { %5036 = vmatmul.mubr.msk.f32.gmra.mrb[28].mxu1 %vm223_vm1, %v6389_v39  ;;  %5262 = vmatmul.mubr.msk.f32.gmra.mrb[12].mxu0 %vm223_vm1, %v4439_v40  ;;  %v4521_v40 = vld [vmem:[%s5787_s21 + $0x106] sm:$0xff] }
  0xc3   : > { %5038 = vmatprep.mubr.msk.f32.mxu1 %vm223_vm1, %v6393_v41  ;;  %5264 = vmatprep.mubr.msk.f32.mxu0 %vm223_vm1, %v4440_v42  ;;  %v4522_v42 = vld [vmem:[%s5787_s21 + $0x10e] sm:$0xff] }
  0xc6   : > { %5039 = vmatmul.mubr.msk.f32.gmra.mrb[30].mxu1 %vm223_vm1, %v6403_v45  ;;  %5265 = vmatmul.mubr.msk.f32.gmra.mrb[14].mxu0 %vm223_vm1, %v4441_v47  ;;  %v4523_v47 = vld [vmem:[%s5787_s21 + $0x116] sm:$0xff] }
  0xc7   : > { %5043 = vmatprep.mubr.msk.f32.mxu1 %vm223_vm1, %v6191_v60  ;;  %5267 = vmatprep.mubr.msk.f32.mxu0 %vm223_vm1, %v4442_v43  ;;  %v4493_v60 = vld [vmem:[%s5787_s21 + $0x26] sm:$0xff] }
  0xc8   : > { %v4256_v43 = vld [vmem:[%s5787_s21 + $0x10b] sm:$0xff] }
  0xca   : > { %5044 = vmatmul.mubr.msk.f32.vlgmr.msra.gmra.mrb[0].mxu1 %vm223_vm1, %v6201_v61  ;;  %5268 = vmatmul.mubr.msk.f32.gmra.mrb[16].mxu0 %vm223_vm1, %v4443_v49  ;;  %v4494_v61 = vld [vmem:[%s5787_s21 + $0x2e] sm:$0xff]  ;;  %v4524_v49 = vld [vmem:[%s5787_s21 + $0x11e] sm:$0xff] }
  0xcb   : > { %5342 = vmatpush3.msk.msra.mxu1 %vm320_vm0, %v5777_v1  ;;  %5046 = vmatprep.mubr.msk.f32.mxu1 %vm223_vm1, %v6206_v62  ;;  %v4447_v1 = vld [vmem:[%s5787_s21 + $0xcd] sm:$0xff]  ;;  %v4495_v62 = vld [vmem:[%s5787_s21 + $0x36] sm:$0xff] }
  0xcc   : > { %5270 = vmatprep.mubr.msk.f32.mxu0 %vm223_vm1, %v4444_v44 }
  0xce   : > { %5047 = vmatmul.mubr.msk.f32.gmra.mrb[2].mxu1 %vm223_vm1, %v6219_v63  ;;  %5271 = vmatmul.mubr.msk.f32.gmra.mrb[18].mxu0 %vm223_vm1, %v4445_v46  ;;  %v4496_v63 = vld [vmem:[%s5787_s21 + $0x3e] sm:$0xff] }
  0xcf   : > { %5049 = vmatprep.mubr.msk.f32.mxu1 %vm223_vm1, %v6222_v0  ;;  %5273 = vmatprep.mubr.msk.f32.mxu0 %vm223_vm1, %v4446_v48  ;;  %v4497_v0 = vld [vmem:[%s5787_s21 + $0x46] sm:$0xff] }
  0xd2   : > { %5050 = vmatmul.mubr.msk.f32.gmra.mrb[4].mxu1 %vm223_vm1, %v6233_v2  ;;  %5274 = vmatmul.mubr.msk.f32.gmra.mrb[20].mxu0 %vm223_vm1, %v4447_v1  ;;  %v4498_v2 = vld [vmem:[%s5787_s21 + $0x4e] sm:$0xff] }
  0xd3   : > { %5052 = vmatprep.mubr.msk.f32.mxu1 %vm223_vm1, %v6236_v3  ;;  %5276 = vmatprep.mubr.msk.f32.mxu0 %vm223_vm1, %v4448_v50  ;;  %v4499_v3 = vld [vmem:[%s5787_s21 + $0x56] sm:$0xff] }
  0xd6   : > { %5053 = vmatmul.mubr.msk.f32.gmra.mrb[6].mxu1 %vm223_vm1, %v6247_v4  ;;  %5277 = vmatmul.mubr.msk.f32.gmra.mrb[22].mxu0 %vm223_vm1, %v4449_v51  ;;  %v4500_v4 = vld [vmem:[%s5787_s21 + $0x5e] sm:$0xff] }
  0xd7   : > { %5055 = vmatprep.mubr.msk.f32.mxu1 %vm223_vm1, %v6250_v5  ;;  %5279 = vmatprep.mubr.msk.f32.mxu0 %vm223_vm1, %v4450_v52  ;;  %v4501_v5 = vld [vmem:[%s5787_s21 + $0x66] sm:$0xff] }
  0xda   : > { %5056 = vmatmul.mubr.msk.f32.gmra.mrb[8].mxu1 %vm223_vm1, %v6261_v6  ;;  %5280 = vmatmul.mubr.msk.f32.gmra.mrb[24].mxu0 %vm223_vm1, %v4451_v53  ;;  %v4502_v6 = vld [vmem:[%s5787_s21 + $0x6e] sm:$0xff] }
  0xdb   : > { %5058 = vmatprep.mubr.msk.f32.mxu1 %vm223_vm1, %v6264_v7  ;;  %5282 = vmatprep.mubr.msk.f32.mxu0 %vm223_vm1, %v4452_v54  ;;  %v4503_v7 = vld [vmem:[%s5787_s21 + $0x76] sm:$0xff] }
  0xde   : > { %5059 = vmatmul.mubr.msk.f32.gmra.mrb[10].mxu1 %vm223_vm1, %v6275_v8  ;;  %5283 = vmatmul.mubr.msk.f32.gmra.mrb[26].mxu0 %vm223_vm1, %v4453_v55  ;;  %v4504_v8 = vld [vmem:[%s5787_s21 + $0x7e] sm:$0xff] }
  0xdf   : > { %5061 = vmatprep.mubr.msk.f32.mxu1 %vm223_vm1, %v6278_v9  ;;  %5285 = vmatprep.mubr.msk.f32.mxu0 %vm223_vm1, %v4454_v56  ;;  %v4505_v9 = vld [vmem:[%s5787_s21 + $0x86] sm:$0xff] }
  0xe2   : > { %5062 = vmatmul.mubr.msk.f32.gmra.mrb[12].mxu1 %vm223_vm1, %v6289_v11  ;;  %5286 = vmatmul.mubr.msk.f32.gmra.mrb[28].mxu0 %vm223_vm1, %v4455_v57  ;;  %v4188_v11 = vld [vmem:[%s5787_s21 + $0x102] sm:$0xff] }
  0xe3   : > { %5064 = vmatprep.mubr.msk.f32.mxu1 %vm223_vm1, %v6293_v13  ;;  %5288 = vmatprep.mubr.msk.f32.mxu0 %vm223_vm1, %v4456_v58  ;;  %v4189_v13 = vld [vmem:[%s5787_s21 + $0x10a] sm:$0xff] }
  0xe6   : > { %5065 = vmatmul.mubr.msk.f32.gmra.mrb[14].mxu1 %vm223_vm1, %v6303_v15  ;;  %5289 = vmatmul.mubr.msk.f32.gmra.mrb[30].mxu0 %vm223_vm1, %v4457_v59  ;;  %v4241_v15 = vld [vmem:[%s5787_s21 + $0x93] sm:$0xff] }
  0xe7   : > { %5067 = vmatprep.mubr.msk.f32.mxu1 %vm223_vm1, %v6307_v17  ;;  %5293 = vmatprep.mubr.msk.f32.mxu0 %vm223_vm1, %v4493_v60  ;;  %v4242_v17 = vld [vmem:[%s5787_s21 + $0x9b] sm:$0xff] }
  0xea   : > { %5068 = vmatmul.mubr.msk.f32.gmra.mrb[16].mxu1 %vm223_vm1, %v6318_v19  ;;  %5294 = vmatmul.mubr.msk.f32.vlgmr.msra.gmra.mrb[0].mxu0 %vm223_vm1, %v4494_v61  ;;  %v4243_v19 = vld [vmem:[%s5787_s21 + $0xa3] sm:$0xff] }
  0xeb   : > { %5070 = vmatprep.mubr.msk.f32.mxu1 %vm223_vm1, %v6323_v21  ;;  %5296 = vmatprep.mubr.msk.f32.mxu0 %vm223_vm1, %v4495_v62  ;;  %v4244_v21 = vld [vmem:[%s5787_s21 + $0xab] sm:$0xff] }
  0xee   : > { %5071 = vmatmul.mubr.msk.f32.gmra.mrb[18].mxu1 %vm223_vm1, %v6333_v23  ;;  %5297 = vmatmul.mubr.msk.f32.gmra.mrb[2].mxu0 %vm223_vm1, %v4496_v63  ;;  %v4245_v23 = vld [vmem:[%s5787_s21 + $0xb3] sm:$0xff]  ;;  %v6618_v63 = vld [vmem:[%s6866_s2] ss:$0 sm:$0xff] }
  0xef   : > { %5073 = vmatprep.mubr.msk.f32.mxu1 %vm223_vm1, %v6337_v25  ;;  %5299 = vmatprep.mubr.msk.f32.mxu0 %vm223_vm1, %v4497_v0  ;;  %v4246_v25 = vld [vmem:[%s5787_s21 + $0xbb] sm:$0xff] }
  0xf2   : > { %5074 = vmatmul.mubr.msk.f32.gmra.mrb[20].mxu1 %vm223_vm1, %v6347_v27  ;;  %5300 = vmatmul.mubr.msk.f32.gmra.mrb[4].mxu0 %vm223_vm1, %v4498_v2  ;;  %v4247_v27 = vld [vmem:[%s5787_s21 + $0xc3] sm:$0xff] }
  0xf3   : > { %5076 = vmatprep.mubr.msk.f32.mxu1 %vm223_vm1, %v6351_v29  ;;  %5302 = vmatprep.mubr.msk.f32.mxu0 %vm223_vm1, %v4499_v3  ;;  %v4248_v29 = vld [vmem:[%s5787_s21 + $0xcb] sm:$0xff] }
  0xf6   : > { %5077 = vmatmul.mubr.msk.f32.gmra.mrb[22].mxu1 %vm223_vm1, %v6361_v31  ;;  %5303 = vmatmul.mubr.msk.f32.gmra.mrb[6].mxu0 %vm223_vm1, %v4500_v4  ;;  %v4249_v31 = vld [vmem:[%s5787_s21 + $0xd3] sm:$0xff] }
  0xf7   : > { %5079 = vmatprep.mubr.msk.f32.mxu1 %vm223_vm1, %v6365_v33  ;;  %5305 = vmatprep.mubr.msk.f32.mxu0 %vm223_vm1, %v4501_v5  ;;  %v4250_v33 = vld [vmem:[%s5787_s21 + $0xdb] sm:$0xff] }
  0xfa   : > { %5080 = vmatmul.mubr.msk.f32.gmra.mrb[24].mxu1 %vm223_vm1, %v6375_v35  ;;  %5306 = vmatmul.mubr.msk.f32.gmra.mrb[8].mxu0 %vm223_vm1, %v4502_v6  ;;  %v4251_v35 = vld [vmem:[%s5787_s21 + $0xe3] sm:$0xff] }
  0xfb   : > { %5082 = vmatprep.mubr.msk.f32.mxu1 %vm223_vm1, %v6379_v37  ;;  %5308 = vmatprep.mubr.msk.f32.mxu0 %vm223_vm1, %v4503_v7  ;;  %v4252_v37 = vld [vmem:[%s5787_s21 + $0xeb] sm:$0xff] }
  0xfe   : > { %5083 = vmatmul.mubr.msk.f32.gmra.mrb[26].mxu1 %vm223_vm1, %v6389_v39  ;;  %5309 = vmatmul.mubr.msk.f32.gmra.mrb[10].mxu0 %vm223_vm1, %v4504_v8  ;;  %v4253_v39 = vld [vmem:[%s5787_s21 + $0xf3] sm:$0xff] }
  0xff   : > { %5085 = vmatprep.mubr.msk.f32.mxu1 %vm223_vm1, %v6393_v41  ;;  %5311 = vmatprep.mubr.msk.f32.mxu0 %vm223_vm1, %v4505_v9  ;;  %v4254_v41 = vld [vmem:[%s5787_s21 + $0xfb] sm:$0xff] }
 0x102   : > { %5086 = vmatmul.mubr.msk.f32.gmra.mrb[28].mxu1 %vm223_vm1, %v6403_v45  ;;  %5312 = vmatmul.mubr.msk.f32.gmra.mrb[12].mxu0 %vm223_vm1, %v4506_v10  ;;  %v4255_v45 = vld [vmem:[%s5787_s21 + $0x103] sm:$0xff] }
 0x103   : > { %5088 = vmatprep.mubr.msk.f32.mxu1 %vm223_vm1, %v4188_v11  ;;  %5314 = vmatprep.mubr.msk.f32.mxu0 %vm223_vm1, %v4507_v12 }
 0x106   : > { %5089 = vmatmul.mubr.msk.f32.gmra.mrb[30].mxu1 %vm223_vm1, %v4189_v13  ;;  %5315 = vmatmul.mubr.msk.f32.gmra.mrb[14].mxu0 %vm223_vm1, %v4508_v14 }
 0x107   : > { %5117 = vmatprep.mubr.msk.f32.mxu1 %vm223_vm1, %v4241_v15  ;;  %5317 = vmatprep.mubr.msk.f32.mxu0 %vm223_vm1, %v4509_v16 }
 0x10a   : > { %5118 = vmatmul.mubr.msk.f32.vlgmr.msra.gmra.mrb[16].mxu1 %vm223_vm1, %v4242_v17  ;;  %5318 = vmatmul.mubr.msk.f32.gmra.mrb[16].mxu0 %vm223_vm1, %v4510_v18 }
 0x10b   : > { %5120 = vmatprep.mubr.msk.f32.mxu1 %vm223_vm1, %v4243_v19  ;;  %5320 = vmatprep.mubr.msk.f32.mxu0 %vm223_vm1, %v4511_v20 }
 0x10e   : > { %5121 = vmatmul.mubr.msk.f32.gmra.mrb[18].mxu1 %vm223_vm1, %v4244_v21  ;;  %5321 = vmatmul.mubr.msk.f32.gmra.mrb[18].mxu0 %vm223_vm1, %v4512_v22 }
 0x10f   : > { %5123 = vmatprep.mubr.msk.f32.mxu1 %vm223_vm1, %v4245_v23  ;;  %5323 = vmatprep.mubr.msk.f32.mxu0 %vm223_vm1, %v4513_v24 }
 0x112   : > { %5124 = vmatmul.mubr.msk.f32.gmra.mrb[20].mxu1 %vm223_vm1, %v4246_v25  ;;  %5324 = vmatmul.mubr.msk.f32.gmra.mrb[20].mxu0 %vm223_vm1, %v4514_v26 }
 0x113   : > { %5126 = vmatprep.mubr.msk.f32.mxu1 %vm223_vm1, %v4247_v27  ;;  %5326 = vmatprep.mubr.msk.f32.mxu0 %vm223_vm1, %v4515_v28 }
 0x116   : > { %5127 = vmatmul.mubr.msk.f32.gmra.mrb[22].mxu1 %vm223_vm1, %v4248_v29  ;;  %5327 = vmatmul.mubr.msk.f32.gmra.mrb[22].mxu0 %vm223_vm1, %v4516_v30 }
 0x117   : > { %5129 = vmatprep.mubr.msk.f32.mxu1 %vm223_vm1, %v4249_v31  ;;  %5329 = vmatprep.mubr.msk.f32.mxu0 %vm223_vm1, %v4517_v32 }
 0x11a   : > { %5130 = vmatmul.mubr.msk.f32.gmra.mrb[24].mxu1 %vm223_vm1, %v4250_v33  ;;  %5330 = vmatmul.mubr.msk.f32.gmra.mrb[24].mxu0 %vm223_vm1, %v4518_v34 }
 0x11b   : > { %5132 = vmatprep.mubr.msk.f32.mxu1 %vm223_vm1, %v4251_v35  ;;  %5332 = vmatprep.mubr.msk.f32.mxu0 %vm223_vm1, %v4519_v36 }
 0x11e   : > { %5133 = vmatmul.mubr.msk.f32.gmra.mrb[26].mxu1 %vm223_vm1, %v4252_v37  ;;  %5333 = vmatmul.mubr.msk.f32.gmra.mrb[26].mxu0 %vm223_vm1, %v4520_v38 }
 0x11f   : > { %5135 = vmatprep.mubr.msk.f32.mxu1 %vm223_vm1, %v4253_v39  ;;  %5335 = vmatprep.mubr.msk.f32.mxu0 %vm223_vm1, %v4521_v40 }
 0x122   : > { %5136 = vmatmul.mubr.msk.f32.gmra.mrb[28].mxu1 %vm223_vm1, %v4254_v41  ;;  %5336 = vmatmul.mubr.msk.f32.gmra.mrb[28].mxu0 %vm223_vm1, %v4522_v42 }
 0x123   : > { %5138 = vmatprep.mubr.msk.f32.mxu1 %vm223_vm1, %v4255_v45  ;;  %5338 = vmatprep.mubr.msk.f32.mxu0 %vm223_vm1, %v4523_v47 }
 0x126   : > { %5139 = vmatmul.mubr.msk.f32.gmra.mrb[30].mxu1 %vm223_vm1, %v4256_v43  ;;  %5339 = vmatmul.mubr.msk.f32.gmra.mrb[30].mxu0 %vm223_vm1, %v4524_v49 }
 0x19d   : > { %v5045_v44 = vpop.f32.mrb[0].mxu1 }
 0x19e   : > { %v1466_v46 = vpop.f32.mrb[1].mxu1 }
 0x1a1   : > { %v5048_v48 = vpop.f32.mrb[2].mxu1 }
 0x1a2   : > { %v1476_v1 = vpop.f32.mrb[3].mxu1 }
 0x1a5   : > { %v5051_v50 = vpop.f32.mrb[4].mxu1 }
 0x1a6   : > { %v1486_v51 = vpop.f32.mrb[5].mxu1 }
 0x1a9   : > { %v5054_v52 = vpop.f32.mrb[6].mxu1 }
 0x1aa   : > { %v1496_v53 = vpop.f32.mrb[7].mxu1 }
 0x1ad   : > { %v5057_v54 = vpop.f32.mrb[8].mxu1 }
 0x1ae   : > { %v1506_v55 = vpop.f32.mrb[9].mxu1 }
 0x1b1   : > { %v6603_v56 = vpop.f32.mrb[10].mxu1 }
 0x1b2   : > { %v6605_v57 = vpop.f32.mrb[11].mxu1 }
 0x1b5   : > { %v6607_v58 = vpop.f32.mrb[12].mxu1 }
 0x1b6   : > { %v6609_v59 = vpop.f32.mrb[13].mxu1 }
 0x1b9   : > { %v6611_v60 = vpop.f32.mrb[14].mxu1 }
 0x1ba   : > { %v6613_v61 = vpop.f32.mrb[15].mxu1 }
 0x1bd   : > { %v5295_v62 = vpop.f32.mrb[0].mxu0 }
 0x1be   : > { %v5343_v0 = vadd.f32 %v5295_v62, %v5045_v44  ;;  %v3426_v2 = vpop.f32.mrb[1].mxu0 }
 0x1bf   : > { %v5344_v3 = vadd.f32 %v3426_v2, %v1466_v46 }
 0x1c0   : > { %v6621_v4 = vadd.f32 %v5343_v0, %v6618_v63 }
 0x1c1   : > { %v6624_v5 = vadd.f32 %v5344_v3, %v6618_v63  ;;  %v5298_v6 = vpop.f32.mrb[2].mxu0 }
 0x1c2   : > { %v4561_v7 = vmul.f32 -1.442695, %v6621_v4  ;;  %v5345_v8 = vadd.f32 %v5298_v6, %v5048_v48  ;;  %v3436_v9 = vpop.f32.mrb[3].mxu0 }
 0x1c3   : > { %v4560_v10 = vmul.f32 -1.442695, %v6624_v5  ;;  %v5346_v11 = vadd.f32 %v3436_v9, %v1476_v1 }
 0x1c4   : > { %5607 = vpow2.f32 %v4561_v7  ;;  %v6629_v12 = vadd.f32 %v5345_v8, %v6618_v63 }
 0x1c5   : > { %5609 = vpow2.f32 %v4560_v10  ;;  %v6632_v13 = vadd.f32 %v5346_v11, %v6618_v63  ;;  %v5301_v14 = vpop.f32.mrb[4].mxu0 }
 0x1c6   : > { %v4563_v15 = vmul.f32 -1.442695, %v6629_v12  ;;  %v5347_v16 = vadd.f32 %v5301_v14, %v5051_v50  ;;  %v3446_v17 = vpop.f32.mrb[5].mxu0 }
 0x1c7   : > { %v4562_v18 = vmul.f32 -1.442695, %v6632_v13  ;;  %v5348_v19 = vadd.f32 %v3446_v17, %v1486_v51 }
 0x1c8   : > { %5611 = vpow2.f32 %v4563_v15  ;;  %v6637_v20 = vadd.f32 %v5347_v16, %v6618_v63 }
 0x1c9   : > { %5613 = vpow2.f32 %v4562_v18  ;;  %v6640_v21 = vadd.f32 %v5348_v19, %v6618_v63  ;;  %v5304_v22 = vpop.f32.mrb[6].mxu0 }
 0x1ca   : > { %v4565_v23 = vmul.f32 -1.442695, %v6637_v20  ;;  %v5349_v24 = vadd.f32 %v5304_v22, %v5054_v52  ;;  %v3456_v25 = vpop.f32.mrb[7].mxu0 }
 0x1cb   : > { %v4564_v26 = vmul.f32 -1.442695, %v6640_v21  ;;  %v5350_v27 = vadd.f32 %v3456_v25, %v1496_v53 }
 0x1cc   : > { %5615 = vpow2.f32 %v4565_v23  ;;  %v6645_v28 = vadd.f32 %v5349_v24, %v6618_v63 }
 0x1cd   : > { %5617 = vpow2.f32 %v4564_v26  ;;  %v6650_v29 = vadd.f32 %v5350_v27, %v6618_v63  ;;  %v5307_v30 = vpop.f32.mrb[8].mxu0 }
 0x1ce   : > { %v5608_v31 = vpop.eup %5607  ;;  %v4567_v32 = vmul.f32 -1.442695, %v6645_v28  ;;  %v5351_v33 = vadd.f32 %v5307_v30, %v5057_v54  ;;  %v3466_v34 = vpop.f32.mrb[9].mxu0 }
 0x1cf   : > { %v5610_v35 = vpop.eup %5609  ;;  %v3753_v36 = vadd.f32 1.0, %v5608_v31  ;;  %v4566_v37 = vmul.f32 -1.442695, %v6650_v29  ;;  %v5352_v38 = vadd.f32 %v3466_v34, %v1506_v55 }
 0x1d0   : > { %v3752_v39 = vadd.f32 1.0, %v5610_v35  ;;  %5619 = vpow2.f32 %v4567_v32  ;;  %v6655_v40 = vadd.f32 %v5351_v33, %v6618_v63 }
 0x1d1   : > { %5621 = vrcp.f32 %v3753_v36  ;;  %v6658_v41 = vadd.f32 %v5352_v38, %v6618_v63  ;;  %v5310_v42 = vpop.f32.mrb[10].mxu0 }
 0x1d2   : > { %v5612_v45 = vpop.eup %5611  ;;  %5623 = vrcp.f32 %v3752_v39  ;;  %v4569_v47 = vmul.f32 -1.442695, %v6655_v40  ;;  %v5353_v43 = vadd.f32 %v5310_v42, %v6603_v56  ;;  %v3476_v49 = vpop.f32.mrb[11].mxu0 }
 0x1d3   : > { %v5614_v44 = vpop.eup %5613  ;;  %v3755_v46 = vadd.f32 1.0, %v5612_v45  ;;  %5625 = vpow2.f32 %v4566_v37  ;;  %v4568_v48 = vmul.f32 -1.442695, %v6658_v41  ;;  %v5354_v1 = vadd.f32 %v3476_v49, %v6605_v57 }
 0x1d4   : > { %v3754_v50 = vadd.f32 1.0, %v5614_v44  ;;  %5627 = vpow2.f32 %v4569_v47  ;;  %v6668_v51 = vadd.f32 %v5353_v43, %v6618_v63 }
 0x1d5   : > { %5629 = vrcp.f32 %v3755_v46  ;;  %v6671_v52 = vadd.f32 %v5354_v1, %v6618_v63  ;;  %v5313_v53 = vpop.f32.mrb[12].mxu0 }
 0x1d6   : > { %v5616_v54 = vpop.eup %5615  ;;  %5631 = vrcp.f32 %v3754_v50  ;;  %v4571_v55 = vmul.f32 -1.442695, %v6668_v51  ;;  %v5355_v56 = vadd.f32 %v5313_v53, %v6607_v58  ;;  %v3486_v57 = vpop.f32.mrb[13].mxu0 }
 0x1d7   : > { %v5618_v62 = vpop.eup %5617  ;;  %v3757_v0 = vadd.f32 1.0, %v5616_v54  ;;  %5633 = vpow2.f32 %v4568_v48  ;;  %v4570_v2 = vmul.f32 -1.442695, %v6671_v52  ;;  %v5356_v3 = vadd.f32 %v3486_v57, %v6609_v59 }
 0x1d8   : > { %v3756_v6 = vadd.f32 1.0, %v5618_v62  ;;  %5635 = vpow2.f32 %v4571_v55  ;;  %v6679_v7 = vadd.f32 %v5355_v56, %v6618_v63 }
 0x1d9   : > { %5637 = vrcp.f32 %v3757_v0  ;;  %v6682_v8 = vadd.f32 %v5356_v3, %v6618_v63  ;;  %v5316_v9 = vpop.f32.mrb[14].mxu0 }
 0x1da   : > { %v5620_v58 = vpop.eup %5619  ;;  %5639 = vrcp.f32 %v3756_v6  ;;  %v4573_v10 = vmul.f32 -1.442695, %v6679_v7  ;;  %v5357_v11 = vadd.f32 %v5316_v9, %v6611_v60  ;;  %v3496_v14 = vpop.f32.mrb[15].mxu0 }
 0x1db   : > { %v5622_v59 = vpop.eup %5621  ;;  %v3759_v15 = vadd.f32 1.0, %v5620_v58  ;;  %5641 = vpow2.f32 %v4570_v2  ;;  %v4572_v16 = vmul.f32 -1.442695, %v6682_v8  ;;  %v5358_v17 = vadd.f32 %v3496_v14, %v6613_v61 }
 0x1dc   : > { %v5624_v18 = vpop.eup %5623  ;;  %v3849_v19 = vmul.f32 %v5622_v59, %v6621_v4  ;;  %5643 = vpow2.f32 %v4573_v10  ;;  %v6695_v60 = vadd.f32 %v5357_v11, %v6618_v63 }
 0x1dd   : > { %v5626_v22 = vpop.eup %5625  ;;  %v3848_v23 = vmul.f32 %v5624_v18, %v6624_v5  ;;  %5645 = vrcp.f32 %v3759_v15  ;;  %v6699_v24 = vadd.f32 %v5358_v17, %v6618_v63  ;;  %v5119_v25 = vpop.f32.mrb[16].mxu1 }
 0x1de   : > { %v5319_v26 = vpop.f32.mrb[16].mxu0  ;;  %v5628_v27 = vpop.eup %5627  ;;  %3882 = vst.msk [vmem:[%s6689_s16 + $0x8] sm:$0xff] %vm3880_vm2, %v3849_v19  ;;  %v3758_v61 = vadd.f32 1.0, %v5626_v22  ;;  %5647 = vpow2.f32 %v4572_v16  ;;  %v4575_v4 = vmul.f32 -1.442695, %v6695_v60 }
 0x1df   : > { %v5359_v30 = vadd.f32 %v5319_v26, %v5119_v25  ;;  %v1938_v31 = vpop.f32.mrb[17].mxu1  ;;  %v3506_v32 = vpop.f32.mrb[17].mxu0  ;;  %3881 = vst.msk [vmem:[%s6689_s16] sm:$0xff] %vm3880_vm2, %v3848_v23  ;;  %v3761_v5 = vadd.f32 1.0, %v5628_v27  ;;  %v4574_v34 = vmul.f32 -1.442695, %v6699_v24 }
 0x1e0   : > { %v5630_v33 = vpop.eup %5629  ;;  %v5360_v35 = vadd.f32 %v3506_v32, %v1938_v31  ;;  %5649 = vrcp.f32 %v3758_v61 }
 0x1e1   : > { %v5632_v36 = vpop.eup %5631  ;;  %v3851_v37 = vmul.f32 %v5630_v33, %v6629_v12  ;;  %v6709_v38 = vadd.f32 %v5359_v30, %v6618_v63  ;;  %5651 = vrcp.f32 %v3761_v5  ;;  %v5122_v47 = vpop.f32.mrb[18].mxu1 }
 0x1e2   : > { %v5634_v39 = vpop.eup %5633  ;;  %v3850_v42 = vmul.f32 %v5632_v36, %v6632_v13  ;;  %v6713_v45 = vadd.f32 %v5360_v35, %v6618_v63  ;;  %v5322_v43 = vpop.f32.mrb[18].mxu0  ;;  %5653 = vpow2.f32 %v4575_v4 }
 0x1e3   : > { %v5636_v49 = vpop.eup %5635  ;;  %3884 = vst.msk [vmem:[%s6689_s16 + $0x18] sm:$0xff] %vm3880_vm2, %v3851_v37  ;;  %v3760_v44 = vadd.f32 1.0, %v5634_v39  ;;  %v4577_v12 = vmul.f32 -1.442695, %v6709_v38  ;;  %v5361_v46 = vadd.f32 %v5322_v43, %v5122_v47  ;;  %v1948_v48 = vpop.f32.mrb[19].mxu1  ;;  %5655 = vpow2.f32 %v4574_v34 }
 0x1e4   : > { %v3516_v1 = vpop.f32.mrb[19].mxu0  ;;  %v5638_v50 = vpop.eup %5637  ;;  %3883 = vst.msk [vmem:[%s6689_s16 + $0x10] sm:$0xff] %vm3880_vm2, %v3850_v42  ;;  %v3763_v13 = vadd.f32 1.0, %v5636_v49  ;;  %v4576_v53 = vmul.f32 -1.442695, %v6713_v45 }
 0x1e5   : > { %v5362_v54 = vadd.f32 %v3516_v1, %v1948_v48  ;;  %v5640_v55 = vpop.eup %5639  ;;  %v3853_v56 = vmul.f32 %v5638_v50, %v6637_v20  ;;  %5657 = vrcp.f32 %v3760_v44  ;;  %v6723_v57 = vadd.f32 %v5361_v46, %v6618_v63  ;;  %v5125_v3 = vpop.f32.mrb[20].mxu1 }
 0x1e6   : > { %v5642_v62 = vpop.eup %5641  ;;  %v3852_v0 = vmul.f32 %v5640_v55, %v6640_v21  ;;  %5659 = vrcp.f32 %v3763_v13  ;;  %v5325_v6 = vpop.f32.mrb[20].mxu0 }
 0x1e7   : > { %v6727_v2 = vadd.f32 %v5362_v54, %v6618_v63  ;;  %v5644_v9 = vpop.eup %5643  ;;  %3886 = vst.msk [vmem:[%s6689_s16 + $0x28] sm:$0xff] %vm3880_vm2, %v3853_v56  ;;  %v3762_v58 = vadd.f32 1.0, %v5642_v62  ;;  %5661 = vpow2.f32 %v4577_v12  ;;  %v4579_v20 = vmul.f32 -1.442695, %v6723_v57  ;;  %v1958_v11 = vpop.f32.mrb[21].mxu1 }
 0x1e8   : > { %v5363_v10 = vadd.f32 %v5325_v6, %v5125_v3  ;;  %v3526_v14 = vpop.f32.mrb[21].mxu0  ;;  %v5646_v59 = vpop.eup %5645  ;;  %3885 = vst.msk [vmem:[%s6689_s16 + $0x20] sm:$0xff] %vm3880_vm2, %v3852_v0  ;;  %v3765_v21 = vadd.f32 1.0, %v5644_v9  ;;  %5663 = vpow2.f32 %v4576_v53 }
 0x1e9   : > { %v5364_v15 = vadd.f32 %v3526_v14, %v1958_v11  ;;  %v5648_v16 = vpop.eup %5647  ;;  %v3855_v17 = vmul.f32 %v5646_v59, %v6645_v28  ;;  %5665 = vrcp.f32 %v3762_v58  ;;  %v4578_v18 = vmul.f32 -1.442695, %v6727_v2  ;;  %v5128_v25 = vpop.f32.mrb[22].mxu1 }
 0x1ea   : > { %v6737_v19 = vadd.f32 %v5363_v10, %v6618_v63  ;;  %5667 = vrcp.f32 %v3765_v21  ;;  %v3764_v22 = vadd.f32 1.0, %v5648_v16  ;;  %v5328_v26 = vpop.f32.mrb[22].mxu0  ;;  %v5650_v27 = vpop.eup %5649 }
 0x1eb   : > { %v6740_v23 = vadd.f32 %v5364_v15, %v6618_v63  ;;  %3888 = vst.msk [vmem:[%s6689_s16 + $0x38] sm:$0xff] %vm3880_vm2, %v3855_v17  ;;  %5669 = vpow2.f32 %v4579_v20  ;;  %v5365_v61 = vadd.f32 %v5328_v26, %v5128_v25  ;;  %v1968_v4 = vpop.f32.mrb[23].mxu1  ;;  %v3536_v30 = vpop.f32.mrb[23].mxu0  ;;  %v3854_v32 = vmul.f32 %v5650_v27, %v6650_v29 }
 0x1ec   : > { %v4581_v28 = vmul.f32 -1.442695, %v6737_v19  ;;  %v5652_v31 = vpop.eup %5651  ;;  %5671 = vrcp.f32 %v3764_v22  ;;  %v5366_v5 = vadd.f32 %v3536_v30, %v1968_v4 }
 0x1ed   : > { %v4580_v33 = vmul.f32 -1.442695, %v6740_v23  ;;  %v5654_v34 = vpop.eup %5653  ;;  %v3857_v35 = vmul.f32 %v5652_v31, %v6655_v40  ;;  %5673 = vpow2.f32 %v4578_v18  ;;  %v6749_v36 = vadd.f32 %v5365_v61, %v6618_v63  ;;  %3887 = vst.msk [vmem:[%s6689_s16 + $0x30] sm:$0xff] %vm3880_vm2, %v3854_v32  ;;  %v5131_v29 = vpop.f32.mrb[24].mxu1 }
 0x1ee   : > { %v5656_v37 = vpop.eup %5655  ;;  %v3767_v39 = vadd.f32 1.0, %v5654_v34  ;;  %5675 = vpow2.f32 %v4581_v28  ;;  %v6754_v42 = vadd.f32 %v5366_v5, %v6618_v63  ;;  %v5331_v47 = vpop.f32.mrb[24].mxu0 }
 0x1ef   : > { %v5658_v43 = vpop.eup %5657  ;;  %3890 = vst.msk [vmem:[%s6689_s16 + $0x48] sm:$0xff] %vm3880_vm2, %v3857_v35  ;;  %v3766_v49 = vadd.f32 1.0, %v5656_v37  ;;  %5677 = vpow2.f32 %v4580_v33  ;;  %v4583_v40 = vmul.f32 -1.442695, %v6749_v36  ;;  %v5367_v44 = vadd.f32 %v5331_v47, %v5131_v29  ;;  %v1978_v12 = vpop.f32.mrb[25].mxu1 }
 0x1f0   : > { %v3546_v46 = vpop.f32.mrb[25].mxu0  ;;  %v5660_v48 = vpop.eup %5659  ;;  %v3856_v1 = vmul.f32 %v5658_v43, %v6658_v41  ;;  %5679 = vrcp.f32 %v3767_v39  ;;  %v4582_v50 = vmul.f32 -1.442695, %v6754_v42 }
 0x1f1   : > { %v5368_v13 = vadd.f32 %v3546_v46, %v1978_v12  ;;  %v5662_v53 = vpop.eup %5661  ;;  %v3859_v54 = vmul.f32 %v5660_v48, %v6668_v51  ;;  %5681 = vrcp.f32 %v3766_v49  ;;  %v6763_v55 = vadd.f32 %v5367_v44, %v6618_v63  ;;  %v5134_v41 = vpop.f32.mrb[26].mxu1 }
 0x1f2   : > { %v5664_v56 = vpop.eup %5663  ;;  %3889 = vst.msk [vmem:[%s6689_s16 + $0x40] sm:$0xff] %vm3880_vm2, %v3856_v1  ;;  %v3769_v62 = vadd.f32 1.0, %v5662_v53  ;;  %5683 = vpow2.f32 %v4583_v40  ;;  %v5334_v3 = vpop.f32.mrb[26].mxu0 }
 0x1f3   : > { %v6768_v0 = vadd.f32 %v5368_v13, %v6618_v63  ;;  %v5666_v6 = vpop.eup %5665  ;;  %3892 = vst.msk [vmem:[%s6689_s16 + $0x58] sm:$0xff] %vm3880_vm2, %v3859_v54  ;;  %v3768_v9 = vadd.f32 1.0, %v5664_v56  ;;  %5685 = vpow2.f32 %v4582_v50  ;;  %v4585_v51 = vmul.f32 -1.442695, %v6763_v55  ;;  %v1988_v20 = vpop.f32.mrb[27].mxu1 }
 0x1f4   : > { %v5369_v58 = vadd.f32 %v5334_v3, %v5134_v41  ;;  %v3556_v10 = vpop.f32.mrb[27].mxu0  ;;  %v5668_v11 = vpop.eup %5667  ;;  %v3858_v14 = vmul.f32 %v5666_v6, %v6671_v52  ;;  %5687 = vrcp.f32 %v3769_v62 }
 0x1f5   : > { %v4584_v59 = vmul.f32 -1.442695, %v6768_v0  ;;  %v5370_v21 = vadd.f32 %v3556_v10, %v1988_v20  ;;  %v5670_v15 = vpop.eup %5669  ;;  %v3861_v16 = vmul.f32 %v5668_v11, %v6679_v7  ;;  %5689 = vrcp.f32 %v3768_v9  ;;  %v5137_v52 = vpop.f32.mrb[28].mxu1 }
 0x1f6   : > { %v6777_v17 = vadd.f32 %v5369_v58, %v6618_v63  ;;  %v5672_v18 = vpop.eup %5671  ;;  %3891 = vst.msk [vmem:[%s6689_s16 + $0x50] sm:$0xff] %vm3880_vm2, %v3858_v14  ;;  %v3771_v22 = vadd.f32 1.0, %v5670_v15  ;;  %5691 = vpow2.f32 %v4585_v51  ;;  %v5337_v26 = vpop.f32.mrb[28].mxu0 }
 0x1f7   : > { %v6782_v25 = vadd.f32 %v5370_v21, %v6618_v63  ;;  %v5674_v27 = vpop.eup %5673  ;;  %3894 = vst.msk [vmem:[%s6689_s16 + $0x68] sm:$0xff] %vm3880_vm2, %v3861_v16  ;;  %v3860_v7 = vmul.f32 %v5672_v18, %v6682_v8  ;;  %5693 = vpow2.f32 %v4584_v59  ;;  %v5371_v61 = vadd.f32 %v5337_v26, %v5137_v52  ;;  %v1998_v4 = vpop.f32.mrb[29].mxu1 }
 0x1f8   : > { %v4587_v28 = vmul.f32 -1.442695, %v6777_v17  ;;  %v3566_v30 = vpop.f32.mrb[29].mxu0  ;;  %v5676_v31 = vpop.eup %5675  ;;  %5695 = vrcp.f32 %v3771_v22  ;;  %v3770_v32 = vadd.f32 1.0, %v5674_v27 }
 0x1f9   : > { %v5372_v33 = vadd.f32 %v3566_v30, %v1998_v4  ;;  %v5678_v5 = vpop.eup %5677  ;;  %3893 = vst.msk [vmem:[%s6689_s16 + $0x60] sm:$0xff] %vm3880_vm2, %v3860_v7  ;;  %v3773_v34 = vadd.f32 1.0, %v5676_v31  ;;  %v4586_v35 = vmul.f32 -1.442695, %v6782_v25  ;;  %v6792_v37 = vadd.f32 %v5371_v61, %v6618_v63  ;;  %v5140_v47 = vpop.f32.mrb[30].mxu1 }
 0x1fa   : > { %5697 = vpow2.f32 %v4587_v28  ;;  %v5680_v8 = vpop.eup %5679  ;;  %v3772_v39 = vadd.f32 1.0, %v5678_v5  ;;  %v5340_v43 = vpop.f32.mrb[30].mxu0 }
 0x1fb   : > { %5699 = vrcp.f32 %v3770_v32  ;;  %v6795_v29 = vadd.f32 %v5372_v33, %v6618_v63  ;;  %v5682_v49 = vpop.eup %5681  ;;  %v3863_v40 = vmul.f32 %v5680_v8, %v6695_v60  ;;  %v4589_v44 = vmul.f32 -1.442695, %v6792_v37  ;;  %v2008_v46 = vpop.f32.mrb[31].mxu1 }
 0x1fc   : > { %5701 = vrcp.f32 %v3773_v34  ;;  %v5373_v12 = vadd.f32 %v5340_v43, %v5140_v47  ;;  %v3576_v48 = vpop.f32.mrb[31].mxu0  ;;  %v5684_v1 = vpop.eup %5683  ;;  %v3862_v50 = vmul.f32 %v5682_v49, %v6699_v24 }
 0x1fd   : > { %5703 = vrcp.f32 %v3772_v39  ;;  %v5374_v13 = vadd.f32 %v3576_v48, %v2008_v46  ;;  %v5686_v53 = vpop.eup %5685  ;;  %3896 = vst.msk [vmem:[%s6689_s16 + $0x78] sm:$0xff] %vm3880_vm2, %v3863_v40  ;;  %v3775_v54 = vadd.f32 1.0, %v5684_v1  ;;  %v4588_v60 = vmul.f32 -1.442695, %v6795_v29 }
 0x1fe   : > { %5705 = vpow2.f32 %v4586_v35  ;;  %v6804_v56 = vadd.f32 %v5373_v12, %v6618_v63  ;;  %v5688_v62 = vpop.eup %5687  ;;  %3895 = vst.msk [vmem:[%s6689_s16 + $0x70] sm:$0xff] %vm3880_vm2, %v3862_v50  ;;  %v3774_v41 = vadd.f32 1.0, %v5686_v53 }
 0x1ff   : > { %5707 = vpow2.f32 %v4589_v44  ;;  %v6809_v24 = vadd.f32 %v5374_v13, %v6618_v63  ;;  %v5690_v3 = vpop.eup %5689  ;;  %v3865_v6 = vmul.f32 %v5688_v62, %v6709_v38 }
 0x200   : > { %5709 = vrcp.f32 %v3775_v54  ;;  %v4591_v9 = vmul.f32 -1.442695, %v6804_v56  ;;  %v5692_v51 = vpop.eup %5691  ;;  %v3864_v58 = vmul.f32 %v5690_v3, %v6713_v45 }
 0x201   : > { %5711 = vrcp.f32 %v3774_v41  ;;  %v5694_v20 = vpop.eup %5693  ;;  %3898 = vst.msk [vmem:[%s6689_s16 + $0x88] sm:$0xff] %vm3880_vm2, %v3865_v6  ;;  %v3777_v10 = vadd.f32 1.0, %v5692_v51  ;;  %v4590_v11 = vmul.f32 -1.442695, %v6809_v24 }
 0x202   : > { %5713 = vpow2.f32 %v4588_v60  ;;  %v5696_v63 = vpop.eup %5695  ;;  %3897 = vst.msk [vmem:[%s6689_s16 + $0x80] sm:$0xff] %vm3880_vm2, %v3864_v58  ;;  %v3776_v14 = vadd.f32 1.0, %v5694_v20 }
 0x203   : > { %5715 = vpow2.f32 %v4591_v9  ;;  %v3867_v59 = vmul.f32 %v5696_v63, %v6723_v57 }
 0x204   : > { %v5698_v38 = vpop.eup %5697  ;;  %5717 = vrcp.f32 %v3777_v10 }
 0x205   : > { %v5700_v45 = vpop.eup %5699  ;;  %5719 = vrcp.f32 %v3776_v14  ;;  %v3779_v21 = vadd.f32 1.0, %v5698_v38  ;;  %3900 = vst.msk [vmem:[%s6689_s16 + $0x98] sm:$0xff] %vm3880_vm2, %v3867_v59 }
 0x206   : > { %v5702_v15 = vpop.eup %5701  ;;  %v3866_v16 = vmul.f32 %v5700_v45, %v6727_v2  ;;  %5721 = vpow2.f32 %v4590_v11 }
 0x207   : > { %v5704_v18 = vpop.eup %5703  ;;  %v3869_v22 = vmul.f32 %v5702_v15, %v6737_v19  ;;  %5723 = vrcp.f32 %v3779_v21 }
 0x208   : > { %v5706_v52 = vpop.eup %5705  ;;  %3899 = vst.msk [vmem:[%s6689_s16 + $0x90] sm:$0xff] %vm3880_vm2, %v3866_v16  ;;  %v3868_v57 = vmul.f32 %v5704_v18, %v6740_v23 }
 0x209   : > { %v5708_v26 = vpop.eup %5707  ;;  %3902 = vst.msk [vmem:[%s6689_s16 + $0xa8] sm:$0xff] %vm3880_vm2, %v3869_v22  ;;  %v3778_v27 = vadd.f32 1.0, %v5706_v52 }
 0x20a   : > { %v5710_v7 = vpop.eup %5709  ;;  %3901 = vst.msk [vmem:[%s6689_s16 + $0xa0] sm:$0xff] %vm3880_vm2, %v3868_v57  ;;  %v3781_v2 = vadd.f32 1.0, %v5708_v26 }
 0x20b   : > { %v5712_v28 = vpop.eup %5711  ;;  %v3871_v61 = vmul.f32 %v5710_v7, %v6749_v36  ;;  %5725 = vrcp.f32 %v3778_v27 }
 0x20c   : > { %v5714_v19 = vpop.eup %5713  ;;  %v3870_v4 = vmul.f32 %v5712_v28, %v6754_v42  ;;  %5727 = vrcp.f32 %v3781_v2 }
 0x20d   : > { %v5716_v23 = vpop.eup %5715  ;;  %3904 = vst.msk [vmem:[%s6689_s16 + $0xb8] sm:$0xff] %vm3880_vm2, %v3871_v61  ;;  %v3780_v30 = vadd.f32 1.0, %v5714_v19 }
 0x20e   : > { %v5718_v31 = vpop.eup %5717  ;;  %3903 = vst.msk [vmem:[%s6689_s16 + $0xb0] sm:$0xff] %vm3880_vm2, %v3870_v4  ;;  %v3783_v32 = vadd.f32 1.0, %v5716_v23 }
 0x20f   : > { %v5720_v33 = vpop.eup %5719  ;;  %v3873_v5 = vmul.f32 %v5718_v31, %v6763_v55  ;;  %5729 = vrcp.f32 %v3780_v30 }
 0x210   : > { %v5722_v36 = vpop.eup %5721  ;;  %v3872_v42 = vmul.f32 %v5720_v33, %v6768_v0  ;;  %5731 = vrcp.f32 %v3783_v32 }
 0x211   : > { %v5724_v34 = vpop.eup %5723  ;;  %3906 = vst.msk [vmem:[%s6689_s16 + $0xc8] sm:$0xff] %vm3880_vm2, %v3873_v5  ;;  %v3782_v35 = vadd.f32 1.0, %v5722_v36 }
 0x212   : > { %3905 = vst.msk [vmem:[%s6689_s16 + $0xc0] sm:$0xff] %vm3880_vm2, %v3872_v42  ;;  %v3875_v8 = vmul.f32 %v5724_v34, %v6777_v17 }
 0x213   : > { %5733 = vrcp.f32 %v3782_v35 }
 0x214   : > { %3908 = vst.msk [vmem:[%s6689_s16 + $0xd8] sm:$0xff] %vm3880_vm2, %v3875_v8 }
 0x215   : > { %v5726_v55 = vpop.eup %5725 }
 0x216   : > { %v5728_v39 = vpop.eup %5727  ;;  %v3874_v47 = vmul.f32 %v5726_v55, %v6782_v25 }
 0x217   : > { %v3877_v0 = vmul.f32 %v5728_v39, %v6792_v37 }
 0x218   : > { %3907 = vst.msk [vmem:[%s6689_s16 + $0xd0] sm:$0xff] %vm3880_vm2, %v3874_v47 }
 0x219   : > { %v5730_v43 = vpop.eup %5729  ;;  %3910 = vst.msk [vmem:[%s6689_s16 + $0xe8] sm:$0xff] %vm3880_vm2, %v3877_v0 }
 0x21a   : > { %v5732_v49 = vpop.eup %5731  ;;  %v3876_v40 = vmul.f32 %v5730_v43, %v6795_v29 }
 0x21b   : > { %v3879_v17 = vmul.f32 %v5732_v49, %v6804_v56 }
 0x21c   : > { %3909 = vst.msk [vmem:[%s6689_s16 + $0xe0] sm:$0xff] %vm3880_vm2, %v3876_v40 }
 0x21d   : > { %v5734_v44 = vpop.eup %5733  ;;  %3912 = vst.msk [vmem:[%s6689_s16 + $0xf8] sm:$0xff] %vm3880_vm2, %v3879_v17 }
 0x21e   : > { %v3878_v12 = vmul.f32 %v5734_v44, %v6809_v24 }
 0x220   : > { %3911 = vst.msk [vmem:[%s6689_s16 + $0xf0] sm:$0xff] %vm3880_vm2, %v3878_v12 }
 0x221 PF: > { %s13_s12 = sadd.s32 1, %s5741_s12  }
 0x222   : > { %p10_p4 = scmp.ge.s32.totalorder %s13_s12, 5  }
 0x224   :  { %12 = sbr.rel (!%p10_p4) target bundleno = 1 (0x1), region = 76 }

// kernel: vae_forward.9
= control target key start
LH: loop header
LB: loop body
LE: loop exit
PB: predicated region body
PF: predicated region fallthrough
CT: control target
= control target key end

     0   :  { %s5854_s13 = smov 0   ;;  %s8202_s0 = inlined_call_operand.vmem [shape: f32[230,32], index: 0, kind: input, shape index: {}]   ;;  %s8203_s1 = inlined_call_operand.vmem [shape: f32[9,32,4], index: 1, kind: input, shape index: {}]   ;;  %s8204_s2 = inlined_call_operand.vmem [shape: f32[9,32,4], index: 2, kind: input, shape index: {}]   ;;  %s8205_s3 = inlined_call_operand.vmem [shape: f32[1,4], index: 3, kind: input, shape index: {}]   ;;  %s8206_s4 = inlined_call_operand.vmem [shape: f32[1,4], index: 4, kind: input, shape index: {}]   ;;  %s8207_s5 = inlined_call_operand.vmem [shape: f32[208,4], index: 5, kind: input, shape index: {}]   ;;  %s8208_s6 = inlined_call_operand.vmem [shape: f32[4,4], index: 6, kind: input, shape index: {}]   ;;  %s8209_s7 = inlined_call_operand.vmem [shape: f32[1,4], index: 7, kind: input, shape index: {}]   ;;  %s8210_s8 = inlined_call_operand.vmem [shape: f32[208,4], index: 8, kind: output, shape index: {0}]   ;;  %s8211_s9 = inlined_call_operand.vmem [shape: f32[208,4], index: 9, kind: output, shape index: {1}]   ;;  %s8212_s10 = inlined_call_operand.vmem [shape: f32[208,4], index: 10, kind: output, shape index: {2}]  }
   0x1 LB: > { %s4002_s14 = sadd.s32 4294967295, %s5794_s13   ;;  %p4006_p0 = scmp.ge.s32.totalorder %s5794_s13, 1  ;;  %s5794_s13 = sphi %s5854_s13, %s21_s13  }
   0x2   : > { %p318_p1 = scmp.lt.s32.totalorder %s5794_s13, 3 }
   0x4   : > { %p319_p2 = pnand %p4006_p0, %p318_p1 }
   0x5   : > { %v4024_v0 = vld [vmem:[%s8203_s1 + $0x20] sm:$0xff] (!%p319_p2)  ;;  %v4025_v1 = vld [vmem:[%s8203_s1 + $0x28] sm:$0xff] (!%p319_p2)  ;;  %v4026_v2 = vld [vmem:[%s8203_s1 + $0x30] sm:$0xff] (!%p319_p2)  ;;  %v5796_v3 = vmov (!%p319_p2), 0.0|0.0   ;;  %s390_s23 = smul.u32 (!%p319_p2), 104, %s4002_s14  ;;  %vm5797_vm0 = vmmov (!%p319_p2), 0  }
   0x6   : > { %322 = sbr.rel (%p319_p2) target bundleno = 957 (0x3bd), region = 52  ;;  %5639 = vmatprep.subr.bf16.mxu0 (!%p319_p2), %v5796_v3  ;;  %5747 = vmatprep.subr.bf16.mxu1 (!%p319_p2), %v5796_v3  ;;  %v5640_v4 = vpack.c.bf16 (!%p319_p2), %v4025_v1, %v4024_v0  ;;  %v4027_v5 = vld [vmem:[%s8203_s1 + $0x38] sm:$0xff] (!%p319_p2)  ;;  %v5798_v6 = vmov (!%p319_p2), 0.0   ;;  %v405_v8 = vld [vmem:[%s8203_s1] sm:$0xff] (!%p319_p2)  ;;  %v406_v9 = vld [vmem:[%s8203_s1 + $0x8] sm:$0xff] (!%p319_p2)  ;;  %vm433_vm1 = vcmask (!%p319_p2), 261120  }
   0x7   : > { %4760 = vmatprep.mubr.msk.f32.mxu0 (!%p319_p2), %vm5797_vm0, %v5798_v6  ;;  %4781 = vmatprep.mubr.msk.f32.mxu1 (!%p319_p2), %vm5797_vm0, %v5798_v6  ;;  %v5643_v7 = vpack.c.bf16 (!%p319_p2), %v4027_v5, %v4026_v2  ;;  %s5887_s26 = scalar_lea.vmem (!%p319_p2), %s8202_s0, %s390_s23  ;;  %v4054_v10 = vld [vmem:[%s8204_s2 + $0x20] sm:$0xff] (!%p319_p2)  ;;  %v4055_v11 = vld [vmem:[%s8204_s2 + $0x28] sm:$0xff] (!%p319_p2)  ;;  %v5646_v14 = vpack.c.bf16 (!%p319_p2), %v406_v9, %v405_v8  ;;  %v407_v15 = vld [vmem:[%s8203_s1 + $0x10] sm:$0xff] (!%p319_p2)  ;;  %vm3705_vm2 = vcmask (!%p319_p2), 1043456   ;;  %s366_s28 = smul.u32 (!%p319_p2), 13, %s4002_s14  ;;  %vm3527_vm3 = vcmask (!%p319_p2), 31744  }
   0x8   : > { %5641 = vmatpush3.bf16.msra.mxu0 (!%p319_p2), %v5640_v4  ;;  %5749 = vmatpush3.bf16.msra.mxu1 (!%p319_p2), %v5640_v4  ;;  %v5902_v12 = vld [vmem:[%s5887_s26 + $0x1] sm:$0xff] (!%p319_p2)  ;;  %v5905_v13 = vld [vmem:[%s5887_s26 + $0x39] sm:$0xff] (!%p319_p2)  ;;  %v5652_v17 = vpack.c.bf16 (!%p319_p2), %v4055_v11, %v4054_v10  ;;  %v4056_v18 = vld [vmem:[%s8204_s2 + $0x30] sm:$0xff] (!%p319_p2) }
   0x9   : > { %5642 = vmatprep.subr.bf16.mxu0 (!%p319_p2), %v5796_v3  ;;  %5748 = vmatprep.subr.bf16.mxu1 (!%p319_p2), %v5796_v3  ;;  %v408_v16 = vld [vmem:[%s8203_s1 + $0x18] sm:$0xff] (!%p319_p2)  ;;  %v5928_v20 = vld [vmem:[%s5887_s26 + $0x9] sm:$0xff] (!%p319_p2)  ;;  %v5931_v21 = vld [vmem:[%s5887_s26 + $0x41] sm:$0xff] (!%p319_p2)  ;;  %p367_p3 = scmp.lt.s32.totalorder (!%p319_p2), %s366_s28, 25 }
   0xa   : > { %v4057_v19 = vld [vmem:[%s8204_s2 + $0x38] sm:$0xff] (!%p319_p2)  ;;  %v5649_v22 = vpack.c.bf16 (!%p319_p2), %v408_v16, %v407_v15  ;;  %v5948_v25 = vld [vmem:[%s5887_s26 + $0x49] sm:$0xff] (!%p319_p2)  ;;  %v4015_v28 = vld [vmem:[%s5887_s26 + $0x21] sm:$0xff] (!%p319_p2) }
   0xb   : > { %v5655_v23 = vpack.c.bf16 (!%p319_p2), %v4057_v19, %v4056_v18  ;;  %v5945_v24 = vld [vmem:[%s5887_s26 + $0x11] sm:$0xff] (!%p319_p2)  ;;  %v4014_v26 = vld [vmem:[%s5887_s26 + $0x19] sm:$0xff] (!%p319_p2)  ;;  %v4016_v30 = vld [vmem:[%s5887_s26 + $0x29] sm:$0xff] (!%p319_p2) }
   0xc   : > { %5644 = vmatpush3.bf16.msra.mxu0 (!%p319_p2), %v5643_v7  ;;  %5750 = vmatpush3.bf16.msra.mxu1 (!%p319_p2), %v5643_v7  ;;  %v5962_v27 = vld [vmem:[%s5887_s26 + $0x51] sm:$0xff] (!%p319_p2)  ;;  %v5974_v29 = vld [vmem:[%s5887_s26 + $0x59] sm:$0xff] (!%p319_p2)  ;;  %v5985_v31 = vld [vmem:[%s5887_s26 + $0x61] sm:$0xff] (!%p319_p2) }
   0xd   : > { %5645 = vmatprep.subr.bf16.mxu1 %v5796_v3  ;;  %5651 = vmatprep.subr.bf16.mxu0 %v5796_v3  ;;  %v409_v32 = vld [vmem:[%s8204_s2] sm:$0xff]  ;;  %v410_v33 = vld [vmem:[%s8204_s2 + $0x8] sm:$0xff]  ;;  %v4017_v34 = vld [vmem:[%s5887_s26 + $0x31] sm:$0xff]  ;;  %s8214_s28 = smov (!%p367_p3, %s366_s28), 25 }
   0xe   : > { %v6002_v35 = vld [vmem:[%s5887_s26] sm:$0xff]  ;;  %v5658_v36 = vpack.c.bf16 %v410_v33, %v409_v32  ;;  %v411_v37 = vld [vmem:[%s8204_s2 + $0x10] sm:$0xff]  ;;  %v412_v38 = vld [vmem:[%s8204_s2 + $0x18] sm:$0xff]  ;;  %s7892_s14 = sshll.u32 %s8214_s28, 3 }
   0xf   : > { %4761 = vmatmul.mubr.msk.f32.vlgmr.msra.gmra.mrb[0].mxu0 %vm433_vm1, %v5902_v12  ;;  %4782 = vmatmul.mubr.msk.f32.vlgmr.msra.gmra.mrb[0].mxu1 %vm433_vm1, %v5905_v13  ;;  %v4097_v39 = vld [vmem:[%s8203_s1 + $0x40] sm:$0xff]  ;;  %v4098_v40 = vld [vmem:[%s8203_s1 + $0x48] sm:$0xff]  ;;  %v5661_v42 = vpack.c.bf16 %v412_v38, %v411_v37  ;;  %v4099_v44 = vld [vmem:[%s8203_s1 + $0x50] sm:$0xff]  ;;  %s7907_s15 = scalar_lea.vmem %s8211_s9, %s7892_s14  ;;  %s8036_s20 = scalar_lea.vmem %s8212_s10, %s7892_s14 }
  0x10   : > { %5647 = vmatpush3.bf16.msra.mxu1 %v5646_v14  ;;  %4763 = vmatprep.mubr.msk.f32.mxu0 %vm5797_vm0, %v5798_v6  ;;  %v6022_v41 = vld [vmem:[%s5887_s26 + $0x8] sm:$0xff]  ;;  %v5664_v43 = vpack.c.bf16 %v4098_v40, %v4097_v39  ;;  %v4100_v45 = vld [vmem:[%s8203_s1 + $0x58] sm:$0xff]  ;;  %v6042_v46 = vld [vmem:[%s5887_s26 + $0x10] sm:$0xff]  ;;  %s8064_s23 = scalar_lea.vmem %s8207_s5, %s7892_s14  ;;  %s8171_s28 = scalar_lea.vmem %s8210_s8, %s7892_s14 }
  0x11   : > { %4784 = vmatprep.mubr.msk.f32.mxu1 %vm5797_vm0, %v5798_v6  ;;  %5648 = vmatprep.subr.bf16.mxu1 %v5796_v3  ;;  %v5667_v47 = vpack.c.bf16 %v4100_v45, %v4099_v44  ;;  %v6055_v48 = vld [vmem:[%s5887_s26 + $0x18] sm:$0xff]  ;;  %v6067_v49 = vld [vmem:[%s5887_s26 + $0x20] sm:$0xff]  ;;  %v6077_v50 = vld [vmem:[%s5887_s26 + $0x28] sm:$0xff] }
  0x12   : > { %5653 = vmatpush3.bf16.msra.mxu0 %v5652_v17  ;;  %v6087_v51 = vld [vmem:[%s5887_s26 + $0x30] sm:$0xff]  ;;  %v6097_v52 = vld [vmem:[%s5887_s26 + $0x38] sm:$0xff]  ;;  %v6107_v53 = vld [vmem:[%s5887_s26 + $0x40] sm:$0xff] }
  0x13   : > { %4764 = vmatmul.mubr.msk.f32.gmra.mrb[2].mxu0 %vm433_vm1, %v5928_v20  ;;  %4785 = vmatmul.mubr.msk.f32.gmra.mrb[2].mxu1 %vm433_vm1, %v5931_v21  ;;  %v6118_v54 = vld [vmem:[%s5887_s26 + $0x48] sm:$0xff]  ;;  %v6129_v55 = vld [vmem:[%s5887_s26 + $0x50] sm:$0xff]  ;;  %v6140_v56 = vld [vmem:[%s5887_s26 + $0x58] sm:$0xff] }
  0x14   : > { %4766 = vmatprep.mubr.msk.f32.mxu0 %vm5797_vm0, %v5798_v6  ;;  %4787 = vmatprep.mubr.msk.f32.mxu1 %vm5797_vm0, %v5798_v6  ;;  %v6151_v57 = vld [vmem:[%s5887_s26 + $0x60] sm:$0xff]  ;;  %v4115_v59 = vld [vmem:[%s8204_s2 + $0x48] sm:$0xff]  ;;  %v4116_v61 = vld [vmem:[%s8204_s2 + $0x50] sm:$0xff] }
  0x15   : > { %5650 = vmatpush3.bf16.msra.mxu1 %v5649_v22  ;;  %5654 = vmatprep.subr.bf16.mxu0 %v5796_v3  ;;  %v4114_v58 = vld [vmem:[%s8204_s2 + $0x40] sm:$0xff]  ;;  %v4117_v62 = vld [vmem:[%s8204_s2 + $0x58] sm:$0xff]  ;;  %v4145_v0 = vld [vmem:[%s8203_s1 + $0x68] sm:$0xff] }
  0x16   : > { %5657 = vmatprep.subr.bf16.mxu1 %v5796_v3  ;;  %5656 = vmatpush3.bf16.msra.mxu0 %v5655_v23  ;;  %v5670_v60 = vpack.c.bf16 %v4115_v59, %v4114_v58  ;;  %v4144_v63 = vld [vmem:[%s8203_s1 + $0x60] sm:$0xff]  ;;  %v5673_v2 = vpack.c.bf16 %v4117_v62, %v4116_v61  ;;  %v4146_v5 = vld [vmem:[%s8203_s1 + $0x70] sm:$0xff]  ;;  %v4147_v7 = vld [vmem:[%s8203_s1 + $0x78] sm:$0xff] }
  0x17   : > { %4767 = vmatmul.mubr.msk.f32.gmra.mrb[4].mxu0 %vm433_vm1, %v5945_v24  ;;  %4788 = vmatmul.mubr.msk.f32.gmra.mrb[4].mxu1 %vm433_vm1, %v5948_v25  ;;  %v6186_v1 = vld [vmem:[%s5887_s26 + $0x2] sm:$0xff]  ;;  %v5676_v4 = vpack.c.bf16 %v4145_v0, %v4144_v63  ;;  %v6206_v8 = vld [vmem:[%s5887_s26 + $0xa] sm:$0xff]  ;;  %v5679_v9 = vpack.c.bf16 %v4147_v7, %v4146_v5  ;;  %v6219_v10 = vld [vmem:[%s5887_s26 + $0x12] sm:$0xff] }
  0x18   : > { %4769 = vmatprep.mubr.msk.f32.mxu0 %vm5797_vm0, %v5798_v6  ;;  %4790 = vmatprep.mubr.msk.f32.mxu1 %vm5797_vm0, %v5798_v6  ;;  %v6231_v11 = vld [vmem:[%s5887_s26 + $0x1a] sm:$0xff]  ;;  %v6264_v14 = vld [vmem:[%s5887_s26 + $0x32] sm:$0xff]  ;;  %v6286_v16 = vld [vmem:[%s5887_s26 + $0x42] sm:$0xff] }
  0x19   : > { %5663 = vmatprep.subr.bf16.mxu0 %v5796_v3  ;;  %v6275_v15 = vld [vmem:[%s5887_s26 + $0x3a] sm:$0xff]  ;;  %v6297_v17 = vld [vmem:[%s5887_s26 + $0x4a] sm:$0xff]  ;;  %v6308_v18 = vld [vmem:[%s5887_s26 + $0x52] sm:$0xff] }
  0x1a   : > { %v6319_v19 = vld [vmem:[%s5887_s26 + $0x5a] sm:$0xff]  ;;  %v6336_v22 = vld [vmem:[%s5887_s26 + $0x62] sm:$0xff]  ;;  %v4210_v37 = vld [vmem:[%s8204_s2 + $0x90] sm:$0xff] }
  0x1b   : > { %4770 = vmatmul.mubr.msk.f32.gmra.mrb[6].mxu0 %vm433_vm1, %v4014_v26  ;;  %4791 = vmatmul.mubr.msk.f32.gmra.mrb[6].mxu1 %vm433_vm1, %v5962_v27  ;;  %v4208_v33 = vld [vmem:[%s8204_s2 + $0x80] sm:$0xff]  ;;  %v4211_v38 = vld [vmem:[%s8204_s2 + $0x98] sm:$0xff]  ;;  %v4239_v40 = vld [vmem:[%s8203_s1 + $0xa8] sm:$0xff] }
  0x1c   : > { %4772 = vmatprep.mubr.msk.f32.mxu0 %vm5797_vm0, %v5798_v6  ;;  %4793 = vmatprep.mubr.msk.f32.mxu1 %vm5797_vm0, %v5798_v6  ;;  %v4238_v39 = vld [vmem:[%s8203_s1 + $0xa0] sm:$0xff]  ;;  %v4240_v44 = vld [vmem:[%s8203_s1 + $0xb0] sm:$0xff]  ;;  %v4241_v45 = vld [vmem:[%s8203_s1 + $0xb8] sm:$0xff] }
  0x1d   : > { %v6596_v58 = vld [vmem:[%s5887_s26 + $0x4b] sm:$0xff]  ;;  %v6611_v63 = vld [vmem:[%s5887_s26 + $0x53] sm:$0xff]  ;;  %v6626_v5 = vld [vmem:[%s5887_s26 + $0x5b] sm:$0xff] }
  0x1f   : > { %4773 = vmatmul.mubr.msk.f32.gmra.mrb[8].mxu0 %vm433_vm1, %v4015_v28  ;;  %4794 = vmatmul.mubr.msk.f32.gmra.mrb[8].mxu1 %vm433_vm1, %v5974_v29 }
  0x20   : > { %4775 = vmatprep.mubr.msk.f32.mxu0 %vm5797_vm0, %v5798_v6  ;;  %4796 = vmatprep.mubr.msk.f32.mxu1 %vm5797_vm0, %v5798_v6 }
  0x23   : > { %4776 = vmatmul.mubr.msk.f32.gmra.mrb[10].mxu0 %vm433_vm1, %v4016_v30  ;;  %4797 = vmatmul.mubr.msk.f32.gmra.mrb[10].mxu1 %vm433_vm1, %v5985_v31 }
  0x24   : > { %4778 = vmatprep.mubr.msk.f32.mxu0 %vm5797_vm0, %v5798_v6  ;;  %4807 = vmatprep.mubr.msk.f32.mxu1 %vm5797_vm0, %v5798_v6 }
  0x27   : > { %4779 = vmatmul.mubr.msk.f32.gmra.mrb[12].mxu0 %vm433_vm1, %v4017_v34  ;;  %4808 = vmatmul.mubr.msk.f32.vlgmr.msra.gmra.mrb[12].mxu1 %vm433_vm1, %v6002_v35 }
  0x28   : > { %5659 = vmatpush3.bf16.msra.mxu1 %v5658_v36  ;;  %4810 = vmatprep.mubr.msk.f32.mxu1 %vm5797_vm0, %v5798_v6 }
  0x29   : > { %4854 = vmatprep.mubr.msk.f32.mxu0 %vm5797_vm0, %v5798_v6  ;;  %5660 = vmatprep.subr.bf16.mxu1 %v5796_v3 }
  0x2b   : > { %4811 = vmatmul.mubr.msk.f32.gmra.mrb[14].mxu1 %vm433_vm1, %v6022_v41  ;;  %4855 = vmatmul.mubr.msk.f32.vlgmr.msra.gmra.mrb[14].mxu0 %vm433_vm1, %v5902_v12  ;;  %v6242_v12 = vld [vmem:[%s5887_s26 + $0x22] sm:$0xff] }
  0x2c   : > { %4813 = vmatprep.mubr.msk.f32.mxu1 %vm5797_vm0, %v5798_v6  ;;  %4857 = vmatprep.mubr.msk.f32.mxu0 %vm5797_vm0, %v5798_v6 }
  0x2d   : > { %5662 = vmatpush3.bf16.msra.mxu1 %v5661_v42  ;;  %5665 = vmatpush3.bf16.msra.mxu0 %v5664_v43  ;;  %v5697_v42 = vpack.c.bf16 %v4211_v38, %v4210_v37  ;;  %v5700_v43 = vpack.c.bf16 %v4239_v40, %v4238_v39  ;;  %v6712_v38 = vld [vmem:[%s5887_s26 + $0x14] sm:$0xff] }
  0x2e   : > { %5666 = vmatprep.subr.bf16.mxu0 %v5796_v3  ;;  %5669 = vmatprep.subr.bf16.mxu1 %v5796_v3 }
  0x2f   : > { %4814 = vmatmul.mubr.msk.f32.gmra.mrb[16].mxu1 %vm433_vm1, %v6042_v46  ;;  %4858 = vmatmul.mubr.msk.f32.gmra.mrb[16].mxu0 %vm433_vm1, %v5928_v20  ;;  %v4161_v20 = vld [vmem:[%s8204_s2 + $0x60] sm:$0xff] }
  0x30   : > { %4816 = vmatprep.mubr.msk.f32.mxu1 %vm5797_vm0, %v5798_v6  ;;  %4860 = vmatprep.mubr.msk.f32.mxu0 %vm5797_vm0, %v5798_v6 }
  0x31   : > { %5668 = vmatpush3.bf16.msra.mxu0 %v5667_v47  ;;  %v5703_v47 = vpack.c.bf16 %v4241_v45, %v4240_v44  ;;  %v6730_v45 = vld [vmem:[%s5887_s26 + $0x1c] sm:$0xff] }
  0x32   : > { %5675 = vmatprep.subr.bf16.mxu0 %v5796_v3 }
  0x33   : > { %4817 = vmatmul.mubr.msk.f32.gmra.mrb[18].mxu1 %vm433_vm1, %v6055_v48  ;;  %4861 = vmatmul.mubr.msk.f32.gmra.mrb[18].mxu0 %vm433_vm1, %v5945_v24  ;;  %v4163_v24 = vld [vmem:[%s8204_s2 + $0x70] sm:$0xff] }
  0x34   : > { %4819 = vmatprep.mubr.msk.f32.mxu1 %vm5797_vm0, %v5798_v6  ;;  %4863 = vmatprep.mubr.msk.f32.mxu0 %vm5797_vm0, %v5798_v6 }
  0x37   : > { %4820 = vmatmul.mubr.msk.f32.gmra.mrb[20].mxu1 %vm433_vm1, %v6067_v49  ;;  %4864 = vmatmul.mubr.msk.f32.gmra.mrb[20].mxu0 %vm433_vm1, %v4014_v26  ;;  %v4191_v26 = vld [vmem:[%s8203_s1 + $0x80] sm:$0xff] }
  0x38   : > { %4822 = vmatprep.mubr.msk.f32.mxu1 %vm5797_vm0, %v5798_v6  ;;  %4866 = vmatprep.mubr.msk.f32.mxu0 %vm5797_vm0, %v5798_v6 }
  0x3b   : > { %4823 = vmatmul.mubr.msk.f32.gmra.mrb[22].mxu1 %vm433_vm1, %v6077_v50  ;;  %4867 = vmatmul.mubr.msk.f32.gmra.mrb[22].mxu0 %vm433_vm1, %v4015_v28 }
  0x3c   : > { %4825 = vmatprep.mubr.msk.f32.mxu1 %vm5797_vm0, %v5798_v6  ;;  %4869 = vmatprep.mubr.msk.f32.mxu0 %vm5797_vm0, %v5798_v6 }
  0x3f   : > { %4826 = vmatmul.mubr.msk.f32.gmra.mrb[24].mxu1 %vm433_vm1, %v6087_v51  ;;  %4870 = vmatmul.mubr.msk.f32.gmra.mrb[24].mxu0 %vm433_vm1, %v4016_v30  ;;  %v4193_v30 = vld [vmem:[%s8203_s1 + $0x90] sm:$0xff] }
  0x40   : > { %4828 = vmatprep.mubr.msk.f32.mxu1 %vm5797_vm0, %v5798_v6  ;;  %4872 = vmatprep.mubr.msk.f32.mxu0 %vm5797_vm0, %v5798_v6 }
  0x43   : > { %4829 = vmatmul.mubr.msk.f32.gmra.mrb[26].mxu1 %vm433_vm1, %v6097_v52  ;;  %4873 = vmatmul.mubr.msk.f32.gmra.mrb[26].mxu0 %vm433_vm1, %v4017_v34  ;;  %v4209_v34 = vld [vmem:[%s8204_s2 + $0x88] sm:$0xff] }
  0x44   : > { %4831 = vmatprep.mubr.msk.f32.mxu1 %vm5797_vm0, %v5798_v6  ;;  %4875 = vmatprep.mubr.msk.f32.mxu0 %vm5797_vm0, %v5798_v6  ;;  %v5694_v36 = vpack.c.bf16 %v4209_v34, %v4208_v33  ;;  %v4287_v33 = vld [vmem:[%s8203_s1 + $0xd0] sm:$0xff]  ;;  %v4288_v34 = vld [vmem:[%s8203_s1 + $0xd8] sm:$0xff] }
  0x45   : > { %v5715_v39 = vpack.c.bf16 %v4288_v34, %v4287_v33 }
  0x47   : > { %4832 = vmatmul.mubr.msk.f32.gmra.mrb[28].mxu1 %vm433_vm1, %v6107_v53  ;;  %4876 = vmatmul.mubr.msk.f32.gmra.mrb[28].mxu0 %vm433_vm1, %v5905_v13  ;;  %v6253_v13 = vld [vmem:[%s5887_s26 + $0x2a] sm:$0xff] }
  0x48   : > { %4834 = vmatprep.mubr.msk.f32.mxu1 %vm5797_vm0, %v5798_v6  ;;  %4878 = vmatprep.mubr.msk.f32.mxu0 %vm5797_vm0, %v5798_v6 }
  0x4b   : > { %4835 = vmatmul.mubr.msk.f32.gmra.mrb[30].mxu1 %vm433_vm1, %v6118_v54  ;;  %4879 = vmatmul.mubr.msk.f32.gmra.mrb[30].mxu0 %vm433_vm1, %v5931_v21  ;;  %v4162_v21 = vld [vmem:[%s8204_s2 + $0x68] sm:$0xff] }
  0x4c   : > { %4837 = vmatprep.mubr.msk.f32.mxu1 %vm5797_vm0, %v5798_v6  ;;  %4881 = vmatprep.mubr.msk.f32.mxu0 %vm5797_vm0, %v5798_v6  ;;  %v5682_v23 = vpack.c.bf16 %v4162_v21, %v4161_v20  ;;  %v4257_v20 = vld [vmem:[%s8204_s2 + $0xb0] sm:$0xff] }
  0x4f   : > { %4838 = vmatmul.mubr.msk.f32.gmra.mrb[32].mxu1 %vm433_vm1, %v6129_v55  ;;  %4882 = vmatmul.mubr.msk.f32.gmra.mrb[32].mxu0 %vm433_vm1, %v5948_v25  ;;  %v4164_v25 = vld [vmem:[%s8204_s2 + $0x78] sm:$0xff] }
  0x50   : > { %4840 = vmatprep.mubr.msk.f32.mxu1 %vm5797_vm0, %v5798_v6  ;;  %4884 = vmatprep.mubr.msk.f32.mxu0 %vm5797_vm0, %v5798_v6  ;;  %v5685_v28 = vpack.c.bf16 %v4164_v25, %v4163_v24  ;;  %v4285_v24 = vld [vmem:[%s8203_s1 + $0xc0] sm:$0xff]  ;;  %v4286_v25 = vld [vmem:[%s8203_s1 + $0xc8] sm:$0xff] }
  0x53   : > { %4841 = vmatmul.mubr.msk.f32.gmra.mrb[34].mxu1 %vm433_vm1, %v6140_v56  ;;  %4885 = vmatmul.mubr.msk.f32.gmra.mrb[34].mxu0 %vm433_vm1, %v5962_v27  ;;  %v4192_v27 = vld [vmem:[%s8203_s1 + $0x88] sm:$0xff] }
  0x54   : > { %4843 = vmatprep.mubr.msk.f32.mxu1 %vm5797_vm0, %v5798_v6  ;;  %4887 = vmatprep.mubr.msk.f32.mxu0 %vm5797_vm0, %v5798_v6 }
  0x57   : > { %4844 = vmatmul.mubr.msk.f32.gmra.mrb[36].mxu1 %vm433_vm1, %v6151_v57  ;;  %4888 = vmatmul.mubr.msk.f32.gmra.mrb[36].mxu0 %vm433_vm1, %v5974_v29  ;;  %v5688_v29 = vpack.c.bf16 %v4192_v27, %v4191_v26 }
  0x58   : > { %4890 = vmatprep.mubr.msk.f32.mxu0 %vm5797_vm0, %v5798_v6  ;;  %4901 = vmatprep.mubr.msk.f32.mxu1 %vm5797_vm0, %v5798_v6 }
  0x5b   : > { %4891 = vmatmul.mubr.msk.f32.gmra.mrb[38].mxu0 %vm433_vm1, %v5985_v31  ;;  %4902 = vmatmul.mubr.msk.f32.vlgmr.msra.gmra.mrb[38].mxu1 %vm433_vm1, %v6002_v35  ;;  %v4194_v31 = vld [vmem:[%s8203_s1 + $0x98] sm:$0xff]  ;;  %v6471_v35 = vld [vmem:[%s5887_s26 + $0x6a] sm:$0xff] }
  0x5c   : > { %5671 = vmatpush3.bf16.msra.mxu1 %v5670_v60  ;;  %4904 = vmatprep.mubr.msk.f32.mxu1 %vm5797_vm0, %v5798_v6  ;;  %v5691_v32 = vpack.c.bf16 %v4194_v31, %v4193_v30  ;;  %v5712_v30 = vpack.c.bf16 %v4286_v25, %v4285_v24  ;;  %v6811_v25 = vld [vmem:[%s5887_s26 + $0x44] sm:$0xff] }
  0x5d   : > { %4948 = vmatprep.mubr.msk.f32.mxu0 %vm5797_vm0, %v5798_v6  ;;  %5672 = vmatprep.subr.bf16.mxu1 %v5796_v3 }
  0x5f   : > { %4905 = vmatmul.mubr.msk.f32.gmra.mrb[40].mxu1 %vm433_vm1, %v6022_v41  ;;  %4949 = vmatmul.mubr.msk.f32.vlgmr.msra.gmra.mrb[40].mxu0 %vm433_vm1, %v6186_v1  ;;  %v6492_v41 = vld [vmem:[%s5887_s26 + $0xb] sm:$0xff] }
  0x60   : > { %4907 = vmatprep.mubr.msk.f32.mxu1 %vm5797_vm0, %v5798_v6  ;;  %4951 = vmatprep.mubr.msk.f32.mxu0 %vm5797_vm0, %v5798_v6 }
  0x61   : > { %5674 = vmatpush3.bf16.msra.mxu1 %v5673_v2  ;;  %5677 = vmatpush3.bf16.msra.mxu0 %v5676_v4 }
  0x62   : > { %5678 = vmatprep.subr.bf16.mxu0 %v5796_v3  ;;  %5681 = vmatprep.subr.bf16.mxu1 %v5796_v3 }
  0x63   : > { %4908 = vmatmul.mubr.msk.f32.gmra.mrb[42].mxu1 %vm433_vm1, %v6042_v46  ;;  %4952 = vmatmul.mubr.msk.f32.gmra.mrb[42].mxu0 %vm433_vm1, %v6206_v8  ;;  %v6512_v46 = vld [vmem:[%s5887_s26 + $0x13] sm:$0xff] }
  0x64   : > { %4910 = vmatprep.mubr.msk.f32.mxu1 %vm5797_vm0, %v5798_v6  ;;  %4954 = vmatprep.mubr.msk.f32.mxu0 %vm5797_vm0, %v5798_v6 }
  0x65   : > { %5680 = vmatpush3.bf16.msra.mxu0 %v5679_v9 }
  0x66   : > { %5687 = vmatprep.subr.bf16.mxu0 %v5796_v3 }
  0x67   : > { %4911 = vmatmul.mubr.msk.f32.gmra.mrb[44].mxu1 %vm433_vm1, %v6055_v48  ;;  %4955 = vmatmul.mubr.msk.f32.gmra.mrb[44].mxu0 %vm433_vm1, %v6219_v10  ;;  %v6525_v48 = vld [vmem:[%s5887_s26 + $0x1b] sm:$0xff] }
  0x68   : > { %4913 = vmatprep.mubr.msk.f32.mxu1 %vm5797_vm0, %v5798_v6  ;;  %4957 = vmatprep.mubr.msk.f32.mxu0 %vm5797_vm0, %v5798_v6 }
  0x6b   : > { %4914 = vmatmul.mubr.msk.f32.gmra.mrb[46].mxu1 %vm433_vm1, %v6067_v49  ;;  %4958 = vmatmul.mubr.msk.f32.gmra.mrb[46].mxu0 %vm433_vm1, %v6231_v11  ;;  %v6537_v49 = vld [vmem:[%s5887_s26 + $0x23] sm:$0xff] }
  0x6c   : > { %4916 = vmatprep.mubr.msk.f32.mxu1 %vm5797_vm0, %v5798_v6  ;;  %4960 = vmatprep.mubr.msk.f32.mxu0 %vm5797_vm0, %v5798_v6 }
  0x6f   : > { %4917 = vmatmul.mubr.msk.f32.gmra.mrb[48].mxu1 %vm433_vm1, %v6077_v50  ;;  %4961 = vmatmul.mubr.msk.f32.gmra.mrb[48].mxu0 %vm433_vm1, %v6242_v12  ;;  %v6548_v50 = vld [vmem:[%s5887_s26 + $0x2b] sm:$0xff] }
  0x70   : > { %4919 = vmatprep.mubr.msk.f32.mxu1 %vm5797_vm0, %v5798_v6  ;;  %4963 = vmatprep.mubr.msk.f32.mxu0 %vm5797_vm0, %v5798_v6 }
  0x73   : > { %4920 = vmatmul.mubr.msk.f32.gmra.mrb[50].mxu1 %vm433_vm1, %v6087_v51  ;;  %4964 = vmatmul.mubr.msk.f32.gmra.mrb[50].mxu0 %vm433_vm1, %v6253_v13  ;;  %v6559_v51 = vld [vmem:[%s5887_s26 + $0x33] sm:$0xff] }
  0x74   : > { %4922 = vmatprep.mubr.msk.f32.mxu1 %vm5797_vm0, %v5798_v6  ;;  %4966 = vmatprep.mubr.msk.f32.mxu0 %vm5797_vm0, %v5798_v6 }
  0x77   : > { %4923 = vmatmul.mubr.msk.f32.gmra.mrb[52].mxu1 %vm433_vm1, %v6097_v52  ;;  %4967 = vmatmul.mubr.msk.f32.gmra.mrb[52].mxu0 %vm433_vm1, %v6264_v14  ;;  %v6570_v52 = vld [vmem:[%s5887_s26 + $0x3b] sm:$0xff] }
  0x78   : > { %4925 = vmatprep.mubr.msk.f32.mxu1 %vm5797_vm0, %v5798_v6  ;;  %4969 = vmatprep.mubr.msk.f32.mxu0 %vm5797_vm0, %v5798_v6 }
  0x7b   : > { %4926 = vmatmul.mubr.msk.f32.gmra.mrb[54].mxu1 %vm433_vm1, %v6107_v53  ;;  %4970 = vmatmul.mubr.msk.f32.gmra.mrb[54].mxu0 %vm433_vm1, %v6275_v15  ;;  %v6581_v53 = vld [vmem:[%s5887_s26 + $0x43] sm:$0xff] }
  0x7c   : > { %4928 = vmatprep.mubr.msk.f32.mxu1 %vm5797_vm0, %v5798_v6  ;;  %4972 = vmatprep.mubr.msk.f32.mxu0 %vm5797_vm0, %v5798_v6 }
  0x7f   : > { %4929 = vmatmul.mubr.msk.f32.gmra.mrb[56].mxu1 %vm433_vm1, %v6118_v54  ;;  %4973 = vmatmul.mubr.msk.f32.gmra.mrb[56].mxu0 %vm433_vm1, %v6286_v16 }
  0x80   : > { %4931 = vmatprep.mubr.msk.f32.mxu1 %vm5797_vm0, %v5798_v6  ;;  %4975 = vmatprep.mubr.msk.f32.mxu0 %vm5797_vm0, %v5798_v6 }
  0x83   : > { %4932 = vmatmul.mubr.msk.f32.gmra.mrb[58].mxu1 %vm433_vm1, %v6129_v55  ;;  %4976 = vmatmul.mubr.msk.f32.gmra.mrb[58].mxu0 %vm433_vm1, %v6297_v17 }
  0x84   : > { %4934 = vmatprep.mubr.msk.f32.mxu1 %vm5797_vm0, %v5798_v6  ;;  %4978 = vmatprep.mubr.msk.f32.mxu0 %vm5797_vm0, %v5798_v6 }
  0x87   : > { %4935 = vmatmul.mubr.msk.f32.gmra.mrb[60].mxu1 %vm433_vm1, %v6140_v56  ;;  %4979 = vmatmul.mubr.msk.f32.gmra.mrb[60].mxu0 %vm433_vm1, %v6308_v18 }
  0x88   : > { %4937 = vmatprep.mubr.msk.f32.mxu1 %vm5797_vm0, %v5798_v6  ;;  %4981 = vmatprep.mubr.msk.f32.mxu0 %vm5797_vm0, %v5798_v6 }
  0x8b   : > { %4938 = vmatmul.mubr.msk.f32.gmra.mrb[62].mxu1 %vm433_vm1, %v6151_v57  ;;  %4982 = vmatmul.mubr.msk.f32.gmra.mrb[62].mxu0 %vm433_vm1, %v6319_v19 }
  0x8c   : > { %4984 = vmatprep.mubr.msk.f32.mxu0 %vm5797_vm0, %v5798_v6  ;;  %4995 = vmatprep.mubr.msk.f32.mxu1 %vm5797_vm0, %v5798_v6 }
  0x8f   : > { %4985 = vmatmul.mubr.msk.f32.gmra.mrb[64].mxu0 %vm433_vm1, %v6336_v22  ;;  %4996 = vmatmul.mubr.msk.f32.vlgmr.msra.gmra.mrb[64].mxu1 %vm433_vm1, %v6186_v1 }
  0x90   : > { %5683 = vmatpush3.bf16.msra.mxu1 %v5682_v23  ;;  %4998 = vmatprep.mubr.msk.f32.mxu1 %vm5797_vm0, %v5798_v6  ;;  %v4258_v23 = vld [vmem:[%s8204_s2 + $0xb8] sm:$0xff] }
  0x91   : > { %5042 = vmatprep.mubr.msk.f32.mxu0 %vm5797_vm0, %v5798_v6  ;;  %5684 = vmatprep.subr.bf16.mxu1 %v5796_v3 }
  0x93   : > { %4999 = vmatmul.mubr.msk.f32.gmra.mrb[66].mxu1 %vm433_vm1, %v6206_v8  ;;  %5043 = vmatmul.mubr.msk.f32.vlgmr.msra.gmra.mrb[66].mxu0 %vm433_vm1, %v6206_v8 }
  0x94   : > { %5001 = vmatprep.mubr.msk.f32.mxu1 %vm5797_vm0, %v5798_v6  ;;  %5045 = vmatprep.mubr.msk.f32.mxu0 %vm5797_vm0, %v5798_v6 }
  0x95   : > { %5686 = vmatpush3.bf16.msra.mxu1 %v5685_v28  ;;  %5689 = vmatpush3.bf16.msra.mxu0 %v5688_v29  ;;  %v6687_v28 = vld [vmem:[%s5887_s26 + $0xc] sm:$0xff]  ;;  %v5709_v29 = vpack.c.bf16 %v4258_v23, %v4257_v20 }
  0x96   : > { %5690 = vmatprep.subr.bf16.mxu0 %v5796_v3  ;;  %5693 = vmatprep.subr.bf16.mxu1 %v5796_v3 }
  0x97   : > { %5002 = vmatmul.mubr.msk.f32.gmra.mrb[68].mxu1 %vm433_vm1, %v6219_v10  ;;  %5046 = vmatmul.mubr.msk.f32.gmra.mrb[68].mxu0 %vm433_vm1, %v6219_v10 }
  0x98   : > { %5004 = vmatprep.mubr.msk.f32.mxu1 %vm5797_vm0, %v5798_v6  ;;  %5048 = vmatprep.mubr.msk.f32.mxu0 %vm5797_vm0, %v5798_v6 }
  0x99   : > { %5692 = vmatpush3.bf16.msra.mxu0 %v5691_v32 }
  0x9a   : > { %5699 = vmatprep.subr.bf16.mxu0 %v5796_v3 }
  0x9b   : > { %5005 = vmatmul.mubr.msk.f32.gmra.mrb[70].mxu1 %vm433_vm1, %v6231_v11  ;;  %5049 = vmatmul.mubr.msk.f32.gmra.mrb[70].mxu0 %vm433_vm1, %v6231_v11 }
  0x9c   : > { %5007 = vmatprep.mubr.msk.f32.mxu1 %vm5797_vm0, %v5798_v6  ;;  %5051 = vmatprep.mubr.msk.f32.mxu0 %vm5797_vm0, %v5798_v6 }
  0x9f   : > { %5008 = vmatmul.mubr.msk.f32.gmra.mrb[72].mxu1 %vm433_vm1, %v6242_v12  ;;  %5052 = vmatmul.mubr.msk.f32.gmra.mrb[72].mxu0 %vm433_vm1, %v6242_v12 }
  0xa0   : > { %5010 = vmatprep.mubr.msk.f32.mxu1 %vm5797_vm0, %v5798_v6  ;;  %5054 = vmatprep.mubr.msk.f32.mxu0 %vm5797_vm0, %v5798_v6 }
  0xa3   : > { %5011 = vmatmul.mubr.msk.f32.gmra.mrb[74].mxu1 %vm433_vm1, %v6253_v13  ;;  %5055 = vmatmul.mubr.msk.f32.gmra.mrb[74].mxu0 %vm433_vm1, %v6253_v13 }
  0xa4   : > { %5013 = vmatprep.mubr.msk.f32.mxu1 %vm5797_vm0, %v5798_v6  ;;  %5057 = vmatprep.mubr.msk.f32.mxu0 %vm5797_vm0, %v5798_v6 }
  0xa7   : > { %5014 = vmatmul.mubr.msk.f32.gmra.mrb[76].mxu1 %vm433_vm1, %v6264_v14  ;;  %5058 = vmatmul.mubr.msk.f32.gmra.mrb[76].mxu0 %vm433_vm1, %v6264_v14 }
  0xa8   : > { %5016 = vmatprep.mubr.msk.f32.mxu1 %vm5797_vm0, %v5798_v6  ;;  %5060 = vmatprep.mubr.msk.f32.mxu0 %vm5797_vm0, %v5798_v6 }
  0xab   : > { %5017 = vmatmul.mubr.msk.f32.gmra.mrb[78].mxu1 %vm433_vm1, %v6275_v15  ;;  %5061 = vmatmul.mubr.msk.f32.gmra.mrb[78].mxu0 %vm433_vm1, %v6275_v15 }
  0xac   : > { %5019 = vmatprep.mubr.msk.f32.mxu1 %vm5797_vm0, %v5798_v6  ;;  %5063 = vmatprep.mubr.msk.f32.mxu0 %vm5797_vm0, %v5798_v6 }
  0xaf   : > { %5020 = vmatmul.mubr.msk.f32.gmra.mrb[80].mxu1 %vm433_vm1, %v6286_v16  ;;  %5064 = vmatmul.mubr.msk.f32.gmra.mrb[80].mxu0 %vm433_vm1, %v6286_v16 }
  0xb0   : > { %5022 = vmatprep.mubr.msk.f32.mxu1 %vm5797_vm0, %v5798_v6  ;;  %5066 = vmatprep.mubr.msk.f32.mxu0 %vm5797_vm0, %v5798_v6 }
  0xb3   : > { %5023 = vmatmul.mubr.msk.f32.gmra.mrb[82].mxu1 %vm433_vm1, %v6297_v17  ;;  %5067 = vmatmul.mubr.msk.f32.gmra.mrb[82].mxu0 %vm433_vm1, %v6297_v17 }
  0xb4   : > { %5025 = vmatprep.mubr.msk.f32.mxu1 %vm5797_vm0, %v5798_v6  ;;  %5069 = vmatprep.mubr.msk.f32.mxu0 %vm5797_vm0, %v5798_v6 }
  0xb7   : > { %5026 = vmatmul.mubr.msk.f32.gmra.mrb[84].mxu1 %vm433_vm1, %v6308_v18  ;;  %5070 = vmatmul.mubr.msk.f32.gmra.mrb[84].mxu0 %vm433_vm1, %v6308_v18 }
  0xb8   : > { %5028 = vmatprep.mubr.msk.f32.mxu1 %vm5797_vm0, %v5798_v6  ;;  %5072 = vmatprep.mubr.msk.f32.mxu0 %vm5797_vm0, %v5798_v6 }
  0xbb   : > { %5029 = vmatmul.mubr.msk.f32.gmra.mrb[86].mxu1 %vm433_vm1, %v6319_v19  ;;  %5073 = vmatmul.mubr.msk.f32.gmra.mrb[86].mxu0 %vm433_vm1, %v6319_v19 }
  0xbc   : > { %5031 = vmatprep.mubr.msk.f32.mxu1 %vm5797_vm0, %v5798_v6  ;;  %5075 = vmatprep.mubr.msk.f32.mxu0 %vm5797_vm0, %v5798_v6 }
  0xbf   : > { %5032 = vmatmul.mubr.msk.f32.gmra.mrb[88].mxu1 %vm433_vm1, %v6336_v22  ;;  %5076 = vmatmul.mubr.msk.f32.gmra.mrb[88].mxu0 %vm433_vm1, %v6336_v22 }
  0xc0   : > { %5078 = vmatprep.mubr.msk.f32.mxu0 %vm5797_vm0, %v5798_v6  ;;  %5089 = vmatprep.mubr.msk.f32.mxu1 %vm5797_vm0, %v5798_v6 }
  0xc3   : > { %5079 = vmatmul.mubr.msk.f32.gmra.mrb[90].mxu0 %vm433_vm1, %v6471_v35  ;;  %5090 = vmatmul.mubr.msk.f32.vlgmr.msra.gmra.mrb[90].mxu1 %vm433_vm1, %v6206_v8 }
  0xc4   : > { %5695 = vmatpush3.bf16.msra.mxu1 %v5694_v36  ;;  %5092 = vmatprep.mubr.msk.f32.mxu1 %vm5797_vm0, %v5798_v6 }
  0xc5   : > { %5136 = vmatprep.mubr.msk.f32.mxu0 %vm5797_vm0, %v5798_v6  ;;  %5696 = vmatprep.subr.bf16.mxu1 %v5796_v3 }
  0xc7   : > { %5093 = vmatmul.mubr.msk.f32.gmra.mrb[92].mxu1 %vm433_vm1, %v6219_v10  ;;  %5137 = vmatmul.mubr.msk.f32.vlgmr.msra.gmra.mrb[92].mxu0 %vm433_vm1, %v6492_v41 }
  0xc8   : > { %5095 = vmatprep.mubr.msk.f32.mxu1 %vm5797_vm0, %v5798_v6  ;;  %5139 = vmatprep.mubr.msk.f32.mxu0 %vm5797_vm0, %v5798_v6 }
  0xc9   : > { %5698 = vmatpush3.bf16.msra.mxu1 %v5697_v42  ;;  %5701 = vmatpush3.bf16.msra.mxu0 %v5700_v43 }
  0xca   : > { %5702 = vmatprep.subr.bf16.mxu0 %v5796_v3  ;;  %5705 = vmatprep.subr.bf16.mxu1 %v5796_v3 }
  0xcb   : > { %5096 = vmatmul.mubr.msk.f32.gmra.mrb[94].mxu1 %vm433_vm1, %v6231_v11  ;;  %5140 = vmatmul.mubr.msk.f32.gmra.mrb[94].mxu0 %vm433_vm1, %v6512_v46  ;;  %v6641_v11 = vld [vmem:[%s5887_s26 + $0x63] sm:$0xff] }
  0xcc   : > { %5098 = vmatprep.mubr.msk.f32.mxu1 %vm5797_vm0, %v5798_v6  ;;  %5142 = vmatprep.mubr.msk.f32.mxu0 %vm5797_vm0, %v5798_v6 }
  0xcd   : > { %5704 = vmatpush3.bf16.msra.mxu0 %v5703_v47 }
  0xce   : > { %5711 = vmatprep.subr.bf16.mxu0 %v5796_v3 }
  0xcf   : > { %5099 = vmatmul.mubr.msk.f32.gmra.mrb[96].mxu1 %vm433_vm1, %v6242_v12  ;;  %5143 = vmatmul.mubr.msk.f32.gmra.mrb[96].mxu0 %vm433_vm1, %v6525_v48  ;;  %v4255_v12 = vld [vmem:[%s8204_s2 + $0xa0] sm:$0xff] }
  0xd0   : > { %5101 = vmatprep.mubr.msk.f32.mxu1 %vm5797_vm0, %v5798_v6  ;;  %5145 = vmatprep.mubr.msk.f32.mxu0 %vm5797_vm0, %v5798_v6 }
  0xd3   : > { %5102 = vmatmul.mubr.msk.f32.gmra.mrb[98].mxu1 %vm433_vm1, %v6253_v13  ;;  %5146 = vmatmul.mubr.msk.f32.gmra.mrb[98].mxu0 %vm433_vm1, %v6537_v49  ;;  %v4256_v13 = vld [vmem:[%s8204_s2 + $0xa8] sm:$0xff] }
  0xd4   : > { %5104 = vmatprep.mubr.msk.f32.mxu1 %vm5797_vm0, %v5798_v6  ;;  %5148 = vmatprep.mubr.msk.f32.mxu0 %vm5797_vm0, %v5798_v6 }
  0xd7   : > { %5105 = vmatmul.mubr.msk.f32.gmra.mrb[100].mxu1 %vm433_vm1, %v6264_v14  ;;  %5149 = vmatmul.mubr.msk.f32.gmra.mrb[100].mxu0 %vm433_vm1, %v6548_v50 }
  0xd8   : > { %5107 = vmatprep.mubr.msk.f32.mxu1 %vm5797_vm0, %v5798_v6  ;;  %5151 = vmatprep.mubr.msk.f32.mxu0 %vm5797_vm0, %v5798_v6 }
  0xdb   : > { %5108 = vmatmul.mubr.msk.f32.gmra.mrb[102].mxu1 %vm433_vm1, %v6275_v15  ;;  %5152 = vmatmul.mubr.msk.f32.gmra.mrb[102].mxu0 %vm433_vm1, %v6559_v51 }
  0xdc   : > { %5110 = vmatprep.mubr.msk.f32.mxu1 %vm5797_vm0, %v5798_v6  ;;  %5154 = vmatprep.mubr.msk.f32.mxu0 %vm5797_vm0, %v5798_v6 }
  0xdf   : > { %5111 = vmatmul.mubr.msk.f32.gmra.mrb[104].mxu1 %vm433_vm1, %v6286_v16  ;;  %5155 = vmatmul.mubr.msk.f32.gmra.mrb[104].mxu0 %vm433_vm1, %v6570_v52 }
  0xe0   : > { %5113 = vmatprep.mubr.msk.f32.mxu1 %vm5797_vm0, %v5798_v6  ;;  %5157 = vmatprep.mubr.msk.f32.mxu0 %vm5797_vm0, %v5798_v6 }
  0xe2   : > { %v6583_v54 = vpop.f32.mrb[0].mxu1  ;;  %v6585_v55 = vpop.f32.mrb[0].mxu0 }
  0xe3   : > { %v4783_v56 = vpop.f32.mrb[1].mxu1  ;;  %5114 = vmatmul.mubr.msk.f32.gmra.mrb[106].mxu1 %vm433_vm1, %v6297_v17  ;;  %5158 = vmatmul.mubr.msk.f32.gmra.mrb[106].mxu0 %vm433_vm1, %v6581_v53  ;;  %v4762_v57 = vpop.f32.mrb[1].mxu0 }
  0xe4   : > { %5116 = vmatprep.mubr.msk.f32.mxu1 %vm5797_vm0, %v5798_v6  ;;  %5160 = vmatprep.mubr.msk.f32.mxu0 %vm5797_vm0, %v5798_v6  ;;  %v6747_v57 = vld [vmem:[%s5887_s26 + $0x24] sm:$0xff] }
  0xe6   : > { %v6598_v59 = vpop.f32.mrb[2].mxu1  ;;  %v6600_v60 = vpop.f32.mrb[2].mxu0 }
  0xe7   : > { %v4786_v61 = vpop.f32.mrb[3].mxu1  ;;  %5117 = vmatmul.mubr.msk.f32.gmra.mrb[108].mxu1 %vm433_vm1, %v6308_v18  ;;  %5161 = vmatmul.mubr.msk.f32.gmra.mrb[108].mxu0 %vm433_vm1, %v6596_v58  ;;  %v4765_v62 = vpop.f32.mrb[3].mxu0  ;;  %v6662_v18 = vld [vmem:[%s5887_s26 + $0x6b] sm:$0xff] }
  0xe8   : > { %5119 = vmatprep.mubr.msk.f32.mxu1 %vm5797_vm0, %v5798_v6  ;;  %5163 = vmatprep.mubr.msk.f32.mxu0 %vm5797_vm0, %v5798_v6 }
  0xea   : > { %v6613_v0 = vpop.f32.mrb[4].mxu1  ;;  %v6615_v1 = vpop.f32.mrb[4].mxu0 }
  0xeb   : > { %v4789_v2 = vpop.f32.mrb[5].mxu1  ;;  %5120 = vmatmul.mubr.msk.f32.gmra.mrb[110].mxu1 %vm433_vm1, %v6319_v19  ;;  %5164 = vmatmul.mubr.msk.f32.gmra.mrb[110].mxu0 %vm433_vm1, %v6611_v63  ;;  %v4768_v4 = vpop.f32.mrb[5].mxu0  ;;  %v5706_v19 = vpack.c.bf16 %v4256_v13, %v4255_v12  ;;  %v6779_v12 = vld [vmem:[%s5887_s26 + $0x34] sm:$0xff] }
  0xec   : > { %5122 = vmatprep.mubr.msk.f32.mxu1 %vm5797_vm0, %v5798_v6  ;;  %5166 = vmatprep.mubr.msk.f32.mxu0 %vm5797_vm0, %v5798_v6  ;;  %v6763_v2 = vld [vmem:[%s5887_s26 + $0x2c] sm:$0xff] }
  0xee   : > { %v6628_v7 = vpop.f32.mrb[6].mxu1  ;;  %v6630_v8 = vpop.f32.mrb[6].mxu0 }
  0xef   : > { %v4792_v9 = vpop.f32.mrb[7].mxu1  ;;  %5123 = vmatmul.mubr.msk.f32.gmra.mrb[112].mxu1 %vm433_vm1, %v6336_v22  ;;  %5167 = vmatmul.mubr.msk.f32.gmra.mrb[112].mxu0 %vm433_vm1, %v6626_v5  ;;  %v4771_v10 = vpop.f32.mrb[7].mxu0 }
  0xf0   : > { %5125 = vmatprep.mubr.msk.f32.mxu1 %vm5797_vm0, %v5798_v6  ;;  %5169 = vmatprep.mubr.msk.f32.mxu0 %vm5797_vm0, %v5798_v6 }
  0xf2   : > { %v6649_v14 = vpop.f32.mrb[8].mxu1  ;;  %v6651_v15 = vpop.f32.mrb[8].mxu0 }
  0xf3   : > { %v4795_v16 = vpop.f32.mrb[9].mxu1  ;;  %5126 = vmatmul.mubr.msk.f32.gmra.mrb[114].mxu1 %vm433_vm1, %v6471_v35  ;;  %5170 = vmatmul.mubr.msk.f32.gmra.mrb[114].mxu0 %vm433_vm1, %v6641_v11  ;;  %v4774_v17 = vpop.f32.mrb[9].mxu0 }
  0xf4   : > { %5172 = vmatprep.mubr.msk.f32.mxu0 %vm5797_vm0, %v5798_v6  ;;  %5183 = vmatprep.mubr.msk.f32.mxu1 %vm5797_vm0, %v5798_v6 }
  0xf6   : > { %v6667_v21 = vpop.f32.mrb[10].mxu1  ;;  %v6669_v22 = vpop.f32.mrb[10].mxu0 }
  0xf7   : > { %v4798_v26 = vpop.f32.mrb[11].mxu1  ;;  %5173 = vmatmul.mubr.msk.f32.gmra.mrb[116].mxu0 %vm433_vm1, %v6662_v18  ;;  %5184 = vmatmul.mubr.msk.f32.vlgmr.msra.gmra.mrb[116].mxu1 %vm433_vm1, %v6492_v41  ;;  %v4777_v27 = vpop.f32.mrb[11].mxu0 }
  0xf8   : > { %5707 = vmatpush3.bf16.msra.mxu1 %v5706_v19  ;;  %5186 = vmatprep.mubr.msk.f32.mxu1 %vm5797_vm0, %v5798_v6  ;;  %v6795_v19 = vld [vmem:[%s5887_s26 + $0x3c] sm:$0xff] }
  0xf9   : > { %5230 = vmatprep.mubr.msk.f32.mxu0 %vm5797_vm0, %v5798_v6  ;;  %5708 = vmatprep.subr.bf16.mxu1 %v5796_v3 }
  0xfa   : > { %v708_v31 = vpop.f32.mrb[12].mxu1  ;;  %v6692_v32 = vpop.f32.mrb[12].mxu0 }
  0xfb   : > { %v6701_v35 = vadd.f32 %v708_v31, %v6585_v55  ;;  %v4809_v36 = vpop.f32.mrb[13].mxu1  ;;  %5187 = vmatmul.mubr.msk.f32.gmra.mrb[118].mxu1 %vm433_vm1, %v6512_v46  ;;  %5231 = vmatmul.mubr.msk.f32.vlgmr.msra.gmra.mrb[118].mxu0 %vm433_vm1, %v6687_v28  ;;  %v4780_v37 = vpop.f32.mrb[13].mxu0  ;;  %v6827_v31 = vld [vmem:[%s5887_s26 + $0x4c] sm:$0xff] }
  0xfc   : > { %5189 = vmatprep.mubr.msk.f32.mxu1 %vm5797_vm0, %v5798_v6  ;;  %5233 = vmatprep.mubr.msk.f32.mxu0 %vm5797_vm0, %v5798_v6  ;;  %v6843_v36 = vld [vmem:[%s5887_s26 + $0x54] sm:$0xff] }
  0xfd   : > { %5710 = vmatpush3.bf16.msra.mxu1 %v5709_v29  ;;  %5713 = vmatpush3.bf16.msra.mxu0 %v5712_v30 }
  0xfe   : > { %v713_v40 = vpop.f32.mrb[14].mxu1  ;;  %v6714_v41 = vpop.f32.mrb[14].mxu0  ;;  %5714 = vmatprep.subr.bf16.mxu0 %v5796_v3  ;;  %5717 = vmatprep.subr.bf16.mxu1 %v5796_v3 }
  0xff   : > { %v6719_v42 = vadd.f32 %v713_v40, %v6600_v60  ;;  %v4812_v43 = vpop.f32.mrb[15].mxu1  ;;  %5190 = vmatmul.mubr.msk.f32.gmra.mrb[120].mxu1 %vm433_vm1, %v6525_v48  ;;  %5234 = vmatmul.mubr.msk.f32.gmra.mrb[120].mxu0 %vm433_vm1, %v6712_v38  ;;  %v4856_v44 = vpop.f32.mrb[15].mxu0 }
 0x100   : > { %5192 = vmatprep.mubr.msk.f32.mxu1 %vm5797_vm0, %v5798_v6  ;;  %5236 = vmatprep.mubr.msk.f32.mxu0 %vm5797_vm0, %v5798_v6  ;;  %v6859_v43 = vld [vmem:[%s5887_s26 + $0x5c] sm:$0xff] }
 0x101   : > { %5716 = vmatpush3.bf16.msra.mxu0 %v5715_v39 }
 0x102   : > { %v718_v46 = vpop.f32.mrb[16].mxu1  ;;  %v6732_v47 = vpop.f32.mrb[16].mxu0  ;;  %5723 = vmatprep.subr.bf16.mxu0 %v5796_v3 }
 0x103   : > { %v6736_v48 = vadd.f32 %v718_v46, %v6615_v1  ;;  %v4815_v55 = vpop.f32.mrb[17].mxu1  ;;  %5193 = vmatmul.mubr.msk.f32.gmra.mrb[122].mxu1 %vm433_vm1, %v6537_v49  ;;  %5237 = vmatmul.mubr.msk.f32.gmra.mrb[122].mxu0 %vm433_vm1, %v6730_v45  ;;  %v4859_v56 = vpop.f32.mrb[17].mxu0 }
 0x104   : > { %5195 = vmatprep.mubr.msk.f32.mxu1 %vm5797_vm0, %v5798_v6  ;;  %5239 = vmatprep.mubr.msk.f32.mxu0 %vm5797_vm0, %v5798_v6  ;;  %v6875_v56 = vld [vmem:[%s5887_s26 + $0x64] sm:$0xff] }
 0x106   : > { %v723_v60 = vpop.f32.mrb[18].mxu1  ;;  %v6749_v61 = vpop.f32.mrb[18].mxu0 }
 0x107   : > { %v6752_v62 = vadd.f32 %v723_v60, %v6630_v8  ;;  %v4818_v1 = vpop.f32.mrb[19].mxu1  ;;  %5196 = vmatmul.mubr.msk.f32.gmra.mrb[124].mxu1 %vm433_vm1, %v6548_v50  ;;  %5240 = vmatmul.mubr.msk.f32.gmra.mrb[124].mxu0 %vm433_vm1, %v6747_v57  ;;  %v4862_v49 = vpop.f32.mrb[19].mxu0 }
 0x108   : > { %5198 = vmatprep.mubr.msk.f32.mxu1 %vm5797_vm0, %v5798_v6  ;;  %5242 = vmatprep.mubr.msk.f32.mxu0 %vm5797_vm0, %v5798_v6 }
 0x10a   : > { %v728_v4 = vpop.f32.mrb[20].mxu1  ;;  %v6765_v8 = vpop.f32.mrb[20].mxu0 }
 0x10b   : > { %v6768_v9 = vadd.f32 %v728_v4, %v6651_v15  ;;  %v4821_v10 = vpop.f32.mrb[21].mxu1  ;;  %5199 = vmatmul.mubr.msk.f32.gmra.mrb[126].mxu1 %vm433_vm1, %v6559_v51  ;;  %5243 = vmatmul.mubr.msk.f32.gmra.mrb[126].mxu0 %vm433_vm1, %v6763_v2  ;;  %v4865_v50 = vpop.f32.mrb[21].mxu0 }
 0x10c   : > { %5201 = vmatprep.mubr.msk.f32.mxu1 %vm5797_vm0, %v5798_v6  ;;  %5245 = vmatprep.mubr.msk.f32.mxu0 %vm5797_vm0, %v5798_v6  ;;  %v6897_v50 = vld [vmem:[%s5887_s26 + $0x6c] sm:$0xff] }
 0x10e   : > { %v733_v13 = vpop.f32.mrb[22].mxu1  ;;  %v6781_v15 = vpop.f32.mrb[22].mxu0 }
 0x10f   : > { %v6784_v16 = vadd.f32 %v733_v13, %v6669_v22  ;;  %v4824_v17 = vpop.f32.mrb[23].mxu1  ;;  %5202 = vmatmul.mubr.msk.f32.gmra.mrb[128].mxu1 %vm433_vm1, %v6570_v52  ;;  %5246 = vmatmul.mubr.msk.f32.gmra.mrb[128].mxu0 %vm433_vm1, %v6779_v12  ;;  %v4868_v51 = vpop.f32.mrb[23].mxu0 }
 0x110   : > { %5204 = vmatprep.mubr.msk.f32.mxu1 %vm5797_vm0, %v5798_v6  ;;  %5248 = vmatprep.mubr.msk.f32.mxu0 %vm5797_vm0, %v5798_v6 }
 0x112   : > { %v738_v20 = vpop.f32.mrb[24].mxu1  ;;  %v6797_v22 = vpop.f32.mrb[24].mxu0 }
 0x113   : > { %v6800_v23 = vadd.f32 %v738_v20, %v6692_v32  ;;  %v4827_v24 = vpop.f32.mrb[25].mxu1  ;;  %5205 = vmatmul.mubr.msk.f32.gmra.mrb[130].mxu1 %vm433_vm1, %v6581_v53  ;;  %5249 = vmatmul.mubr.msk.f32.gmra.mrb[130].mxu0 %vm433_vm1, %v6795_v19  ;;  %v4871_v52 = vpop.f32.mrb[25].mxu0  ;;  %v4332_v20 = vld [vmem:[%s8203_s1 + $0xe0] sm:$0xff] }
 0x114   : > { %5207 = vmatprep.mubr.msk.f32.mxu1 %vm5797_vm0, %v5798_v6  ;;  %5251 = vmatprep.mubr.msk.f32.mxu0 %vm5797_vm0, %v5798_v6  ;;  %v4333_v24 = vld [vmem:[%s8203_s1 + $0xe8] sm:$0xff] }
 0x116   : > { %v743_v26 = vpop.f32.mrb[26].mxu1  ;;  %v6813_v27 = vpop.f32.mrb[26].mxu0 }
 0x117   : > { %v6816_v29 = vadd.f32 %v743_v26, %v6583_v54  ;;  %v4830_v30 = vpop.f32.mrb[27].mxu1  ;;  %5208 = vmatmul.mubr.msk.f32.gmra.mrb[132].mxu1 %vm433_vm1, %v6596_v58  ;;  %5252 = vmatmul.mubr.msk.f32.gmra.mrb[132].mxu0 %vm433_vm1, %v6811_v25  ;;  %v4874_v53 = vpop.f32.mrb[27].mxu0 }
 0x118   : > { %5210 = vmatprep.mubr.msk.f32.mxu1 %vm5797_vm0, %v5798_v6  ;;  %5254 = vmatprep.mubr.msk.f32.mxu0 %vm5797_vm0, %v5798_v6 }
 0x11a   : > { %v748_v32 = vpop.f32.mrb[28].mxu1  ;;  %v6829_v54 = vpop.f32.mrb[28].mxu0 }
 0x11b   : > { %v6832_v33 = vadd.f32 %v748_v32, %v6598_v59  ;;  %v4833_v34 = vpop.f32.mrb[29].mxu1  ;;  %5211 = vmatmul.mubr.msk.f32.gmra.mrb[134].mxu1 %vm433_vm1, %v6611_v63  ;;  %5255 = vmatmul.mubr.msk.f32.gmra.mrb[134].mxu0 %vm433_vm1, %v6827_v31  ;;  %v4877_v58 = vpop.f32.mrb[29].mxu0 }
 0x11c   : > { %5213 = vmatprep.mubr.msk.f32.mxu1 %vm5797_vm0, %v5798_v6  ;;  %5257 = vmatprep.mubr.msk.f32.mxu0 %vm5797_vm0, %v5798_v6  ;;  %v4334_v58 = vld [vmem:[%s8203_s1 + $0xf0] sm:$0xff] }
 0x11e   : > { %v753_v37 = vpop.f32.mrb[30].mxu1  ;;  %v6845_v59 = vpop.f32.mrb[30].mxu0 }
 0x11f   : > { %v6848_v39 = vadd.f32 %v753_v37, %v6613_v0  ;;  %v4836_v40 = vpop.f32.mrb[31].mxu1  ;;  %5214 = vmatmul.mubr.msk.f32.gmra.mrb[136].mxu1 %vm433_vm1, %v6626_v5  ;;  %5258 = vmatmul.mubr.msk.f32.gmra.mrb[136].mxu0 %vm433_vm1, %v6843_v36  ;;  %v4880_v63 = vpop.f32.mrb[31].mxu0 }
 0x120   : > { %5216 = vmatprep.mubr.msk.f32.mxu1 %vm5797_vm0, %v5798_v6  ;;  %5260 = vmatprep.mubr.msk.f32.mxu0 %vm5797_vm0, %v5798_v6 }
 0x122   : > { %v758_v44 = vpop.f32.mrb[32].mxu1  ;;  %v6861_v0 = vpop.f32.mrb[32].mxu0 }
 0x123   : > { %v6864_v46 = vadd.f32 %v758_v44, %v6628_v7  ;;  %v4839_v55 = vpop.f32.mrb[33].mxu1  ;;  %5217 = vmatmul.mubr.msk.f32.gmra.mrb[138].mxu1 %vm433_vm1, %v6641_v11  ;;  %5261 = vmatmul.mubr.msk.f32.gmra.mrb[138].mxu0 %vm433_vm1, %v6859_v43  ;;  %v4883_v5 = vpop.f32.mrb[33].mxu0  ;;  %v4302_v7 = vld [vmem:[%s8204_s2 + $0xc0] sm:$0xff]  ;;  %v4303_v11 = vld [vmem:[%s8204_s2 + $0xc8] sm:$0xff] }
 0x124   : > { %5219 = vmatprep.mubr.msk.f32.mxu1 %vm5797_vm0, %v5798_v6  ;;  %5263 = vmatprep.mubr.msk.f32.mxu0 %vm5797_vm0, %v5798_v6  ;;  %v5718_v13 = vpack.c.bf16 %v4303_v11, %v4302_v7 }
 0x126   : > { %v763_v60 = vpop.f32.mrb[34].mxu1  ;;  %v6883_v1 = vpop.f32.mrb[34].mxu0 }
 0x127   : > { %v6886_v49 = vadd.f32 %v763_v60, %v6649_v14  ;;  %v4842_v4 = vpop.f32.mrb[35].mxu1  ;;  %5220 = vmatmul.mubr.msk.f32.gmra.mrb[140].mxu1 %vm433_vm1, %v6662_v18  ;;  %5264 = vmatmul.mubr.msk.f32.gmra.mrb[140].mxu0 %vm433_vm1, %v6875_v56  ;;  %v4886_v10 = vpop.f32.mrb[35].mxu0  ;;  %v4304_v14 = vld [vmem:[%s8204_s2 + $0xd0] sm:$0xff]  ;;  %v4305_v18 = vld [vmem:[%s8204_s2 + $0xd8] sm:$0xff] }
 0x128   : > { %5266 = vmatprep.mubr.msk.f32.mxu0 %vm5797_vm0, %v5798_v6  ;;  %5277 = vmatprep.mubr.msk.f32.mxu1 %vm5797_vm0, %v5798_v6  ;;  %v5721_v53 = vpack.c.bf16 %v4305_v18, %v4304_v14 }
 0x12a   : > { %v768_v17 = vpop.f32.mrb[36].mxu1  ;;  %v6902_v51 = vpop.f32.mrb[36].mxu0 }
 0x12b   : > { %v6914_v52 = vadd.f32 %v768_v17, %v6667_v21  ;;  %v4845_v26 = vpop.f32.mrb[37].mxu1  ;;  %5267 = vmatmul.mubr.msk.f32.gmra.mrb[142].mxu0 %vm433_vm1, %v6897_v50  ;;  %5278 = vmatmul.mubr.msk.f32.vlgmr.msra.gmra.mrb[142].mxu1 %vm433_vm1, %v6687_v28  ;;  %v4889_v30 = vpop.f32.mrb[37].mxu0  ;;  %v5724_v21 = vpack.c.bf16 %v4333_v24, %v4332_v20  ;;  %v4335_v28 = vld [vmem:[%s8203_s1 + $0xf8] sm:$0xff] }
 0x12c   : > { %5719 = vmatpush3.bf16.msra.mxu1 %v5718_v13  ;;  %5280 = vmatprep.mubr.msk.f32.mxu1 %vm5797_vm0, %v5798_v6  ;;  %v5727_v44 = vpack.c.bf16 %v4335_v28, %v4334_v58 }
 0x12d   : > { %5324 = vmatprep.mubr.msk.f32.mxu0 %vm5797_vm0, %v5798_v6  ;;  %5720 = vmatprep.subr.bf16.mxu1 %v5796_v3 }
 0x12e   : > { %v973_v32 = vpop.f32.mrb[38].mxu1  ;;  %v6925_v34 = vpop.f32.mrb[38].mxu0 }
 0x12f   : > { %v6934_v37 = vadd.f32 %v973_v32, %v6714_v41  ;;  %v4903_v40 = vpop.f32.mrb[39].mxu1  ;;  %5281 = vmatmul.mubr.msk.f32.gmra.mrb[144].mxu1 %vm433_vm1, %v6712_v38  ;;  %5325 = vmatmul.mubr.msk.f32.vlgmr.msra.gmra.mrb[144].mxu0 %vm433_vm1, %v6712_v38  ;;  %v4892_v63 = vpop.f32.mrb[39].mxu0 }
 0x130   : > { %5283 = vmatprep.mubr.msk.f32.mxu1 %vm5797_vm0, %v5798_v6  ;;  %5327 = vmatprep.mubr.msk.f32.mxu0 %vm5797_vm0, %v5798_v6 }
 0x131   : > { %5722 = vmatpush3.bf16.msra.mxu1 %v5721_v53  ;;  %5725 = vmatpush3.bf16.msra.mxu0 %v5724_v21 }
 0x132   : > { %v978_v55 = vpop.f32.mrb[40].mxu1  ;;  %v1162_v41 = vpop.f32.mrb[40].mxu0  ;;  %5726 = vmatprep.subr.bf16.mxu0 %v5796_v3  ;;  %5729 = vmatprep.subr.bf16.mxu1 %v5796_v3 }
 0x133   : > { %v6947_v5 = vadd.f32 %v978_v55, %v6732_v47  ;;  %v6950_v7 = vadd.f32 %v1162_v41, %v6701_v35  ;;  %v4906_v11 = vpop.f32.mrb[41].mxu1  ;;  %5284 = vmatmul.mubr.msk.f32.gmra.mrb[146].mxu1 %vm433_vm1, %v6730_v45  ;;  %5328 = vmatmul.mubr.msk.f32.gmra.mrb[146].mxu0 %vm433_vm1, %v6730_v45  ;;  %v4950_v60 = vpop.f32.mrb[41].mxu0 }
 0x134   : > { %5286 = vmatprep.mubr.msk.f32.mxu1 %vm5797_vm0, %v5798_v6  ;;  %5330 = vmatprep.mubr.msk.f32.mxu0 %vm5797_vm0, %v5798_v6 }
 0x135   : > { %5728 = vmatpush3.bf16.msra.mxu0 %v5727_v44 }
 0x136   : > { %v983_v47 = vpop.f32.mrb[42].mxu1  ;;  %v1167_v4 = vpop.f32.mrb[42].mxu0  ;;  %5735 = vmatprep.subr.bf16.mxu0 %v5796_v3 }
 0x137   : > { %v6962_v35 = vadd.f32 %v983_v47, %v6749_v61  ;;  %v6965_v10 = vadd.f32 %v1167_v4, %v6719_v42  ;;  %v4909_v13 = vpop.f32.mrb[43].mxu1  ;;  %5287 = vmatmul.mubr.msk.f32.gmra.mrb[148].mxu1 %vm433_vm1, %v6747_v57  ;;  %5331 = vmatmul.mubr.msk.f32.gmra.mrb[148].mxu0 %vm433_vm1, %v6747_v57  ;;  %v4953_v14 = vpop.f32.mrb[43].mxu0 }
 0x138   : > { %5289 = vmatprep.mubr.msk.f32.mxu1 %vm5797_vm0, %v5798_v6  ;;  %5333 = vmatprep.mubr.msk.f32.mxu0 %vm5797_vm0, %v5798_v6 }
 0x13a   : > { %v988_v17 = vpop.f32.mrb[44].mxu1  ;;  %v1172_v61 = vpop.f32.mrb[44].mxu0 }
 0x13b   : > { %v6976_v18 = vadd.f32 %v988_v17, %v6765_v8  ;;  %v6979_v42 = vadd.f32 %v1172_v61, %v6736_v48  ;;  %v4912_v20 = vpop.f32.mrb[45].mxu1  ;;  %5290 = vmatmul.mubr.msk.f32.gmra.mrb[150].mxu1 %vm433_vm1, %v6763_v2  ;;  %5334 = vmatmul.mubr.msk.f32.gmra.mrb[150].mxu0 %vm433_vm1, %v6763_v2  ;;  %v4956_v24 = vpop.f32.mrb[45].mxu0 }
 0x13c   : > { %5292 = vmatprep.mubr.msk.f32.mxu1 %vm5797_vm0, %v5798_v6  ;;  %5336 = vmatprep.mubr.msk.f32.mxu0 %vm5797_vm0, %v5798_v6 }
 0x13e   : > { %v993_v26 = vpop.f32.mrb[46].mxu1  ;;  %v1177_v8 = vpop.f32.mrb[46].mxu0 }
 0x13f   : > { %v6990_v30 = vadd.f32 %v993_v26, %v6781_v15  ;;  %v6993_v48 = vadd.f32 %v1177_v8, %v6752_v62  ;;  %v4915_v53 = vpop.f32.mrb[47].mxu1  ;;  %5293 = vmatmul.mubr.msk.f32.gmra.mrb[152].mxu1 %vm433_vm1, %v6779_v12  ;;  %5337 = vmatmul.mubr.msk.f32.gmra.mrb[152].mxu0 %vm433_vm1, %v6779_v12  ;;  %v4959_v21 = vpop.f32.mrb[47].mxu0 }
 0x140   : > { %5295 = vmatprep.mubr.msk.f32.mxu1 %vm5797_vm0, %v5798_v6  ;;  %5339 = vmatprep.mubr.msk.f32.mxu0 %vm5797_vm0, %v5798_v6 }
 0x142   : > { %v998_v32 = vpop.f32.mrb[48].mxu1  ;;  %v1182_v15 = vpop.f32.mrb[48].mxu0 }
 0x143   : > { %v7004_v58 = vadd.f32 %v998_v32, %v6797_v22  ;;  %v7007_v62 = vadd.f32 %v1182_v15, %v6768_v9  ;;  %v4918_v28 = vpop.f32.mrb[49].mxu1  ;;  %5296 = vmatmul.mubr.msk.f32.gmra.mrb[154].mxu1 %vm433_vm1, %v6795_v19  ;;  %5340 = vmatmul.mubr.msk.f32.gmra.mrb[154].mxu0 %vm433_vm1, %v6795_v19  ;;  %v4962_v40 = vpop.f32.mrb[49].mxu0 }
 0x144   : > { %5298 = vmatprep.mubr.msk.f32.mxu1 %vm5797_vm0, %v5798_v6  ;;  %5342 = vmatprep.mubr.msk.f32.mxu0 %vm5797_vm0, %v5798_v6 }
 0x146   : > { %v1003_v63 = vpop.f32.mrb[50].mxu1  ;;  %v1187_v22 = vpop.f32.mrb[50].mxu0 }
 0x147   : > { %v7018_v44 = vadd.f32 %v1003_v63, %v6813_v27  ;;  %v7021_v9 = vadd.f32 %v1187_v22, %v6784_v16  ;;  %v4921_v55 = vpop.f32.mrb[51].mxu1  ;;  %5299 = vmatmul.mubr.msk.f32.gmra.mrb[156].mxu1 %vm433_vm1, %v6811_v25  ;;  %5343 = vmatmul.mubr.msk.f32.gmra.mrb[156].mxu0 %vm433_vm1, %v6811_v25  ;;  %v4965_v41 = vpop.f32.mrb[51].mxu0 }
 0x148   : > { %5301 = vmatprep.mubr.msk.f32.mxu1 %vm5797_vm0, %v5798_v6  ;;  %5345 = vmatprep.mubr.msk.f32.mxu0 %vm5797_vm0, %v5798_v6 }
 0x14a   : > { %v1008_v11 = vpop.f32.mrb[52].mxu1  ;;  %v1192_v27 = vpop.f32.mrb[52].mxu0 }
 0x14b   : > { %v7032_v60 = vadd.f32 %v1008_v11, %v6829_v54  ;;  %v7035_v16 = vadd.f32 %v1192_v27, %v6800_v23  ;;  %v4924_v47 = vpop.f32.mrb[53].mxu1  ;;  %5302 = vmatmul.mubr.msk.f32.gmra.mrb[158].mxu1 %vm433_vm1, %v6827_v31  ;;  %5346 = vmatmul.mubr.msk.f32.gmra.mrb[158].mxu0 %vm433_vm1, %v6827_v31  ;;  %v4968_v4 = vpop.f32.mrb[53].mxu0  ;;  %v7108_v11 = vld [vmem:[%s5887_s26 + $0x74] sm:$0xff] }
 0x14c   : > { %5304 = vmatprep.mubr.msk.f32.mxu1 %vm5797_vm0, %v5798_v6  ;;  %5348 = vmatprep.mubr.msk.f32.mxu0 %vm5797_vm0, %v5798_v6  ;;  %v4352_v4 = vld [vmem:[%s8204_s2 + $0xf8] sm:$0xff] }
 0x14e   : > { %v1013_v13 = vpop.f32.mrb[54].mxu1  ;;  %v1197_v54 = vpop.f32.mrb[54].mxu0 }
 0x14f   : > { %v7046_v14 = vadd.f32 %v1013_v13, %v6845_v59  ;;  %v7049_v23 = vadd.f32 %v1197_v54, %v6816_v29  ;;  %v4927_v17 = vpop.f32.mrb[55].mxu1  ;;  %5305 = vmatmul.mubr.msk.f32.gmra.mrb[160].mxu1 %vm433_vm1, %v6843_v36  ;;  %5349 = vmatmul.mubr.msk.f32.gmra.mrb[160].mxu0 %vm433_vm1, %v6843_v36  ;;  %v4971_v61 = vpop.f32.mrb[55].mxu0  ;;  %v4379_v13 = vld [vmem:[%s8203_s1 + $0x100] sm:$0xff]  ;;  %v4380_v54 = vld [vmem:[%s8203_s1 + $0x108] sm:$0xff] }
 0x150   : > { %5307 = vmatprep.mubr.msk.f32.mxu1 %vm5797_vm0, %v5798_v6  ;;  %5351 = vmatprep.mubr.msk.f32.mxu0 %vm5797_vm0, %v5798_v6 }
 0x152   : > { %v1018_v20 = vpop.f32.mrb[56].mxu1  ;;  %v1202_v59 = vpop.f32.mrb[56].mxu0 }
 0x153   : > { %v7060_v24 = vadd.f32 %v1018_v20, %v6861_v0  ;;  %v7063_v29 = vadd.f32 %v1202_v59, %v6832_v33  ;;  %v4930_v26 = vpop.f32.mrb[57].mxu1  ;;  %5308 = vmatmul.mubr.msk.f32.gmra.mrb[162].mxu1 %vm433_vm1, %v6859_v43  ;;  %5352 = vmatmul.mubr.msk.f32.gmra.mrb[162].mxu0 %vm433_vm1, %v6859_v43  ;;  %v4974_v8 = vpop.f32.mrb[57].mxu0 }
 0x154   : > { %5310 = vmatprep.mubr.msk.f32.mxu1 %vm5797_vm0, %v5798_v6  ;;  %5354 = vmatprep.mubr.msk.f32.mxu0 %vm5797_vm0, %v5798_v6  ;;  %v7135_v26 = vld [vmem:[%s5887_s26 + $0x15] sm:$0xff] }
 0x156   : > { %v1023_v53 = vpop.f32.mrb[58].mxu1  ;;  %v1207_v0 = vpop.f32.mrb[58].mxu0 }
 0x157   : > { %v7074_v21 = vadd.f32 %v1023_v53, %v6883_v1  ;;  %v7077_v33 = vadd.f32 %v1207_v0, %v6848_v39  ;;  %v4933_v32 = vpop.f32.mrb[59].mxu1  ;;  %5311 = vmatmul.mubr.msk.f32.gmra.mrb[164].mxu1 %vm433_vm1, %v6875_v56  ;;  %5355 = vmatmul.mubr.msk.f32.gmra.mrb[164].mxu0 %vm433_vm1, %v6875_v56  ;;  %v4977_v15 = vpop.f32.mrb[59].mxu0  ;;  %v4349_v39 = vld [vmem:[%s8204_s2 + $0xe0] sm:$0xff]  ;;  %v4350_v1 = vld [vmem:[%s8204_s2 + $0xe8] sm:$0xff]  ;;  %v4382_v0 = vld [vmem:[%s8203_s1 + $0x118] sm:$0xff] }
 0x158   : > { %5313 = vmatprep.mubr.msk.f32.mxu1 %vm5797_vm0, %v5798_v6  ;;  %5357 = vmatprep.mubr.msk.f32.mxu0 %vm5797_vm0, %v5798_v6 }
 0x15a   : > { %v1028_v28 = vpop.f32.mrb[60].mxu1  ;;  %v1212_v40 = vpop.f32.mrb[60].mxu0 }
 0x15b   : > { %v7094_v63 = vadd.f32 %v1028_v28, %v6902_v51  ;;  %v7097_v22 = vadd.f32 %v1212_v40, %v6864_v46  ;;  %v4936_v55 = vpop.f32.mrb[61].mxu1  ;;  %5314 = vmatmul.mubr.msk.f32.gmra.mrb[166].mxu1 %vm433_vm1, %v6897_v50  ;;  %5358 = vmatmul.mubr.msk.f32.gmra.mrb[166].mxu0 %vm433_vm1, %v6897_v50  ;;  %v4980_v41 = vpop.f32.mrb[61].mxu0  ;;  %v5730_v51 = vpack.c.bf16 %v4350_v1, %v4349_v39  ;;  %v4351_v46 = vld [vmem:[%s8204_s2 + $0xf0] sm:$0xff]  ;;  %v7161_v28 = vld [vmem:[%s5887_s26 + $0x1d] sm:$0xff] }
 0x15c   : > { %5360 = vmatprep.mubr.msk.f32.mxu0 %vm5797_vm0, %v5798_v6  ;;  %5371 = vmatprep.mubr.msk.f32.mxu1 %vm5797_vm0, %v5798_v6 }
 0x15e   : > { %v1033_v27 = vpop.f32.mrb[62].mxu1  ;;  %v1217_v47 = vpop.f32.mrb[62].mxu0 }
 0x15f   : > { %v7123_v17 = vadd.f32 %v1033_v27, %v6925_v34  ;;  %v7126_v61 = vadd.f32 %v1217_v47, %v6886_v49  ;;  %v4939_v20 = vpop.f32.mrb[63].mxu1  ;;  %5361 = vmatmul.mubr.msk.f32.gmra.mrb[168].mxu0 %vm433_vm1, %v7108_v11  ;;  %5372 = vmatmul.mubr.msk.f32.vlgmr.msra.gmra.mrb[168].mxu1 %vm433_vm1, %v6712_v38  ;;  %v4983_v59 = vpop.f32.mrb[63].mxu0  ;;  %v5733_v49 = vpack.c.bf16 %v4352_v4, %v4351_v46  ;;  %v4381_v38 = vld [vmem:[%s8203_s1 + $0x110] sm:$0xff] }
 0x160   : > { %5731 = vmatpush3.bf16.msra.mxu1 %v5730_v51  ;;  %5374 = vmatprep.mubr.msk.f32.mxu1 %vm5797_vm0, %v5798_v6  ;;  %v5736_v34 = vpack.c.bf16 %v4380_v54, %v4379_v13 }
 0x161   : > { %5418 = vmatprep.mubr.msk.f32.mxu0 %vm5797_vm0, %v5798_v6  ;;  %5732 = vmatprep.subr.bf16.mxu1 %v5796_v3 }
 0x162   : > { %v1222_v8 = vpop.f32.mrb[64].mxu0  ;;  %v1310_v53 = vpop.f32.mrb[64].mxu1 }
 0x163   : > { %v7147_v32 = vadd.f32 %v1222_v8, %v6914_v52  ;;  %v7150_v15 = vadd.f32 %v1310_v53, %v6934_v37  ;;  %v4997_v39 = vpop.f32.mrb[65].mxu1  ;;  %5375 = vmatmul.mubr.msk.f32.gmra.mrb[170].mxu1 %vm433_vm1, %v6730_v45  ;;  %5419 = vmatmul.mubr.msk.f32.vlgmr.msra.gmra.mrb[170].mxu0 %vm433_vm1, %v7135_v26  ;;  %v4986_v1 = vpop.f32.mrb[65].mxu0  ;;  %v5739_v52 = vpack.c.bf16 %v4382_v0, %v4381_v38 }
 0x164   : > { %5377 = vmatprep.mubr.msk.f32.mxu1 %vm5797_vm0, %v5798_v6  ;;  %5421 = vmatprep.mubr.msk.f32.mxu0 %vm5797_vm0, %v5798_v6 }
 0x165   : > { %5734 = vmatpush3.bf16.msra.mxu1 %v5733_v49  ;;  %5737 = vmatpush3.bf16.msra.mxu0 %v5736_v34 }
 0x166   : > { %v1315_v37 = vpop.f32.mrb[66].mxu1  ;;  %v1512_v40 = vpop.f32.mrb[66].mxu0  ;;  %5738 = vmatprep.subr.bf16.mxu0 %v5796_v3  ;;  %5741 = vmatprep.subr.bf16.mxu1 %v5796_v3 }
 0x167   : > { %v7166_v45 = vadd.f32 %v1315_v37, %v6947_v5  ;;  %v7169_v55 = vadd.f32 %v1512_v40, %v6950_v7  ;;  %v5000_v41 = vpop.f32.mrb[67].mxu1  ;;  %5378 = vmatmul.mubr.msk.f32.gmra.mrb[172].mxu1 %vm433_vm1, %v6747_v57  ;;  %5422 = vmatmul.mubr.msk.f32.gmra.mrb[172].mxu0 %vm433_vm1, %v7161_v28  ;;  %v5044_v51 = vpop.f32.mrb[67].mxu0  ;;  %v7180_v5 = vld [vmem:[%s5887_s26 + $0x25] sm:$0xff] }
 0x168   : > { %5380 = vmatprep.mubr.msk.f32.mxu1 %vm5797_vm0, %v5798_v6  ;;  %5424 = vmatprep.mubr.msk.f32.mxu0 %vm5797_vm0, %v5798_v6 }
 0x169   : > { %5740 = vmatpush3.bf16.msra.mxu0 %v5739_v52 }
 0x16a   : > { %v1320_v7 = vpop.f32.mrb[68].mxu1  ;;  %v1517_v46 = vpop.f32.mrb[68].mxu0  ;;  %5598 = vmatprep.subr.mxu0 %v5798_v6 }
 0x16b   : > { %v7184_v57 = vadd.f32 %v1320_v7, %v6962_v35  ;;  %v7187_v27 = vadd.f32 %v1517_v46, %v6965_v10  ;;  %v5003_v47 = vpop.f32.mrb[69].mxu1  ;;  %5381 = vmatmul.mubr.msk.f32.gmra.mrb[174].mxu1 %vm433_vm1, %v6763_v2  ;;  %5425 = vmatmul.mubr.msk.f32.gmra.mrb[174].mxu0 %vm433_vm1, %v7180_v5  ;;  %v5047_v4 = vpop.f32.mrb[69].mxu0  ;;  %v7198_v35 = vld [vmem:[%s5887_s26 + $0x2d] sm:$0xff] }
 0x16c   : > { %5383 = vmatprep.mubr.msk.f32.mxu1 %vm5797_vm0, %v5798_v6  ;;  %5427 = vmatprep.mubr.msk.f32.mxu0 %vm5797_vm0, %v5798_v6 }
 0x16e   : > { %v1325_v13 = vpop.f32.mrb[70].mxu1  ;;  %v1522_v10 = vpop.f32.mrb[70].mxu0 }
 0x16f   : > { %v7201_v54 = vadd.f32 %v1325_v13, %v6976_v18  ;;  %v7204_v2 = vadd.f32 %v1522_v10, %v6979_v42  ;;  %v5006_v20 = vpop.f32.mrb[71].mxu1  ;;  %5384 = vmatmul.mubr.msk.f32.gmra.mrb[176].mxu1 %vm433_vm1, %v6779_v12  ;;  %5428 = vmatmul.mubr.msk.f32.gmra.mrb[176].mxu0 %vm433_vm1, %v7198_v35  ;;  %v5050_v59 = vpop.f32.mrb[71].mxu0  ;;  %v7215_v18 = vld [vmem:[%s5887_s26 + $0x35] sm:$0xff] }
 0x170   : > { %5386 = vmatprep.mubr.msk.f32.mxu1 %vm5797_vm0, %v5798_v6  ;;  %5430 = vmatprep.mubr.msk.f32.mxu0 %vm5797_vm0, %v5798_v6 }
 0x172   : > { %v1330_v49 = vpop.f32.mrb[72].mxu1  ;;  %v1527_v42 = vpop.f32.mrb[72].mxu0 }
 0x173   : > { %v7218_v34 = vadd.f32 %v1330_v49, %v6990_v30  ;;  %v7221_v12 = vadd.f32 %v1527_v42, %v6993_v48  ;;  %v5009_v8 = vpop.f32.mrb[73].mxu1  ;;  %5387 = vmatmul.mubr.msk.f32.gmra.mrb[178].mxu1 %vm433_vm1, %v6795_v19  ;;  %5431 = vmatmul.mubr.msk.f32.gmra.mrb[178].mxu0 %vm433_vm1, %v7215_v18  ;;  %v5053_v53 = vpop.f32.mrb[73].mxu0  ;;  %v7232_v30 = vld [vmem:[%s5887_s26 + $0x3d] sm:$0xff] }
 0x174   : > { %5389 = vmatprep.mubr.msk.f32.mxu1 %vm5797_vm0, %v5798_v6  ;;  %5433 = vmatprep.mubr.msk.f32.mxu0 %vm5797_vm0, %v5798_v6 }
 0x176   : > { %v1335_v38 = vpop.f32.mrb[74].mxu1  ;;  %v1532_v48 = vpop.f32.mrb[74].mxu0 }
 0x177   : > { %v7235_v0 = vadd.f32 %v1335_v38, %v7004_v58  ;;  %v7238_v19 = vadd.f32 %v1532_v48, %v7007_v62  ;;  %v5012_v39 = vpop.f32.mrb[75].mxu1  ;;  %5390 = vmatmul.mubr.msk.f32.gmra.mrb[180].mxu1 %vm433_vm1, %v6811_v25  ;;  %5434 = vmatmul.mubr.msk.f32.gmra.mrb[180].mxu0 %vm433_vm1, %v7232_v30  ;;  %v5056_v1 = vpop.f32.mrb[75].mxu0  ;;  %v7249_v58 = vld [vmem:[%s5887_s26 + $0x45] sm:$0xff] }
 0x178   : > { %5392 = vmatprep.mubr.msk.f32.mxu1 %vm5797_vm0, %v5798_v6  ;;  %5436 = vmatprep.mubr.msk.f32.mxu0 %vm5797_vm0, %v5798_v6 }
 0x17a   : > { %v1340_v52 = vpop.f32.mrb[76].mxu1  ;;  %v1537_v62 = vpop.f32.mrb[76].mxu0 }
 0x17b   : > { %v7252_v37 = vadd.f32 %v1340_v52, %v7018_v44  ;;  %v7255_v25 = vadd.f32 %v1537_v62, %v7021_v9  ;;  %v5015_v40 = vpop.f32.mrb[77].mxu1  ;;  %5393 = vmatmul.mubr.msk.f32.gmra.mrb[182].mxu1 %vm433_vm1, %v6827_v31  ;;  %5437 = vmatmul.mubr.msk.f32.gmra.mrb[182].mxu0 %vm433_vm1, %v7249_v58  ;;  %v5059_v41 = vpop.f32.mrb[77].mxu0  ;;  %v7266_v44 = vld [vmem:[%s5887_s26 + $0x4d] sm:$0xff] }
 0x17c   : > { %5395 = vmatprep.mubr.msk.f32.mxu1 %vm5797_vm0, %v5798_v6  ;;  %5439 = vmatprep.mubr.msk.f32.mxu0 %vm5797_vm0, %v5798_v6 }
 0x17e   : > { %v1345_v51 = vpop.f32.mrb[78].mxu1  ;;  %v1542_v9 = vpop.f32.mrb[78].mxu0 }
 0x17f   : > { %v7269_v7 = vadd.f32 %v1345_v51, %v7032_v60  ;;  %v7272_v31 = vadd.f32 %v1542_v9, %v7035_v16  ;;  %v5018_v46 = vpop.f32.mrb[79].mxu1  ;;  %5396 = vmatmul.mubr.msk.f32.gmra.mrb[184].mxu1 %vm433_vm1, %v6843_v36  ;;  %5440 = vmatmul.mubr.msk.f32.gmra.mrb[184].mxu0 %vm433_vm1, %v7266_v44  ;;  %v5062_v47 = vpop.f32.mrb[79].mxu0  ;;  %v7283_v60 = vld [vmem:[%s5887_s26 + $0x55] sm:$0xff] }
 0x180   : > { %5398 = vmatprep.mubr.msk.f32.mxu1 %vm5797_vm0, %v5798_v6  ;;  %5442 = vmatprep.mubr.msk.f32.mxu0 %vm5797_vm0, %v5798_v6  ;;  %v4399_v47 = vld [vmem:[%s8204_s2 + $0x118] sm:$0xff] }
 0x182   : > { %v1350_v4 = vpop.f32.mrb[80].mxu1  ;;  %v1547_v16 = vpop.f32.mrb[80].mxu0 }
 0x183   : > { %v7286_v13 = vadd.f32 %v1350_v4, %v7046_v14  ;;  %v7289_v36 = vadd.f32 %v1547_v16, %v7049_v23  ;;  %v5021_v10 = vpop.f32.mrb[81].mxu1  ;;  %5399 = vmatmul.mubr.msk.f32.gmra.mrb[186].mxu1 %vm433_vm1, %v6859_v43  ;;  %5443 = vmatmul.mubr.msk.f32.gmra.mrb[186].mxu0 %vm433_vm1, %v7283_v60  ;;  %v5065_v20 = vpop.f32.mrb[81].mxu0  ;;  %v7300_v14 = vld [vmem:[%s5887_s26 + $0x5d] sm:$0xff] }
 0x184   : > { %5401 = vmatprep.mubr.msk.f32.mxu1 %vm5797_vm0, %v5798_v6  ;;  %5445 = vmatprep.mubr.msk.f32.mxu0 %vm5797_vm0, %v5798_v6 }
 0x186   : > { %v1355_v59 = vpop.f32.mrb[82].mxu1  ;;  %v1552_v23 = vpop.f32.mrb[82].mxu0 }
 0x187   : > { %v7303_v49 = vadd.f32 %v1355_v59, %v7060_v24  ;;  %v7306_v43 = vadd.f32 %v1552_v23, %v7063_v29  ;;  %v5024_v42 = vpop.f32.mrb[83].mxu1  ;;  %5402 = vmatmul.mubr.msk.f32.gmra.mrb[188].mxu1 %vm433_vm1, %v6875_v56  ;;  %5446 = vmatmul.mubr.msk.f32.gmra.mrb[188].mxu0 %vm433_vm1, %v7300_v14  ;;  %v5068_v8 = vpop.f32.mrb[83].mxu0  ;;  %v7317_v24 = vld [vmem:[%s5887_s26 + $0x65] sm:$0xff]  ;;  %v7378_v59 = vld [vmem:[%s5887_s26 + $0x16] sm:$0xff] }
 0x188   : > { %5404 = vmatprep.mubr.msk.f32.mxu1 %vm5797_vm0, %v5798_v6  ;;  %5448 = vmatprep.mubr.msk.f32.mxu0 %vm5797_vm0, %v5798_v6 }
 0x18a   : > { %v1360_v53 = vpop.f32.mrb[84].mxu1  ;;  %v1557_v29 = vpop.f32.mrb[84].mxu0 }
 0x18b   : > { %v7320_v38 = vadd.f32 %v1360_v53, %v7074_v21  ;;  %v7323_v56 = vadd.f32 %v1557_v29, %v7077_v33  ;;  %v5027_v48 = vpop.f32.mrb[85].mxu1  ;;  %5405 = vmatmul.mubr.msk.f32.gmra.mrb[190].mxu1 %vm433_vm1, %v6897_v50  ;;  %5449 = vmatmul.mubr.msk.f32.gmra.mrb[190].mxu0 %vm433_vm1, %v7317_v24  ;;  %v5071_v39 = vpop.f32.mrb[85].mxu0  ;;  %v7334_v21 = vld [vmem:[%s5887_s26 + $0x6d] sm:$0xff]  ;;  %v4396_v33 = vld [vmem:[%s8204_s2 + $0x100] sm:$0xff] }
 0x18c   : > { %5407 = vmatprep.mubr.msk.f32.mxu1 %vm5797_vm0, %v5798_v6  ;;  %5451 = vmatprep.mubr.msk.f32.mxu0 %vm5797_vm0, %v5798_v6  ;;  %v4397_v50 = vld [vmem:[%s8204_s2 + $0x108] sm:$0xff] }
 0x18d   : > { %v5742_v9 = vpack.c.bf16 %v4397_v50, %v4396_v33 }
 0x18e   : > { %v1365_v1 = vpop.f32.mrb[86].mxu1  ;;  %v1562_v52 = vpop.f32.mrb[86].mxu0 }
 0x18f   : > { %v7343_v62 = vadd.f32 %v1365_v1, %v7094_v63  ;;  %v7346_v40 = vadd.f32 %v1562_v52, %v7097_v22  ;;  %v5030_v41 = vpop.f32.mrb[87].mxu1  ;;  %5408 = vmatmul.mubr.msk.f32.gmra.mrb[192].mxu1 %vm433_vm1, %v7108_v11  ;;  %5452 = vmatmul.mubr.msk.f32.gmra.mrb[192].mxu0 %vm433_vm1, %v7334_v21  ;;  %v5074_v51 = vpop.f32.mrb[87].mxu0  ;;  %v7357_v63 = vld [vmem:[%s5887_s26 + $0x75] sm:$0xff] }
 0x190   : > { %5454 = vmatprep.mubr.msk.f32.mxu0 %vm5797_vm0, %v5798_v6  ;;  %5465 = vmatprep.mubr.msk.f32.mxu1 %vm5797_vm0, %v5798_v6  ;;  %v4398_v11 = vld [vmem:[%s8204_s2 + $0x110] sm:$0xff] }
 0x192   : > { %v1370_v22 = vpop.f32.mrb[88].mxu1  ;;  %v1567_v46 = vpop.f32.mrb[88].mxu0 }
 0x193   : > { %v7366_v4 = vadd.f32 %v1370_v22, %v7123_v17  ;;  %v7369_v16 = vadd.f32 %v1567_v46, %v7126_v61  ;;  %v5033_v10 = vpop.f32.mrb[89].mxu1  ;;  %5455 = vmatmul.mubr.msk.f32.gmra.mrb[194].mxu0 %vm433_vm1, %v7357_v63  ;;  %5466 = vmatmul.mubr.msk.f32.vlgmr.msra.gmra.mrb[194].mxu1 %vm433_vm1, %v7135_v26  ;;  %v5077_v20 = vpop.f32.mrb[89].mxu0  ;;  %v5745_v17 = vpack.c.bf16 %v4399_v47, %v4398_v11 }
 0x194   : > { %5743 = vmatpush3.bf16.msra.mxu1 %v5742_v9  ;;  %5468 = vmatprep.mubr.msk.f32.mxu1 %vm5797_vm0, %v5798_v6 }
 0x195   : > { %5512 = vmatprep.mubr.msk.f32.mxu0 %vm5797_vm0, %v5798_v6  ;;  %5744 = vmatprep.subr.bf16.mxu1 %v5796_v3  ;;  %v7398_v3 = vld [vmem:[%s5887_s26 + $0x1e] sm:$0xff] }
 0x196   : > { %v1572_v61 = vpop.f32.mrb[90].mxu0  ;;  %v1660_v23 = vpop.f32.mrb[90].mxu1 }
 0x197   : > { %v7384_v42 = vadd.f32 %v1572_v61, %v7147_v32  ;;  %v7387_v26 = vadd.f32 %v1660_v23, %v7150_v15  ;;  %v5091_v8 = vpop.f32.mrb[91].mxu1  ;;  %5469 = vmatmul.mubr.msk.f32.gmra.mrb[196].mxu1 %vm433_vm1, %v7161_v28  ;;  %5513 = vmatmul.mubr.msk.f32.vlgmr.msra.gmra.mrb[196].mxu0 %vm433_vm1, %v7378_v59  ;;  %v5080_v53 = vpop.f32.mrb[91].mxu0 }
 0x198   : > { %5471 = vmatprep.mubr.msk.f32.mxu1 %vm5797_vm0, %v5798_v6  ;;  %5515 = vmatprep.mubr.msk.f32.mxu0 %vm5797_vm0, %v5798_v6 }
 0x199   : > { %5746 = vmatpush3.bf16.msra.mxu1 %v5745_v17 }
 0x19a   : > { %v1665_v32 = vpop.f32.mrb[92].mxu1  ;;  %v1862_v15 = vpop.f32.mrb[92].mxu0 }
 0x19b   : > { %v7401_v29 = vadd.f32 %v1665_v32, %v7166_v45  ;;  %v7404_v28 = vadd.f32 %v1862_v15, %v7169_v55  ;;  %v5094_v48 = vpop.f32.mrb[93].mxu1  ;;  %5472 = vmatmul.mubr.msk.f32.gmra.mrb[198].mxu1 %vm433_vm1, %v7180_v5  ;;  %5516 = vmatmul.mubr.msk.f32.gmra.mrb[198].mxu0 %vm433_vm1, %v7398_v3  ;;  %v5138_v39 = vpop.f32.mrb[93].mxu0  ;;  %v7415_v45 = vld [vmem:[%s5887_s26 + $0x26] sm:$0xff] }
 0x19c   : > { %5474 = vmatprep.mubr.msk.f32.mxu1 %vm5797_vm0, %v5798_v6  ;;  %5518 = vmatprep.mubr.msk.f32.mxu0 %vm5797_vm0, %v5798_v6 }
 0x19e   : > { %v1670_v33 = vpop.f32.mrb[94].mxu1  ;;  %v1867_v55 = vpop.f32.mrb[94].mxu0 }
 0x19f   : > { %v7418_v50 = vadd.f32 %v1670_v33, %v7184_v57  ;;  %v7421_v5 = vadd.f32 %v1867_v55, %v7187_v27  ;;  %v5097_v1 = vpop.f32.mrb[95].mxu1  ;;  %5475 = vmatmul.mubr.msk.f32.gmra.mrb[200].mxu1 %vm433_vm1, %v7198_v35  ;;  %5519 = vmatmul.mubr.msk.f32.gmra.mrb[200].mxu0 %vm433_vm1, %v7415_v45  ;;  %v5141_v52 = vpop.f32.mrb[95].mxu0  ;;  %v7432_v57 = vld [vmem:[%s5887_s26 + $0x2e] sm:$0xff] }
 0x1a0   : > { %5477 = vmatprep.mubr.msk.f32.mxu1 %vm5797_vm0, %v5798_v6  ;;  %5521 = vmatprep.mubr.msk.f32.mxu0 %vm5797_vm0, %v5798_v6 }
 0x1a2   : > { %v1675_v41 = vpop.f32.mrb[96].mxu1  ;;  %v1872_v27 = vpop.f32.mrb[96].mxu0 }
 0x1a3   : > { %v7435_v51 = vadd.f32 %v1675_v41, %v7201_v54  ;;  %v7438_v35 = vadd.f32 %v1872_v27, %v7204_v2  ;;  %v5100_v9 = vpop.f32.mrb[97].mxu1  ;;  %5478 = vmatmul.mubr.msk.f32.gmra.mrb[202].mxu1 %vm433_vm1, %v7215_v18  ;;  %5522 = vmatmul.mubr.msk.f32.gmra.mrb[202].mxu0 %vm433_vm1, %v7432_v57  ;;  %v5144_v22 = vpop.f32.mrb[97].mxu0  ;;  %v7449_v54 = vld [vmem:[%s5887_s26 + $0x36] sm:$0xff] }
 0x1a4   : > { %5480 = vmatprep.mubr.msk.f32.mxu1 %vm5797_vm0, %v5798_v6  ;;  %5524 = vmatprep.mubr.msk.f32.mxu0 %vm5797_vm0, %v5798_v6 }
 0x1a6   : > { %v1680_v46 = vpop.f32.mrb[98].mxu1  ;;  %v1877_v2 = vpop.f32.mrb[98].mxu0 }
 0x1a7   : > { %v7452_v11 = vadd.f32 %v1680_v46, %v7218_v34  ;;  %v7455_v18 = vadd.f32 %v1877_v2, %v7221_v12  ;;  %v5103_v47 = vpop.f32.mrb[99].mxu1  ;;  %5481 = vmatmul.mubr.msk.f32.gmra.mrb[204].mxu1 %vm433_vm1, %v7232_v30  ;;  %5525 = vmatmul.mubr.msk.f32.gmra.mrb[204].mxu0 %vm433_vm1, %v7449_v54  ;;  %v5147_v10 = vpop.f32.mrb[99].mxu0  ;;  %v7466_v34 = vld [vmem:[%s5887_s26 + $0x3e] sm:$0xff] }
 0x1a8   : > { %5483 = vmatprep.mubr.msk.f32.mxu1 %vm5797_vm0, %v5798_v6  ;;  %5527 = vmatprep.mubr.msk.f32.mxu0 %vm5797_vm0, %v5798_v6 }
 0x1aa   : > { %v1685_v20 = vpop.f32.mrb[100].mxu1  ;;  %v1882_v12 = vpop.f32.mrb[100].mxu0 }
 0x1ab   : > { %v7469_v17 = vadd.f32 %v1685_v20, %v7235_v0  ;;  %v7472_v30 = vadd.f32 %v1882_v12, %v7238_v19  ;;  %v5106_v61 = vpop.f32.mrb[101].mxu1  ;;  %5484 = vmatmul.mubr.msk.f32.gmra.mrb[206].mxu1 %vm433_vm1, %v7249_v58  ;;  %5528 = vmatmul.mubr.msk.f32.gmra.mrb[206].mxu0 %vm433_vm1, %v7466_v34  ;;  %v5150_v23 = vpop.f32.mrb[101].mxu0  ;;  %v7483_v0 = vld [vmem:[%s5887_s26 + $0x46] sm:$0xff] }
 0x1ac   : > { %5486 = vmatprep.mubr.msk.f32.mxu1 %vm5797_vm0, %v5798_v6  ;;  %5530 = vmatprep.mubr.msk.f32.mxu0 %vm5797_vm0, %v5798_v6 }
 0x1ae   : > { %v1690_v8 = vpop.f32.mrb[102].mxu1  ;;  %v1887_v19 = vpop.f32.mrb[102].mxu0 }
 0x1af   : > { %v7486_v53 = vadd.f32 %v1690_v8, %v7252_v37  ;;  %v7489_v58 = vadd.f32 %v1887_v19, %v7255_v25  ;;  %v5109_v32 = vpop.f32.mrb[103].mxu1  ;;  %5487 = vmatmul.mubr.msk.f32.gmra.mrb[208].mxu1 %vm433_vm1, %v7266_v44  ;;  %5531 = vmatmul.mubr.msk.f32.gmra.mrb[208].mxu0 %vm433_vm1, %v7483_v0  ;;  %v5153_v15 = vpop.f32.mrb[103].mxu0  ;;  %v7500_v37 = vld [vmem:[%s5887_s26 + $0x4e] sm:$0xff] }
 0x1b0   : > { %5489 = vmatprep.mubr.msk.f32.mxu1 %vm5797_vm0, %v5798_v6  ;;  %5533 = vmatprep.mubr.msk.f32.mxu0 %vm5797_vm0, %v5798_v6  ;;  %v7585_v32 = vld [vmem:[%s5887_s26 + $0x76] sm:$0xff] }
 0x1b2   : > { %v1695_v48 = vpop.f32.mrb[104].mxu1  ;;  %v1892_v25 = vpop.f32.mrb[104].mxu0 }
 0x1b3   : > { %v7503_v39 = vadd.f32 %v1695_v48, %v7269_v7  ;;  %v7506_v44 = vadd.f32 %v1892_v25, %v7272_v31  ;;  %v5112_v33 = vpop.f32.mrb[105].mxu1  ;;  %5490 = vmatmul.mubr.msk.f32.gmra.mrb[210].mxu1 %vm433_vm1, %v7283_v60  ;;  %5534 = vmatmul.mubr.msk.f32.gmra.mrb[210].mxu0 %vm433_vm1, %v7500_v37  ;;  %v5156_v55 = vpop.f32.mrb[105].mxu0  ;;  %v7517_v7 = vld [vmem:[%s5887_s26 + $0x56] sm:$0xff] }
 0x1b4   : > { %5492 = vmatprep.mubr.msk.f32.mxu1 %vm5797_vm0, %v5798_v6  ;;  %5536 = vmatprep.mubr.msk.f32.mxu0 %vm5797_vm0, %v5798_v6 }
 0x1b6   : > { %v1700_v1 = vpop.f32.mrb[106].mxu1  ;;  %v1897_v31 = vpop.f32.mrb[106].mxu0 }
 0x1b7   : > { %v7520_v52 = vadd.f32 %v1700_v1, %v7286_v13  ;;  %v7523_v60 = vadd.f32 %v1897_v31, %v7289_v36  ;;  %v5115_v41 = vpop.f32.mrb[107].mxu1  ;;  %5493 = vmatmul.mubr.msk.f32.gmra.mrb[212].mxu1 %vm433_vm1, %v7300_v14  ;;  %5537 = vmatmul.mubr.msk.f32.gmra.mrb[212].mxu0 %vm433_vm1, %v7517_v7  ;;  %v5159_v27 = vpop.f32.mrb[107].mxu0  ;;  %v7534_v13 = vld [vmem:[%s5887_s26 + $0x5e] sm:$0xff] }
 0x1b8   : > { %5495 = vmatprep.mubr.msk.f32.mxu1 %vm5797_vm0, %v5798_v6  ;;  %5539 = vmatprep.mubr.msk.f32.mxu0 %vm5797_vm0, %v5798_v6 }
 0x1ba   : > { %v1705_v9 = vpop.f32.mrb[108].mxu1  ;;  %v1902_v36 = vpop.f32.mrb[108].mxu0 }
 0x1bb   : > { %v7537_v22 = vadd.f32 %v1705_v9, %v7303_v49  ;;  %v7540_v14 = vadd.f32 %v1902_v36, %v7306_v43  ;;  %v5118_v46 = vpop.f32.mrb[109].mxu1  ;;  %5496 = vmatmul.mubr.msk.f32.gmra.mrb[214].mxu1 %vm433_vm1, %v7317_v24  ;;  %5540 = vmatmul.mubr.msk.f32.gmra.mrb[214].mxu0 %vm433_vm1, %v7534_v13  ;;  %v5162_v2 = vpop.f32.mrb[109].mxu0  ;;  %v7551_v49 = vld [vmem:[%s5887_s26 + $0x66] sm:$0xff] }
 0x1bc   : > { %5498 = vmatprep.mubr.msk.f32.mxu1 %vm5797_vm0, %v5798_v6  ;;  %5542 = vmatprep.mubr.msk.f32.mxu0 %vm5797_vm0, %v5798_v6 }
 0x1be   : > { %v1710_v47 = vpop.f32.mrb[110].mxu1  ;;  %v1907_v43 = vpop.f32.mrb[110].mxu0 }
 0x1bf   : > { %v7554_v10 = vadd.f32 %v1710_v47, %v7320_v38  ;;  %v7557_v24 = vadd.f32 %v1907_v43, %v7323_v56  ;;  %v5121_v20 = vpop.f32.mrb[111].mxu1  ;;  %5499 = vmatmul.mubr.msk.f32.gmra.mrb[216].mxu1 %vm433_vm1, %v7334_v21  ;;  %5543 = vmatmul.mubr.msk.f32.gmra.mrb[216].mxu0 %vm433_vm1, %v7551_v49  ;;  %v5165_v12 = vpop.f32.mrb[111].mxu0  ;;  %v7568_v38 = vld [vmem:[%s5887_s26 + $0x6e] sm:$0xff] }
 0x1c0   : > { %5501 = vmatprep.mubr.msk.f32.mxu1 %vm5797_vm0, %v5798_v6  ;;  %5545 = vmatprep.mubr.msk.f32.mxu0 %vm5797_vm0, %v5798_v6 }
 0x1c2   : > { %v1715_v61 = vpop.f32.mrb[112].mxu1  ;;  %v1912_v56 = vpop.f32.mrb[112].mxu0 }
 0x1c3   : > { %v7571_v23 = vadd.f32 %v1715_v61, %v7343_v62  ;;  %v7574_v21 = vadd.f32 %v1912_v56, %v7346_v40  ;;  %v5124_v8 = vpop.f32.mrb[113].mxu1  ;;  %5502 = vmatmul.mubr.msk.f32.gmra.mrb[218].mxu1 %vm433_vm1, %v7357_v63  ;;  %5546 = vmatmul.mubr.msk.f32.gmra.mrb[218].mxu0 %vm433_vm1, %v7568_v38  ;;  %v5168_v19 = vpop.f32.mrb[113].mxu0 }
 0x1c4   : > { %5548 = vmatprep.mubr.msk.f32.mxu0 %vm5797_vm0, %v5798_v6  ;;  %5559 = vmatprep.mubr.msk.f32.mxu1 %vm5797_vm0, %v5798_v6 }
 0x1c6   : > { %v1720_v62 = vpop.f32.mrb[114].mxu1  ;;  %v1917_v15 = vpop.f32.mrb[114].mxu0 }
 0x1c7   : > { %v7588_v40 = vadd.f32 %v1720_v62, %v7366_v4  ;;  %v7591_v48 = vadd.f32 %v1917_v15, %v7369_v16  ;;  %v5127_v63 = vpop.f32.mrb[115].mxu1  ;;  %5549 = vmatmul.mubr.msk.f32.gmra.mrb[220].mxu0 %vm433_vm1, %v7585_v32  ;;  %5560 = vmatmul.mubr.msk.f32.vlgmr.msra.gmra.mrb[220].mxu1 %vm433_vm1, %v7378_v59  ;;  %v5171_v25 = vpop.f32.mrb[115].mxu0 }
 0x1c8   : > { %5562 = vmatprep.mubr.msk.f32.mxu1 %vm5797_vm0, %v5798_v6  ;;  %5600 = vmatprep.mubr.msk.f32.mxu0 %vm5797_vm0, %v5798_v6 }
 0x1ca   : > { %v1922_v33 = vpop.f32.mrb[116].mxu0  ;;  %v2010_v4 = vpop.f32.mrb[116].mxu1 }
 0x1cb   : > { %v7602_v55 = vadd.f32 %v1922_v33, %v7384_v42  ;;  %v7605_v16 = vadd.f32 %v2010_v4, %v7387_v26  ;;  %v5185_v1 = vpop.f32.mrb[117].mxu1  ;;  %5563 = vmatmul.mubr.msk.f32.gmra.mrb[222].mxu1 %vm433_vm1, %v7398_v3  ;;  %v5174_v59 = vpop.f32.mrb[117].mxu0 }
 0x1cc   : > { %5565 = vmatprep.mubr.msk.f32.mxu1 %vm5797_vm0, %v5798_v6 }
 0x1ce   : > { %v2015_v31 = vpop.f32.mrb[118].mxu1  ;;  %v2212_v41 = vpop.f32.mrb[118].mxu0 }
 0x1cf   : > { %v7612_v27 = vadd.f32 %v2015_v31, %v7401_v29  ;;  %v7615_v9 = vadd.f32 %v2212_v41, %v7404_v28  ;;  %v5188_v42 = vpop.f32.mrb[119].mxu1  ;;  %5566 = vmatmul.mubr.msk.f32.gmra.mrb[224].mxu1 %vm433_vm1, %v7415_v45  ;;  %v5232_v26 = vpop.f32.mrb[119].mxu0 }
 0x1d0   : > { %5568 = vmatprep.mubr.msk.f32.mxu1 %vm5797_vm0, %v5798_v6 }
 0x1d2   : > { %v2020_v3 = vpop.f32.mrb[120].mxu1  ;;  %v2217_v36 = vpop.f32.mrb[120].mxu0 }
 0x1d3   : > { %v7622_v46 = vadd.f32 %v2020_v3, %v7418_v50  ;;  %v7625_v2 = vadd.f32 %v2217_v36, %v7421_v5  ;;  %v5191_v29 = vpop.f32.mrb[121].mxu1  ;;  %5569 = vmatmul.mubr.msk.f32.gmra.mrb[226].mxu1 %vm433_vm1, %v7432_v57  ;;  %v5235_v28 = vpop.f32.mrb[121].mxu0 }
 0x1d4   : > { %5571 = vmatprep.mubr.msk.f32.mxu1 %vm5797_vm0, %v5798_v6 }
 0x1d6   : > { %v2025_v45 = vpop.f32.mrb[122].mxu1  ;;  %v2222_v47 = vpop.f32.mrb[122].mxu0 }
 0x1d7   : > { %v7632_v43 = vadd.f32 %v2025_v45, %v7435_v51  ;;  %v7635_v20 = vadd.f32 %v2222_v47, %v7438_v35  ;;  %v5194_v50 = vpop.f32.mrb[123].mxu1  ;;  %5572 = vmatmul.mubr.msk.f32.gmra.mrb[228].mxu1 %vm433_vm1, %v7449_v54  ;;  %v5238_v5 = vpop.f32.mrb[123].mxu0 }
 0x1d8   : > { %5574 = vmatprep.mubr.msk.f32.mxu1 %vm5797_vm0, %v5798_v6 }
 0x1da   : > { %v2030_v57 = vpop.f32.mrb[124].mxu1  ;;  %v2227_v12 = vpop.f32.mrb[124].mxu0 }
 0x1db   : > { %v7642_v61 = vadd.f32 %v2030_v57, %v7452_v11  ;;  %v7645_v56 = vadd.f32 %v2227_v12, %v7455_v18  ;;  %v5197_v51 = vpop.f32.mrb[125].mxu1  ;;  %5575 = vmatmul.mubr.msk.f32.gmra.mrb[230].mxu1 %vm433_vm1, %v7466_v34  ;;  %v5241_v35 = vpop.f32.mrb[125].mxu0 }
 0x1dc   : > { %5577 = vmatprep.mubr.msk.f32.mxu1 %vm5797_vm0, %v5798_v6 }
 0x1de   : > { %v2035_v54 = vpop.f32.mrb[126].mxu1  ;;  %v2232_v8 = vpop.f32.mrb[126].mxu0 }
 0x1df   : > { %v7652_v19 = vadd.f32 %v2035_v54, %v7469_v17  ;;  %v7655_v62 = vadd.f32 %v2232_v8, %v7472_v30  ;;  %v5200_v11 = vpop.f32.mrb[127].mxu1  ;;  %5578 = vmatmul.mubr.msk.f32.gmra.mrb[232].mxu1 %vm433_vm1, %v7483_v0  ;;  %v5244_v18 = vpop.f32.mrb[127].mxu0 }
 0x1e0   : > { %5580 = vmatprep.mubr.msk.f32.mxu1 %vm5797_vm0, %v5798_v6 }
 0x1e2   : > { %v2040_v34 = vpop.f32.mrb[128].mxu1  ;;  %v2237_v15 = vpop.f32.mrb[128].mxu0 }
 0x1e3   : > { %v7662_v63 = vadd.f32 %v2040_v34, %v7486_v53  ;;  %v7665_v25 = vadd.f32 %v2237_v15, %v7489_v58  ;;  %v5203_v17 = vpop.f32.mrb[129].mxu1  ;;  %5581 = vmatmul.mubr.msk.f32.gmra.mrb[234].mxu1 %vm433_vm1, %v7500_v37  ;;  %v5247_v30 = vpop.f32.mrb[129].mxu0 }
 0x1e4   : > { %5583 = vmatprep.mubr.msk.f32.mxu1 %vm5797_vm0, %v5798_v6 }
 0x1e6   : > { %v2045_v0 = vpop.f32.mrb[130].mxu1  ;;  %v2242_v33 = vpop.f32.mrb[130].mxu0 }
 0x1e7   : > { %v7672_v4 = vadd.f32 %v2045_v0, %v7503_v39  ;;  %v7675_v1 = vadd.f32 %v2242_v33, %v7506_v44  ;;  %v5206_v53 = vpop.f32.mrb[131].mxu1  ;;  %5584 = vmatmul.mubr.msk.f32.gmra.mrb[236].mxu1 %vm433_vm1, %v7517_v7  ;;  %v5250_v58 = vpop.f32.mrb[131].mxu0 }
 0x1e8   : > { %5586 = vmatprep.mubr.msk.f32.mxu1 %vm5797_vm0, %v5798_v6 }
 0x1ea   : > { %v2050_v37 = vpop.f32.mrb[132].mxu1  ;;  %v2247_v59 = vpop.f32.mrb[132].mxu0 }
 0x1eb   : > { %v7682_v31 = vadd.f32 %v2050_v37, %v7520_v52  ;;  %v7685_v41 = vadd.f32 %v2247_v59, %v7523_v60  ;;  %v5209_v39 = vpop.f32.mrb[133].mxu1  ;;  %5587 = vmatmul.mubr.msk.f32.gmra.mrb[238].mxu1 %vm433_vm1, %v7534_v13  ;;  %v5253_v44 = vpop.f32.mrb[133].mxu0 }
 0x1ec   : > { %5589 = vmatprep.mubr.msk.f32.mxu1 %vm5797_vm0, %v5798_v6 }
 0x1ee   : > { %v2055_v7 = vpop.f32.mrb[134].mxu1  ;;  %v2252_v42 = vpop.f32.mrb[134].mxu0 }
 0x1ef   : > { %v7692_v26 = vadd.f32 %v2055_v7, %v7537_v22  ;;  %v7695_v3 = vadd.f32 %v2252_v42, %v7540_v14  ;;  %v5212_v52 = vpop.f32.mrb[135].mxu1  ;;  %5590 = vmatmul.mubr.msk.f32.gmra.mrb[240].mxu1 %vm433_vm1, %v7551_v49  ;;  %v5256_v60 = vpop.f32.mrb[135].mxu0 }
 0x1f0   : > { %5592 = vmatprep.mubr.msk.f32.mxu1 %vm5797_vm0, %v5798_v6 }
 0x1f2   : > { %v2060_v13 = vpop.f32.mrb[136].mxu1  ;;  %v2257_v36 = vpop.f32.mrb[136].mxu0 }
 0x1f3   : > { %v7702_v29 = vadd.f32 %v2060_v13, %v7554_v10  ;;  %v7705_v28 = vadd.f32 %v2257_v36, %v7557_v24  ;;  %v5215_v22 = vpop.f32.mrb[137].mxu1  ;;  %5593 = vmatmul.mubr.msk.f32.gmra.mrb[242].mxu1 %vm433_vm1, %v7568_v38  ;;  %v5259_v14 = vpop.f32.mrb[137].mxu0 }
 0x1f4   : > { %5595 = vmatprep.mubr.msk.f32.mxu1 %vm5797_vm0, %v5798_v6 }
 0x1f6   : > { %v2065_v49 = vpop.f32.mrb[138].mxu1  ;;  %v2262_v45 = vpop.f32.mrb[138].mxu0 }
 0x1f7   : > { %v7712_v47 = vadd.f32 %v2065_v49, %v7571_v23  ;;  %v7715_v50 = vadd.f32 %v2262_v45, %v7574_v21  ;;  %v5218_v10 = vpop.f32.mrb[139].mxu1  ;;  %5596 = vmatmul.mubr.msk.f32.gmra.mrb[244].mxu1 %vm433_vm1, %v7585_v32  ;;  %v5262_v24 = vpop.f32.mrb[139].mxu0 }
 0x1fa   : > { %v2070_v5 = vpop.f32.mrb[140].mxu1  ;;  %v2267_v57 = vpop.f32.mrb[140].mxu0 }
 0x1fb   : > { %v7720_v38 = vadd.f32 %v2070_v5, %v7588_v40  ;;  %v7723_v12 = vadd.f32 %v2267_v57, %v7591_v48  ;;  %v5221_v51 = vpop.f32.mrb[141].mxu1  ;;  %v5265_v35 = vpop.f32.mrb[141].mxu0 }
 0x1fe   : > { %v2272_v23 = vpop.f32.mrb[142].mxu0  ;;  %v2360_v54 = vpop.f32.mrb[142].mxu1 }
 0x1ff   : > { %v7726_v21 = vadd.f32 %v2272_v23, %v7602_v55  ;;  %v7729_v8 = vadd.f32 %v2360_v54, %v7605_v16  ;;  %v5279_v32 = vpop.f32.mrb[143].mxu1  ;;  %v5268_v11 = vpop.f32.mrb[143].mxu0 }
 0x202   : > { %v2365_v18 = vpop.f32.mrb[144].mxu1  ;;  %v2562_v34 = vpop.f32.mrb[144].mxu0 }
 0x203   : > { %v7732_v40 = vadd.f32 %v2365_v18, %v7612_v27  ;;  %v7735_v48 = vadd.f32 %v2562_v34, %v7615_v9  ;;  %v5282_v15 = vpop.f32.mrb[145].mxu1  ;;  %v5326_v17 = vpop.f32.mrb[145].mxu0  ;;  %v3658_v27 = vld [vmem:[%s8208_s6] sm:$0xf] }
 0x204   : > { %5599 = vmatpush3.msk.msra.mxu0 %vm3705_vm2, %v3658_v27 }
 0x206   : > { %v2370_v30 = vpop.f32.mrb[146].mxu1  ;;  %v2567_v0 = vpop.f32.mrb[146].mxu0 }
 0x207   : > { %v7738_v55 = vadd.f32 %v2370_v30, %v7622_v46  ;;  %v7741_v16 = vadd.f32 %v2567_v0, %v7625_v2  ;;  %v5285_v33 = vpop.f32.mrb[147].mxu1  ;;  %v5329_v53 = vpop.f32.mrb[147].mxu0 }
 0x20a   : > { %v2375_v9 = vpop.f32.mrb[148].mxu1  ;;  %v2572_v58 = vpop.f32.mrb[148].mxu0 }
 0x20b   : > { %v7747_v37 = vadd.f32 %v2375_v9, %v7632_v43  ;;  %v7750_v59 = vadd.f32 %v2572_v58, %v7635_v20  ;;  %v5288_v46 = vpop.f32.mrb[149].mxu1  ;;  %v5332_v39 = vpop.f32.mrb[149].mxu0 }
 0x20e   : > { %v2380_v2 = vpop.f32.mrb[150].mxu1  ;;  %v2577_v44 = vpop.f32.mrb[150].mxu0 }
 0x20f   : > { %v7753_v7 = vadd.f32 %v2380_v2, %v7642_v61  ;;  %v7756_v42 = vadd.f32 %v2577_v44, %v7645_v56  ;;  %v5291_v52 = vpop.f32.mrb[151].mxu1  ;;  %v5335_v60 = vpop.f32.mrb[151].mxu0 }
 0x212   : > { %v2385_v13 = vpop.f32.mrb[152].mxu1  ;;  %v2582_v36 = vpop.f32.mrb[152].mxu0 }
 0x213   : > { %v7759_v43 = vadd.f32 %v2385_v13, %v7652_v19  ;;  %v7762_v20 = vadd.f32 %v2582_v36, %v7655_v62  ;;  %v5294_v22 = vpop.f32.mrb[153].mxu1  ;;  %v5338_v14 = vpop.f32.mrb[153].mxu0 }
 0x216   : > { %v2390_v49 = vpop.f32.mrb[154].mxu1  ;;  %v2587_v45 = vpop.f32.mrb[154].mxu0 }
 0x217   : > { %v7765_v61 = vadd.f32 %v2390_v49, %v7662_v63  ;;  %v7768_v56 = vadd.f32 %v2587_v45, %v7665_v25  ;;  %v5297_v10 = vpop.f32.mrb[155].mxu1  ;;  %v5341_v24 = vpop.f32.mrb[155].mxu0 }
 0x21a   : > { %v2395_v5 = vpop.f32.mrb[156].mxu1  ;;  %v2592_v57 = vpop.f32.mrb[156].mxu0 }
 0x21b   : > { %v7771_v19 = vadd.f32 %v2395_v5, %v7672_v4  ;;  %v7774_v62 = vadd.f32 %v2592_v57, %v7675_v1  ;;  %v5300_v51 = vpop.f32.mrb[157].mxu1  ;;  %v5344_v35 = vpop.f32.mrb[157].mxu0 }
 0x21e   : > { %v2400_v23 = vpop.f32.mrb[158].mxu1  ;;  %v2597_v54 = vpop.f32.mrb[158].mxu0 }
 0x21f   : > { %v7777_v63 = vadd.f32 %v2400_v23, %v7682_v31  ;;  %v7780_v25 = vadd.f32 %v2597_v54, %v7685_v41  ;;  %v5303_v32 = vpop.f32.mrb[159].mxu1  ;;  %v5347_v11 = vpop.f32.mrb[159].mxu0 }
 0x222   : > { %v2405_v18 = vpop.f32.mrb[160].mxu1  ;;  %v2602_v34 = vpop.f32.mrb[160].mxu0 }
 0x223   : > { %v7783_v4 = vadd.f32 %v2405_v18, %v7692_v26  ;;  %v7786_v1 = vadd.f32 %v2602_v34, %v7695_v3  ;;  %v5306_v15 = vpop.f32.mrb[161].mxu1  ;;  %v5350_v17 = vpop.f32.mrb[161].mxu0 }
 0x226   : > { %v2410_v30 = vpop.f32.mrb[162].mxu1  ;;  %v2607_v0 = vpop.f32.mrb[162].mxu0 }
 0x227   : > { %v7789_v31 = vadd.f32 %v2410_v30, %v7702_v29  ;;  %v7792_v41 = vadd.f32 %v2607_v0, %v7705_v28  ;;  %v5309_v33 = vpop.f32.mrb[163].mxu1  ;;  %v5353_v53 = vpop.f32.mrb[163].mxu0 }
 0x22a   : > { %v2415_v27 = vpop.f32.mrb[164].mxu1  ;;  %v2612_v9 = vpop.f32.mrb[164].mxu0 }
 0x22b   : > { %v7795_v26 = vadd.f32 %v2415_v27, %v7712_v47  ;;  %v7798_v3 = vadd.f32 %v2612_v9, %v7715_v50  ;;  %v5312_v58 = vpop.f32.mrb[165].mxu1  ;;  %v5356_v46 = vpop.f32.mrb[165].mxu0 }
 0x22e   : > { %v2420_v39 = vpop.f32.mrb[166].mxu1  ;;  %v2617_v2 = vpop.f32.mrb[166].mxu0 }
 0x22f   : > { %v7801_v29 = vadd.f32 %v2420_v39, %v7720_v38  ;;  %v7804_v28 = vadd.f32 %v2617_v2, %v7723_v12  ;;  %v5315_v44 = vpop.f32.mrb[167].mxu1  ;;  %v5359_v52 = vpop.f32.mrb[167].mxu0 }
 0x232   : > { %v2622_v60 = vpop.f32.mrb[168].mxu0  ;;  %v2710_v13 = vpop.f32.mrb[168].mxu1 }
 0x233   : > { %v7807_v47 = vadd.f32 %v2622_v60, %v7726_v21  ;;  %v7810_v50 = vadd.f32 %v2710_v13, %v7729_v8  ;;  %v5373_v36 = vpop.f32.mrb[169].mxu1  ;;  %v5362_v22 = vpop.f32.mrb[169].mxu0 }
 0x236   : > { %v2715_v14 = vpop.f32.mrb[170].mxu1  ;;  %v2912_v49 = vpop.f32.mrb[170].mxu0 }
 0x237   : > { %v7813_v38 = vadd.f32 %v2715_v14, %v7732_v40  ;;  %v7816_v12 = vadd.f32 %v2912_v49, %v7735_v48  ;;  %v5376_v45 = vpop.f32.mrb[171].mxu1  ;;  %v5420_v10 = vpop.f32.mrb[171].mxu0 }
 0x23a   : > { %v2720_v24 = vpop.f32.mrb[172].mxu1  ;;  %v2917_v5 = vpop.f32.mrb[172].mxu0 }
 0x23b   : > { %v7819_v21 = vadd.f32 %v2720_v24, %v7738_v55  ;;  %v7822_v8 = vadd.f32 %v2917_v5, %v7741_v16  ;;  %v5379_v57 = vpop.f32.mrb[173].mxu1  ;;  %v5423_v51 = vpop.f32.mrb[173].mxu0 }
 0x23e   : > { %v2725_v35 = vpop.f32.mrb[174].mxu1  ;;  %v2922_v23 = vpop.f32.mrb[174].mxu0 }
 0x23f   : > { %v7825_v40 = vadd.f32 %v2725_v35, %v7747_v37  ;;  %v7828_v48 = vadd.f32 %v2922_v23, %v7750_v59  ;;  %v5382_v54 = vpop.f32.mrb[175].mxu1  ;;  %v5426_v32 = vpop.f32.mrb[175].mxu0 }
 0x242   : > { %v2730_v11 = vpop.f32.mrb[176].mxu1  ;;  %v2927_v18 = vpop.f32.mrb[176].mxu0 }
 0x243   : > { %v7831_v55 = vadd.f32 %v2730_v11, %v7753_v7  ;;  %v7834_v16 = vadd.f32 %v2927_v18, %v7756_v42  ;;  %v5385_v34 = vpop.f32.mrb[177].mxu1  ;;  %v5429_v15 = vpop.f32.mrb[177].mxu0 }
 0x246   : > { %v2735_v17 = vpop.f32.mrb[178].mxu1  ;;  %v2932_v30 = vpop.f32.mrb[178].mxu0 }
 0x247   : > { %v7837_v37 = vadd.f32 %v2735_v17, %v7759_v43  ;;  %v7840_v59 = vadd.f32 %v2932_v30, %v7762_v20  ;;  %v5388_v0 = vpop.f32.mrb[179].mxu1  ;;  %v5432_v33 = vpop.f32.mrb[179].mxu0 }
 0x24a   : > { %v2740_v53 = vpop.f32.mrb[180].mxu1  ;;  %v2937_v27 = vpop.f32.mrb[180].mxu0 }
 0x24b   : > { %v7843_v7 = vadd.f32 %v2740_v53, %v7765_v61  ;;  %v7846_v42 = vadd.f32 %v2937_v27, %v7768_v56  ;;  %v5391_v9 = vpop.f32.mrb[181].mxu1  ;;  %v5435_v58 = vpop.f32.mrb[181].mxu0 }
 0x24e   : > { %v2745_v46 = vpop.f32.mrb[182].mxu1  ;;  %v2942_v39 = vpop.f32.mrb[182].mxu0 }
 0x24f   : > { %v7849_v43 = vadd.f32 %v2745_v46, %v7771_v19  ;;  %v7852_v20 = vadd.f32 %v2942_v39, %v7774_v62  ;;  %v5394_v2 = vpop.f32.mrb[183].mxu1  ;;  %v5438_v44 = vpop.f32.mrb[183].mxu0 }
 0x252   : > { %v2750_v52 = vpop.f32.mrb[184].mxu1  ;;  %v2947_v60 = vpop.f32.mrb[184].mxu0 }
 0x253   : > { %v7855_v61 = vadd.f32 %v2750_v52, %v7777_v63  ;;  %v7858_v56 = vadd.f32 %v2947_v60, %v7780_v25  ;;  %v5397_v13 = vpop.f32.mrb[185].mxu1  ;;  %v5441_v36 = vpop.f32.mrb[185].mxu0 }
 0x256   : > { %v2755_v22 = vpop.f32.mrb[186].mxu1  ;;  %v2952_v14 = vpop.f32.mrb[186].mxu0 }
 0x257   : > { %v7861_v19 = vadd.f32 %v2755_v22, %v7783_v4  ;;  %v7864_v62 = vadd.f32 %v2952_v14, %v7786_v1  ;;  %v5400_v49 = vpop.f32.mrb[187].mxu1  ;;  %v5444_v45 = vpop.f32.mrb[187].mxu0 }
 0x25a   : > { %v2760_v10 = vpop.f32.mrb[188].mxu1  ;;  %v2957_v24 = vpop.f32.mrb[188].mxu0 }
 0x25b   : > { %v7867_v63 = vadd.f32 %v2760_v10, %v7789_v31  ;;  %v7870_v25 = vadd.f32 %v2957_v24, %v7792_v41  ;;  %v5403_v5 = vpop.f32.mrb[189].mxu1  ;;  %v5447_v57 = vpop.f32.mrb[189].mxu0 }
 0x25e   : > { %v2765_v51 = vpop.f32.mrb[190].mxu1  ;;  %v2962_v4 = vpop.f32.mrb[190].mxu0 }
 0x25f   : > { %v7875_v35 = vadd.f32 %v2765_v51, %v7795_v26  ;;  %v7878_v1 = vadd.f32 %v2962_v4, %v7798_v3  ;;  %v5406_v23 = vpop.f32.mrb[191].mxu1  ;;  %v5450_v54 = vpop.f32.mrb[191].mxu0 }
 0x262   : > { %v2770_v31 = vpop.f32.mrb[192].mxu1  ;;  %v2967_v32 = vpop.f32.mrb[192].mxu0 }
 0x263   : > { %v7881_v41 = vadd.f32 %v2770_v31, %v7801_v29  ;;  %v7884_v11 = vadd.f32 %v2967_v32, %v7804_v28  ;;  %v5409_v18 = vpop.f32.mrb[193].mxu1  ;;  %v5453_v34 = vpop.f32.mrb[193].mxu0  ;;  %v7897_v28 = vld [vmem:[%s8205_s3] ss:$0 sm:$0xff] }
 0x266   : > { %v2972_v15 = vpop.f32.mrb[194].mxu0  ;;  %v3060_v26 = vpop.f32.mrb[194].mxu1 }
 0x267   : > { %v7887_v17 = vadd.f32 %v2972_v15, %v7807_v47  ;;  %v7890_v3 = vadd.f32 %v3060_v26, %v7810_v50  ;;  %v5467_v30 = vpop.f32.mrb[195].mxu1  ;;  %v5456_v0 = vpop.f32.mrb[195].mxu0 }
 0x26a   : > { %v3065_v29 = vpop.f32.mrb[196].mxu1  ;;  %v3262_v33 = vpop.f32.mrb[196].mxu0 }
 0x26b   : > { %v7900_v53 = vadd.f32 %v3065_v29, %v7813_v38  ;;  %v3326_v47 = vadd.f32 %v3262_v33, %v7816_v12  ;;  %v5470_v27 = vpop.f32.mrb[197].mxu1  ;;  %v5514_v50 = vpop.f32.mrb[197].mxu0 }
 0x26d   : > { %v7910_v9 = vadd.f32 %v7897_v28, %v3326_v47 }
 0x26e   : > { %v3070_v58 = vpop.f32.mrb[198].mxu1  ;;  %v3267_v46 = vpop.f32.mrb[198].mxu0 }
 0x26f   : > { %3528 = vst.msk [vmem:[%s7907_s15] sm:$0xff] %vm3527_vm3, %v7910_v9  ;;  %v7916_v38 = vadd.f32 %v3070_v58, %v7819_v21  ;;  %v3327_v12 = vadd.f32 %v3267_v46, %v7822_v8  ;;  %v5473_v39 = vpop.f32.mrb[199].mxu1  ;;  %v5517_v2 = vpop.f32.mrb[199].mxu0 }
 0x271   : > { %v7920_v44 = vadd.f32 %v7897_v28, %v3327_v12 }
 0x272   : > { %v3075_v52 = vpop.f32.mrb[200].mxu1  ;;  %v3272_v60 = vpop.f32.mrb[200].mxu0 }
 0x273   : > { %3529 = vst.msk [vmem:[%s7907_s15 + $0x8] sm:$0xff] %vm3527_vm3, %v7920_v44  ;;  %v7926_v13 = vadd.f32 %v3075_v52, %v7825_v40  ;;  %v3328_v36 = vadd.f32 %v3272_v60, %v7828_v48  ;;  %v5476_v21 = vpop.f32.mrb[201].mxu1  ;;  %v5520_v22 = vpop.f32.mrb[201].mxu0 }
 0x275   : > { %v7930_v8 = vadd.f32 %v7897_v28, %v3328_v36 }
 0x276   : > { %v3080_v14 = vpop.f32.mrb[202].mxu1  ;;  %v3277_v49 = vpop.f32.mrb[202].mxu0 }
 0x277   : > { %3530 = vst.msk [vmem:[%s7907_s15 + $0x10] sm:$0xff] %vm3527_vm3, %v7930_v8  ;;  %v7936_v45 = vadd.f32 %v3080_v14, %v7831_v55  ;;  %v3329_v10 = vadd.f32 %v3277_v49, %v7834_v16  ;;  %v5479_v40 = vpop.f32.mrb[203].mxu1  ;;  %v5523_v24 = vpop.f32.mrb[203].mxu0 }
 0x279   : > { %v7940_v48 = vadd.f32 %v7897_v28, %v3329_v10 }
 0x27a   : > { %v3085_v5 = vpop.f32.mrb[204].mxu1  ;;  %v3282_v57 = vpop.f32.mrb[204].mxu0 }
 0x27b   : > { %3531 = vst.msk [vmem:[%s7907_s15 + $0x18] sm:$0xff] %vm3527_vm3, %v7940_v48  ;;  %v7946_v51 = vadd.f32 %v3085_v5, %v7837_v37  ;;  %v3330_v4 = vadd.f32 %v3282_v57, %v7840_v59  ;;  %v5482_v55 = vpop.f32.mrb[205].mxu1  ;;  %v5526_v23 = vpop.f32.mrb[205].mxu0 }
 0x27d   : > { %v7950_v16 = vadd.f32 %v7897_v28, %v3330_v4 }
 0x27e   : > { %v3090_v54 = vpop.f32.mrb[206].mxu1  ;;  %v3287_v31 = vpop.f32.mrb[206].mxu0 }
 0x27f   : > { %3532 = vst.msk [vmem:[%s7907_s15 + $0x20] sm:$0xff] %vm3527_vm3, %v7950_v16  ;;  %v7956_v32 = vadd.f32 %v3090_v54, %v7843_v7  ;;  %v3331_v18 = vadd.f32 %v3287_v31, %v7846_v42  ;;  %v5485_v37 = vpop.f32.mrb[207].mxu1  ;;  %v5529_v34 = vpop.f32.mrb[207].mxu0 }
 0x280   : > { %v8025_v37 = vld [vmem:[%s8206_s4] ss:$0 sm:$0xff] }
 0x281   : > { %v7960_v59 = vadd.f32 %v7897_v28, %v3331_v18 }
 0x282   : > { %v3095_v15 = vpop.f32.mrb[208].mxu1  ;;  %v3292_v26 = vpop.f32.mrb[208].mxu0 }
 0x283   : > { %3533 = vst.msk [vmem:[%s7907_s15 + $0x28] sm:$0xff] %vm3527_vm3, %v7960_v59  ;;  %v7966_v30 = vadd.f32 %v3095_v15, %v7849_v43  ;;  %v3332_v0 = vadd.f32 %v3292_v26, %v7852_v20  ;;  %v5488_v7 = vpop.f32.mrb[209].mxu1  ;;  %v5532_v29 = vpop.f32.mrb[209].mxu0 }
 0x285   : > { %v7970_v42 = vadd.f32 %v7897_v28, %v3332_v0 }
 0x286   : > { %v3100_v33 = vpop.f32.mrb[210].mxu1  ;;  %v3297_v47 = vpop.f32.mrb[210].mxu0 }
 0x287   : > { %3534 = vst.msk [vmem:[%s7907_s15 + $0x30] sm:$0xff] %vm3527_vm3, %v7970_v42  ;;  %v7976_v27 = vadd.f32 %v3100_v33, %v7855_v61  ;;  %v3333_v50 = vadd.f32 %v3297_v47, %v7858_v56  ;;  %v5491_v43 = vpop.f32.mrb[211].mxu1  ;;  %v5535_v58 = vpop.f32.mrb[211].mxu0 }
 0x289   : > { %v7980_v20 = vadd.f32 %v7897_v28, %v3333_v50 }
 0x28a   : > { %v3105_v46 = vpop.f32.mrb[212].mxu1  ;;  %v3302_v12 = vpop.f32.mrb[212].mxu0 }
 0x28b   : > { %3535 = vst.msk [vmem:[%s7907_s15 + $0x38] sm:$0xff] %vm3527_vm3, %v7980_v20  ;;  %v7986_v39 = vadd.f32 %v3105_v46, %v7861_v19  ;;  %v3334_v2 = vadd.f32 %v3302_v12, %v7864_v62  ;;  %v5494_v61 = vpop.f32.mrb[213].mxu1  ;;  %v5538_v52 = vpop.f32.mrb[213].mxu0 }
 0x28d   : > { %v7990_v56 = vadd.f32 %v7897_v28, %v3334_v2 }
 0x28e   : > { %v3110_v60 = vpop.f32.mrb[214].mxu1  ;;  %v3307_v36 = vpop.f32.mrb[214].mxu0 }
 0x28f   : > { %3536 = vst.msk [vmem:[%s7907_s15 + $0x40] sm:$0xff] %vm3527_vm3, %v7990_v56  ;;  %v7996_v21 = vadd.f32 %v3110_v60, %v7867_v63  ;;  %v3335_v22 = vadd.f32 %v3307_v36, %v7870_v25  ;;  %v5497_v19 = vpop.f32.mrb[215].mxu1  ;;  %v5541_v14 = vpop.f32.mrb[215].mxu0 }
 0x291   : > { %v8000_v62 = vadd.f32 %v7897_v28, %v3335_v22 }
 0x292   : > { %v3115_v49 = vpop.f32.mrb[216].mxu1  ;;  %v3312_v10 = vpop.f32.mrb[216].mxu0 }
 0x293   : > { %3537 = vst.msk [vmem:[%s7907_s15 + $0x48] sm:$0xff] %vm3527_vm3, %v8000_v62  ;;  %v8006_v40 = vadd.f32 %v3115_v49, %v7875_v35  ;;  %v3336_v24 = vadd.f32 %v3312_v10, %v7878_v1  ;;  %v5500_v63 = vpop.f32.mrb[217].mxu1  ;;  %v5544_v5 = vpop.f32.mrb[217].mxu0 }
 0x295   : > { %v8010_v25 = vadd.f32 %v7897_v28, %v3336_v24 }
 0x296   : > { %v3120_v57 = vpop.f32.mrb[218].mxu1  ;;  %v3317_v4 = vpop.f32.mrb[218].mxu0 }
 0x297   : > { %3538 = vst.msk [vmem:[%s7907_s15 + $0x50] sm:$0xff] %vm3527_vm3, %v8010_v25  ;;  %v8016_v55 = vadd.f32 %v3120_v57, %v7881_v41  ;;  %v3337_v35 = vadd.f32 %v3317_v4, %v7884_v11  ;;  %v5503_v23 = vpop.f32.mrb[219].mxu1  ;;  %v5547_v54 = vpop.f32.mrb[219].mxu0 }
 0x298   : > { %v3619_v23 = vld [vmem:[%s8064_s23] sm:$0xff] }
 0x299   : > { %v8020_v1 = vadd.f32 %v7897_v28, %v3337_v35 }
 0x29a   : > { %v3322_v31 = vpop.f32.mrb[220].mxu0  ;;  %v3410_v18 = vpop.f32.mrb[220].mxu1 }
 0x29b   : > { %3539 = vst.msk [vmem:[%s7907_s15 + $0x58] sm:$0xff] %vm3527_vm3, %v8020_v1  ;;  %v3338_v41 = vadd.f32 %v3322_v31, %v7887_v17  ;;  %v3474_v11 = vadd.f32 %v3410_v18, %v7890_v3  ;;  %v5561_v34 = vpop.f32.mrb[221].mxu1  ;;  %v5550_v15 = vpop.f32.mrb[221].mxu0 }
 0x29d   : > { %v8039_v26 = vadd.f32 %v7897_v28, %v3338_v41  ;;  %v3514_v0 = vadd.f32 %v8025_v37, %v3474_v11 }
 0x29e   : > { %v3415_v7 = vpop.f32.mrb[222].mxu1 }
 0x29f   : > { %3540 = vst.msk [vmem:[%s7907_s15 + $0x60] sm:$0xff] %vm3527_vm3, %v8039_v26  ;;  %3541 = vst.msk [vmem:[%s8036_s20] sm:$0xff] %vm3527_vm3, %v3514_v0  ;;  %v3554_v17 = vmax.f32 %v3514_v0, -30.0  ;;  %v3475_v3 = vadd.f32 %v3415_v7, %v7900_v53  ;;  %v5564_v29 = vpop.f32.mrb[223].mxu1 }
 0x2a1   : > { %v3567_v33 = vmin.f32 %v3554_v17, 20.0  ;;  %v3515_v47 = vadd.f32 %v8025_v37, %v3475_v3 }
 0x2a2   : > { %v3420_v50 = vpop.f32.mrb[224].mxu1 }
 0x2a3   : > { %v3580_v43 = vmul.f32 0.5, %v3567_v33  ;;  %3542 = vst.msk [vmem:[%s8036_s20 + $0x8] sm:$0xff] %vm3527_vm3, %v3515_v47  ;;  %v3555_v28 = vmax.f32 %v3515_v47, -30.0  ;;  %v3476_v58 = vadd.f32 %v3420_v50, %v7916_v38  ;;  %v5567_v46 = vpop.f32.mrb[225].mxu1  ;;  %v3620_v47 = vld [vmem:[%s8064_s23 + $0x8] sm:$0xff] }
 0x2a5   : > { %v3593_v12 = vmul.f32 1.442695, %v3580_v43  ;;  %v3568_v2 = vmin.f32 %v3555_v28, 20.0  ;;  %v3516_v61 = vadd.f32 %v8025_v37, %v3476_v58 }
 0x2a6   : > { %v3425_v52 = vpop.f32.mrb[226].mxu1 }
 0x2a7   : > { %5762 = vpow2.f32 %v3593_v12  ;;  %v3581_v53 = vmul.f32 0.5, %v3568_v2  ;;  %3543 = vst.msk [vmem:[%s8036_s20 + $0x10] sm:$0xff] %vm3527_vm3, %v3516_v61  ;;  %v3556_v60 = vmax.f32 %v3516_v61, -30.0  ;;  %v3477_v36 = vadd.f32 %v3425_v52, %v7926_v13  ;;  %v5570_v22 = vpop.f32.mrb[227].mxu1 }
 0x2a9   : > { %v3595_v19 = vmul.f32 1.442695, %v3581_v53  ;;  %v3569_v14 = vmin.f32 %v3556_v60, 20.0  ;;  %v3517_v38 = vadd.f32 %v8025_v37, %v3477_v36 }
 0x2aa   : > { %v3430_v49 = vpop.f32.mrb[228].mxu1 }
 0x2ab   : > { %5764 = vpow2.f32 %v3595_v19  ;;  %v3582_v10 = vmul.f32 0.5, %v3569_v14  ;;  %3544 = vst.msk [vmem:[%s8036_s20 + $0x18] sm:$0xff] %vm3527_vm3, %v3517_v38  ;;  %v3557_v24 = vmax.f32 %v3517_v38, -30.0  ;;  %v3478_v63 = vadd.f32 %v3430_v49, %v7936_v45  ;;  %v5573_v5 = vpop.f32.mrb[229].mxu1 }
 0x2ad   : > { %v3597_v13 = vmul.f32 1.442695, %v3582_v10  ;;  %v3570_v57 = vmin.f32 %v3557_v24, 20.0  ;;  %v3518_v4 = vadd.f32 %v8025_v37, %v3478_v63 }
 0x2ae   : > { %v3435_v35 = vpop.f32.mrb[230].mxu1 }
 0x2af   : > { %5766 = vpow2.f32 %v3597_v13  ;;  %v3583_v54 = vmul.f32 0.5, %v3570_v57  ;;  %3545 = vst.msk [vmem:[%s8036_s20 + $0x20] sm:$0xff] %vm3527_vm3, %v3518_v4  ;;  %v3558_v45 = vmax.f32 %v3518_v4, -30.0  ;;  %v3479_v31 = vadd.f32 %v3435_v35, %v7946_v51  ;;  %v5576_v18 = vpop.f32.mrb[231].mxu1 }
 0x2b1   : > { %v5763_v41 = vpop.eup %5762  ;;  %v3599_v11 = vmul.f32 1.442695, %v3583_v54  ;;  %v3571_v34 = vmin.f32 %v3558_v45, 20.0  ;;  %v3519_v15 = vadd.f32 %v8025_v37, %v3479_v31 }
 0x2b2   : > { %v3632_v0 = vmul.f32 %v5763_v41, %v3619_v23  ;;  %v3440_v7 = vpop.f32.mrb[232].mxu1 }
 0x2b3   : > { %5768 = vpow2.f32 %v3599_v11  ;;  %v3584_v17 = vmul.f32 0.5, %v3571_v34  ;;  %3546 = vst.msk [vmem:[%s8036_s20 + $0x28] sm:$0xff] %vm3527_vm3, %v3519_v15  ;;  %v3559_v3 = vmax.f32 %v3519_v15, -30.0  ;;  %v3480_v29 = vadd.f32 %v3440_v7, %v7956_v32  ;;  %v5579_v33 = vpop.f32.mrb[233].mxu1 }
 0x2b4   : > { %v3645_v51 = vadd.f32 %v3632_v0, %v7910_v9  ;;  %v3621_v9 = vld [vmem:[%s8064_s23 + $0x10] sm:$0xff] }
 0x2b5   : > { %v5765_v50 = vpop.eup %5764  ;;  %v3601_v43 = vmul.f32 1.442695, %v3584_v17  ;;  %v3572_v28 = vmin.f32 %v3559_v3, 20.0  ;;  %v3520_v58 = vadd.f32 %v8025_v37, %v3480_v29 }
 0x2b6   : > { %v3445_v46 = vpop.f32.mrb[234].mxu1  ;;  %5601 = vmatmul.mubr.msk.f32.vlgmr.msra.gmra.mrb[222].mxu0 %vm3527_vm3, %v3645_v51  ;;  %v3633_v12 = vmul.f32 %v5765_v50, %v3620_v47 }
 0x2b7   : > { %5770 = vpow2.f32 %v3601_v43  ;;  %v3585_v2 = vmul.f32 0.5, %v3572_v28  ;;  %3547 = vst.msk [vmem:[%s8036_s20 + $0x30] sm:$0xff] %vm3527_vm3, %v3520_v58  ;;  %v3560_v32 = vmax.f32 %v3520_v58, -30.0  ;;  %v3481_v61 = vadd.f32 %v3445_v46, %v7966_v30  ;;  %v5582_v52 = vpop.f32.mrb[235].mxu1  ;;  %5603 = vmatprep.mubr.msk.f32.mxu0 %vm5797_vm0, %v5798_v6 }
 0x2b8   : > { %v3646_v53 = vadd.f32 %v3633_v12, %v7920_v44  ;;  %v3622_v44 = vld [vmem:[%s8064_s23 + $0x18] sm:$0xff] }
 0x2b9   : > { %v5767_v60 = vpop.eup %5766  ;;  %v3603_v36 = vmul.f32 1.442695, %v3585_v2  ;;  %v3573_v22 = vmin.f32 %v3560_v32, 20.0  ;;  %v3521_v19 = vadd.f32 %v8025_v37, %v3481_v61 }
 0x2ba   : > { %v3450_v14 = vpop.f32.mrb[236].mxu1  ;;  %5604 = vmatmul.mubr.msk.f32.gmra.mrb[224].mxu0 %vm3527_vm3, %v3646_v53  ;;  %v3634_v38 = vmul.f32 %v5767_v60, %v3621_v9 }
 0x2bb   : > { %5772 = vpow2.f32 %v3603_v36  ;;  %v3586_v49 = vmul.f32 0.5, %v3573_v22  ;;  %3548 = vst.msk [vmem:[%s8036_s20 + $0x38] sm:$0xff] %vm3527_vm3, %v3521_v19  ;;  %v3561_v30 = vmax.f32 %v3521_v19, -30.0  ;;  %v3482_v10 = vadd.f32 %v3450_v14, %v7976_v27  ;;  %v5585_v24 = vpop.f32.mrb[237].mxu1  ;;  %5606 = vmatprep.mubr.msk.f32.mxu0 %vm5797_vm0, %v5798_v6 }
 0x2bc   : > { %v3647_v63 = vadd.f32 %v3634_v38, %v7930_v8  ;;  %v3623_v8 = vld [vmem:[%s8064_s23 + $0x20] sm:$0xff] }
 0x2bd   : > { %v5769_v5 = vpop.eup %5768  ;;  %v3605_v13 = vmul.f32 1.442695, %v3586_v49  ;;  %v3574_v57 = vmin.f32 %v3561_v30, 20.0  ;;  %v3522_v4 = vadd.f32 %v8025_v37, %v3482_v10 }
 0x2be   : > { %v3455_v35 = vpop.f32.mrb[238].mxu1  ;;  %5607 = vmatmul.mubr.msk.f32.gmra.mrb[226].mxu0 %vm3527_vm3, %v3647_v63  ;;  %v3635_v23 = vmul.f32 %v5769_v5, %v3622_v44  ;;  %v3627_v5 = vld [vmem:[%s8064_s23 + $0x40] sm:$0xff] }
 0x2bf   : > { %5774 = vpow2.f32 %v3605_v13  ;;  %v3587_v54 = vmul.f32 0.5, %v3574_v57  ;;  %3549 = vst.msk [vmem:[%s8036_s20 + $0x40] sm:$0xff] %vm3527_vm3, %v3522_v4  ;;  %v3562_v27 = vmax.f32 %v3522_v4, -30.0  ;;  %v3483_v45 = vadd.f32 %v3455_v35, %v7986_v39  ;;  %v5588_v31 = vpop.f32.mrb[239].mxu1  ;;  %5609 = vmatprep.mubr.msk.f32.mxu0 %vm5797_vm0, %v5798_v6 }
 0x2c0   : > { %v3648_v18 = vadd.f32 %v3635_v23, %v7940_v48  ;;  %v3624_v48 = vld [vmem:[%s8064_s23 + $0x28] sm:$0xff]  ;;  %v3629_v31 = vld [vmem:[%s8064_s23 + $0x50] sm:$0xff] }
 0x2c1   : > { %v5771_v41 = vpop.eup %5770  ;;  %v3607_v11 = vmul.f32 1.442695, %v3587_v54  ;;  %v3575_v34 = vmin.f32 %v3562_v27, 20.0  ;;  %v3523_v15 = vadd.f32 %v8025_v37, %v3483_v45  ;;  %v3628_v23 = vld [vmem:[%s8064_s23 + $0x48] sm:$0xff] }
 0x2c2   : > { %v3460_v0 = vpop.f32.mrb[240].mxu1  ;;  %5610 = vmatmul.mubr.msk.f32.gmra.mrb[228].mxu0 %vm3527_vm3, %v3648_v18  ;;  %v3636_v7 = vmul.f32 %v5771_v41, %v3623_v8 }
 0x2c3   : > { %5776 = vpow2.f32 %v3607_v11  ;;  %v3588_v17 = vmul.f32 0.5, %v3575_v34  ;;  %3550 = vst.msk [vmem:[%s8036_s20 + $0x48] sm:$0xff] %vm3527_vm3, %v3523_v15  ;;  %v3563_v39 = vmax.f32 %v3523_v15, -30.0  ;;  %v3484_v3 = vadd.f32 %v3460_v0, %v7996_v21  ;;  %v5591_v29 = vpop.f32.mrb[241].mxu1  ;;  %5612 = vmatprep.mubr.msk.f32.mxu0 %vm5797_vm0, %v5798_v6  ;;  %v3631_v0 = vld [vmem:[%s8064_s23 + $0x60] sm:$0xff] }
 0x2c4   : > { %v3649_v33 = vadd.f32 %v3636_v7, %v7950_v16  ;;  %v3625_v16 = vld [vmem:[%s8064_s23 + $0x30] sm:$0xff] }
 0x2c5   : > { %v5773_v47 = vpop.eup %5772  ;;  %v3609_v51 = vmul.f32 1.442695, %v3588_v17  ;;  %v3576_v50 = vmin.f32 %v3563_v39, 20.0  ;;  %v3524_v43 = vadd.f32 %v8025_v37, %v3484_v3 }
 0x2c6   : > { %v3465_v28 = vpop.f32.mrb[242].mxu1  ;;  %5613 = vmatmul.mubr.msk.f32.gmra.mrb[230].mxu0 %vm3527_vm3, %v3649_v33  ;;  %v3637_v58 = vmul.f32 %v5773_v47, %v3624_v48 }
 0x2c7   : > { %5778 = vpow2.f32 %v3609_v51  ;;  %v3589_v46 = vmul.f32 0.5, %v3576_v50  ;;  %3551 = vst.msk [vmem:[%s8036_s20 + $0x50] sm:$0xff] %vm3527_vm3, %v3524_v43  ;;  %v3564_v21 = vmax.f32 %v3524_v43, -30.0  ;;  %v3485_v12 = vadd.f32 %v3465_v28, %v8006_v40  ;;  %v5594_v2 = vpop.f32.mrb[243].mxu1  ;;  %5615 = vmatprep.mubr.msk.f32.mxu0 %vm5797_vm0, %v5798_v6 }
 0x2c8   : > { %v3650_v32 = vadd.f32 %v3637_v58, %v7960_v59  ;;  %v3626_v59 = vld [vmem:[%s8064_s23 + $0x38] sm:$0xff] }
 0x2c9   : > { %v5775_v61 = vpop.eup %5774  ;;  %v3611_v52 = vmul.f32 1.442695, %v3589_v46  ;;  %v3577_v9 = vmin.f32 %v3564_v21, 20.0  ;;  %v3525_v53 = vadd.f32 %v8025_v37, %v3485_v12 }
 0x2ca   : > { %v3470_v60 = vpop.f32.mrb[244].mxu1  ;;  %5616 = vmatmul.mubr.msk.f32.gmra.mrb[232].mxu0 %vm3527_vm3, %v3650_v32  ;;  %v3638_v36 = vmul.f32 %v5775_v61, %v3625_v16 }
 0x2cb   : > { %5780 = vpow2.f32 %v3611_v52  ;;  %v3590_v22 = vmul.f32 0.5, %v3577_v9  ;;  %3552 = vst.msk [vmem:[%s8036_s20 + $0x58] sm:$0xff] %vm3527_vm3, %v3525_v53  ;;  %v3565_v40 = vmax.f32 %v3525_v53, -30.0  ;;  %v3486_v19 = vadd.f32 %v3470_v60, %v8016_v55  ;;  %v5597_v14 = vpop.f32.mrb[245].mxu1  ;;  %5618 = vmatprep.mubr.msk.f32.mxu0 %vm5797_vm0, %v5798_v6 }
 0x2cc   : > { %v3651_v38 = vadd.f32 %v3638_v36, %v7970_v42 }
 0x2cd   : > { %v5777_v49 = vpop.eup %5776  ;;  %v3613_v30 = vmul.f32 1.442695, %v3590_v22  ;;  %v3578_v10 = vmin.f32 %v3565_v40, 20.0  ;;  %v3526_v24 = vadd.f32 %v8025_v37, %v3486_v19 }
 0x2ce   : > { %5619 = vmatmul.mubr.msk.f32.gmra.mrb[234].mxu0 %vm3527_vm3, %v3651_v38  ;;  %v3639_v44 = vmul.f32 %v5777_v49, %v3626_v59 }
 0x2cf   : > { %5782 = vpow2.f32 %v3613_v30  ;;  %v3591_v63 = vmul.f32 0.5, %v3578_v10  ;;  %3553 = vst.msk [vmem:[%s8036_s20 + $0x60] sm:$0xff] %vm3527_vm3, %v3526_v24  ;;  %v3566_v55 = vmax.f32 %v3526_v24, -30.0  ;;  %5621 = vmatprep.mubr.msk.f32.mxu0 %vm5797_vm0, %v5798_v6 }
 0x2d0   : > { %v3652_v42 = vadd.f32 %v3639_v44, %v7980_v20 }
 0x2d1   : > { %v5779_v13 = vpop.eup %5778  ;;  %v3615_v57 = vmul.f32 1.442695, %v3591_v63  ;;  %v3579_v4 = vmin.f32 %v3566_v55, 20.0 }
 0x2d2   : > { %5622 = vmatmul.mubr.msk.f32.gmra.mrb[236].mxu0 %vm3527_vm3, %v3652_v42  ;;  %v3640_v37 = vmul.f32 %v5779_v13, %v3627_v5 }
 0x2d3   : > { %5784 = vpow2.f32 %v3615_v57  ;;  %v3592_v35 = vmul.f32 0.5, %v3579_v4  ;;  %5624 = vmatprep.mubr.msk.f32.mxu0 %vm5797_vm0, %v5798_v6 }
 0x2d4   : > { %v3653_v54 = vadd.f32 %v3640_v37, %v7990_v56  ;;  %v3630_v56 = vld [vmem:[%s8064_s23 + $0x58] sm:$0xff] }
 0x2d5   : > { %v5781_v27 = vpop.eup %5780  ;;  %v3617_v45 = vmul.f32 1.442695, %v3592_v35 }
 0x2d6   : > { %5625 = vmatmul.mubr.msk.f32.gmra.mrb[238].mxu0 %vm3527_vm3, %v3653_v54  ;;  %v3641_v20 = vmul.f32 %v5781_v27, %v3628_v23 }
 0x2d7   : > { %5786 = vpow2.f32 %v3617_v45  ;;  %5627 = vmatprep.mubr.msk.f32.mxu0 %vm5797_vm0, %v5798_v6 }
 0x2d8   : > { %v3654_v8 = vadd.f32 %v3641_v20, %v8000_v62 }
 0x2d9   : > { %v5783_v18 = vpop.eup %5782 }
 0x2da   : > { %5628 = vmatmul.mubr.msk.f32.gmra.mrb[240].mxu0 %vm3527_vm3, %v3654_v8  ;;  %v3642_v41 = vmul.f32 %v5783_v18, %v3629_v31 }
 0x2db   : > { %5630 = vmatprep.mubr.msk.f32.mxu0 %vm5797_vm0, %v5798_v6 }
 0x2dc   : > { %v3655_v11 = vadd.f32 %v3642_v41, %v8010_v25  ;;  %v4415_v25 = vld [vmem:[%s8209_s7] ss:$0 sm:$0xff] }
 0x2dd   : > { %v5785_v34 = vpop.eup %5784 }
 0x2de   : > { %5631 = vmatmul.mubr.msk.f32.gmra.mrb[242].mxu0 %vm3527_vm3, %v3655_v11  ;;  %v3643_v15 = vmul.f32 %v5785_v34, %v3630_v56 }
 0x2df   : > { %5633 = vmatprep.mubr.msk.f32.mxu0 %vm5797_vm0, %v5798_v6 }
 0x2e0   : > { %v3656_v62 = vadd.f32 %v3643_v15, %v8020_v1 }
 0x2e1   : > { %v5787_v7 = vpop.eup %5786 }
 0x2e2   : > { %5634 = vmatmul.mubr.msk.f32.gmra.mrb[244].mxu0 %vm3527_vm3, %v3656_v62  ;;  %v3644_v17 = vmul.f32 %v5787_v7, %v3631_v0 }
 0x2e3   : > { %5636 = vmatprep.mubr.msk.f32.mxu0 %vm5797_vm0, %v5798_v6 }
 0x2e4   : > { %v3657_v39 = vadd.f32 %v3644_v17, %v8039_v26 }
 0x2e6   : > { %5637 = vmatmul.mubr.msk.f32.gmra.mrb[246].mxu0 %vm3527_vm3, %v3657_v39 }
 0x389   : > { %v3775_v1 = vpop.f32.mrb[222].mxu0 }
 0x38a   : > { %v3776_v3 = vadd.f32 %v4415_v25, %v3775_v1  ;;  %v5602_v6 = vpop.f32.mrb[223].mxu0 }
 0x38c   : > { %3839 = vst.msk [vmem:[%s8171_s28] sm:$0xff] %vm3527_vm3, %v3776_v3 }
 0x38d   : > { %v3780_v26 = vpop.f32.mrb[224].mxu0 }
 0x38e   : > { %v3781_v29 = vadd.f32 %v4415_v25, %v3780_v26  ;;  %v5605_v48 = vpop.f32.mrb[225].mxu0 }
 0x390   : > { %3840 = vst.msk [vmem:[%s8171_s28 + $0x8] sm:$0xff] %vm3527_vm3, %v3781_v29 }
 0x391   : > { %v3785_v33 = vpop.f32.mrb[226].mxu0 }
 0x392   : > { %v3786_v47 = vadd.f32 %v4415_v25, %v3785_v33  ;;  %v5608_v51 = vpop.f32.mrb[227].mxu0 }
 0x394   : > { %3841 = vst.msk [vmem:[%s8171_s28 + $0x10] sm:$0xff] %vm3527_vm3, %v3786_v47 }
 0x395   : > { %v3790_v50 = vpop.f32.mrb[228].mxu0 }
 0x396   : > { %v3791_v43 = vadd.f32 %v4415_v25, %v3790_v50  ;;  %v5611_v28 = vpop.f32.mrb[229].mxu0 }
 0x398   : > { %3842 = vst.msk [vmem:[%s8171_s28 + $0x18] sm:$0xff] %vm3527_vm3, %v3791_v43 }
 0x399   : > { %v3795_v58 = vpop.f32.mrb[230].mxu0 }
 0x39a   : > { %v3796_v46 = vadd.f32 %v4415_v25, %v3795_v58  ;;  %v5614_v21 = vpop.f32.mrb[231].mxu0 }
 0x39c   : > { %3843 = vst.msk [vmem:[%s8171_s28 + $0x20] sm:$0xff] %vm3527_vm3, %v3796_v46 }
 0x39d   : > { %v3800_v12 = vpop.f32.mrb[232].mxu0 }
 0x39e   : > { %v3801_v2 = vadd.f32 %v4415_v25, %v3800_v12  ;;  %v5617_v16 = vpop.f32.mrb[233].mxu0 }
 0x3a0   : > { %3844 = vst.msk [vmem:[%s8171_s28 + $0x28] sm:$0xff] %vm3527_vm3, %v3801_v2 }
 0x3a1   : > { %v3805_v32 = vpop.f32.mrb[234].mxu0 }
 0x3a2   : > { %v3806_v61 = vadd.f32 %v4415_v25, %v3805_v32  ;;  %v5620_v52 = vpop.f32.mrb[235].mxu0 }
 0x3a4   : > { %3845 = vst.msk [vmem:[%s8171_s28 + $0x30] sm:$0xff] %vm3527_vm3, %v3806_v61 }
 0x3a5   : > { %v3810_v9 = vpop.f32.mrb[236].mxu0 }
 0x3a6   : > { %v3811_v53 = vadd.f32 %v4415_v25, %v3810_v9  ;;  %v5623_v60 = vpop.f32.mrb[237].mxu0 }
 0x3a8   : > { %3846 = vst.msk [vmem:[%s8171_s28 + $0x38] sm:$0xff] %vm3527_vm3, %v3811_v53 }
 0x3a9   : > { %v3815_v36 = vpop.f32.mrb[238].mxu0 }
 0x3aa   : > { %v3816_v22 = vadd.f32 %v4415_v25, %v3815_v36  ;;  %v5626_v40 = vpop.f32.mrb[239].mxu0 }
 0x3ac   : > { %3847 = vst.msk [vmem:[%s8171_s28 + $0x40] sm:$0xff] %vm3527_vm3, %v3816_v22 }
 0x3ad   : > { %v3820_v19 = vpop.f32.mrb[240].mxu0 }
 0x3ae   : > { %v3821_v14 = vadd.f32 %v4415_v25, %v3820_v19  ;;  %v5629_v59 = vpop.f32.mrb[241].mxu0 }
 0x3b0   : > { %3848 = vst.msk [vmem:[%s8171_s28 + $0x48] sm:$0xff] %vm3527_vm3, %v3821_v14 }
 0x3b1   : > { %v3825_v38 = vpop.f32.mrb[242].mxu0 }
 0x3b2   : > { %v3826_v49 = vadd.f32 %v4415_v25, %v3825_v38  ;;  %v5632_v30 = vpop.f32.mrb[243].mxu0 }
 0x3b4   : > { %3849 = vst.msk [vmem:[%s8171_s28 + $0x50] sm:$0xff] %vm3527_vm3, %v3826_v49 }
 0x3b5   : > { %v3830_v10 = vpop.f32.mrb[244].mxu0 }
 0x3b6   : > { %v3831_v24 = vadd.f32 %v4415_v25, %v3830_v10  ;;  %v5635_v44 = vpop.f32.mrb[245].mxu0 }
 0x3b8   : > { %3850 = vst.msk [vmem:[%s8171_s28 + $0x58] sm:$0xff] %vm3527_vm3, %v3831_v24 }
 0x3b9   : > { %v3835_v63 = vpop.f32.mrb[246].mxu0 }
 0x3ba   : > { %v3836_v55 = vadd.f32 %v4415_v25, %v3835_v63  ;;  %v5638_v5 = vpop.f32.mrb[247].mxu0 }
 0x3bc   : > { %3851 = vst.msk [vmem:[%s8171_s28 + $0x60] sm:$0xff] %vm3527_vm3, %v3836_v55 }
 0x3bd PF: > { %s21_s13 = sadd.s32 1, %s5794_s13  }
 0x3be   : > { %p18_p4 = scmp.ge.s32.totalorder %s21_s13, 4  }
 0x3c0   :  { %20 = sbr.rel (!%p18_p4) target bundleno = 1 (0x1), region = 131 }

// kernel: vae_forward.10
= control target key start
LH: loop header
LB: loop body
LE: loop exit
PB: predicated region body
PF: predicated region fallthrough
CT: control target
= control target key end

     0   :  { %s2988_s12 = smov 0   ;;  %s3771_s0 = inlined_call_operand.vmem [shape: f32[230,4], index: 0, kind: input, shape index: {}]   ;;  %s3772_s1 = inlined_call_operand.vmem [shape: f32[9,4,32], index: 1, kind: input, shape index: {}]   ;;  %s3773_s2 = inlined_call_operand.vmem [shape: f32[1,32], index: 2, kind: input, shape index: {}]   ;;  %s3774_s3 = inlined_call_operand.vmem [shape: f32[208,32], index: 3, kind: output, shape index: {}]  }
   0x1 LB: > { %s2140_s13 = sadd.s32 4294967295, %s2964_s12   ;;  %p2143_p0 = scmp.ge.s32.totalorder %s2964_s12, 1  ;;  %s2964_s12 = sphi %s2988_s12, %s13_s12  }
   0x2   : > { %p127_p1 = scmp.lt.s32.totalorder %s2964_s12, 3 }
   0x4   : > { %p128_p2 = pnand %p2143_p0, %p127_p1 }
   0x5   : > { %v2158_v0 = vld [vmem:[%s3772_s1 + $0x4] sm:$0xf] (!%p128_p2)  ;;  %vm225_vm0 = vcmask (!%p128_p2), 1043456   ;;  %s152_s16 = smul.u32 (!%p128_p2), 104, %s2140_s13  ;;  %v2966_v1 = vmov (!%p128_p2), 0.0   ;;  %vm185_vm1 = vcmask (!%p128_p2), 31744  }
   0x6   : > { %131 = sbr.rel (%p128_p2) target bundleno = 486 (0x1e6), region = 32  ;;  %2525 = vmatprep.subr.mxu0 (!%p128_p2), %v2966_v1  ;;  %2894 = vmatprep.subr.mxu1 (!%p128_p2), %v2966_v1  ;;  %v2200_v2 = vld [vmem:[%s3772_s1 + $0x8] sm:$0xf] (!%p128_p2)  ;;  %vm2967_vm2 = vmmov (!%p128_p2), 0   ;;  %v167_v5 = vld [vmem:[%s3772_s1] sm:$0xf] (!%p128_p2) }
   0x7   : > { %2526 = vmatpush3.msk.msra.mxu0 (!%p128_p2), %vm225_vm0, %v2158_v0  ;;  %2895 = vmatpush3.msk.msra.mxu1 (!%p128_p2), %vm225_vm0, %v2158_v0  ;;  %s3008_s19 = scalar_lea.vmem (!%p128_p2), %s3771_s0, %s152_s16  ;;  %v2228_v18 = vld [vmem:[%s3772_s1 + $0xc] sm:$0xf] (!%p128_p2)  ;;  %v2256_v21 = vld [vmem:[%s3772_s1 + $0x10] sm:$0xf] (!%p128_p2)  ;;  %v2284_v45 = vld [vmem:[%s3772_s1 + $0x14] sm:$0xf] (!%p128_p2) }
   0x8   : > { %2527 = vmatprep.mubr.msk.f32.mxu0 (!%p128_p2), %vm2967_vm2, %v2966_v1  ;;  %2548 = vmatprep.mubr.msk.f32.mxu1 (!%p128_p2), %vm2967_vm2, %v2966_v1  ;;  %v2145_v3 = vld [vmem:[%s3008_s19 + $0x1] sm:$0xff] (!%p128_p2)  ;;  %v2152_v4 = vld [vmem:[%s3008_s19 + $0x39] sm:$0xff] (!%p128_p2)  ;;  %v2146_v6 = vld [vmem:[%s3008_s19 + $0x9] sm:$0xff] (!%p128_p2)  ;;  %s146_s11 = smul.u32 (!%p128_p2), 13, %s2140_s13  ;;  %vm2056_vm3 = vcmask (!%p128_p2), 261120  }
   0x9   : > { %2607 = vmatprep.subr.mxu0 (!%p128_p2), %v2966_v1  ;;  %2528 = vmatmul.mubr.msk.f32.vlgmr.msra.gmra.mrb[0].mxu0 (!%p128_p2), %vm185_vm1, %v2145_v3  ;;  %v2153_v7 = vld [vmem:[%s3008_s19 + $0x41] sm:$0xff] (!%p128_p2)  ;;  %v2147_v8 = vld [vmem:[%s3008_s19 + $0x11] sm:$0xff] (!%p128_p2)  ;;  %v2154_v9 = vld [vmem:[%s3008_s19 + $0x49] sm:$0xff] (!%p128_p2) }
   0xa   : > { %2549 = vmatmul.mubr.msk.f32.vlgmr.msra.gmra.mrb[0].mxu1 (!%p128_p2), %vm185_vm1, %v2152_v4  ;;  %2608 = vmatpush3.msk.msra.mxu0 (!%p128_p2), %vm225_vm0, %v2200_v2  ;;  %v2148_v10 = vld [vmem:[%s3008_s19 + $0x19] sm:$0xff] (!%p128_p2)  ;;  %v2155_v11 = vld [vmem:[%s3008_s19 + $0x51] sm:$0xff] (!%p128_p2)  ;;  %v2149_v12 = vld [vmem:[%s3008_s19 + $0x21] sm:$0xff] (!%p128_p2)  ;;  %p147_p3 = scmp.lt.s32.totalorder (!%p128_p2), %s146_s11, 25 }
   0xb   : > { %2566 = vmatprep.subr.mxu1 (!%p128_p2), %v2966_v1  ;;  %2530 = vmatprep.mubr.msk.f32.mxu0 (!%p128_p2), %vm2967_vm2, %v2966_v1  ;;  %v2156_v13 = vld [vmem:[%s3008_s19 + $0x59] sm:$0xff] (!%p128_p2)  ;;  %v2150_v14 = vld [vmem:[%s3008_s19 + $0x29] sm:$0xff] (!%p128_p2)  ;;  %v2157_v15 = vld [vmem:[%s3008_s19 + $0x61] sm:$0xff] (!%p128_p2) }
   0xc   : > { %2567 = vmatpush3.msk.msra.mxu1 (!%p128_p2), %vm225_vm0, %v167_v5  ;;  %2551 = vmatprep.mubr.msk.f32.mxu1 (!%p128_p2), %vm2967_vm2, %v2966_v1  ;;  %v2151_v16 = vld [vmem:[%s3008_s19 + $0x31] sm:$0xff] (!%p128_p2)  ;;  %v154_v17 = vld [vmem:[%s3008_s19] sm:$0xff] (!%p128_p2)  ;;  %v155_v20 = vld [vmem:[%s3008_s19 + $0x8] sm:$0xff] (!%p128_p2) }
   0xd   : > { %2531 = vmatmul.mubr.msk.f32.gmra.mrb[2].mxu0 %vm185_vm1, %v2146_v6  ;;  %2648 = vmatprep.subr.mxu1 %v2966_v1  ;;  %v2187_v19 = vld [vmem:[%s3008_s19 + $0x2] sm:$0xff]  ;;  %v3096_v22 = vld [vmem:[%s3008_s19 + $0xa] sm:$0xff]  ;;  %v3110_v24 = vld [vmem:[%s3008_s19 + $0x12] sm:$0xff]  ;;  %s3776_s11 = smov (!%p147_p3, %s146_s11), 25 }
   0xe   : > { %2552 = vmatmul.mubr.msk.f32.gmra.mrb[2].mxu1 %vm185_vm1, %v2153_v7  ;;  %2533 = vmatprep.mubr.msk.f32.mxu0 %vm2967_vm2, %v2966_v1  ;;  %v156_v23 = vld [vmem:[%s3008_s19 + $0x10] sm:$0xff]  ;;  %v157_v25 = vld [vmem:[%s3008_s19 + $0x18] sm:$0xff]  ;;  %v158_v27 = vld [vmem:[%s3008_s19 + $0x20] sm:$0xff]  ;;  %s2144_s13 = sshll.u32 %s3776_s11, 3 }
   0xf   : > { %2554 = vmatprep.mubr.msk.f32.mxu1 %vm2967_vm2, %v2966_v1  ;;  %2689 = vmatprep.subr.mxu0 %v2966_v1  ;;  %v3121_v26 = vld [vmem:[%s3008_s19 + $0x1a] sm:$0xff]  ;;  %v3132_v28 = vld [vmem:[%s3008_s19 + $0x22] sm:$0xff]  ;;  %v3143_v30 = vld [vmem:[%s3008_s19 + $0x2a] sm:$0xff]  ;;  %s3710_s16 = scalar_lea.vmem %s3774_s3, %s2144_s13 }
  0x10   : > { %v159_v29 = vld [vmem:[%s3008_s19 + $0x28] sm:$0xff]  ;;  %v160_v31 = vld [vmem:[%s3008_s19 + $0x30] sm:$0xff]  ;;  %v161_v33 = vld [vmem:[%s3008_s19 + $0x38] sm:$0xff] }
  0x11   : > { %2534 = vmatmul.mubr.msk.f32.gmra.mrb[4].mxu0 %vm185_vm1, %v2147_v8  ;;  %v3154_v32 = vld [vmem:[%s3008_s19 + $0x32] sm:$0xff]  ;;  %v3165_v34 = vld [vmem:[%s3008_s19 + $0x3a] sm:$0xff]  ;;  %v3176_v36 = vld [vmem:[%s3008_s19 + $0x42] sm:$0xff] }
  0x12   : > { %2555 = vmatmul.mubr.msk.f32.gmra.mrb[4].mxu1 %vm185_vm1, %v2154_v9  ;;  %2536 = vmatprep.mubr.msk.f32.mxu0 %vm2967_vm2, %v2966_v1  ;;  %v162_v35 = vld [vmem:[%s3008_s19 + $0x40] sm:$0xff]  ;;  %v163_v37 = vld [vmem:[%s3008_s19 + $0x48] sm:$0xff]  ;;  %v164_v39 = vld [vmem:[%s3008_s19 + $0x50] sm:$0xff] }
  0x13   : > { %2557 = vmatprep.mubr.msk.f32.mxu1 %vm2967_vm2, %v2966_v1  ;;  %v3187_v38 = vld [vmem:[%s3008_s19 + $0x4a] sm:$0xff]  ;;  %v3198_v40 = vld [vmem:[%s3008_s19 + $0x52] sm:$0xff]  ;;  %v3209_v42 = vld [vmem:[%s3008_s19 + $0x5a] sm:$0xff] }
  0x14   : > { %v165_v41 = vld [vmem:[%s3008_s19 + $0x58] sm:$0xff]  ;;  %v166_v43 = vld [vmem:[%s3008_s19 + $0x60] sm:$0xff]  ;;  %v2243_v46 = vld [vmem:[%s3008_s19 + $0xb] sm:$0xff] }
  0x15   : > { %2537 = vmatmul.mubr.msk.f32.gmra.mrb[6].mxu0 %vm185_vm1, %v2148_v10  ;;  %v3220_v44 = vld [vmem:[%s3008_s19 + $0x62] sm:$0xff]  ;;  %v2312_v47 = vld [vmem:[%s3772_s1 + $0x18] sm:$0xf]  ;;  %v2247_v51 = vld [vmem:[%s3008_s19 + $0x2b] sm:$0xff] }
  0x16   : > { %2558 = vmatmul.mubr.msk.f32.gmra.mrb[6].mxu1 %vm185_vm1, %v2155_v11  ;;  %2539 = vmatprep.mubr.msk.f32.mxu0 %vm2967_vm2, %v2966_v1  ;;  %v2244_v48 = vld [vmem:[%s3008_s19 + $0x13] sm:$0xff]  ;;  %v2245_v49 = vld [vmem:[%s3008_s19 + $0x1b] sm:$0xff]  ;;  %v2246_v50 = vld [vmem:[%s3008_s19 + $0x23] sm:$0xff] }
  0x17   : > { %2560 = vmatprep.mubr.msk.f32.mxu1 %vm2967_vm2, %v2966_v1  ;;  %v2248_v52 = vld [vmem:[%s3008_s19 + $0x33] sm:$0xff]  ;;  %v2249_v53 = vld [vmem:[%s3008_s19 + $0x3b] sm:$0xff]  ;;  %v2250_v54 = vld [vmem:[%s3008_s19 + $0x43] sm:$0xff] }
  0x18   : > { %v2251_v55 = vld [vmem:[%s3008_s19 + $0x4b] sm:$0xff]  ;;  %v2252_v56 = vld [vmem:[%s3008_s19 + $0x53] sm:$0xff]  ;;  %v2253_v57 = vld [vmem:[%s3008_s19 + $0x5b] sm:$0xff] }
  0x19   : > { %2540 = vmatmul.mubr.msk.f32.gmra.mrb[8].mxu0 %vm185_vm1, %v2149_v12  ;;  %v2254_v58 = vld [vmem:[%s3008_s19 + $0x63] sm:$0xff]  ;;  %v2255_v60 = vld [vmem:[%s3008_s19 + $0x6b] sm:$0xff]  ;;  %v2340_v62 = vld [vmem:[%s3772_s1 + $0x1c] sm:$0xf] }
  0x1a   : > { %2561 = vmatmul.mubr.msk.f32.gmra.mrb[8].mxu1 %vm185_vm1, %v2156_v13  ;;  %2542 = vmatprep.mubr.msk.f32.mxu0 %vm2967_vm2, %v2966_v1  ;;  %v2227_v59 = vld [vmem:[%s3008_s19 + $0x6a] sm:$0xff]  ;;  %v2272_v63 = vld [vmem:[%s3008_s19 + $0x14] sm:$0xff]  ;;  %v2368_v0 = vld [vmem:[%s3772_s1 + $0x20] sm:$0xf] }
  0x1b   : > { %2563 = vmatprep.mubr.msk.f32.mxu1 %vm2967_vm2, %v2966_v1  ;;  %v2271_v61 = vld [vmem:[%s3008_s19 + $0xc] sm:$0xff]  ;;  %v2273_v2 = vld [vmem:[%s3008_s19 + $0x1c] sm:$0xff]  ;;  %v2274_v3 = vld [vmem:[%s3008_s19 + $0x24] sm:$0xff] }
  0x1c   : > { %v2275_v4 = vld [vmem:[%s3008_s19 + $0x2c] sm:$0xff]  ;;  %v2276_v5 = vld [vmem:[%s3008_s19 + $0x34] sm:$0xff]  ;;  %v2277_v6 = vld [vmem:[%s3008_s19 + $0x3c] sm:$0xff] }
  0x1d   : > { %2543 = vmatmul.mubr.msk.f32.gmra.mrb[10].mxu0 %vm185_vm1, %v2150_v14  ;;  %v2278_v7 = vld [vmem:[%s3008_s19 + $0x44] sm:$0xff]  ;;  %v2279_v8 = vld [vmem:[%s3008_s19 + $0x4c] sm:$0xff]  ;;  %v2280_v9 = vld [vmem:[%s3008_s19 + $0x54] sm:$0xff] }
  0x1e   : > { %2564 = vmatmul.mubr.msk.f32.gmra.mrb[10].mxu1 %vm185_vm1, %v2157_v15  ;;  %2545 = vmatprep.mubr.msk.f32.mxu0 %vm2967_vm2, %v2966_v1  ;;  %v2281_v10 = vld [vmem:[%s3008_s19 + $0x5c] sm:$0xff]  ;;  %v2282_v11 = vld [vmem:[%s3008_s19 + $0x64] sm:$0xff]  ;;  %v2283_v12 = vld [vmem:[%s3008_s19 + $0x6c] sm:$0xff] }
  0x1f   : > { %2568 = vmatprep.mubr.msk.f32.mxu1 %vm2967_vm2, %v2966_v1  ;;  %v2311_v13 = vld [vmem:[%s3008_s19 + $0x74] sm:$0xff] }
  0x20   : > { %v2327_v14 = vld [vmem:[%s3008_s19 + $0x15] sm:$0xff] }
  0x21   : > { %2546 = vmatmul.mubr.msk.f32.gmra.mrb[12].mxu0 %vm185_vm1, %v2151_v16  ;;  %v2355_v15 = vld [vmem:[%s3008_s19 + $0x16] sm:$0xff] }
  0x22   : > { %2569 = vmatmul.mubr.msk.f32.vlgmr.msra.gmra.mrb[12].mxu1 %vm185_vm1, %v154_v17  ;;  %2609 = vmatprep.mubr.msk.f32.mxu0 %vm2967_vm2, %v2966_v1  ;;  %v2328_v16 = vld [vmem:[%s3008_s19 + $0x1d] sm:$0xff] }
  0x23   : > { %2649 = vmatpush3.msk.msra.mxu1 %vm225_vm0, %v2228_v18  ;;  %2571 = vmatprep.mubr.msk.f32.mxu1 %vm2967_vm2, %v2966_v1  ;;  %v2356_v17 = vld [vmem:[%s3008_s19 + $0x1e] sm:$0xff] }
  0x24   : > { %2730 = vmatprep.subr.mxu1 %v2966_v1  ;;  %v2329_v18 = vld [vmem:[%s3008_s19 + $0x25] sm:$0xff] }
  0x25   : > { %2610 = vmatmul.mubr.msk.f32.vlgmr.msra.gmra.mrb[14].mxu0 %vm185_vm1, %v2187_v19  ;;  %v2357_v19 = vld [vmem:[%s3008_s19 + $0x26] sm:$0xff] }
  0x26   : > { %2572 = vmatmul.mubr.msk.f32.gmra.mrb[14].mxu1 %vm185_vm1, %v155_v20  ;;  %2690 = vmatpush3.msk.msra.mxu0 %vm225_vm0, %v2256_v21  ;;  %v2330_v20 = vld [vmem:[%s3008_s19 + $0x2d] sm:$0xff] }
  0x27   : > { %2574 = vmatprep.mubr.msk.f32.mxu1 %vm2967_vm2, %v2966_v1  ;;  %2612 = vmatprep.mubr.msk.f32.mxu0 %vm2967_vm2, %v2966_v1  ;;  %v2358_v21 = vld [vmem:[%s3008_s19 + $0x2e] sm:$0xff] }
  0x28   : > { %2771 = vmatprep.subr.mxu0 %v2966_v1 }
  0x29   : > { %2613 = vmatmul.mubr.msk.f32.gmra.mrb[16].mxu0 %vm185_vm1, %v3096_v22 }
  0x2a   : > { %2575 = vmatmul.mubr.msk.f32.gmra.mrb[16].mxu1 %vm185_vm1, %v156_v23  ;;  %2615 = vmatprep.mubr.msk.f32.mxu0 %vm2967_vm2, %v2966_v1  ;;  %v2359_v23 = vld [vmem:[%s3008_s19 + $0x36] sm:$0xff] }
  0x2b   : > { %2577 = vmatprep.mubr.msk.f32.mxu1 %vm2967_vm2, %v2966_v1 }
  0x2d   : > { %2616 = vmatmul.mubr.msk.f32.gmra.mrb[18].mxu0 %vm185_vm1, %v3110_v24 }
  0x2e   : > { %2578 = vmatmul.mubr.msk.f32.gmra.mrb[18].mxu1 %vm185_vm1, %v157_v25  ;;  %2618 = vmatprep.mubr.msk.f32.mxu0 %vm2967_vm2, %v2966_v1  ;;  %v2360_v25 = vld [vmem:[%s3008_s19 + $0x3e] sm:$0xff] }
  0x2f   : > { %2580 = vmatprep.mubr.msk.f32.mxu1 %vm2967_vm2, %v2966_v1 }
  0x31   : > { %2619 = vmatmul.mubr.msk.f32.gmra.mrb[20].mxu0 %vm185_vm1, %v3121_v26 }
  0x32   : > { %2581 = vmatmul.mubr.msk.f32.gmra.mrb[20].mxu1 %vm185_vm1, %v158_v27  ;;  %2621 = vmatprep.mubr.msk.f32.mxu0 %vm2967_vm2, %v2966_v1  ;;  %v2361_v27 = vld [vmem:[%s3008_s19 + $0x46] sm:$0xff] }
  0x33   : > { %2583 = vmatprep.mubr.msk.f32.mxu1 %vm2967_vm2, %v2966_v1 }
  0x35   : > { %2622 = vmatmul.mubr.msk.f32.gmra.mrb[22].mxu0 %vm185_vm1, %v3132_v28 }
  0x36   : > { %2584 = vmatmul.mubr.msk.f32.gmra.mrb[22].mxu1 %vm185_vm1, %v159_v29  ;;  %2624 = vmatprep.mubr.msk.f32.mxu0 %vm2967_vm2, %v2966_v1  ;;  %v2362_v29 = vld [vmem:[%s3008_s19 + $0x4e] sm:$0xff] }
  0x37   : > { %2586 = vmatprep.mubr.msk.f32.mxu1 %vm2967_vm2, %v2966_v1 }
  0x39   : > { %2625 = vmatmul.mubr.msk.f32.gmra.mrb[24].mxu0 %vm185_vm1, %v3143_v30 }
  0x3a   : > { %2587 = vmatmul.mubr.msk.f32.gmra.mrb[24].mxu1 %vm185_vm1, %v160_v31  ;;  %2627 = vmatprep.mubr.msk.f32.mxu0 %vm2967_vm2, %v2966_v1 }
  0x3b   : > { %2589 = vmatprep.mubr.msk.f32.mxu1 %vm2967_vm2, %v2966_v1 }
  0x3d   : > { %2628 = vmatmul.mubr.msk.f32.gmra.mrb[26].mxu0 %vm185_vm1, %v3154_v32 }
  0x3e   : > { %2590 = vmatmul.mubr.msk.f32.gmra.mrb[26].mxu1 %vm185_vm1, %v161_v33  ;;  %2630 = vmatprep.mubr.msk.f32.mxu0 %vm2967_vm2, %v2966_v1 }
  0x3f   : > { %2592 = vmatprep.mubr.msk.f32.mxu1 %vm2967_vm2, %v2966_v1 }
  0x41   : > { %2631 = vmatmul.mubr.msk.f32.gmra.mrb[28].mxu0 %vm185_vm1, %v3165_v34 }
  0x42   : > { %2593 = vmatmul.mubr.msk.f32.gmra.mrb[28].mxu1 %vm185_vm1, %v162_v35  ;;  %2633 = vmatprep.mubr.msk.f32.mxu0 %vm2967_vm2, %v2966_v1  ;;  %v2363_v35 = vld [vmem:[%s3008_s19 + $0x56] sm:$0xff] }
  0x43   : > { %2595 = vmatprep.mubr.msk.f32.mxu1 %vm2967_vm2, %v2966_v1 }
  0x45   : > { %2634 = vmatmul.mubr.msk.f32.gmra.mrb[30].mxu0 %vm185_vm1, %v3176_v36 }
  0x46   : > { %2596 = vmatmul.mubr.msk.f32.gmra.mrb[30].mxu1 %vm185_vm1, %v163_v37  ;;  %2636 = vmatprep.mubr.msk.f32.mxu0 %vm2967_vm2, %v2966_v1 }
  0x47   : > { %2598 = vmatprep.mubr.msk.f32.mxu1 %vm2967_vm2, %v2966_v1 }
  0x49   : > { %2637 = vmatmul.mubr.msk.f32.gmra.mrb[32].mxu0 %vm185_vm1, %v3187_v38 }
  0x4a   : > { %2599 = vmatmul.mubr.msk.f32.gmra.mrb[32].mxu1 %vm185_vm1, %v164_v39  ;;  %2639 = vmatprep.mubr.msk.f32.mxu0 %vm2967_vm2, %v2966_v1 }
  0x4b   : > { %2601 = vmatprep.mubr.msk.f32.mxu1 %vm2967_vm2, %v2966_v1 }
  0x4d   : > { %2640 = vmatmul.mubr.msk.f32.gmra.mrb[34].mxu0 %vm185_vm1, %v3198_v40 }
  0x4e   : > { %2602 = vmatmul.mubr.msk.f32.gmra.mrb[34].mxu1 %vm185_vm1, %v165_v41  ;;  %2642 = vmatprep.mubr.msk.f32.mxu0 %vm2967_vm2, %v2966_v1  ;;  %v2364_v41 = vld [vmem:[%s3008_s19 + $0x5e] sm:$0xff] }
  0x4f   : > { %2604 = vmatprep.mubr.msk.f32.mxu1 %vm2967_vm2, %v2966_v1 }
  0x51   : > { %2643 = vmatmul.mubr.msk.f32.gmra.mrb[36].mxu0 %vm185_vm1, %v3209_v42 }
  0x52   : > { %2605 = vmatmul.mubr.msk.f32.gmra.mrb[36].mxu1 %vm185_vm1, %v166_v43  ;;  %2645 = vmatprep.mubr.msk.f32.mxu0 %vm2967_vm2, %v2966_v1 }
  0x53   : > { %2650 = vmatprep.mubr.msk.f32.mxu1 %vm2967_vm2, %v2966_v1 }
  0x55   : > { %2646 = vmatmul.mubr.msk.f32.gmra.mrb[38].mxu0 %vm185_vm1, %v3220_v44 }
  0x56   : > { %2651 = vmatmul.mubr.msk.f32.vlgmr.msra.gmra.mrb[38].mxu1 %vm185_vm1, %v3096_v22  ;;  %2691 = vmatprep.mubr.msk.f32.mxu0 %vm2967_vm2, %v2966_v1  ;;  %v2331_v22 = vld [vmem:[%s3008_s19 + $0x35] sm:$0xff] }
  0x57   : > { %2731 = vmatpush3.msk.msra.mxu1 %vm225_vm0, %v2284_v45  ;;  %2653 = vmatprep.mubr.msk.f32.mxu1 %vm2967_vm2, %v2966_v1 }
  0x58   : > { %2812 = vmatprep.subr.mxu1 %v2966_v1 }
  0x59   : > { %2692 = vmatmul.mubr.msk.f32.vlgmr.msra.gmra.mrb[40].mxu0 %vm185_vm1, %v2243_v46 }
  0x5a   : > { %2654 = vmatmul.mubr.msk.f32.gmra.mrb[40].mxu1 %vm185_vm1, %v3110_v24  ;;  %2772 = vmatpush3.msk.msra.mxu0 %vm225_vm0, %v2312_v47  ;;  %v2332_v24 = vld [vmem:[%s3008_s19 + $0x3d] sm:$0xff]  ;;  %v2365_v47 = vld [vmem:[%s3008_s19 + $0x66] sm:$0xff] }
  0x5b   : > { %2656 = vmatprep.mubr.msk.f32.mxu1 %vm2967_vm2, %v2966_v1  ;;  %2694 = vmatprep.mubr.msk.f32.mxu0 %vm2967_vm2, %v2966_v1 }
  0x5c   : > { %2853 = vmatprep.subr.mxu0 %v2966_v1 }
  0x5d   : > { %2695 = vmatmul.mubr.msk.f32.gmra.mrb[42].mxu0 %vm185_vm1, %v2244_v48  ;;  %v2338_v48 = vld [vmem:[%s3008_s19 + $0x6d] sm:$0xff] }
  0x5e   : > { %2657 = vmatmul.mubr.msk.f32.gmra.mrb[42].mxu1 %vm185_vm1, %v3121_v26  ;;  %2697 = vmatprep.mubr.msk.f32.mxu0 %vm2967_vm2, %v2966_v1  ;;  %v2333_v26 = vld [vmem:[%s3008_s19 + $0x45] sm:$0xff] }
  0x5f   : > { %2659 = vmatprep.mubr.msk.f32.mxu1 %vm2967_vm2, %v2966_v1 }
  0x61   : > { %2698 = vmatmul.mubr.msk.f32.gmra.mrb[44].mxu0 %vm185_vm1, %v2245_v49 }
  0x62   : > { %2660 = vmatmul.mubr.msk.f32.gmra.mrb[44].mxu1 %vm185_vm1, %v3132_v28  ;;  %2700 = vmatprep.mubr.msk.f32.mxu0 %vm2967_vm2, %v2966_v1  ;;  %v2334_v28 = vld [vmem:[%s3008_s19 + $0x4d] sm:$0xff] }
  0x63   : > { %2662 = vmatprep.mubr.msk.f32.mxu1 %vm2967_vm2, %v2966_v1 }
  0x65   : > { %2701 = vmatmul.mubr.msk.f32.gmra.mrb[46].mxu0 %vm185_vm1, %v2246_v50 }
  0x66   : > { %2663 = vmatmul.mubr.msk.f32.gmra.mrb[46].mxu1 %vm185_vm1, %v3143_v30  ;;  %2703 = vmatprep.mubr.msk.f32.mxu0 %vm2967_vm2, %v2966_v1  ;;  %v2335_v30 = vld [vmem:[%s3008_s19 + $0x55] sm:$0xff] }
  0x67   : > { %2665 = vmatprep.mubr.msk.f32.mxu1 %vm2967_vm2, %v2966_v1 }
  0x69   : > { %2704 = vmatmul.mubr.msk.f32.gmra.mrb[48].mxu0 %vm185_vm1, %v2247_v51 }
  0x6a   : > { %2666 = vmatmul.mubr.msk.f32.gmra.mrb[48].mxu1 %vm185_vm1, %v3154_v32  ;;  %2706 = vmatprep.mubr.msk.f32.mxu0 %vm2967_vm2, %v2966_v1 }
  0x6b   : > { %2668 = vmatprep.mubr.msk.f32.mxu1 %vm2967_vm2, %v2966_v1 }
  0x6d   : > { %2707 = vmatmul.mubr.msk.f32.gmra.mrb[50].mxu0 %vm185_vm1, %v2248_v52 }
  0x6e   : > { %2669 = vmatmul.mubr.msk.f32.gmra.mrb[50].mxu1 %vm185_vm1, %v3165_v34  ;;  %2709 = vmatprep.mubr.msk.f32.mxu0 %vm2967_vm2, %v2966_v1 }
  0x6f   : > { %2671 = vmatprep.mubr.msk.f32.mxu1 %vm2967_vm2, %v2966_v1 }
  0x71   : > { %2710 = vmatmul.mubr.msk.f32.gmra.mrb[52].mxu0 %vm185_vm1, %v2249_v53  ;;  %v2366_v53 = vld [vmem:[%s3008_s19 + $0x6e] sm:$0xff] }
  0x72   : > { %2672 = vmatmul.mubr.msk.f32.gmra.mrb[52].mxu1 %vm185_vm1, %v3176_v36  ;;  %2712 = vmatprep.mubr.msk.f32.mxu0 %vm2967_vm2, %v2966_v1  ;;  %v2336_v36 = vld [vmem:[%s3008_s19 + $0x5d] sm:$0xff] }
  0x73   : > { %2674 = vmatprep.mubr.msk.f32.mxu1 %vm2967_vm2, %v2966_v1 }
  0x75   : > { %2713 = vmatmul.mubr.msk.f32.gmra.mrb[54].mxu0 %vm185_vm1, %v2250_v54  ;;  %v2339_v54 = vld [vmem:[%s3008_s19 + $0x75] sm:$0xff] }
  0x76   : > { %2675 = vmatmul.mubr.msk.f32.gmra.mrb[54].mxu1 %vm185_vm1, %v3187_v38  ;;  %2715 = vmatprep.mubr.msk.f32.mxu0 %vm2967_vm2, %v2966_v1 }
  0x77   : > { %2677 = vmatprep.mubr.msk.f32.mxu1 %vm2967_vm2, %v2966_v1 }
  0x79   : > { %2716 = vmatmul.mubr.msk.f32.gmra.mrb[56].mxu0 %vm185_vm1, %v2251_v55 }
  0x7a   : > { %2678 = vmatmul.mubr.msk.f32.gmra.mrb[56].mxu1 %vm185_vm1, %v3198_v40  ;;  %2718 = vmatprep.mubr.msk.f32.mxu0 %vm2967_vm2, %v2966_v1 }
  0x7b   : > { %2680 = vmatprep.mubr.msk.f32.mxu1 %vm2967_vm2, %v2966_v1 }
  0x7d   : > { %2719 = vmatmul.mubr.msk.f32.gmra.mrb[58].mxu0 %vm185_vm1, %v2252_v56 }
  0x7e   : > { %2681 = vmatmul.mubr.msk.f32.gmra.mrb[58].mxu1 %vm185_vm1, %v3209_v42  ;;  %2721 = vmatprep.mubr.msk.f32.mxu0 %vm2967_vm2, %v2966_v1  ;;  %v2337_v42 = vld [vmem:[%s3008_s19 + $0x65] sm:$0xff] }
  0x7f   : > { %2683 = vmatprep.mubr.msk.f32.mxu1 %vm2967_vm2, %v2966_v1 }
  0x81   : > { %2722 = vmatmul.mubr.msk.f32.gmra.mrb[60].mxu0 %vm185_vm1, %v2253_v57 }
  0x82   : > { %2684 = vmatmul.mubr.msk.f32.gmra.mrb[60].mxu1 %vm185_vm1, %v3220_v44  ;;  %2724 = vmatprep.mubr.msk.f32.mxu0 %vm2967_vm2, %v2966_v1 }
  0x83   : > { %2686 = vmatprep.mubr.msk.f32.mxu1 %vm2967_vm2, %v2966_v1 }
  0x85   : > { %2725 = vmatmul.mubr.msk.f32.gmra.mrb[62].mxu0 %vm185_vm1, %v2254_v58 }
  0x86   : > { %2687 = vmatmul.mubr.msk.f32.gmra.mrb[62].mxu1 %vm185_vm1, %v2227_v59  ;;  %2727 = vmatprep.mubr.msk.f32.mxu0 %vm2967_vm2, %v2966_v1  ;;  %v2367_v59 = vld [vmem:[%s3008_s19 + $0x76] sm:$0xff] }
  0x87   : > { %2732 = vmatprep.mubr.msk.f32.mxu1 %vm2967_vm2, %v2966_v1 }
  0x89   : > { %2728 = vmatmul.mubr.msk.f32.gmra.mrb[64].mxu0 %vm185_vm1, %v2255_v60 }
  0x8a   : > { %2733 = vmatmul.mubr.msk.f32.vlgmr.msra.gmra.mrb[64].mxu1 %vm185_vm1, %v2271_v61  ;;  %2773 = vmatprep.mubr.msk.f32.mxu0 %vm2967_vm2, %v2966_v1 }
  0x8b   : > { %2813 = vmatpush3.msk.msra.mxu1 %vm225_vm0, %v2340_v62  ;;  %2735 = vmatprep.mubr.msk.f32.mxu1 %vm2967_vm2, %v2966_v1 }
  0x8d   : > { %2774 = vmatmul.mubr.msk.f32.vlgmr.msra.gmra.mrb[66].mxu0 %vm185_vm1, %v2272_v63 }
  0x8e   : > { %2736 = vmatmul.mubr.msk.f32.gmra.mrb[66].mxu1 %vm185_vm1, %v2272_v63  ;;  %2854 = vmatpush3.msk.msra.mxu0 %vm225_vm0, %v2368_v0 }
  0x8f   : > { %2738 = vmatprep.mubr.msk.f32.mxu1 %vm2967_vm2, %v2966_v1  ;;  %2776 = vmatprep.mubr.msk.f32.mxu0 %vm2967_vm2, %v2966_v1 }
  0x91   : > { %2777 = vmatmul.mubr.msk.f32.gmra.mrb[68].mxu0 %vm185_vm1, %v2273_v2 }
  0x92   : > { %2739 = vmatmul.mubr.msk.f32.gmra.mrb[68].mxu1 %vm185_vm1, %v2273_v2  ;;  %2779 = vmatprep.mubr.msk.f32.mxu0 %vm2967_vm2, %v2966_v1 }
  0x93   : > { %2741 = vmatprep.mubr.msk.f32.mxu1 %vm2967_vm2, %v2966_v1 }
  0x95   : > { %2780 = vmatmul.mubr.msk.f32.gmra.mrb[70].mxu0 %vm185_vm1, %v2274_v3 }
  0x96   : > { %2742 = vmatmul.mubr.msk.f32.gmra.mrb[70].mxu1 %vm185_vm1, %v2274_v3  ;;  %2782 = vmatprep.mubr.msk.f32.mxu0 %vm2967_vm2, %v2966_v1 }
  0x97   : > { %2744 = vmatprep.mubr.msk.f32.mxu1 %vm2967_vm2, %v2966_v1 }
  0x99   : > { %2783 = vmatmul.mubr.msk.f32.gmra.mrb[72].mxu0 %vm185_vm1, %v2275_v4 }
  0x9a   : > { %2745 = vmatmul.mubr.msk.f32.gmra.mrb[72].mxu1 %vm185_vm1, %v2275_v4  ;;  %2785 = vmatprep.mubr.msk.f32.mxu0 %vm2967_vm2, %v2966_v1 }
  0x9b   : > { %2747 = vmatprep.mubr.msk.f32.mxu1 %vm2967_vm2, %v2966_v1 }
  0x9d   : > { %2786 = vmatmul.mubr.msk.f32.gmra.mrb[74].mxu0 %vm185_vm1, %v2276_v5 }
  0x9e   : > { %2748 = vmatmul.mubr.msk.f32.gmra.mrb[74].mxu1 %vm185_vm1, %v2276_v5  ;;  %2788 = vmatprep.mubr.msk.f32.mxu0 %vm2967_vm2, %v2966_v1 }
  0x9f   : > { %2750 = vmatprep.mubr.msk.f32.mxu1 %vm2967_vm2, %v2966_v1 }
  0xa1   : > { %2789 = vmatmul.mubr.msk.f32.gmra.mrb[76].mxu0 %vm185_vm1, %v2277_v6 }
  0xa2   : > { %2751 = vmatmul.mubr.msk.f32.gmra.mrb[76].mxu1 %vm185_vm1, %v2277_v6  ;;  %2791 = vmatprep.mubr.msk.f32.mxu0 %vm2967_vm2, %v2966_v1 }
  0xa3   : > { %2753 = vmatprep.mubr.msk.f32.mxu1 %vm2967_vm2, %v2966_v1 }
  0xa5   : > { %2792 = vmatmul.mubr.msk.f32.gmra.mrb[78].mxu0 %vm185_vm1, %v2278_v7 }
  0xa6   : > { %2754 = vmatmul.mubr.msk.f32.gmra.mrb[78].mxu1 %vm185_vm1, %v2278_v7  ;;  %2794 = vmatprep.mubr.msk.f32.mxu0 %vm2967_vm2, %v2966_v1 }
  0xa7   : > { %2756 = vmatprep.mubr.msk.f32.mxu1 %vm2967_vm2, %v2966_v1 }
  0xa9   : > { %2795 = vmatmul.mubr.msk.f32.gmra.mrb[80].mxu0 %vm185_vm1, %v2279_v8 }
  0xaa   : > { %2757 = vmatmul.mubr.msk.f32.gmra.mrb[80].mxu1 %vm185_vm1, %v2279_v8  ;;  %2797 = vmatprep.mubr.msk.f32.mxu0 %vm2967_vm2, %v2966_v1 }
  0xab   : > { %2759 = vmatprep.mubr.msk.f32.mxu1 %vm2967_vm2, %v2966_v1 }
  0xad   : > { %2798 = vmatmul.mubr.msk.f32.gmra.mrb[82].mxu0 %vm185_vm1, %v2280_v9 }
  0xae   : > { %2760 = vmatmul.mubr.msk.f32.gmra.mrb[82].mxu1 %vm185_vm1, %v2280_v9  ;;  %2800 = vmatprep.mubr.msk.f32.mxu0 %vm2967_vm2, %v2966_v1 }
  0xaf   : > { %2762 = vmatprep.mubr.msk.f32.mxu1 %vm2967_vm2, %v2966_v1 }
  0xb1   : > { %2801 = vmatmul.mubr.msk.f32.gmra.mrb[84].mxu0 %vm185_vm1, %v2281_v10 }
  0xb2   : > { %2763 = vmatmul.mubr.msk.f32.gmra.mrb[84].mxu1 %vm185_vm1, %v2281_v10  ;;  %2803 = vmatprep.mubr.msk.f32.mxu0 %vm2967_vm2, %v2966_v1 }
  0xb3   : > { %2765 = vmatprep.mubr.msk.f32.mxu1 %vm2967_vm2, %v2966_v1 }
  0xb5   : > { %2804 = vmatmul.mubr.msk.f32.gmra.mrb[86].mxu0 %vm185_vm1, %v2282_v11 }
  0xb6   : > { %2766 = vmatmul.mubr.msk.f32.gmra.mrb[86].mxu1 %vm185_vm1, %v2282_v11  ;;  %2806 = vmatprep.mubr.msk.f32.mxu0 %vm2967_vm2, %v2966_v1 }
  0xb7   : > { %2768 = vmatprep.mubr.msk.f32.mxu1 %vm2967_vm2, %v2966_v1 }
  0xb9   : > { %2807 = vmatmul.mubr.msk.f32.gmra.mrb[88].mxu0 %vm185_vm1, %v2283_v12 }
  0xba   : > { %2769 = vmatmul.mubr.msk.f32.gmra.mrb[88].mxu1 %vm185_vm1, %v2283_v12  ;;  %2809 = vmatprep.mubr.msk.f32.mxu0 %vm2967_vm2, %v2966_v1 }
  0xbb   : > { %2814 = vmatprep.mubr.msk.f32.mxu1 %vm2967_vm2, %v2966_v1 }
  0xbd   : > { %2810 = vmatmul.mubr.msk.f32.gmra.mrb[90].mxu0 %vm185_vm1, %v2311_v13 }
  0xbe   : > { %2815 = vmatmul.mubr.msk.f32.vlgmr.msra.gmra.mrb[90].mxu1 %vm185_vm1, %v2327_v14  ;;  %2855 = vmatprep.mubr.msk.f32.mxu0 %vm2967_vm2, %v2966_v1 }
  0xbf   : > { %2817 = vmatprep.mubr.msk.f32.mxu1 %vm2967_vm2, %v2966_v1 }
  0xc1   : > { %2856 = vmatmul.mubr.msk.f32.vlgmr.msra.gmra.mrb[92].mxu0 %vm185_vm1, %v2355_v15 }
  0xc2   : > { %2818 = vmatmul.mubr.msk.f32.gmra.mrb[92].mxu1 %vm185_vm1, %v2328_v16  ;;  %2858 = vmatprep.mubr.msk.f32.mxu0 %vm2967_vm2, %v2966_v1 }
  0xc3   : > { %2820 = vmatprep.mubr.msk.f32.mxu1 %vm2967_vm2, %v2966_v1 }
  0xc5   : > { %2859 = vmatmul.mubr.msk.f32.gmra.mrb[94].mxu0 %vm185_vm1, %v2356_v17 }
  0xc6   : > { %2821 = vmatmul.mubr.msk.f32.gmra.mrb[94].mxu1 %vm185_vm1, %v2329_v18  ;;  %2861 = vmatprep.mubr.msk.f32.mxu0 %vm2967_vm2, %v2966_v1 }
  0xc7   : > { %2823 = vmatprep.mubr.msk.f32.mxu1 %vm2967_vm2, %v2966_v1 }
  0xc9   : > { %2862 = vmatmul.mubr.msk.f32.gmra.mrb[96].mxu0 %vm185_vm1, %v2357_v19 }
  0xca   : > { %2824 = vmatmul.mubr.msk.f32.gmra.mrb[96].mxu1 %vm185_vm1, %v2330_v20  ;;  %2864 = vmatprep.mubr.msk.f32.mxu0 %vm2967_vm2, %v2966_v1 }
  0xcb   : > { %2826 = vmatprep.mubr.msk.f32.mxu1 %vm2967_vm2, %v2966_v1 }
  0xcd   : > { %2865 = vmatmul.mubr.msk.f32.gmra.mrb[98].mxu0 %vm185_vm1, %v2358_v21 }
  0xce   : > { %2827 = vmatmul.mubr.msk.f32.gmra.mrb[98].mxu1 %vm185_vm1, %v2331_v22  ;;  %2867 = vmatprep.mubr.msk.f32.mxu0 %vm2967_vm2, %v2966_v1 }
  0xcf   : > { %2829 = vmatprep.mubr.msk.f32.mxu1 %vm2967_vm2, %v2966_v1 }
  0xd1   : > { %2868 = vmatmul.mubr.msk.f32.gmra.mrb[100].mxu0 %vm185_vm1, %v2359_v23 }
  0xd2   : > { %2830 = vmatmul.mubr.msk.f32.gmra.mrb[100].mxu1 %vm185_vm1, %v2332_v24  ;;  %2870 = vmatprep.mubr.msk.f32.mxu0 %vm2967_vm2, %v2966_v1 }
  0xd3   : > { %2832 = vmatprep.mubr.msk.f32.mxu1 %vm2967_vm2, %v2966_v1 }
  0xd5   : > { %2871 = vmatmul.mubr.msk.f32.gmra.mrb[102].mxu0 %vm185_vm1, %v2360_v25 }
  0xd6   : > { %2833 = vmatmul.mubr.msk.f32.gmra.mrb[102].mxu1 %vm185_vm1, %v2333_v26  ;;  %2873 = vmatprep.mubr.msk.f32.mxu0 %vm2967_vm2, %v2966_v1 }
  0xd7   : > { %2835 = vmatprep.mubr.msk.f32.mxu1 %vm2967_vm2, %v2966_v1 }
  0xd9   : > { %2874 = vmatmul.mubr.msk.f32.gmra.mrb[104].mxu0 %vm185_vm1, %v2361_v27 }
  0xda   : > { %2836 = vmatmul.mubr.msk.f32.gmra.mrb[104].mxu1 %vm185_vm1, %v2334_v28  ;;  %2876 = vmatprep.mubr.msk.f32.mxu0 %vm2967_vm2, %v2966_v1 }
  0xdb   : > { %2838 = vmatprep.mubr.msk.f32.mxu1 %vm2967_vm2, %v2966_v1 }
  0xdc   : > { %v295_v31 = vpop.f32.mrb[0].mxu0 }
  0xdd   : > { %v2529_v32 = vpop.f32.mrb[1].mxu0  ;;  %v3504_v33 = vpop.f32.mrb[0].mxu1  ;;  %2877 = vmatmul.mubr.msk.f32.gmra.mrb[106].mxu0 %vm185_vm1, %v2362_v29 }
  0xde   : > { %2839 = vmatmul.mubr.msk.f32.gmra.mrb[106].mxu1 %vm185_vm1, %v2335_v30  ;;  %v2550_v34 = vpop.f32.mrb[1].mxu1  ;;  %2879 = vmatprep.mubr.msk.f32.mxu0 %vm2967_vm2, %v2966_v1 }
  0xdf   : > { %2841 = vmatprep.mubr.msk.f32.mxu1 %vm2967_vm2, %v2966_v1 }
  0xe0   : > { %v300_v37 = vpop.f32.mrb[2].mxu0 }
  0xe1   : > { %v2532_v38 = vpop.f32.mrb[3].mxu0  ;;  %v3514_v39 = vpop.f32.mrb[2].mxu1  ;;  %2880 = vmatmul.mubr.msk.f32.gmra.mrb[108].mxu0 %vm185_vm1, %v2363_v35 }
  0xe2   : > { %2842 = vmatmul.mubr.msk.f32.gmra.mrb[108].mxu1 %vm185_vm1, %v2336_v36  ;;  %v2553_v40 = vpop.f32.mrb[3].mxu1  ;;  %2882 = vmatprep.mubr.msk.f32.mxu0 %vm2967_vm2, %v2966_v1 }
  0xe3   : > { %2844 = vmatprep.mubr.msk.f32.mxu1 %vm2967_vm2, %v2966_v1 }
  0xe4   : > { %v305_v43 = vpop.f32.mrb[4].mxu0 }
  0xe5   : > { %v2535_v44 = vpop.f32.mrb[5].mxu0  ;;  %v3524_v45 = vpop.f32.mrb[4].mxu1  ;;  %2883 = vmatmul.mubr.msk.f32.gmra.mrb[110].mxu0 %vm185_vm1, %v2364_v41 }
  0xe6   : > { %2845 = vmatmul.mubr.msk.f32.gmra.mrb[110].mxu1 %vm185_vm1, %v2337_v42  ;;  %v2556_v46 = vpop.f32.mrb[5].mxu1  ;;  %2885 = vmatprep.mubr.msk.f32.mxu0 %vm2967_vm2, %v2966_v1 }
  0xe7   : > { %2847 = vmatprep.mubr.msk.f32.mxu1 %vm2967_vm2, %v2966_v1 }
  0xe8   : > { %v310_v49 = vpop.f32.mrb[6].mxu0 }
  0xe9   : > { %v2538_v50 = vpop.f32.mrb[7].mxu0  ;;  %v3534_v51 = vpop.f32.mrb[6].mxu1  ;;  %2886 = vmatmul.mubr.msk.f32.gmra.mrb[112].mxu0 %vm185_vm1, %v2365_v47 }
  0xea   : > { %2848 = vmatmul.mubr.msk.f32.gmra.mrb[112].mxu1 %vm185_vm1, %v2338_v48  ;;  %v2559_v52 = vpop.f32.mrb[7].mxu1  ;;  %2888 = vmatprep.mubr.msk.f32.mxu0 %vm2967_vm2, %v2966_v1 }
  0xeb   : > { %2850 = vmatprep.mubr.msk.f32.mxu1 %vm2967_vm2, %v2966_v1 }
  0xec   : > { %v315_v55 = vpop.f32.mrb[8].mxu0 }
  0xed   : > { %v2541_v56 = vpop.f32.mrb[9].mxu0  ;;  %v3544_v57 = vpop.f32.mrb[8].mxu1  ;;  %2889 = vmatmul.mubr.msk.f32.gmra.mrb[114].mxu0 %vm185_vm1, %v2366_v53 }
  0xee   : > { %2851 = vmatmul.mubr.msk.f32.gmra.mrb[114].mxu1 %vm185_vm1, %v2339_v54  ;;  %v2562_v58 = vpop.f32.mrb[9].mxu1  ;;  %2891 = vmatprep.mubr.msk.f32.mxu0 %vm2967_vm2, %v2966_v1 }
  0xf0   : > { %v320_v60 = vpop.f32.mrb[10].mxu0 }
  0xf1   : > { %v2544_v61 = vpop.f32.mrb[11].mxu0  ;;  %v3551_v62 = vpop.f32.mrb[10].mxu1  ;;  %2892 = vmatmul.mubr.msk.f32.gmra.mrb[116].mxu0 %vm185_vm1, %v2367_v59 }
  0xf2   : > { %v2565_v63 = vpop.f32.mrb[11].mxu1 }
  0xf4   : > { %v325_v0 = vpop.f32.mrb[12].mxu0 }
  0xf5   : > { %v467_v2 = vpop.f32.mrb[12].mxu1  ;;  %v2547_v3 = vpop.f32.mrb[13].mxu0 }
  0xf6   : > { %v468_v4 = vadd.f32 %v467_v2, %v295_v31  ;;  %v2570_v5 = vpop.f32.mrb[13].mxu1 }
  0xf8   : > { %v656_v6 = vpop.f32.mrb[14].mxu0 }
  0xf9   : > { %v472_v7 = vpop.f32.mrb[14].mxu1  ;;  %v3554_v8 = vadd.f32 %v656_v6, %v468_v4  ;;  %v2611_v9 = vpop.f32.mrb[15].mxu0 }
  0xfa   : > { %v473_v10 = vadd.f32 %v472_v7, %v300_v37  ;;  %v2573_v1 = vpop.f32.mrb[15].mxu1 }
  0xfc   : > { %v661_v11 = vpop.f32.mrb[16].mxu0 }
  0xfd   : > { %v477_v12 = vpop.f32.mrb[16].mxu1  ;;  %v3556_v13 = vadd.f32 %v661_v11, %v473_v10  ;;  %v2614_v14 = vpop.f32.mrb[17].mxu0 }
  0xfe   : > { %v478_v15 = vadd.f32 %v477_v12, %v305_v43  ;;  %v2576_v16 = vpop.f32.mrb[17].mxu1 }
 0x100   : > { %v666_v17 = vpop.f32.mrb[18].mxu0 }
 0x101   : > { %v482_v18 = vpop.f32.mrb[18].mxu1  ;;  %v3558_v19 = vadd.f32 %v666_v17, %v478_v15  ;;  %v2617_v20 = vpop.f32.mrb[19].mxu0 }
 0x102   : > { %v483_v21 = vadd.f32 %v482_v18, %v310_v49  ;;  %v2579_v22 = vpop.f32.mrb[19].mxu1 }
 0x104   : > { %v671_v23 = vpop.f32.mrb[20].mxu0 }
 0x105   : > { %v487_v24 = vpop.f32.mrb[20].mxu1  ;;  %v3560_v25 = vadd.f32 %v671_v23, %v483_v21  ;;  %v2620_v26 = vpop.f32.mrb[21].mxu0 }
 0x106   : > { %v488_v27 = vadd.f32 %v487_v24, %v315_v55  ;;  %v2582_v28 = vpop.f32.mrb[21].mxu1 }
 0x108   : > { %v676_v29 = vpop.f32.mrb[22].mxu0 }
 0x109   : > { %v492_v30 = vpop.f32.mrb[22].mxu1  ;;  %v3562_v31 = vadd.f32 %v676_v29, %v488_v27  ;;  %v2623_v32 = vpop.f32.mrb[23].mxu0 }
 0x10a   : > { %v493_v34 = vadd.f32 %v492_v30, %v320_v60  ;;  %v2585_v35 = vpop.f32.mrb[23].mxu1 }
 0x10c   : > { %v681_v36 = vpop.f32.mrb[24].mxu0 }
 0x10d   : > { %v497_v37 = vpop.f32.mrb[24].mxu1  ;;  %v3564_v38 = vadd.f32 %v681_v36, %v493_v34  ;;  %v2626_v40 = vpop.f32.mrb[25].mxu0 }
 0x10e   : > { %v498_v41 = vadd.f32 %v497_v37, %v325_v0  ;;  %v2588_v42 = vpop.f32.mrb[25].mxu1 }
 0x110   : > { %v686_v43 = vpop.f32.mrb[26].mxu0 }
 0x111   : > { %v502_v44 = vpop.f32.mrb[26].mxu1  ;;  %v3566_v46 = vadd.f32 %v686_v43, %v498_v41  ;;  %v2629_v47 = vpop.f32.mrb[27].mxu0 }
 0x112   : > { %v503_v48 = vadd.f32 %v502_v44, %v3504_v33  ;;  %v2591_v49 = vpop.f32.mrb[27].mxu1 }
 0x114   : > { %v691_v50 = vpop.f32.mrb[28].mxu0 }
 0x115   : > { %v507_v52 = vpop.f32.mrb[28].mxu1  ;;  %v3569_v53 = vadd.f32 %v691_v50, %v503_v48  ;;  %v2632_v54 = vpop.f32.mrb[29].mxu0 }
 0x116   : > { %v508_v55 = vadd.f32 %v507_v52, %v3514_v39  ;;  %v2594_v56 = vpop.f32.mrb[29].mxu1 }
 0x118   : > { %v696_v58 = vpop.f32.mrb[30].mxu0 }
 0x119   : > { %v512_v59 = vpop.f32.mrb[30].mxu1  ;;  %v3572_v60 = vadd.f32 %v696_v58, %v508_v55  ;;  %v2635_v61 = vpop.f32.mrb[31].mxu0 }
 0x11a   : > { %v513_v63 = vadd.f32 %v512_v59, %v3524_v45  ;;  %v2597_v0 = vpop.f32.mrb[31].mxu1 }
 0x11c   : > { %v701_v2 = vpop.f32.mrb[32].mxu0 }
 0x11d   : > { %v517_v3 = vpop.f32.mrb[32].mxu1  ;;  %v3575_v33 = vadd.f32 %v701_v2, %v513_v63  ;;  %v2638_v4 = vpop.f32.mrb[33].mxu0 }
 0x11e   : > { %v518_v5 = vadd.f32 %v517_v3, %v3534_v51  ;;  %v2600_v6 = vpop.f32.mrb[33].mxu1 }
 0x120   : > { %v706_v7 = vpop.f32.mrb[34].mxu0 }
 0x121   : > { %v522_v9 = vpop.f32.mrb[34].mxu1  ;;  %v3578_v39 = vadd.f32 %v706_v7, %v518_v5  ;;  %v2641_v10 = vpop.f32.mrb[35].mxu0 }
 0x122   : > { %v523_v1 = vadd.f32 %v522_v9, %v3544_v57  ;;  %v2603_v11 = vpop.f32.mrb[35].mxu1 }
 0x124   : > { %v711_v12 = vpop.f32.mrb[36].mxu0 }
 0x125   : > { %v527_v14 = vpop.f32.mrb[36].mxu1  ;;  %v3581_v45 = vadd.f32 %v711_v12, %v523_v1  ;;  %v2644_v15 = vpop.f32.mrb[37].mxu0 }
 0x126   : > { %v528_v16 = vadd.f32 %v527_v14, %v3551_v62  ;;  %v2606_v17 = vpop.f32.mrb[37].mxu1 }
 0x128   : > { %v716_v18 = vpop.f32.mrb[38].mxu0 }
 0x129   : > { %v3584_v20 = vadd.f32 %v716_v18, %v528_v16  ;;  %v858_v51 = vpop.f32.mrb[38].mxu1  ;;  %v2647_v21 = vpop.f32.mrb[39].mxu0 }
 0x12a   : > { %v922_v22 = vadd.f32 %v858_v51, %v3554_v8  ;;  %v2652_v23 = vpop.f32.mrb[39].mxu1 }
 0x12c   : > { %v1060_v24 = vpop.f32.mrb[40].mxu0 }
 0x12d   : > { %v863_v26 = vpop.f32.mrb[40].mxu1  ;;  %v3587_v57 = vadd.f32 %v1060_v24, %v922_v22  ;;  %v2693_v27 = vpop.f32.mrb[41].mxu0 }
 0x12e   : > { %v923_v28 = vadd.f32 %v863_v26, %v3556_v13  ;;  %v2655_v29 = vpop.f32.mrb[41].mxu1 }
 0x130   : > { %v1065_v30 = vpop.f32.mrb[42].mxu0 }
 0x131   : > { %v868_v32 = vpop.f32.mrb[42].mxu1  ;;  %v3590_v62 = vadd.f32 %v1065_v30, %v923_v28  ;;  %v2696_v34 = vpop.f32.mrb[43].mxu0 }
 0x132   : > { %v924_v35 = vadd.f32 %v868_v32, %v3558_v19  ;;  %v2658_v36 = vpop.f32.mrb[43].mxu1 }
 0x134   : > { %v1070_v37 = vpop.f32.mrb[44].mxu0 }
 0x135   : > { %v873_v40 = vpop.f32.mrb[44].mxu1  ;;  %v3593_v8 = vadd.f32 %v1070_v37, %v924_v35  ;;  %v2699_v41 = vpop.f32.mrb[45].mxu0 }
 0x136   : > { %v925_v42 = vadd.f32 %v873_v40, %v3560_v25  ;;  %v2661_v43 = vpop.f32.mrb[45].mxu1 }
 0x138   : > { %v1075_v44 = vpop.f32.mrb[46].mxu0 }
 0x139   : > { %v878_v47 = vpop.f32.mrb[46].mxu1  ;;  %v3596_v13 = vadd.f32 %v1075_v44, %v925_v42  ;;  %v2702_v48 = vpop.f32.mrb[47].mxu0 }
 0x13a   : > { %v926_v49 = vadd.f32 %v878_v47, %v3562_v31  ;;  %v2664_v50 = vpop.f32.mrb[47].mxu1 }
 0x13c   : > { %v1080_v52 = vpop.f32.mrb[48].mxu0 }
 0x13d   : > { %v883_v54 = vpop.f32.mrb[48].mxu1  ;;  %v3599_v19 = vadd.f32 %v1080_v52, %v926_v49  ;;  %v2705_v55 = vpop.f32.mrb[49].mxu0 }
 0x13e   : > { %v927_v56 = vadd.f32 %v883_v54, %v3564_v38  ;;  %v2667_v58 = vpop.f32.mrb[49].mxu1 }
 0x140   : > { %v1085_v59 = vpop.f32.mrb[50].mxu0 }
 0x141   : > { %v888_v61 = vpop.f32.mrb[50].mxu1  ;;  %v3602_v25 = vadd.f32 %v1085_v59, %v927_v56  ;;  %v2708_v63 = vpop.f32.mrb[51].mxu0 }
 0x142   : > { %v928_v0 = vadd.f32 %v888_v61, %v3566_v46  ;;  %v2670_v2 = vpop.f32.mrb[51].mxu1 }
 0x144   : > { %v1090_v3 = vpop.f32.mrb[52].mxu0 }
 0x145   : > { %v893_v4 = vpop.f32.mrb[52].mxu1  ;;  %v3605_v31 = vadd.f32 %v1090_v3, %v928_v0  ;;  %v2711_v5 = vpop.f32.mrb[53].mxu0 }
 0x146   : > { %v929_v6 = vadd.f32 %v893_v4, %v3569_v53  ;;  %v2673_v7 = vpop.f32.mrb[53].mxu1 }
 0x148   : > { %v1095_v9 = vpop.f32.mrb[54].mxu0 }
 0x149   : > { %v898_v10 = vpop.f32.mrb[54].mxu1  ;;  %v3608_v38 = vadd.f32 %v1095_v9, %v929_v6  ;;  %v2714_v1 = vpop.f32.mrb[55].mxu0 }
 0x14a   : > { %v930_v11 = vadd.f32 %v898_v10, %v3572_v60  ;;  %v2676_v12 = vpop.f32.mrb[55].mxu1 }
 0x14c   : > { %v1100_v14 = vpop.f32.mrb[56].mxu0 }
 0x14d   : > { %v903_v15 = vpop.f32.mrb[56].mxu1  ;;  %v3611_v46 = vadd.f32 %v1100_v14, %v930_v11  ;;  %v2717_v16 = vpop.f32.mrb[57].mxu0 }
 0x14e   : > { %v931_v17 = vadd.f32 %v903_v15, %v3575_v33  ;;  %v2679_v18 = vpop.f32.mrb[57].mxu1 }
 0x150   : > { %v1105_v51 = vpop.f32.mrb[58].mxu0 }
 0x151   : > { %v908_v21 = vpop.f32.mrb[58].mxu1  ;;  %v3614_v53 = vadd.f32 %v1105_v51, %v931_v17  ;;  %v2720_v22 = vpop.f32.mrb[59].mxu0 }
 0x152   : > { %v932_v23 = vadd.f32 %v908_v21, %v3578_v39  ;;  %v2682_v24 = vpop.f32.mrb[59].mxu1 }
 0x154   : > { %v1110_v26 = vpop.f32.mrb[60].mxu0 }
 0x155   : > { %v913_v27 = vpop.f32.mrb[60].mxu1  ;;  %v3617_v60 = vadd.f32 %v1110_v26, %v932_v23  ;;  %v2723_v28 = vpop.f32.mrb[61].mxu0 }
 0x156   : > { %v933_v29 = vadd.f32 %v913_v27, %v3581_v45  ;;  %v2685_v30 = vpop.f32.mrb[61].mxu1 }
 0x158   : > { %v1115_v32 = vpop.f32.mrb[62].mxu0 }
 0x159   : > { %v918_v34 = vpop.f32.mrb[62].mxu1  ;;  %v3620_v33 = vadd.f32 %v1115_v32, %v933_v29  ;;  %v2726_v35 = vpop.f32.mrb[63].mxu0 }
 0x15a   : > { %v934_v36 = vadd.f32 %v918_v34, %v3584_v20  ;;  %v2688_v37 = vpop.f32.mrb[63].mxu1 }
 0x15c   : > { %v1120_v40 = vpop.f32.mrb[64].mxu0 }
 0x15d   : > { %v3623_v41 = vadd.f32 %v1120_v40, %v934_v36  ;;  %v1262_v39 = vpop.f32.mrb[64].mxu1  ;;  %v2729_v42 = vpop.f32.mrb[65].mxu0 }
 0x15e   : > { %v1326_v43 = vadd.f32 %v1262_v39, %v3587_v57  ;;  %v2734_v44 = vpop.f32.mrb[65].mxu1 }
 0x160   : > { %v1464_v47 = vpop.f32.mrb[66].mxu0 }
 0x161   : > { %v1267_v48 = vpop.f32.mrb[66].mxu1  ;;  %v3626_v45 = vadd.f32 %v1464_v47, %v1326_v43  ;;  %v2775_v49 = vpop.f32.mrb[67].mxu0 }
 0x162   : > { %v1327_v50 = vadd.f32 %v1267_v48, %v3590_v62  ;;  %v2737_v52 = vpop.f32.mrb[67].mxu1 }
 0x164   : > { %v1469_v54 = vpop.f32.mrb[68].mxu0 }
 0x165   : > { %v1272_v55 = vpop.f32.mrb[68].mxu1  ;;  %v3629_v20 = vadd.f32 %v1469_v54, %v1327_v50  ;;  %v2778_v56 = vpop.f32.mrb[69].mxu0 }
 0x166   : > { %v1328_v58 = vadd.f32 %v1272_v55, %v3593_v8  ;;  %v2740_v59 = vpop.f32.mrb[69].mxu1 }
 0x168   : > { %v1474_v61 = vpop.f32.mrb[70].mxu0 }
 0x169   : > { %v1277_v63 = vpop.f32.mrb[70].mxu1  ;;  %v3632_v57 = vadd.f32 %v1474_v61, %v1328_v58  ;;  %v2781_v0 = vpop.f32.mrb[71].mxu0 }
 0x16a   : > { %v1329_v2 = vadd.f32 %v1277_v63, %v3596_v13  ;;  %v2743_v3 = vpop.f32.mrb[71].mxu1 }
 0x16c   : > { %v1479_v4 = vpop.f32.mrb[72].mxu0 }
 0x16d   : > { %v1282_v5 = vpop.f32.mrb[72].mxu1  ;;  %v3635_v62 = vadd.f32 %v1479_v4, %v1329_v2  ;;  %v2784_v6 = vpop.f32.mrb[73].mxu0 }
 0x16e   : > { %v1330_v7 = vadd.f32 %v1282_v5, %v3599_v19  ;;  %v2746_v9 = vpop.f32.mrb[73].mxu1 }
 0x170   : > { %v1484_v10 = vpop.f32.mrb[74].mxu0 }
 0x171   : > { %v1287_v1 = vpop.f32.mrb[74].mxu1  ;;  %v3638_v8 = vadd.f32 %v1484_v10, %v1330_v7  ;;  %v2787_v11 = vpop.f32.mrb[75].mxu0 }
 0x172   : > { %v1331_v12 = vadd.f32 %v1287_v1, %v3602_v25  ;;  %v2749_v14 = vpop.f32.mrb[75].mxu1 }
 0x174   : > { %v1489_v15 = vpop.f32.mrb[76].mxu0 }
 0x175   : > { %v1292_v16 = vpop.f32.mrb[76].mxu1  ;;  %v3641_v13 = vadd.f32 %v1489_v15, %v1331_v12  ;;  %v2790_v17 = vpop.f32.mrb[77].mxu0 }
 0x176   : > { %v1332_v18 = vadd.f32 %v1292_v16, %v3605_v31  ;;  %v2752_v51 = vpop.f32.mrb[77].mxu1 }
 0x178   : > { %v1494_v21 = vpop.f32.mrb[78].mxu0 }
 0x179   : > { %v1297_v22 = vpop.f32.mrb[78].mxu1  ;;  %v3644_v19 = vadd.f32 %v1494_v21, %v1332_v18  ;;  %v2793_v23 = vpop.f32.mrb[79].mxu0 }
 0x17a   : > { %v1333_v24 = vadd.f32 %v1297_v22, %v3608_v38  ;;  %v2755_v26 = vpop.f32.mrb[79].mxu1 }
 0x17c   : > { %v1499_v27 = vpop.f32.mrb[80].mxu0 }
 0x17d   : > { %v1302_v28 = vpop.f32.mrb[80].mxu1  ;;  %v3647_v25 = vadd.f32 %v1499_v27, %v1333_v24  ;;  %v2796_v29 = vpop.f32.mrb[81].mxu0 }
 0x17e   : > { %v1334_v30 = vadd.f32 %v1302_v28, %v3611_v46  ;;  %v2758_v32 = vpop.f32.mrb[81].mxu1 }
 0x180   : > { %v1504_v34 = vpop.f32.mrb[82].mxu0 }
 0x181   : > { %v1307_v35 = vpop.f32.mrb[82].mxu1  ;;  %v3650_v31 = vadd.f32 %v1504_v34, %v1334_v30  ;;  %v2799_v36 = vpop.f32.mrb[83].mxu0 }
 0x182   : > { %v1335_v37 = vadd.f32 %v1307_v35, %v3614_v53  ;;  %v2761_v40 = vpop.f32.mrb[83].mxu1 }
 0x184   : > { %v1509_v39 = vpop.f32.mrb[84].mxu0 }
 0x185   : > { %v1312_v42 = vpop.f32.mrb[84].mxu1  ;;  %v3653_v38 = vadd.f32 %v1509_v39, %v1335_v37  ;;  %v2802_v43 = vpop.f32.mrb[85].mxu0 }
 0x186   : > { %v1336_v44 = vadd.f32 %v1312_v42, %v3617_v60  ;;  %v2764_v47 = vpop.f32.mrb[85].mxu1 }
 0x188   : > { %v1514_v48 = vpop.f32.mrb[86].mxu0 }
 0x189   : > { %v1317_v49 = vpop.f32.mrb[86].mxu1  ;;  %v3656_v46 = vadd.f32 %v1514_v48, %v1336_v44  ;;  %v2805_v50 = vpop.f32.mrb[87].mxu0 }
 0x18a   : > { %v1337_v52 = vadd.f32 %v1317_v49, %v3620_v33  ;;  %v2767_v54 = vpop.f32.mrb[87].mxu1  ;;  %v3668_v33 = vld [vmem:[%s3773_s2] ss:$0 sm:$0xff] }
 0x18c   : > { %v1519_v55 = vpop.f32.mrb[88].mxu0 }
 0x18d   : > { %v1322_v56 = vpop.f32.mrb[88].mxu1  ;;  %v3659_v53 = vadd.f32 %v1519_v55, %v1337_v52  ;;  %v2808_v58 = vpop.f32.mrb[89].mxu0 }
 0x18e   : > { %v1338_v59 = vadd.f32 %v1322_v56, %v3623_v41  ;;  %v2770_v61 = vpop.f32.mrb[89].mxu1 }
 0x190   : > { %v1524_v63 = vpop.f32.mrb[90].mxu0 }
 0x191   : > { %v3662_v0 = vadd.f32 %v1524_v63, %v1338_v59  ;;  %v1666_v60 = vpop.f32.mrb[90].mxu1  ;;  %v2811_v2 = vpop.f32.mrb[91].mxu0 }
 0x192   : > { %v1730_v3 = vadd.f32 %v1666_v60, %v3626_v45  ;;  %v2816_v4 = vpop.f32.mrb[91].mxu1 }
 0x194   : > { %v1868_v5 = vpop.f32.mrb[92].mxu0 }
 0x195   : > { %v1671_v6 = vpop.f32.mrb[92].mxu1  ;;  %v1932_v7 = vadd.f32 %v1868_v5, %v1730_v3  ;;  %v2857_v9 = vpop.f32.mrb[93].mxu0 }
 0x196   : > { %v1731_v41 = vadd.f32 %v1671_v6, %v3629_v20  ;;  %v2819_v10 = vpop.f32.mrb[93].mxu1 }
 0x197   : > { %v3672_v1 = vadd.f32 %v3668_v33, %v1932_v7 }
 0x198   : > { %v1873_v11 = vpop.f32.mrb[94].mxu0 }
 0x199   : > { %v2384_v12 = vmul.f32 -1.442695, %v3672_v1  ;;  %v1676_v45 = vpop.f32.mrb[94].mxu1  ;;  %v1933_v14 = vadd.f32 %v1873_v11, %v1731_v41  ;;  %v2860_v15 = vpop.f32.mrb[95].mxu0 }
 0x19a   : > { %v1732_v16 = vadd.f32 %v1676_v45, %v3632_v57  ;;  %v2822_v17 = vpop.f32.mrb[95].mxu1 }
 0x19b   : > { %2906 = vpow2.f32 %v2384_v12  ;;  %v3677_v18 = vadd.f32 %v3668_v33, %v1933_v14 }
 0x19c   : > { %v1878_v51 = vpop.f32.mrb[96].mxu0 }
 0x19d   : > { %v2385_v20 = vmul.f32 -1.442695, %v3677_v18  ;;  %v1681_v21 = vpop.f32.mrb[96].mxu1  ;;  %v1934_v22 = vadd.f32 %v1878_v51, %v1732_v16  ;;  %v2863_v23 = vpop.f32.mrb[97].mxu0 }
 0x19e   : > { %v1733_v24 = vadd.f32 %v1681_v21, %v3635_v62  ;;  %v2825_v26 = vpop.f32.mrb[97].mxu1 }
 0x19f   : > { %2908 = vpow2.f32 %v2385_v20  ;;  %v3682_v27 = vadd.f32 %v3668_v33, %v1934_v22 }
 0x1a0   : > { %v1883_v57 = vpop.f32.mrb[98].mxu0 }
 0x1a1   : > { %v2386_v28 = vmul.f32 -1.442695, %v3682_v27  ;;  %v1686_v29 = vpop.f32.mrb[98].mxu1  ;;  %v1935_v30 = vadd.f32 %v1883_v57, %v1733_v24  ;;  %v2866_v32 = vpop.f32.mrb[99].mxu0 }
 0x1a2   : > { %v1734_v34 = vadd.f32 %v1686_v29, %v3638_v8  ;;  %v2828_v35 = vpop.f32.mrb[99].mxu1 }
 0x1a3   : > { %2910 = vpow2.f32 %v2386_v28  ;;  %v3689_v36 = vadd.f32 %v3668_v33, %v1935_v30 }
 0x1a4   : > { %v1888_v62 = vpop.f32.mrb[100].mxu0 }
 0x1a5   : > { %v2907_v37 = vpop.eup %2906  ;;  %v2387_v40 = vmul.f32 -1.442695, %v3689_v36  ;;  %v1691_v39 = vpop.f32.mrb[100].mxu1  ;;  %v1936_v42 = vadd.f32 %v1888_v62, %v1734_v34 }
 0x1a6   : > { %v2869_v43 = vpop.f32.mrb[101].mxu0  ;;  %v2004_v44 = vadd.f32 1.0, %v2907_v37  ;;  %v1735_v47 = vadd.f32 %v1691_v39, %v3641_v13  ;;  %v2831_v48 = vpop.f32.mrb[101].mxu1 }
 0x1a7   : > { %2912 = vpow2.f32 %v2387_v40  ;;  %v3694_v8 = vadd.f32 %v3668_v33, %v1936_v42 }
 0x1a8   : > { %2914 = vrcp.f32 %v2004_v44  ;;  %v1893_v49 = vpop.f32.mrb[102].mxu0 }
 0x1a9   : > { %v2909_v50 = vpop.eup %2908  ;;  %v2388_v52 = vmul.f32 -1.442695, %v3694_v8  ;;  %v1696_v54 = vpop.f32.mrb[102].mxu1  ;;  %v1937_v55 = vadd.f32 %v1893_v49, %v1735_v47 }
 0x1aa   : > { %v2872_v56 = vpop.f32.mrb[103].mxu0  ;;  %v2005_v58 = vadd.f32 1.0, %v2909_v50  ;;  %v1736_v59 = vadd.f32 %v1696_v54, %v3644_v19  ;;  %v2834_v61 = vpop.f32.mrb[103].mxu1 }
 0x1ab   : > { %2916 = vpow2.f32 %v2388_v52  ;;  %v3699_v13 = vadd.f32 %v3668_v33, %v1937_v55 }
 0x1ac   : > { %2918 = vrcp.f32 %v2005_v58  ;;  %v1898_v63 = vpop.f32.mrb[104].mxu0 }
 0x1ad   : > { %v2911_v60 = vpop.eup %2910  ;;  %v2389_v2 = vmul.f32 -1.442695, %v3699_v13  ;;  %v1701_v3 = vpop.f32.mrb[104].mxu1  ;;  %v1938_v4 = vadd.f32 %v1898_v63, %v1736_v59 }
 0x1ae   : > { %v2875_v5 = vpop.f32.mrb[105].mxu0  ;;  %v2006_v6 = vadd.f32 1.0, %v2911_v60  ;;  %v1737_v7 = vadd.f32 %v1701_v3, %v3647_v25  ;;  %v2837_v9 = vpop.f32.mrb[105].mxu1 }
 0x1af   : > { %2920 = vpow2.f32 %v2389_v2  ;;  %v3704_v19 = vadd.f32 %v3668_v33, %v1938_v4 }
 0x1b0   : > { %2922 = vrcp.f32 %v2006_v6  ;;  %v1903_v41 = vpop.f32.mrb[106].mxu0 }
 0x1b1   : > { %v2913_v10 = vpop.eup %2912  ;;  %v2390_v11 = vmul.f32 -1.442695, %v3704_v19  ;;  %v1706_v12 = vpop.f32.mrb[106].mxu1  ;;  %v1939_v45 = vadd.f32 %v1903_v41, %v1737_v7 }
 0x1b2   : > { %v2878_v14 = vpop.f32.mrb[107].mxu0  ;;  %v2915_v15 = vpop.eup %2914  ;;  %v2007_v25 = vadd.f32 1.0, %v2913_v10  ;;  %v1738_v16 = vadd.f32 %v1706_v12, %v3650_v31 }
 0x1b3   : > { %v2840_v17 = vpop.f32.mrb[107].mxu1  ;;  %v2043_v51 = vmul.f32 %v2915_v15, %v3672_v1  ;;  %2924 = vpow2.f32 %v2390_v11  ;;  %v3715_v20 = vadd.f32 %v3668_v33, %v1939_v45 }
 0x1b4   : > { %2926 = vrcp.f32 %v2007_v25  ;;  %v1908_v21 = vpop.f32.mrb[108].mxu0 }
 0x1b5   : > { %v2917_v22 = vpop.eup %2916  ;;  %2057 = vst.msk [vmem:[%s3710_s16] sm:$0xff] %vm2056_vm3, %v2043_v51  ;;  %v2391_v23 = vmul.f32 -1.442695, %v3715_v20  ;;  %v1711_v24 = vpop.f32.mrb[108].mxu1  ;;  %v1940_v26 = vadd.f32 %v1908_v21, %v1738_v16 }
 0x1b6   : > { %v2881_v57 = vpop.f32.mrb[109].mxu0  ;;  %v2919_v28 = vpop.eup %2918  ;;  %v2008_v31 = vadd.f32 1.0, %v2917_v22  ;;  %v1739_v29 = vadd.f32 %v1711_v24, %v3653_v38 }
 0x1b7   : > { %v2843_v1 = vpop.f32.mrb[109].mxu1  ;;  %v2044_v30 = vmul.f32 %v2919_v28, %v3677_v18  ;;  %2928 = vpow2.f32 %v2391_v23  ;;  %v3723_v32 = vadd.f32 %v3668_v33, %v1940_v26 }
 0x1b8   : > { %2930 = vrcp.f32 %v2008_v31  ;;  %v1913_v34 = vpop.f32.mrb[110].mxu0 }
 0x1b9   : > { %v2921_v35 = vpop.eup %2920  ;;  %2058 = vst.msk [vmem:[%s3710_s16 + $0x8] sm:$0xff] %vm2056_vm3, %v2044_v30  ;;  %v2392_v62 = vmul.f32 -1.442695, %v3723_v32  ;;  %v1716_v37 = vpop.f32.mrb[110].mxu1  ;;  %v1941_v40 = vadd.f32 %v1913_v34, %v1739_v29 }
 0x1ba   : > { %v2884_v39 = vpop.f32.mrb[111].mxu0  ;;  %v2923_v42 = vpop.eup %2922  ;;  %v2009_v38 = vadd.f32 1.0, %v2921_v35  ;;  %v1740_v43 = vadd.f32 %v1716_v37, %v3656_v46 }
 0x1bb   : > { %v2846_v18 = vpop.f32.mrb[111].mxu1  ;;  %v2045_v44 = vmul.f32 %v2923_v42, %v3682_v27  ;;  %2932 = vpow2.f32 %v2392_v62  ;;  %v3731_v47 = vadd.f32 %v3668_v33, %v1941_v40 }
 0x1bc   : > { %2934 = vrcp.f32 %v2009_v38  ;;  %v1918_v48 = vpop.f32.mrb[112].mxu0 }
 0x1bd   : > { %v2925_v49 = vpop.eup %2924  ;;  %2059 = vst.msk [vmem:[%s3710_s16 + $0x10] sm:$0xff] %vm2056_vm3, %v2045_v44  ;;  %v2393_v50 = vmul.f32 -1.442695, %v3731_v47  ;;  %v1721_v52 = vpop.f32.mrb[112].mxu1  ;;  %v1942_v54 = vadd.f32 %v1918_v48, %v1740_v43 }
 0x1be   : > { %v2887_v55 = vpop.f32.mrb[113].mxu0  ;;  %v2927_v56 = vpop.eup %2926  ;;  %v2010_v46 = vadd.f32 1.0, %v2925_v49  ;;  %v1741_v58 = vadd.f32 %v1721_v52, %v3659_v53 }
 0x1bf   : > { %v2849_v27 = vpop.f32.mrb[113].mxu1  ;;  %v2046_v59 = vmul.f32 %v2927_v56, %v3689_v36  ;;  %2936 = vpow2.f32 %v2393_v50  ;;  %v1962_v61 = vadd.f32 %v3668_v33, %v1942_v54 }
 0x1c0   : > { %2938 = vrcp.f32 %v2010_v46  ;;  %v1923_v63 = vpop.f32.mrb[114].mxu0 }
 0x1c1   : > { %v2929_v60 = vpop.eup %2928  ;;  %2060 = vst.msk [vmem:[%s3710_s16 + $0x18] sm:$0xff] %vm2056_vm3, %v2046_v59  ;;  %v2394_v2 = vmul.f32 -1.442695, %v1962_v61  ;;  %v1726_v3 = vpop.f32.mrb[114].mxu1  ;;  %v1943_v4 = vadd.f32 %v1923_v63, %v1741_v58 }
 0x1c2   : > { %v2890_v5 = vpop.f32.mrb[115].mxu0  ;;  %v2931_v6 = vpop.eup %2930  ;;  %v2011_v7 = vadd.f32 1.0, %v2929_v60  ;;  %v1742_v53 = vadd.f32 %v1726_v3, %v3662_v0 }
 0x1c3   : > { %v2852_v9 = vpop.f32.mrb[115].mxu1  ;;  %v2047_v36 = vmul.f32 %v2931_v6, %v3694_v8  ;;  %2940 = vpow2.f32 %v2394_v2  ;;  %v1963_v41 = vadd.f32 %v3668_v33, %v1943_v4 }
 0x1c4   : > { %2942 = vrcp.f32 %v2011_v7  ;;  %v1928_v10 = vpop.f32.mrb[116].mxu0 }
 0x1c5   : > { %v2933_v11 = vpop.eup %2932  ;;  %2061 = vst.msk [vmem:[%s3710_s16 + $0x20] sm:$0xff] %vm2056_vm3, %v2047_v36  ;;  %v2395_v12 = vmul.f32 -1.442695, %v1963_v41  ;;  %v1944_v45 = vadd.f32 %v1928_v10, %v1742_v53  ;;  %v2893_v14 = vpop.f32.mrb[117].mxu0 }
 0x1c6   : > { %v2935_v15 = vpop.eup %2934  ;;  %v2012_v25 = vadd.f32 1.0, %v2933_v11 }
 0x1c7   : > { %v2048_v0 = vmul.f32 %v2935_v15, %v3699_v13  ;;  %2944 = vpow2.f32 %v2395_v12  ;;  %v1964_v8 = vadd.f32 %v3668_v33, %v1944_v45 }
 0x1c8   : > { %2946 = vrcp.f32 %v2012_v25 }
 0x1c9   : > { %v2937_v16 = vpop.eup %2936  ;;  %2062 = vst.msk [vmem:[%s3710_s16 + $0x28] sm:$0xff] %vm2056_vm3, %v2048_v0  ;;  %v2396_v17 = vmul.f32 -1.442695, %v1964_v8 }
 0x1ca   : > { %v2939_v51 = vpop.eup %2938  ;;  %v2013_v21 = vadd.f32 1.0, %v2937_v16 }
 0x1cb   : > { %v2049_v22 = vmul.f32 %v2939_v51, %v3704_v19  ;;  %2948 = vpow2.f32 %v2396_v17 }
 0x1cc   : > { %2950 = vrcp.f32 %v2013_v21 }
 0x1cd   : > { %v2941_v23 = vpop.eup %2940  ;;  %2063 = vst.msk [vmem:[%s3710_s16 + $0x30] sm:$0xff] %vm2056_vm3, %v2049_v22 }
 0x1ce   : > { %v2943_v13 = vpop.eup %2942  ;;  %v2014_v24 = vadd.f32 1.0, %v2941_v23 }
 0x1cf   : > { %v2050_v33 = vmul.f32 %v2943_v13, %v3715_v20 }
 0x1d0   : > { %2952 = vrcp.f32 %v2014_v24 }
 0x1d1   : > { %v2945_v26 = vpop.eup %2944  ;;  %2064 = vst.msk [vmem:[%s3710_s16 + $0x38] sm:$0xff] %vm2056_vm3, %v2050_v33 }
 0x1d2   : > { %v2947_v57 = vpop.eup %2946  ;;  %v2015_v28 = vadd.f32 1.0, %v2945_v26 }
 0x1d3   : > { %v2051_v19 = vmul.f32 %v2947_v57, %v3723_v32 }
 0x1d4   : > { %2954 = vrcp.f32 %v2015_v28 }
 0x1d5   : > { %v2949_v31 = vpop.eup %2948  ;;  %2065 = vst.msk [vmem:[%s3710_s16 + $0x40] sm:$0xff] %vm2056_vm3, %v2051_v19 }
 0x1d6   : > { %v2951_v29 = vpop.eup %2950  ;;  %v2016_v1 = vadd.f32 1.0, %v2949_v31 }
 0x1d7   : > { %v2052_v30 = vmul.f32 %v2951_v29, %v3731_v47 }
 0x1d8   : > { %2956 = vrcp.f32 %v2016_v1 }
 0x1d9   : > { %2066 = vst.msk [vmem:[%s3710_s16 + $0x48] sm:$0xff] %vm2056_vm3, %v2052_v30 }
 0x1da   : > { %v2953_v20 = vpop.eup %2952 }
 0x1db   : > { %v2053_v34 = vmul.f32 %v2953_v20, %v1962_v61 }
 0x1dd   : > { %2067 = vst.msk [vmem:[%s3710_s16 + $0x50] sm:$0xff] %vm2056_vm3, %v2053_v34 }
 0x1de   : > { %v2955_v35 = vpop.eup %2954 }
 0x1df   : > { %v2054_v62 = vmul.f32 %v2955_v35, %v1963_v41 }
 0x1e1   : > { %2068 = vst.msk [vmem:[%s3710_s16 + $0x58] sm:$0xff] %vm2056_vm3, %v2054_v62 }
 0x1e2   : > { %v2957_v32 = vpop.eup %2956 }
 0x1e3   : > { %v2055_v37 = vmul.f32 %v2957_v32, %v1964_v8 }
 0x1e5   : > { %2069 = vst.msk [vmem:[%s3710_s16 + $0x60] sm:$0xff] %vm2056_vm3, %v2055_v37 }
 0x1e6 PF: > { %s13_s12 = sadd.s32 1, %s2964_s12  }
 0x1e7   : > { %p10_p4 = scmp.ge.s32.totalorder %s13_s12, 4  }
 0x1e9   :  { %12 = sbr.rel (!%p10_p4) target bundleno = 1 (0x1), region = 76 }

// kernel: vae_forward.11
= control target key start
LH: loop header
LB: loop body
LE: loop exit
PB: predicated region body
PF: predicated region fallthrough
CT: control target
= control target key end

     0   :  { %s5931_s12 = smov 0   ;;  %s7103_s0 = inlined_call_operand.vmem [shape: f32[806,32], index: 0, kind: input, shape index: {}]   ;;  %s7104_s1 = inlined_call_operand.vmem [shape: f32[9,32,32], index: 1, kind: input, shape index: {}]   ;;  %s7105_s2 = inlined_call_operand.vmem [shape: f32[1,32], index: 2, kind: input, shape index: {}]   ;;  %s7106_s3 = inlined_call_operand.vmem [shape: f32[768,32], index: 3, kind: output, shape index: {}]  }
   0x1 LB: > { %s3981_s13 = sadd.s32 4294967295, %s5909_s12   ;;  %p3984_p0 = scmp.ge.s32.totalorder %s5909_s12, 1  ;;  %s5909_s12 = sphi %s5931_s12, %s13_s12  }
   0x2   : > { %p127_p1 = scmp.lt.s32.totalorder %s5909_s12, 4 }
   0x4   : > { %p128_p2 = pnand %p3984_p0, %p127_p1 }
   0x5   : > { %v4021_v0 = vld [vmem:[%s7104_s1 + $0x20] sm:$0xff] (!%p128_p2)  ;;  %v4022_v1 = vld [vmem:[%s7104_s1 + $0x28] sm:$0xff] (!%p128_p2)  ;;  %s3987_s20 = sshll.u32 (!%p128_p2), %s3981_s13, 8  ;;  %vm229_vm0 = vcmask (!%p128_p2), 261120   ;;  %v4023_v5 = vld [vmem:[%s7104_s1 + $0x30] sm:$0xff] (!%p128_p2)  ;;  %s3985_s18 = sshll.u32 (!%p128_p2), %s3981_s13, 5 }
   0x6   : > { %131 = sbr.rel (%p128_p2) target bundleno = 551 (0x227), region = 32  ;;  %v4260_v2 = vld [vmem:[%s7104_s1 + $0x80] sm:$0xff] (!%p128_p2)  ;;  %v5435_v3 = vpack.c.bf16 (!%p128_p2), %v4022_v1, %v4021_v0  ;;  %v4261_v4 = vld [vmem:[%s7104_s1 + $0x88] sm:$0xff] (!%p128_p2)  ;;  %v4024_v6 = vld [vmem:[%s7104_s1 + $0x38] sm:$0xff] (!%p128_p2)  ;;  %s5962_s29 = scalar_lea.vmem (!%p128_p2), %s7103_s0, %s3987_s20 }
   0x7   : > { %v5964_v7 = vpack.c.bf16 (!%p128_p2), %v4261_v4, %v4260_v2  ;;  %v5439_v8 = vpack.c.bf16 (!%p128_p2), %v4024_v6, %v4023_v5  ;;  %v4262_v9 = vld [vmem:[%s7104_s1 + $0x90] sm:$0xff] (!%p128_p2)  ;;  %v4263_v10 = vld [vmem:[%s7104_s1 + $0x98] sm:$0xff] (!%p128_p2)  ;;  %v3989_v11 = vld [vmem:[%s5962_s29 + $0x1] sm:$0xff] (!%p128_p2)  ;;  %p147_p3 = scmp.lt.s32.totalorder (!%p128_p2), %s3985_s18, 95 }
   0x8   : > { %5436 = vmatprep.subr.bf16.mxu1 (!%p128_p2), %v5435_v3  ;;  %v5973_v12 = vpack.c.bf16 (!%p128_p2), %v4263_v10, %v4262_v9  ;;  %4939 = vmatprep.mubr.msk.f32.mxu1 (!%p128_p2), %vm229_vm0, %v3989_v11  ;;  %v4228_v13 = vld [vmem:[%s5962_s29 + $0x13] sm:$0xff] (!%p128_p2)  ;;  %v186_v14 = vld [vmem:[%s7104_s1] sm:$0xff] (!%p128_p2)  ;;  %v187_v15 = vld [vmem:[%s7104_s1 + $0x8] sm:$0xff] (!%p128_p2) }
   0x9   : > { %5468 = vmatprep.subr.bf16.mxu0 (!%p128_p2), %v5964_v7  ;;  %5438 = vmatpush3.bf16.msra.mxu1 (!%p128_p2), %v5435_v3  ;;  %v4329_v16 = vld [vmem:[%s7104_s1 + $0xa0] sm:$0xff] (!%p128_p2)  ;;  %v5443_v17 = vpack.c.bf16 (!%p128_p2), %v187_v15, %v186_v14  ;;  %v4330_v18 = vld [vmem:[%s7104_s1 + $0xa8] sm:$0xff] (!%p128_p2)  ;;  %v3991_v22 = vld [vmem:[%s5962_s29 + $0x11] sm:$0xff] (!%p128_p2) }
   0xa   : > { %5470 = vmatpush3.bf16.msra.mxu0 (!%p128_p2), %v5964_v7  ;;  %5440 = vmatprep.subr.bf16.mxu1 (!%p128_p2), %v5439_v8  ;;  %v5475_v19 = vpack.c.bf16 (!%p128_p2), %v4330_v18, %v4329_v16  ;;  %v3990_v20 = vld [vmem:[%s5962_s29 + $0x9] sm:$0xff] (!%p128_p2)  ;;  %v4229_v21 = vld [vmem:[%s5962_s29 + $0x1b] sm:$0xff] (!%p128_p2)  ;;  %v4232_v30 = vld [vmem:[%s5962_s29 + $0x33] sm:$0xff] (!%p128_p2) }
   0xb   : > { %5472 = vmatprep.subr.bf16.mxu0 (!%p128_p2), %v5973_v12  ;;  %5163 = vmatprep.mubr.msk.f32.mxu0 (!%p128_p2), %vm229_vm0, %v4228_v13  ;;  %v4331_v23 = vld [vmem:[%s7104_s1 + $0xb0] sm:$0xff] (!%p128_p2)  ;;  %v4230_v24 = vld [vmem:[%s5962_s29 + $0x23] sm:$0xff] (!%p128_p2)  ;;  %v4332_v25 = vld [vmem:[%s7104_s1 + $0xb8] sm:$0xff] (!%p128_p2) }
   0xc   : > { %v3992_v26 = vld [vmem:[%s5962_s29 + $0x19] sm:$0xff] (!%p128_p2)  ;;  %v5479_v27 = vpack.c.bf16 (!%p128_p2), %v4332_v25, %v4331_v23  ;;  %v4231_v28 = vld [vmem:[%s5962_s29 + $0x2b] sm:$0xff] (!%p128_p2)  ;;  %v3993_v29 = vld [vmem:[%s5962_s29 + $0x21] sm:$0xff] (!%p128_p2) }
   0xd   : > { %5442 = vmatpush3.bf16.msra.mxu1 %v5439_v8  ;;  %v3994_v31 = vld [vmem:[%s5962_s29 + $0x29] sm:$0xff]  ;;  %v4233_v32 = vld [vmem:[%s5962_s29 + $0x3b] sm:$0xff]  ;;  %v3995_v35 = vld [vmem:[%s5962_s29 + $0x31] sm:$0xff]  ;;  %s7108_s18 = smov (!%p147_p3, %s3985_s18), 95 }
   0xe   : > { %5474 = vmatpush3.bf16.msra.mxu0 %v5973_v12  ;;  %5444 = vmatprep.subr.bf16.mxu1 %v5443_v17  ;;  %v188_v33 = vld [vmem:[%s7104_s1 + $0x10] sm:$0xff]  ;;  %v189_v34 = vld [vmem:[%s7104_s1 + $0x18] sm:$0xff]  ;;  %v4398_v37 = vld [vmem:[%s7104_s1 + $0xc0] sm:$0xff]  ;;  %s3986_s13 = sshll.u32 %s7108_s18, 3 }
   0xf   : > { %5476 = vmatprep.subr.bf16.mxu0 %v5475_v19  ;;  %v5447_v36 = vpack.c.bf16 %v189_v34, %v188_v33  ;;  %v4399_v38 = vld [vmem:[%s7104_s1 + $0xc8] sm:$0xff]  ;;  %v3996_v41 = vld [vmem:[%s5962_s29 + $0x39] sm:$0xff]  ;;  %v3999_v47 = vld [vmem:[%s5962_s29 + $0x51] sm:$0xff]  ;;  %s6928_s21 = scalar_lea.vmem %s7106_s3, %s3986_s13 }
  0x10   : > { %4940 = vmatmul.mubr.msk.f32.vlgmr.msra.gmra.mrb[0].mxu1 %vm229_vm0, %v3990_v20  ;;  %v4234_v39 = vld [vmem:[%s5962_s29 + $0x43] sm:$0xff]  ;;  %v6032_v40 = vpack.c.bf16 %v4399_v38, %v4398_v37  ;;  %v4235_v42 = vld [vmem:[%s5962_s29 + $0x4b] sm:$0xff]  ;;  %v4236_v44 = vld [vmem:[%s5962_s29 + $0x53] sm:$0xff] }
  0x11   : > { %5164 = vmatmul.mubr.msk.f32.vlgmr.msra.gmra.mrb[0].mxu0 %vm229_vm0, %v4229_v21  ;;  %5446 = vmatpush3.bf16.msra.mxu1 %v5443_v17  ;;  %v3997_v43 = vld [vmem:[%s5962_s29 + $0x41] sm:$0xff]  ;;  %v3998_v45 = vld [vmem:[%s5962_s29 + $0x49] sm:$0xff]  ;;  %v4000_v49 = vld [vmem:[%s5962_s29 + $0x59] sm:$0xff] }
  0x12   : > { %5478 = vmatpush3.bf16.msra.mxu0 %v5475_v19  ;;  %4942 = vmatprep.mubr.msk.f32.mxu1 %vm229_vm0, %v3991_v22  ;;  %v4237_v46 = vld [vmem:[%s5962_s29 + $0x5b] sm:$0xff]  ;;  %v4238_v48 = vld [vmem:[%s5962_s29 + $0x63] sm:$0xff]  ;;  %v4239_v52 = vld [vmem:[%s5962_s29 + $0x6b] sm:$0xff] }
  0x13   : > { %5166 = vmatprep.mubr.msk.f32.mxu0 %vm229_vm0, %v4230_v24  ;;  %5480 = vmatprep.subr.bf16.mxu0 %v5479_v27  ;;  %v4122_v50 = vld [vmem:[%s7104_s1 + $0x40] sm:$0xff]  ;;  %v4123_v51 = vld [vmem:[%s7104_s1 + $0x48] sm:$0xff]  ;;  %v4240_v55 = vld [vmem:[%s5962_s29 + $0x73] sm:$0xff] }
  0x14   : > { %4943 = vmatmul.mubr.msk.f32.gmra.mrb[2].mxu1 %vm229_vm0, %v3992_v26  ;;  %5448 = vmatprep.subr.bf16.mxu1 %v5447_v36  ;;  %v4001_v53 = vld [vmem:[%s5962_s29 + $0x61] sm:$0xff]  ;;  %v6064_v54 = vpack.c.bf16 %v4123_v51, %v4122_v50  ;;  %v4002_v56 = vld [vmem:[%s5962_s29 + $0x69] sm:$0xff]  ;;  %v4003_v58 = vld [vmem:[%s5962_s29 + $0x71] sm:$0xff] }
  0x15   : > { %5167 = vmatmul.mubr.msk.f32.gmra.mrb[2].mxu0 %vm229_vm0, %v4231_v28  ;;  %4945 = vmatprep.mubr.msk.f32.mxu1 %vm229_vm0, %v3993_v29  ;;  %v4241_v57 = vld [vmem:[%s5962_s29 + $0x7b] sm:$0xff]  ;;  %v4242_v59 = vld [vmem:[%s5962_s29 + $0x83] sm:$0xff]  ;;  %v4243_v61 = vld [vmem:[%s5962_s29 + $0x8b] sm:$0xff] }
  0x16   : > { %5169 = vmatprep.mubr.msk.f32.mxu0 %vm229_vm0, %v4232_v30  ;;  %5482 = vmatpush3.bf16.msra.mxu0 %v5479_v27  ;;  %v4004_v60 = vld [vmem:[%s5962_s29 + $0x79] sm:$0xff]  ;;  %v4005_v62 = vld [vmem:[%s5962_s29 + $0x81] sm:$0xff]  ;;  %v4400_v0 = vld [vmem:[%s7104_s1 + $0xd0] sm:$0xff] }
  0x17   : > { %5484 = vmatprep.subr.bf16.mxu0 %v6032_v40  ;;  %5450 = vmatpush3.bf16.msra.mxu1 %v5447_v36  ;;  %v4297_v63 = vld [vmem:[%s5962_s29 + $0x14] sm:$0xff]  ;;  %v4006_v2 = vld [vmem:[%s5962_s29 + $0x89] sm:$0xff]  ;;  %v4298_v3 = vld [vmem:[%s5962_s29 + $0x1c] sm:$0xff] }
  0x18   : > { %4946 = vmatmul.mubr.msk.f32.gmra.mrb[4].mxu1 %vm229_vm0, %v3994_v31  ;;  %5452 = vmatprep.subr.bf16.mxu1 %v6064_v54  ;;  %v4401_v1 = vld [vmem:[%s7104_s1 + $0xd8] sm:$0xff]  ;;  %v6098_v5 = vld [vmem:[%s5962_s29 + $0x24] sm:$0xff]  ;;  %v6114_v11 = vld [vmem:[%s5962_s29 + $0x2c] sm:$0xff] }
  0x19   : > { %5170 = vmatmul.mubr.msk.f32.gmra.mrb[4].mxu0 %vm229_vm0, %v4233_v32  ;;  %4948 = vmatprep.mubr.msk.f32.mxu1 %vm229_vm0, %v3995_v35  ;;  %v4007_v4 = vld [vmem:[%s5962_s29 + $0x91] sm:$0xff]  ;;  %v5487_v6 = vpack.c.bf16 %v4401_v1, %v4400_v0  ;;  %v4467_v8 = vld [vmem:[%s7104_s1 + $0xe0] sm:$0xff]  ;;  %v4468_v9 = vld [vmem:[%s7104_s1 + $0xe8] sm:$0xff] }
  0x1a   : > { %5172 = vmatprep.mubr.msk.f32.mxu0 %vm229_vm0, %v4234_v39  ;;  %v4008_v10 = vld [vmem:[%s5962_s29 + $0x99] sm:$0xff]  ;;  %v4009_v13 = vld [vmem:[%s5962_s29 + $0xa1] sm:$0xff]  ;;  %v6120_v15 = vpack.c.bf16 %v4468_v9, %v4467_v8  ;;  %v4010_v16 = vld [vmem:[%s5962_s29 + $0xa9] sm:$0xff] }
  0x1b   : > { %v6118_v14 = vld [vmem:[%s5962_s29 + $0x34] sm:$0xff]  ;;  %v6130_v17 = vld [vmem:[%s5962_s29 + $0x3c] sm:$0xff]  ;;  %v6134_v19 = vld [vmem:[%s5962_s29 + $0x44] sm:$0xff] }
  0x1c   : > { %4949 = vmatmul.mubr.msk.f32.gmra.mrb[6].mxu1 %vm229_vm0, %v3996_v41  ;;  %v4011_v18 = vld [vmem:[%s5962_s29 + $0xb1] sm:$0xff]  ;;  %v4012_v20 = vld [vmem:[%s5962_s29 + $0xb9] sm:$0xff]  ;;  %v4013_v22 = vld [vmem:[%s5962_s29 + $0xc1] sm:$0xff] }
  0x1d   : > { %5173 = vmatmul.mubr.msk.f32.gmra.mrb[6].mxu0 %vm229_vm0, %v4235_v42  ;;  %4951 = vmatprep.mubr.msk.f32.mxu1 %vm229_vm0, %v3997_v43  ;;  %v6145_v21 = vld [vmem:[%s5962_s29 + $0x4c] sm:$0xff]  ;;  %v6149_v23 = vld [vmem:[%s5962_s29 + $0x54] sm:$0xff]  ;;  %v6159_v25 = vld [vmem:[%s5962_s29 + $0x5c] sm:$0xff] }
  0x1e   : > { %5175 = vmatprep.mubr.msk.f32.mxu0 %vm229_vm0, %v4236_v44  ;;  %v4014_v24 = vld [vmem:[%s5962_s29 + $0xc9] sm:$0xff]  ;;  %v4015_v26 = vld [vmem:[%s5962_s29 + $0xd1] sm:$0xff]  ;;  %v4016_v28 = vld [vmem:[%s5962_s29 + $0xd9] sm:$0xff] }
  0x1f   : > { %v6163_v27 = vld [vmem:[%s5962_s29 + $0x64] sm:$0xff]  ;;  %v6173_v29 = vld [vmem:[%s5962_s29 + $0x6c] sm:$0xff]  ;;  %v6177_v31 = vld [vmem:[%s5962_s29 + $0x74] sm:$0xff] }
  0x20   : > { %4952 = vmatmul.mubr.msk.f32.gmra.mrb[8].mxu1 %vm229_vm0, %v3998_v45  ;;  %v4017_v30 = vld [vmem:[%s5962_s29 + $0xe1] sm:$0xff]  ;;  %v4018_v32 = vld [vmem:[%s5962_s29 + $0xe9] sm:$0xff]  ;;  %v4019_v34 = vld [vmem:[%s5962_s29 + $0xf1] sm:$0xff] }
  0x21   : > { %5176 = vmatmul.mubr.msk.f32.gmra.mrb[8].mxu0 %vm229_vm0, %v4237_v46  ;;  %4954 = vmatprep.mubr.msk.f32.mxu1 %vm229_vm0, %v3999_v47  ;;  %v6187_v33 = vld [vmem:[%s5962_s29 + $0x7c] sm:$0xff]  ;;  %v6191_v35 = vld [vmem:[%s5962_s29 + $0x84] sm:$0xff]  ;;  %v6201_v37 = vld [vmem:[%s5962_s29 + $0x8c] sm:$0xff] }
  0x22   : > { %5178 = vmatprep.mubr.msk.f32.mxu0 %vm229_vm0, %v4238_v48  ;;  %v4020_v36 = vld [vmem:[%s5962_s29 + $0xf9] sm:$0xff]  ;;  %v155_v42 = vld [vmem:[%s5962_s29 + $0x8] sm:$0xff]  ;;  %v156_v44 = vld [vmem:[%s5962_s29 + $0x10] sm:$0xff] }
  0x23   : > { %v154_v38 = vld [vmem:[%s5962_s29] sm:$0xff]  ;;  %v6205_v39 = vld [vmem:[%s5962_s29 + $0x94] sm:$0xff]  ;;  %v4192_v48 = vld [vmem:[%s7104_s1 + $0x68] sm:$0xff] }
  0x24   : > { %4955 = vmatmul.mubr.msk.f32.gmra.mrb[10].mxu1 %vm229_vm0, %v4000_v49  ;;  %v4125_v41 = vld [vmem:[%s7104_s1 + $0x58] sm:$0xff]  ;;  %v6225_v45 = vld [vmem:[%s5962_s29 + $0xa4] sm:$0xff]  ;;  %v6242_v50 = vld [vmem:[%s5962_s29 + $0xac] sm:$0xff] }
  0x25   : > { %5179 = vmatmul.mubr.msk.f32.gmra.mrb[10].mxu0 %vm229_vm0, %v4239_v52  ;;  %4957 = vmatprep.mubr.msk.f32.mxu1 %vm229_vm0, %v4001_v53  ;;  %v6221_v43 = vld [vmem:[%s5962_s29 + $0x9c] sm:$0xff]  ;;  %v6246_v52 = vld [vmem:[%s5962_s29 + $0xb4] sm:$0xff]  ;;  %v6291_v1 = vld [vmem:[%s5962_s29 + $0xe4] sm:$0xff] }
  0x26   : > { %5181 = vmatprep.mubr.msk.f32.mxu0 %vm229_vm0, %v4240_v55  ;;  %v4191_v47 = vld [vmem:[%s7104_s1 + $0x60] sm:$0xff]  ;;  %v157_v49 = vld [vmem:[%s5962_s29 + $0x18] sm:$0xff]  ;;  %v164_v0 = vld [vmem:[%s5962_s29 + $0x50] sm:$0xff] }
  0x27   : > { %v158_v51 = vld [vmem:[%s5962_s29 + $0x20] sm:$0xff]  ;;  %v6248_v53 = vpack.c.bf16 %v4192_v48, %v4191_v47  ;;  %v167_v8 = vld [vmem:[%s5962_s29 + $0x68] sm:$0xff] }
  0x28   : > { %4958 = vmatmul.mubr.msk.f32.gmra.mrb[12].mxu1 %vm229_vm0, %v4002_v56  ;;  %v6258_v55 = vld [vmem:[%s5962_s29 + $0xbc] sm:$0xff]  ;;  %v160_v56 = vld [vmem:[%s5962_s29 + $0x30] sm:$0xff] }
  0x29   : > { %5182 = vmatmul.mubr.msk.f32.gmra.mrb[12].mxu0 %vm229_vm0, %v4241_v57  ;;  %4960 = vmatprep.mubr.msk.f32.mxu1 %vm229_vm0, %v4003_v58  ;;  %v6262_v57 = vld [vmem:[%s5962_s29 + $0xc4] sm:$0xff]  ;;  %v161_v58 = vld [vmem:[%s5962_s29 + $0x38] sm:$0xff] }
  0x2a   : > { %5184 = vmatprep.mubr.msk.f32.mxu0 %vm229_vm0, %v4242_v59  ;;  %v6273_v59 = vld [vmem:[%s5962_s29 + $0xcc] sm:$0xff]  ;;  %v6315_v9 = vld [vmem:[%s5962_s29 + $0xfc] sm:$0xff] }
  0x2b   : > { %v6469_v47 = vld [vmem:[%s5962_s29 + $0x42] sm:$0xff]  ;;  %v6478_v48 = vld [vmem:[%s5962_s29 + $0x4a] sm:$0xff] }
  0x2c   : > { %4961 = vmatmul.mubr.msk.f32.gmra.mrb[14].mxu1 %vm229_vm0, %v4004_v60  ;;  %v162_v60 = vld [vmem:[%s5962_s29 + $0x40] sm:$0xff] }
  0x2d   : > { %5185 = vmatmul.mubr.msk.f32.gmra.mrb[14].mxu0 %vm229_vm0, %v4243_v61  ;;  %4963 = vmatprep.mubr.msk.f32.mxu1 %vm229_vm0, %v4005_v62  ;;  %v6277_v61 = vld [vmem:[%s5962_s29 + $0xd4] sm:$0xff]  ;;  %v163_v62 = vld [vmem:[%s5962_s29 + $0x48] sm:$0xff] }
  0x2e   : > { %5219 = vmatprep.mubr.msk.f32.mxu0 %vm229_vm0, %v4297_v63  ;;  %v6287_v63 = vld [vmem:[%s5962_s29 + $0xdc] sm:$0xff] }
  0x30   : > { %4964 = vmatmul.mubr.msk.f32.gmra.mrb[16].mxu1 %vm229_vm0, %v4006_v2  ;;  %v165_v2 = vld [vmem:[%s5962_s29 + $0x58] sm:$0xff] }
  0x31   : > { %5220 = vmatmul.mubr.msk.f32.vlgmr.msra.gmra.mrb[0].mxu0 %vm229_vm0, %v4298_v3  ;;  %4966 = vmatprep.mubr.msk.f32.mxu1 %vm229_vm0, %v4007_v4  ;;  %v6301_v3 = vld [vmem:[%s5962_s29 + $0xec] sm:$0xff]  ;;  %v166_v4 = vld [vmem:[%s5962_s29 + $0x60] sm:$0xff] }
  0x32   : > { %5486 = vmatpush3.bf16.msra.mxu0 %v6032_v40  ;;  %5222 = vmatprep.mubr.msk.f32.mxu0 %vm229_vm0, %v6098_v5  ;;  %v4124_v40 = vld [vmem:[%s7104_s1 + $0x50] sm:$0xff] }
  0x33   : > { %5488 = vmatprep.subr.bf16.mxu0 %v5487_v6  ;;  %v5455_v46 = vpack.c.bf16 %v4125_v41, %v4124_v40  ;;  %v4194_v40 = vld [vmem:[%s7104_s1 + $0x78] sm:$0xff] }
  0x34   : > { %4967 = vmatmul.mubr.msk.f32.gmra.mrb[18].mxu1 %vm229_vm0, %v4008_v10  ;;  %v168_v10 = vld [vmem:[%s5962_s29 + $0x70] sm:$0xff] }
  0x35   : > { %5223 = vmatmul.mubr.msk.f32.gmra.mrb[2].mxu0 %vm229_vm0, %v6114_v11  ;;  %4969 = vmatprep.mubr.msk.f32.mxu1 %vm229_vm0, %v4009_v13  ;;  %v6319_v13 = vld [vmem:[%s5962_s29 + $0x104] sm:$0xff] }
  0x36   : > { %5225 = vmatprep.mubr.msk.f32.mxu0 %vm229_vm0, %v6118_v14  ;;  %5490 = vmatpush3.bf16.msra.mxu0 %v5487_v6  ;;  %v6305_v6 = vld [vmem:[%s5962_s29 + $0xf4] sm:$0xff] }
  0x37   : > { %5492 = vmatprep.subr.bf16.mxu0 %v6120_v15 }
  0x38   : > { %4970 = vmatmul.mubr.msk.f32.gmra.mrb[20].mxu1 %vm229_vm0, %v4010_v16  ;;  %v169_v16 = vld [vmem:[%s5962_s29 + $0x78] sm:$0xff] }
  0x39   : > { %5226 = vmatmul.mubr.msk.f32.gmra.mrb[4].mxu0 %vm229_vm0, %v6130_v17  ;;  %4972 = vmatprep.mubr.msk.f32.mxu1 %vm229_vm0, %v4011_v18  ;;  %v6329_v18 = vld [vmem:[%s5962_s29 + $0x10c] sm:$0xff] }
  0x3a   : > { %5228 = vmatprep.mubr.msk.f32.mxu0 %vm229_vm0, %v6134_v19 }
  0x3c   : > { %4973 = vmatmul.mubr.msk.f32.gmra.mrb[22].mxu1 %vm229_vm0, %v4012_v20  ;;  %v170_v20 = vld [vmem:[%s5962_s29 + $0x80] sm:$0xff] }
  0x3d   : > { %5229 = vmatmul.mubr.msk.f32.gmra.mrb[6].mxu0 %vm229_vm0, %v6145_v21  ;;  %4975 = vmatprep.mubr.msk.f32.mxu1 %vm229_vm0, %v4013_v22  ;;  %v4469_v22 = vld [vmem:[%s7104_s1 + $0xf0] sm:$0xff] }
  0x3e   : > { %5231 = vmatprep.mubr.msk.f32.mxu0 %vm229_vm0, %v6149_v23 }
  0x40   : > { %4976 = vmatmul.mubr.msk.f32.gmra.mrb[24].mxu1 %vm229_vm0, %v4014_v24  ;;  %v4470_v24 = vld [vmem:[%s7104_s1 + $0xf8] sm:$0xff] }
  0x41   : > { %5232 = vmatmul.mubr.msk.f32.gmra.mrb[8].mxu0 %vm229_vm0, %v6159_v25  ;;  %4978 = vmatprep.mubr.msk.f32.mxu1 %vm229_vm0, %v4015_v26  ;;  %v171_v26 = vld [vmem:[%s5962_s29 + $0x88] sm:$0xff] }
  0x42   : > { %5234 = vmatprep.mubr.msk.f32.mxu0 %vm229_vm0, %v6163_v27 }
  0x44   : > { %4979 = vmatmul.mubr.msk.f32.gmra.mrb[26].mxu1 %vm229_vm0, %v4016_v28  ;;  %v172_v28 = vld [vmem:[%s5962_s29 + $0x90] sm:$0xff] }
  0x45   : > { %5235 = vmatmul.mubr.msk.f32.gmra.mrb[10].mxu0 %vm229_vm0, %v6173_v29  ;;  %4981 = vmatprep.mubr.msk.f32.mxu1 %vm229_vm0, %v4017_v30  ;;  %v5495_v30 = vpack.c.bf16 %v4470_v24, %v4469_v22  ;;  %v4443_v22 = vld [vmem:[%s5962_s29 + $0x65] sm:$0xff] }
  0x46   : > { %5237 = vmatprep.mubr.msk.f32.mxu0 %vm229_vm0, %v6177_v31  ;;  %v6598_v24 = vld [vmem:[%s5962_s29 + $0xca] sm:$0xff] }
  0x48   : > { %4982 = vmatmul.mubr.msk.f32.gmra.mrb[28].mxu1 %vm229_vm0, %v4018_v32  ;;  %v4536_v32 = vld [vmem:[%s7104_s1 + $0x100] sm:$0xff] }
  0x49   : > { %5238 = vmatmul.mubr.msk.f32.gmra.mrb[12].mxu0 %vm229_vm0, %v6187_v33  ;;  %4984 = vmatprep.mubr.msk.f32.mxu1 %vm229_vm0, %v4019_v34  ;;  %v4537_v34 = vld [vmem:[%s7104_s1 + $0x108] sm:$0xff] }
  0x4a   : > { %5240 = vmatprep.mubr.msk.f32.mxu0 %vm229_vm0, %v6191_v35 }
  0x4c   : > { %4985 = vmatmul.mubr.msk.f32.gmra.mrb[30].mxu1 %vm229_vm0, %v4020_v36  ;;  %v174_v36 = vld [vmem:[%s5962_s29 + $0xa0] sm:$0xff] }
  0x4d   : > { %5241 = vmatmul.mubr.msk.f32.gmra.mrb[14].mxu0 %vm229_vm0, %v6201_v37  ;;  %4995 = vmatprep.mubr.msk.f32.mxu1 %vm229_vm0, %v154_v38  ;;  %v6361_v38 = vpack.c.bf16 %v4537_v34, %v4536_v32  ;;  %v6612_v32 = vld [vmem:[%s5962_s29 + $0xda] sm:$0xff] }
  0x4e   : > { %5243 = vmatprep.mubr.msk.f32.mxu0 %vm229_vm0, %v6205_v39  ;;  %v4446_v34 = vld [vmem:[%s5962_s29 + $0x7d] sm:$0xff] }
  0x50   : > { %4996 = vmatmul.mubr.msk.f32.vlgmr.msra.gmra.mrb[0].mxu1 %vm229_vm0, %v155_v42  ;;  %v6433_v42 = vld [vmem:[%s5962_s29 + $0x1a] sm:$0xff] }
  0x51   : > { %5244 = vmatmul.mubr.msk.f32.gmra.mrb[16].mxu0 %vm229_vm0, %v6221_v43  ;;  %5454 = vmatpush3.bf16.msra.mxu1 %v6064_v54  ;;  %v159_v54 = vld [vmem:[%s5962_s29 + $0x28] sm:$0xff] }
  0x52   : > { %4998 = vmatprep.mubr.msk.f32.mxu1 %vm229_vm0, %v156_v44  ;;  %5246 = vmatprep.mubr.msk.f32.mxu0 %vm229_vm0, %v6225_v45  ;;  %v6449_v44 = vld [vmem:[%s5962_s29 + $0x2a] sm:$0xff] }
  0x53   : > { %5456 = vmatprep.subr.bf16.mxu1 %v5455_v46 }
  0x54   : > { %4999 = vmatmul.mubr.msk.f32.gmra.mrb[2].mxu1 %vm229_vm0, %v157_v49  ;;  %v6483_v49 = vld [vmem:[%s5962_s29 + $0x52] sm:$0xff] }
  0x55   : > { %5247 = vmatmul.mubr.msk.f32.gmra.mrb[18].mxu0 %vm229_vm0, %v6242_v50  ;;  %5001 = vmatprep.mubr.msk.f32.mxu1 %vm229_vm0, %v158_v51  ;;  %v6497_v51 = vld [vmem:[%s5962_s29 + $0x62] sm:$0xff] }
  0x56   : > { %5249 = vmatprep.mubr.msk.f32.mxu0 %vm229_vm0, %v6246_v52  ;;  %5458 = vmatpush3.bf16.msra.mxu1 %v5455_v46  ;;  %v6464_v46 = vld [vmem:[%s5962_s29 + $0x3a] sm:$0xff] }
  0x57   : > { %5460 = vmatprep.subr.bf16.mxu1 %v6248_v53 }
  0x58   : > { %5002 = vmatmul.mubr.msk.f32.gmra.mrb[4].mxu1 %vm229_vm0, %v159_v54  ;;  %v4396_v54 = vld [vmem:[%s5962_s29 + $0x114] sm:$0xff] }
  0x59   : > { %5250 = vmatmul.mubr.msk.f32.gmra.mrb[20].mxu0 %vm229_vm0, %v6258_v55  ;;  %5004 = vmatprep.mubr.msk.f32.mxu1 %vm229_vm0, %v160_v56  ;;  %v4397_v56 = vld [vmem:[%s5962_s29 + $0x11c] sm:$0xff] }
  0x5a   : > { %5252 = vmatprep.mubr.msk.f32.mxu0 %vm229_vm0, %v6262_v57 }
  0x5c   : > { %5005 = vmatmul.mubr.msk.f32.gmra.mrb[6].mxu1 %vm229_vm0, %v161_v58  ;;  %v4435_v58 = vld [vmem:[%s5962_s29 + $0x25] sm:$0xff] }
  0x5d   : > { %5253 = vmatmul.mubr.msk.f32.gmra.mrb[22].mxu0 %vm229_vm0, %v6273_v59  ;;  %5007 = vmatprep.mubr.msk.f32.mxu1 %vm229_vm0, %v162_v60  ;;  %v4539_v60 = vld [vmem:[%s7104_s1 + $0x118] sm:$0xff] }
  0x5e   : > { %5255 = vmatprep.mubr.msk.f32.mxu0 %vm229_vm0, %v6277_v61 }
  0x60   : > { %5008 = vmatmul.mubr.msk.f32.gmra.mrb[8].mxu1 %vm229_vm0, %v163_v62  ;;  %v4436_v62 = vld [vmem:[%s5962_s29 + $0x2d] sm:$0xff] }
  0x61   : > { %5256 = vmatmul.mubr.msk.f32.gmra.mrb[24].mxu0 %vm229_vm0, %v6287_v63  ;;  %5010 = vmatprep.mubr.msk.f32.mxu1 %vm229_vm0, %v164_v0  ;;  %v4437_v0 = vld [vmem:[%s5962_s29 + $0x35] sm:$0xff] }
  0x62   : > { %5258 = vmatprep.mubr.msk.f32.mxu0 %vm229_vm0, %v6291_v1 }
  0x64   : > { %5011 = vmatmul.mubr.msk.f32.gmra.mrb[10].mxu1 %vm229_vm0, %v165_v2  ;;  %v6555_v2 = vld [vmem:[%s5962_s29 + $0x9a] sm:$0xff] }
  0x65   : > { %5259 = vmatmul.mubr.msk.f32.gmra.mrb[26].mxu0 %vm229_vm0, %v6301_v3  ;;  %5013 = vmatprep.mubr.msk.f32.mxu1 %vm229_vm0, %v166_v4  ;;  %v6561_v4 = vld [vmem:[%s5962_s29 + $0xa2] sm:$0xff] }
  0x66   : > { %5261 = vmatprep.mubr.msk.f32.mxu0 %vm229_vm0, %v6305_v6 }
  0x68   : > { %5014 = vmatmul.mubr.msk.f32.gmra.mrb[12].mxu1 %vm229_vm0, %v167_v8  ;;  %v6570_v8 = vld [vmem:[%s5962_s29 + $0xaa] sm:$0xff] }
  0x69   : > { %5262 = vmatmul.mubr.msk.f32.gmra.mrb[28].mxu0 %vm229_vm0, %v6315_v9  ;;  %5016 = vmatprep.mubr.msk.f32.mxu1 %vm229_vm0, %v168_v10  ;;  %v6575_v10 = vld [vmem:[%s5962_s29 + $0xb2] sm:$0xff] }
  0x6a   : > { %5264 = vmatprep.mubr.msk.f32.mxu0 %vm229_vm0, %v6319_v13 }
  0x6c   : > { %5017 = vmatmul.mubr.msk.f32.gmra.mrb[14].mxu1 %vm229_vm0, %v169_v16  ;;  %v6584_v16 = vld [vmem:[%s5962_s29 + $0xba] sm:$0xff] }
  0x6d   : > { %5265 = vmatmul.mubr.msk.f32.gmra.mrb[30].mxu0 %vm229_vm0, %v6329_v18  ;;  %5019 = vmatprep.mubr.msk.f32.mxu1 %vm229_vm0, %v170_v20  ;;  %v6589_v20 = vld [vmem:[%s5962_s29 + $0xc2] sm:$0xff] }
  0x6e   : > { %5275 = vmatprep.mubr.msk.f32.mxu0 %vm229_vm0, %v6098_v5  ;;  %v173_v5 = vld [vmem:[%s5962_s29 + $0x98] sm:$0xff] }
  0x70   : > { %5020 = vmatmul.mubr.msk.f32.gmra.mrb[16].mxu1 %vm229_vm0, %v171_v26  ;;  %v4444_v26 = vld [vmem:[%s5962_s29 + $0x6d] sm:$0xff] }
  0x71   : > { %5276 = vmatmul.mubr.msk.f32.vlgmr.msra.gmra.mrb[0].mxu0 %vm229_vm0, %v6114_v11  ;;  %5022 = vmatprep.mubr.msk.f32.mxu1 %vm229_vm0, %v172_v28  ;;  %v175_v11 = vld [vmem:[%s5962_s29 + $0xa8] sm:$0xff]  ;;  %v6603_v28 = vld [vmem:[%s5962_s29 + $0xd2] sm:$0xff] }
  0x72   : > { %5494 = vmatpush3.bf16.msra.mxu0 %v6120_v15  ;;  %5278 = vmatprep.mubr.msk.f32.mxu0 %vm229_vm0, %v6118_v14  ;;  %v176_v15 = vld [vmem:[%s5962_s29 + $0xb0] sm:$0xff]  ;;  %v177_v14 = vld [vmem:[%s5962_s29 + $0xb8] sm:$0xff] }
  0x73   : > { %5496 = vmatprep.subr.bf16.mxu0 %v5495_v30 }
  0x74   : > { %5023 = vmatmul.mubr.msk.f32.gmra.mrb[18].mxu1 %vm229_vm0, %v173_v5  ;;  %v6617_v5 = vld [vmem:[%s5962_s29 + $0xe2] sm:$0xff] }
  0x75   : > { %5279 = vmatmul.mubr.msk.f32.gmra.mrb[2].mxu0 %vm229_vm0, %v6130_v17  ;;  %5025 = vmatprep.mubr.msk.f32.mxu1 %vm229_vm0, %v174_v36  ;;  %v178_v17 = vld [vmem:[%s5962_s29 + $0xc0] sm:$0xff] }
  0x76   : > { %5281 = vmatprep.mubr.msk.f32.mxu0 %vm229_vm0, %v6134_v19  ;;  %5498 = vmatpush3.bf16.msra.mxu0 %v5495_v30  ;;  %v179_v19 = vld [vmem:[%s5962_s29 + $0xc8] sm:$0xff]  ;;  %v4445_v30 = vld [vmem:[%s5962_s29 + $0x75] sm:$0xff] }
  0x77   : > { %5500 = vmatprep.subr.bf16.mxu0 %v6361_v38  ;;  %v4447_v36 = vld [vmem:[%s5962_s29 + $0x85] sm:$0xff] }
  0x78   : > { %5026 = vmatmul.mubr.msk.f32.gmra.mrb[20].mxu1 %vm229_vm0, %v175_v11  ;;  %v4448_v11 = vld [vmem:[%s5962_s29 + $0x8d] sm:$0xff] }
  0x79   : > { %5282 = vmatmul.mubr.msk.f32.gmra.mrb[4].mxu0 %vm229_vm0, %v6145_v21  ;;  %5028 = vmatprep.mubr.msk.f32.mxu1 %vm229_vm0, %v176_v15  ;;  %v180_v21 = vld [vmem:[%s5962_s29 + $0xd0] sm:$0xff] }
  0x7a   : > { %5284 = vmatprep.mubr.msk.f32.mxu0 %vm229_vm0, %v6149_v23  ;;  %v181_v23 = vld [vmem:[%s5962_s29 + $0xd8] sm:$0xff] }
  0x7b   : > { %v6631_v15 = vld [vmem:[%s5962_s29 + $0xf2] sm:$0xff] }
  0x7c   : > { %5029 = vmatmul.mubr.msk.f32.gmra.mrb[22].mxu1 %vm229_vm0, %v177_v14  ;;  %v4449_v14 = vld [vmem:[%s5962_s29 + $0x95] sm:$0xff] }
  0x7d   : > { %5285 = vmatmul.mubr.msk.f32.gmra.mrb[6].mxu0 %vm229_vm0, %v6159_v25  ;;  %5031 = vmatprep.mubr.msk.f32.mxu1 %vm229_vm0, %v178_v17  ;;  %v182_v25 = vld [vmem:[%s5962_s29 + $0xe0] sm:$0xff] }
  0x7e   : > { %5287 = vmatprep.mubr.msk.f32.mxu0 %vm229_vm0, %v6163_v27  ;;  %v183_v27 = vld [vmem:[%s5962_s29 + $0xe8] sm:$0xff]  ;;  %v6640_v17 = vld [vmem:[%s5962_s29 + $0xfa] sm:$0xff] }
  0x80   : > { %5032 = vmatmul.mubr.msk.f32.gmra.mrb[24].mxu1 %vm229_vm0, %v179_v19  ;;  %v4450_v19 = vld [vmem:[%s5962_s29 + $0x9d] sm:$0xff] }
  0x81   : > { %5288 = vmatmul.mubr.msk.f32.gmra.mrb[8].mxu0 %vm229_vm0, %v6173_v29  ;;  %5034 = vmatprep.mubr.msk.f32.mxu1 %vm229_vm0, %v180_v21  ;;  %v184_v29 = vld [vmem:[%s5962_s29 + $0xf0] sm:$0xff]  ;;  %v4451_v21 = vld [vmem:[%s5962_s29 + $0xa5] sm:$0xff] }
  0x82   : > { %5290 = vmatprep.mubr.msk.f32.mxu0 %vm229_vm0, %v6177_v31  ;;  %v185_v31 = vld [vmem:[%s5962_s29 + $0xf8] sm:$0xff] }
  0x84   : > { %5035 = vmatmul.mubr.msk.f32.gmra.mrb[26].mxu1 %vm229_vm0, %v181_v23  ;;  %v4452_v23 = vld [vmem:[%s5962_s29 + $0xad] sm:$0xff] }
  0x85   : > { %5291 = vmatmul.mubr.msk.f32.gmra.mrb[10].mxu0 %vm229_vm0, %v6187_v33  ;;  %5037 = vmatprep.mubr.msk.f32.mxu1 %vm229_vm0, %v182_v25  ;;  %v4090_v33 = vld [vmem:[%s5962_s29 + $0x2] sm:$0xff]  ;;  %v4453_v25 = vld [vmem:[%s5962_s29 + $0xb5] sm:$0xff] }
  0x86   : > { %5293 = vmatprep.mubr.msk.f32.mxu0 %vm229_vm0, %v6191_v35  ;;  %v4193_v35 = vld [vmem:[%s7104_s1 + $0x70] sm:$0xff] }
  0x87   : > { %v5463_v41 = vpack.c.bf16 %v4194_v40, %v4193_v35  ;;  %v4459_v35 = vld [vmem:[%s5962_s29 + $0xe5] sm:$0xff]  ;;  %v4461_v40 = vld [vmem:[%s5962_s29 + $0xf5] sm:$0xff] }
  0x88   : > { %5038 = vmatmul.mubr.msk.f32.gmra.mrb[28].mxu1 %vm229_vm0, %v183_v27  ;;  %v4454_v27 = vld [vmem:[%s5962_s29 + $0xbd] sm:$0xff] }
  0x89   : > { %5294 = vmatmul.mubr.msk.f32.gmra.mrb[12].mxu0 %vm229_vm0, %v6201_v37  ;;  %5040 = vmatprep.mubr.msk.f32.mxu1 %vm229_vm0, %v184_v29  ;;  %v4091_v37 = vld [vmem:[%s5962_s29 + $0xa] sm:$0xff] }
  0x8a   : > { %5296 = vmatprep.mubr.msk.f32.mxu0 %vm229_vm0, %v6205_v39  ;;  %v6426_v39 = vld [vmem:[%s5962_s29 + $0x12] sm:$0xff]  ;;  %v4455_v29 = vld [vmem:[%s5962_s29 + $0xc5] sm:$0xff] }
  0x8c   : > { %5041 = vmatmul.mubr.msk.f32.gmra.mrb[30].mxu1 %vm229_vm0, %v185_v31  ;;  %v4457_v31 = vld [vmem:[%s5962_s29 + $0xd5] sm:$0xff] }
  0x8d   : > { %5297 = vmatmul.mubr.msk.f32.gmra.mrb[14].mxu0 %vm229_vm0, %v6221_v43  ;;  %5051 = vmatprep.mubr.msk.f32.mxu1 %vm229_vm0, %v4090_v33  ;;  %v6440_v43 = vld [vmem:[%s5962_s29 + $0x22] sm:$0xff] }
  0x8e   : > { %5299 = vmatprep.mubr.msk.f32.mxu0 %vm229_vm0, %v6225_v45  ;;  %v6454_v45 = vld [vmem:[%s5962_s29 + $0x32] sm:$0xff]  ;;  %v4458_v33 = vld [vmem:[%s5962_s29 + $0xdd] sm:$0xff] }
  0x90   : > { %5052 = vmatmul.mubr.msk.f32.vlgmr.msra.gmra.mrb[0].mxu1 %vm229_vm0, %v4091_v37  ;;  %v4462_v37 = vld [vmem:[%s5962_s29 + $0xfd] sm:$0xff] }
  0x91   : > { %5300 = vmatmul.mubr.msk.f32.gmra.mrb[16].mxu0 %vm229_vm0, %v6242_v50  ;;  %5462 = vmatpush3.bf16.msra.mxu1 %v6248_v53  ;;  %v6492_v50 = vld [vmem:[%s5962_s29 + $0x5a] sm:$0xff]  ;;  %v6511_v53 = vld [vmem:[%s5962_s29 + $0x72] sm:$0xff] }
  0x92   : > { %5054 = vmatprep.mubr.msk.f32.mxu1 %vm229_vm0, %v6426_v39  ;;  %5302 = vmatprep.mubr.msk.f32.mxu0 %vm229_vm0, %v6246_v52  ;;  %v6506_v52 = vld [vmem:[%s5962_s29 + $0x6a] sm:$0xff] }
  0x93   : > { %5464 = vmatprep.subr.bf16.mxu1 %v5463_v41 }
  0x94   : > { %5055 = vmatmul.mubr.msk.f32.gmra.mrb[2].mxu1 %vm229_vm0, %v6433_v42 }
  0x95   : > { %5303 = vmatmul.mubr.msk.f32.gmra.mrb[18].mxu0 %vm229_vm0, %v6258_v55  ;;  %5057 = vmatprep.mubr.msk.f32.mxu1 %vm229_vm0, %v6440_v43  ;;  %v6521_v55 = vld [vmem:[%s5962_s29 + $0x7a] sm:$0xff] }
  0x96   : > { %5305 = vmatprep.mubr.msk.f32.mxu0 %vm229_vm0, %v6262_v57  ;;  %5466 = vmatpush3.bf16.msra.mxu1 %v5463_v41  ;;  %v6526_v57 = vld [vmem:[%s5962_s29 + $0x82] sm:$0xff]  ;;  %v4464_v41 = vld [vmem:[%s5962_s29 + $0x10d] sm:$0xff] }
  0x97   : > { %5507 = vmatprep.subr.bf16.mxu1 %v5964_v7 }
  0x98   : > { %5058 = vmatmul.mubr.msk.f32.gmra.mrb[4].mxu1 %vm229_vm0, %v6449_v44 }
  0x99   : > { %5306 = vmatmul.mubr.msk.f32.gmra.mrb[20].mxu0 %vm229_vm0, %v6273_v59  ;;  %5060 = vmatprep.mubr.msk.f32.mxu1 %vm229_vm0, %v6454_v45  ;;  %v4538_v59 = vld [vmem:[%s7104_s1 + $0x110] sm:$0xff] }
  0x9a   : > { %5308 = vmatprep.mubr.msk.f32.mxu0 %vm229_vm0, %v6277_v61  ;;  %v6541_v61 = vld [vmem:[%s5962_s29 + $0x8a] sm:$0xff] }
  0x9c   : > { %5061 = vmatmul.mubr.msk.f32.gmra.mrb[6].mxu1 %vm229_vm0, %v6464_v46 }
  0x9d   : > { %5309 = vmatmul.mubr.msk.f32.gmra.mrb[22].mxu0 %vm229_vm0, %v6287_v63  ;;  %5063 = vmatprep.mubr.msk.f32.mxu1 %vm229_vm0, %v6469_v47  ;;  %v6546_v63 = vld [vmem:[%s5962_s29 + $0x92] sm:$0xff] }
  0x9e   : > { %5311 = vmatprep.mubr.msk.f32.mxu0 %vm229_vm0, %v6291_v1  ;;  %v5503_v1 = vpack.c.bf16 %v4539_v60, %v4538_v59  ;;  %v4518_v59 = vld [vmem:[%s5962_s29 + $0x96] sm:$0xff]  ;;  %v4190_v60 = vld [vmem:[%s5962_s29 + $0x10a] sm:$0xff] }
  0xa0   : > { %5064 = vmatmul.mubr.msk.f32.gmra.mrb[8].mxu1 %vm229_vm0, %v6478_v48 }
  0xa1   : > { %5312 = vmatmul.mubr.msk.f32.gmra.mrb[24].mxu0 %vm229_vm0, %v6301_v3  ;;  %5066 = vmatprep.mubr.msk.f32.mxu1 %vm229_vm0, %v6483_v49  ;;  %v4438_v3 = vld [vmem:[%s5962_s29 + $0x3d] sm:$0xff] }
  0xa2   : > { %5314 = vmatprep.mubr.msk.f32.mxu0 %vm229_vm0, %v6305_v6  ;;  %v4439_v6 = vld [vmem:[%s5962_s29 + $0x45] sm:$0xff] }
  0xa4   : > { %5067 = vmatmul.mubr.msk.f32.gmra.mrb[10].mxu1 %vm229_vm0, %v6492_v50 }
  0xa5   : > { %5315 = vmatmul.mubr.msk.f32.gmra.mrb[26].mxu0 %vm229_vm0, %v6315_v9  ;;  %5069 = vmatprep.mubr.msk.f32.mxu1 %vm229_vm0, %v6497_v51  ;;  %v4440_v9 = vld [vmem:[%s5962_s29 + $0x4d] sm:$0xff] }
  0xa6   : > { %5317 = vmatprep.mubr.msk.f32.mxu0 %vm229_vm0, %v6319_v13  ;;  %v4441_v13 = vld [vmem:[%s5962_s29 + $0x55] sm:$0xff] }
  0xa8   : > { %5070 = vmatmul.mubr.msk.f32.gmra.mrb[12].mxu1 %vm229_vm0, %v6506_v52 }
  0xa9   : > { %5318 = vmatmul.mubr.msk.f32.gmra.mrb[28].mxu0 %vm229_vm0, %v6329_v18  ;;  %5072 = vmatprep.mubr.msk.f32.mxu1 %vm229_vm0, %v6511_v53  ;;  %v4442_v18 = vld [vmem:[%s5962_s29 + $0x5d] sm:$0xff] }
  0xaa   : > { %5320 = vmatprep.mubr.msk.f32.mxu0 %vm229_vm0, %v4396_v54  ;;  %v4514_v54 = vld [vmem:[%s5962_s29 + $0x76] sm:$0xff] }
  0xac   : > { %5073 = vmatmul.mubr.msk.f32.gmra.mrb[14].mxu1 %vm229_vm0, %v6521_v55 }
  0xad   : > { %5321 = vmatmul.mubr.msk.f32.gmra.mrb[30].mxu0 %vm229_vm0, %v4397_v56  ;;  %5075 = vmatprep.mubr.msk.f32.mxu1 %vm229_vm0, %v6526_v57  ;;  %v4516_v56 = vld [vmem:[%s5962_s29 + $0x86] sm:$0xff] }
  0xae   : > { %5331 = vmatprep.mubr.msk.f32.mxu0 %vm229_vm0, %v4435_v58  ;;  %v4189_v58 = vld [vmem:[%s5962_s29 + $0x102] sm:$0xff] }
  0xb0   : > { %5076 = vmatmul.mubr.msk.f32.gmra.mrb[16].mxu1 %vm229_vm0, %v6541_v61 }
  0xb1   : > { %5332 = vmatmul.mubr.msk.f32.vlgmr.msra.gmra.mrb[0].mxu0 %vm229_vm0, %v4436_v62  ;;  %5078 = vmatprep.mubr.msk.f32.mxu1 %vm229_vm0, %v6546_v63  ;;  %v4244_v62 = vld [vmem:[%s5962_s29 + $0x93] sm:$0xff] }
  0xb2   : > { %5502 = vmatpush3.bf16.msra.mxu0 %v6361_v38  ;;  %5334 = vmatprep.mubr.msk.f32.mxu0 %vm229_vm0, %v4437_v0  ;;  %v6626_v38 = vld [vmem:[%s5962_s29 + $0xea] sm:$0xff]  ;;  %v4245_v0 = vld [vmem:[%s5962_s29 + $0x9b] sm:$0xff] }
  0xb3   : > { %5504 = vmatprep.subr.bf16.mxu0 %v5503_v1 }
  0xb4   : > { %5079 = vmatmul.mubr.msk.f32.gmra.mrb[18].mxu1 %vm229_vm0, %v6555_v2 }
  0xb5   : > { %5335 = vmatmul.mubr.msk.f32.gmra.mrb[2].mxu0 %vm229_vm0, %v4438_v3  ;;  %5081 = vmatprep.mubr.msk.f32.mxu1 %vm229_vm0, %v6561_v4  ;;  %v4522_v3 = vld [vmem:[%s5962_s29 + $0xb6] sm:$0xff] }
  0xb6   : > { %5337 = vmatprep.mubr.msk.f32.mxu0 %vm229_vm0, %v4439_v6  ;;  %5506 = vmatpush3.bf16.msra.mxu0 %v5503_v1  ;;  %v4521_v1 = vld [vmem:[%s5962_s29 + $0xae] sm:$0xff]  ;;  %v4523_v6 = vld [vmem:[%s5962_s29 + $0xbe] sm:$0xff] }
  0xb8   : > { %5082 = vmatmul.mubr.msk.f32.gmra.mrb[20].mxu1 %vm229_vm0, %v6570_v8 }
  0xb9   : > { %5338 = vmatmul.mubr.msk.f32.gmra.mrb[4].mxu0 %vm229_vm0, %v4440_v9  ;;  %5084 = vmatprep.mubr.msk.f32.mxu1 %vm229_vm0, %v6575_v10  ;;  %v4524_v9 = vld [vmem:[%s5962_s29 + $0xc6] sm:$0xff] }
  0xba   : > { %5340 = vmatprep.mubr.msk.f32.mxu0 %vm229_vm0, %v4441_v13  ;;  %v4525_v13 = vld [vmem:[%s5962_s29 + $0xce] sm:$0xff] }
  0xbc   : > { %5085 = vmatmul.mubr.msk.f32.gmra.mrb[22].mxu1 %vm229_vm0, %v6584_v16 }
  0xbd   : > { %5341 = vmatmul.mubr.msk.f32.gmra.mrb[6].mxu0 %vm229_vm0, %v4442_v18  ;;  %5087 = vmatprep.mubr.msk.f32.mxu1 %vm229_vm0, %v6589_v20  ;;  %v4526_v18 = vld [vmem:[%s5962_s29 + $0xd6] sm:$0xff] }
  0xbe   : > { %5343 = vmatprep.mubr.msk.f32.mxu0 %vm229_vm0, %v4443_v22  ;;  %v4527_v22 = vld [vmem:[%s5962_s29 + $0xde] sm:$0xff] }
  0xc0   : > { %5088 = vmatmul.mubr.msk.f32.gmra.mrb[24].mxu1 %vm229_vm0, %v6598_v24 }
  0xc1   : > { %5344 = vmatmul.mubr.msk.f32.gmra.mrb[8].mxu0 %vm229_vm0, %v4444_v26  ;;  %5090 = vmatprep.mubr.msk.f32.mxu1 %vm229_vm0, %v6603_v28  ;;  %v4528_v26 = vld [vmem:[%s5962_s29 + $0xe6] sm:$0xff] }
  0xc2   : > { %5346 = vmatprep.mubr.msk.f32.mxu0 %vm229_vm0, %v4445_v30  ;;  %v4529_v30 = vld [vmem:[%s5962_s29 + $0xee] sm:$0xff] }
  0xc4   : > { %5091 = vmatmul.mubr.msk.f32.gmra.mrb[26].mxu1 %vm229_vm0, %v6612_v32 }
  0xc5   : > { %5347 = vmatmul.mubr.msk.f32.gmra.mrb[10].mxu0 %vm229_vm0, %v4446_v34  ;;  %5093 = vmatprep.mubr.msk.f32.mxu1 %vm229_vm0, %v6617_v5  ;;  %v4530_v34 = vld [vmem:[%s5962_s29 + $0xf6] sm:$0xff] }
  0xc6   : > { %5349 = vmatprep.mubr.msk.f32.mxu0 %vm229_vm0, %v4447_v36  ;;  %v4531_v36 = vld [vmem:[%s5962_s29 + $0xfe] sm:$0xff] }
  0xc8   : > { %5094 = vmatmul.mubr.msk.f32.gmra.mrb[28].mxu1 %vm229_vm0, %v6626_v38 }
  0xc9   : > { %5350 = vmatmul.mubr.msk.f32.gmra.mrb[12].mxu0 %vm229_vm0, %v4448_v11  ;;  %5096 = vmatprep.mubr.msk.f32.mxu1 %vm229_vm0, %v6631_v15  ;;  %v4532_v11 = vld [vmem:[%s5962_s29 + $0x106] sm:$0xff] }
  0xca   : > { %5352 = vmatprep.mubr.msk.f32.mxu0 %vm229_vm0, %v4449_v14  ;;  %v4533_v14 = vld [vmem:[%s5962_s29 + $0x10e] sm:$0xff] }
  0xcc   : > { %5097 = vmatmul.mubr.msk.f32.gmra.mrb[30].mxu1 %vm229_vm0, %v6640_v17 }
  0xcd   : > { %5353 = vmatmul.mubr.msk.f32.gmra.mrb[14].mxu0 %vm229_vm0, %v4450_v19  ;;  %5107 = vmatprep.mubr.msk.f32.mxu1 %vm229_vm0, %v6426_v39  ;;  %v4463_v39 = vld [vmem:[%s5962_s29 + $0x105] sm:$0xff]  ;;  %v4534_v19 = vld [vmem:[%s5962_s29 + $0x116] sm:$0xff] }
  0xce   : > { %5355 = vmatprep.mubr.msk.f32.mxu0 %vm229_vm0, %v4451_v21  ;;  %v4259_v21 = vld [vmem:[%s5962_s29 + $0x10b] sm:$0xff] }
  0xd0   : > { %5108 = vmatmul.mubr.msk.f32.vlgmr.msra.gmra.mrb[0].mxu1 %vm229_vm0, %v6433_v42  ;;  %v4465_v42 = vld [vmem:[%s5962_s29 + $0x115] sm:$0xff] }
  0xd1   : > { %5356 = vmatmul.mubr.msk.f32.gmra.mrb[16].mxu0 %vm229_vm0, %v4452_v23  ;;  %5509 = vmatpush3.bf16.msra.mxu1 %v5964_v7  ;;  %v4456_v7 = vld [vmem:[%s5962_s29 + $0xcd] sm:$0xff]  ;;  %v4535_v23 = vld [vmem:[%s5962_s29 + $0x11e] sm:$0xff] }
  0xd2   : > { %5110 = vmatprep.mubr.msk.f32.mxu1 %vm229_vm0, %v6440_v43  ;;  %5358 = vmatprep.mubr.msk.f32.mxu0 %vm229_vm0, %v4453_v25  ;;  %v4466_v43 = vld [vmem:[%s5962_s29 + $0x11d] sm:$0xff] }
  0xd3   : > { %5508 = vmatprep.subr.bf16.mxu1 %v5973_v12 }
  0xd4   : > { %5111 = vmatmul.mubr.msk.f32.gmra.mrb[2].mxu1 %vm229_vm0, %v6449_v44  ;;  %v4504_v44 = vld [vmem:[%s5962_s29 + $0x26] sm:$0xff] }
  0xd5   : > { %5359 = vmatmul.mubr.msk.f32.gmra.mrb[18].mxu0 %vm229_vm0, %v4454_v27  ;;  %5113 = vmatprep.mubr.msk.f32.mxu1 %vm229_vm0, %v6454_v45  ;;  %v4505_v45 = vld [vmem:[%s5962_s29 + $0x2e] sm:$0xff] }
  0xd6   : > { %5361 = vmatprep.mubr.msk.f32.mxu0 %vm229_vm0, %v4455_v29  ;;  %5510 = vmatpush3.bf16.msra.mxu1 %v5973_v12  ;;  %v4460_v12 = vld [vmem:[%s5962_s29 + $0xed] sm:$0xff] }
  0xd8   : > { %5114 = vmatmul.mubr.msk.f32.gmra.mrb[4].mxu1 %vm229_vm0, %v6464_v46  ;;  %v4506_v46 = vld [vmem:[%s5962_s29 + $0x36] sm:$0xff] }
  0xd9   : > { %5362 = vmatmul.mubr.msk.f32.gmra.mrb[20].mxu0 %vm229_vm0, %v4456_v7  ;;  %5116 = vmatprep.mubr.msk.f32.mxu1 %vm229_vm0, %v6469_v47  ;;  %v4507_v47 = vld [vmem:[%s5962_s29 + $0x3e] sm:$0xff] }
  0xda   : > { %5364 = vmatprep.mubr.msk.f32.mxu0 %vm229_vm0, %v4457_v31 }
  0xdc   : > { %5117 = vmatmul.mubr.msk.f32.gmra.mrb[6].mxu1 %vm229_vm0, %v6478_v48  ;;  %v4508_v48 = vld [vmem:[%s5962_s29 + $0x46] sm:$0xff] }
  0xdd   : > { %5365 = vmatmul.mubr.msk.f32.gmra.mrb[22].mxu0 %vm229_vm0, %v4458_v33  ;;  %5119 = vmatprep.mubr.msk.f32.mxu1 %vm229_vm0, %v6483_v49  ;;  %v4509_v49 = vld [vmem:[%s5962_s29 + $0x4e] sm:$0xff] }
  0xde   : > { %5367 = vmatprep.mubr.msk.f32.mxu0 %vm229_vm0, %v4459_v35 }
  0xe0   : > { %5120 = vmatmul.mubr.msk.f32.gmra.mrb[8].mxu1 %vm229_vm0, %v6492_v50  ;;  %v4510_v50 = vld [vmem:[%s5962_s29 + $0x56] sm:$0xff] }
  0xe1   : > { %5368 = vmatmul.mubr.msk.f32.gmra.mrb[24].mxu0 %vm229_vm0, %v4460_v12  ;;  %5122 = vmatprep.mubr.msk.f32.mxu1 %vm229_vm0, %v6497_v51  ;;  %v4511_v51 = vld [vmem:[%s5962_s29 + $0x5e] sm:$0xff] }
  0xe2   : > { %5370 = vmatprep.mubr.msk.f32.mxu0 %vm229_vm0, %v4461_v40 }
  0xe4   : > { %5123 = vmatmul.mubr.msk.f32.gmra.mrb[10].mxu1 %vm229_vm0, %v6506_v52  ;;  %v4512_v52 = vld [vmem:[%s5962_s29 + $0x66] sm:$0xff] }
  0xe5   : > { %5371 = vmatmul.mubr.msk.f32.gmra.mrb[26].mxu0 %vm229_vm0, %v4462_v37  ;;  %5125 = vmatprep.mubr.msk.f32.mxu1 %vm229_vm0, %v6511_v53  ;;  %v4513_v53 = vld [vmem:[%s5962_s29 + $0x6e] sm:$0xff] }
  0xe6   : > { %5373 = vmatprep.mubr.msk.f32.mxu0 %vm229_vm0, %v4463_v39 }
  0xe8   : > { %5126 = vmatmul.mubr.msk.f32.gmra.mrb[12].mxu1 %vm229_vm0, %v6521_v55  ;;  %v4515_v55 = vld [vmem:[%s5962_s29 + $0x7e] sm:$0xff] }
  0xe9   : > { %5374 = vmatmul.mubr.msk.f32.gmra.mrb[28].mxu0 %vm229_vm0, %v4464_v41  ;;  %5128 = vmatprep.mubr.msk.f32.mxu1 %vm229_vm0, %v6526_v57  ;;  %v4517_v57 = vld [vmem:[%s5962_s29 + $0x8e] sm:$0xff] }
  0xea   : > { %5376 = vmatprep.mubr.msk.f32.mxu0 %vm229_vm0, %v4465_v42 }
  0xec   : > { %5129 = vmatmul.mubr.msk.f32.gmra.mrb[14].mxu1 %vm229_vm0, %v6541_v61  ;;  %v4519_v61 = vld [vmem:[%s5962_s29 + $0x9e] sm:$0xff] }
  0xed   : > { %5377 = vmatmul.mubr.msk.f32.gmra.mrb[30].mxu0 %vm229_vm0, %v4466_v43  ;;  %5131 = vmatprep.mubr.msk.f32.mxu1 %vm229_vm0, %v6546_v63  ;;  %v4520_v63 = vld [vmem:[%s5962_s29 + $0xa6] sm:$0xff] }
  0xee   : > { %5387 = vmatprep.mubr.msk.f32.mxu0 %vm229_vm0, %v4504_v44 }
  0xf0   : > { %5132 = vmatmul.mubr.msk.f32.gmra.mrb[16].mxu1 %vm229_vm0, %v6555_v2  ;;  %v4246_v2 = vld [vmem:[%s5962_s29 + $0xa3] sm:$0xff] }
  0xf1   : > { %5388 = vmatmul.mubr.msk.f32.vlgmr.msra.gmra.mrb[0].mxu0 %vm229_vm0, %v4505_v45  ;;  %5134 = vmatprep.mubr.msk.f32.mxu1 %vm229_vm0, %v6561_v4  ;;  %v4247_v4 = vld [vmem:[%s5962_s29 + $0xab] sm:$0xff] }
  0xf2   : > { %5390 = vmatprep.mubr.msk.f32.mxu0 %vm229_vm0, %v4506_v46 }
  0xf4   : > { %5135 = vmatmul.mubr.msk.f32.gmra.mrb[18].mxu1 %vm229_vm0, %v6570_v8  ;;  %v4248_v8 = vld [vmem:[%s5962_s29 + $0xb3] sm:$0xff] }
  0xf5   : > { %5391 = vmatmul.mubr.msk.f32.gmra.mrb[2].mxu0 %vm229_vm0, %v4507_v47  ;;  %5137 = vmatprep.mubr.msk.f32.mxu1 %vm229_vm0, %v6575_v10  ;;  %v4249_v10 = vld [vmem:[%s5962_s29 + $0xbb] sm:$0xff] }
  0xf6   : > { %5393 = vmatprep.mubr.msk.f32.mxu0 %vm229_vm0, %v4508_v48  ;;  %v6857_v47 = vld [vmem:[%s7105_s2] ss:$0 sm:$0xff] }
  0xf8   : > { %5138 = vmatmul.mubr.msk.f32.gmra.mrb[20].mxu1 %vm229_vm0, %v6584_v16  ;;  %v4250_v16 = vld [vmem:[%s5962_s29 + $0xc3] sm:$0xff] }
  0xf9   : > { %5394 = vmatmul.mubr.msk.f32.gmra.mrb[4].mxu0 %vm229_vm0, %v4509_v49  ;;  %5140 = vmatprep.mubr.msk.f32.mxu1 %vm229_vm0, %v6589_v20  ;;  %v4251_v20 = vld [vmem:[%s5962_s29 + $0xcb] sm:$0xff] }
  0xfa   : > { %5396 = vmatprep.mubr.msk.f32.mxu0 %vm229_vm0, %v4510_v50 }
  0xfc   : > { %5141 = vmatmul.mubr.msk.f32.gmra.mrb[22].mxu1 %vm229_vm0, %v6598_v24  ;;  %v4252_v24 = vld [vmem:[%s5962_s29 + $0xd3] sm:$0xff] }
  0xfd   : > { %5397 = vmatmul.mubr.msk.f32.gmra.mrb[6].mxu0 %vm229_vm0, %v4511_v51  ;;  %5143 = vmatprep.mubr.msk.f32.mxu1 %vm229_vm0, %v6603_v28  ;;  %v4253_v28 = vld [vmem:[%s5962_s29 + $0xdb] sm:$0xff] }
  0xfe   : > { %5399 = vmatprep.mubr.msk.f32.mxu0 %vm229_vm0, %v4512_v52 }
 0x100   : > { %5144 = vmatmul.mubr.msk.f32.gmra.mrb[24].mxu1 %vm229_vm0, %v6612_v32  ;;  %v4254_v32 = vld [vmem:[%s5962_s29 + $0xe3] sm:$0xff] }
 0x101   : > { %5400 = vmatmul.mubr.msk.f32.gmra.mrb[8].mxu0 %vm229_vm0, %v4513_v53  ;;  %5146 = vmatprep.mubr.msk.f32.mxu1 %vm229_vm0, %v6617_v5  ;;  %v4255_v5 = vld [vmem:[%s5962_s29 + $0xeb] sm:$0xff] }
 0x102   : > { %5402 = vmatprep.mubr.msk.f32.mxu0 %vm229_vm0, %v4514_v54 }
 0x104   : > { %5147 = vmatmul.mubr.msk.f32.gmra.mrb[26].mxu1 %vm229_vm0, %v6626_v38  ;;  %v4256_v38 = vld [vmem:[%s5962_s29 + $0xf3] sm:$0xff] }
 0x105   : > { %5403 = vmatmul.mubr.msk.f32.gmra.mrb[10].mxu0 %vm229_vm0, %v4515_v55  ;;  %5149 = vmatprep.mubr.msk.f32.mxu1 %vm229_vm0, %v6631_v15  ;;  %v4257_v15 = vld [vmem:[%s5962_s29 + $0xfb] sm:$0xff] }
 0x106   : > { %5405 = vmatprep.mubr.msk.f32.mxu0 %vm229_vm0, %v4516_v56 }
 0x108   : > { %5150 = vmatmul.mubr.msk.f32.gmra.mrb[28].mxu1 %vm229_vm0, %v6640_v17  ;;  %v4258_v17 = vld [vmem:[%s5962_s29 + $0x103] sm:$0xff] }
 0x109   : > { %5406 = vmatmul.mubr.msk.f32.gmra.mrb[12].mxu0 %vm229_vm0, %v4517_v57  ;;  %5152 = vmatprep.mubr.msk.f32.mxu1 %vm229_vm0, %v4189_v58 }
 0x10a   : > { %5408 = vmatprep.mubr.msk.f32.mxu0 %vm229_vm0, %v4518_v59 }
 0x10c   : > { %5153 = vmatmul.mubr.msk.f32.gmra.mrb[30].mxu1 %vm229_vm0, %v4190_v60 }
 0x10d   : > { %5409 = vmatmul.mubr.msk.f32.gmra.mrb[14].mxu0 %vm229_vm0, %v4519_v61  ;;  %5187 = vmatprep.mubr.msk.f32.mxu1 %vm229_vm0, %v4244_v62 }
 0x10e   : > { %5411 = vmatprep.mubr.msk.f32.mxu0 %vm229_vm0, %v4520_v63 }
 0x110   : > { %5188 = vmatmul.mubr.msk.f32.vlgmr.msra.gmra.mrb[16].mxu1 %vm229_vm0, %v4245_v0 }
 0x111   : > { %5412 = vmatmul.mubr.msk.f32.gmra.mrb[16].mxu0 %vm229_vm0, %v4521_v1  ;;  %5190 = vmatprep.mubr.msk.f32.mxu1 %vm229_vm0, %v4246_v2 }
 0x112   : > { %5414 = vmatprep.mubr.msk.f32.mxu0 %vm229_vm0, %v4522_v3 }
 0x114   : > { %5191 = vmatmul.mubr.msk.f32.gmra.mrb[18].mxu1 %vm229_vm0, %v4247_v4 }
 0x115   : > { %5415 = vmatmul.mubr.msk.f32.gmra.mrb[18].mxu0 %vm229_vm0, %v4523_v6  ;;  %5193 = vmatprep.mubr.msk.f32.mxu1 %vm229_vm0, %v4248_v8 }
 0x116   : > { %5417 = vmatprep.mubr.msk.f32.mxu0 %vm229_vm0, %v4524_v9 }
 0x118   : > { %5194 = vmatmul.mubr.msk.f32.gmra.mrb[20].mxu1 %vm229_vm0, %v4249_v10 }
 0x119   : > { %5418 = vmatmul.mubr.msk.f32.gmra.mrb[20].mxu0 %vm229_vm0, %v4525_v13  ;;  %5196 = vmatprep.mubr.msk.f32.mxu1 %vm229_vm0, %v4250_v16 }
 0x11a   : > { %5420 = vmatprep.mubr.msk.f32.mxu0 %vm229_vm0, %v4526_v18 }
 0x11c   : > { %5197 = vmatmul.mubr.msk.f32.gmra.mrb[22].mxu1 %vm229_vm0, %v4251_v20 }
 0x11d   : > { %5421 = vmatmul.mubr.msk.f32.gmra.mrb[22].mxu0 %vm229_vm0, %v4527_v22  ;;  %5199 = vmatprep.mubr.msk.f32.mxu1 %vm229_vm0, %v4252_v24 }
 0x11e   : > { %5423 = vmatprep.mubr.msk.f32.mxu0 %vm229_vm0, %v4528_v26 }
 0x120   : > { %5200 = vmatmul.mubr.msk.f32.gmra.mrb[24].mxu1 %vm229_vm0, %v4253_v28 }
 0x121   : > { %5424 = vmatmul.mubr.msk.f32.gmra.mrb[24].mxu0 %vm229_vm0, %v4529_v30  ;;  %5202 = vmatprep.mubr.msk.f32.mxu1 %vm229_vm0, %v4254_v32 }
 0x122   : > { %5426 = vmatprep.mubr.msk.f32.mxu0 %vm229_vm0, %v4530_v34 }
 0x124   : > { %5203 = vmatmul.mubr.msk.f32.gmra.mrb[26].mxu1 %vm229_vm0, %v4255_v5 }
 0x125   : > { %5427 = vmatmul.mubr.msk.f32.gmra.mrb[26].mxu0 %vm229_vm0, %v4531_v36  ;;  %5205 = vmatprep.mubr.msk.f32.mxu1 %vm229_vm0, %v4256_v38 }
 0x126   : > { %5429 = vmatprep.mubr.msk.f32.mxu0 %vm229_vm0, %v4532_v11 }
 0x128   : > { %5206 = vmatmul.mubr.msk.f32.gmra.mrb[28].mxu1 %vm229_vm0, %v4257_v15 }
 0x129   : > { %5430 = vmatmul.mubr.msk.f32.gmra.mrb[28].mxu0 %vm229_vm0, %v4533_v14  ;;  %5208 = vmatprep.mubr.msk.f32.mxu1 %vm229_vm0, %v4258_v17 }
 0x12a   : > { %5432 = vmatprep.mubr.msk.f32.mxu0 %vm229_vm0, %v4534_v19 }
 0x12c   : > { %5209 = vmatmul.mubr.msk.f32.gmra.mrb[30].mxu1 %vm229_vm0, %v4259_v21 }
 0x12d   : > { %5433 = vmatmul.mubr.msk.f32.gmra.mrb[30].mxu0 %vm229_vm0, %v4535_v23 }
 0x1a3   : > { %v5109_v25 = vpop.f32.mrb[0].mxu1 }
 0x1a4   : > { %v1465_v27 = vpop.f32.mrb[1].mxu1 }
 0x1a7   : > { %v5112_v29 = vpop.f32.mrb[2].mxu1 }
 0x1a8   : > { %v1475_v7 = vpop.f32.mrb[3].mxu1 }
 0x1ab   : > { %v5115_v31 = vpop.f32.mrb[4].mxu1 }
 0x1ac   : > { %v1485_v33 = vpop.f32.mrb[5].mxu1 }
 0x1af   : > { %v5118_v35 = vpop.f32.mrb[6].mxu1 }
 0x1b0   : > { %v1495_v12 = vpop.f32.mrb[7].mxu1 }
 0x1b3   : > { %v5121_v40 = vpop.f32.mrb[8].mxu1 }
 0x1b4   : > { %v1505_v37 = vpop.f32.mrb[9].mxu1 }
 0x1b7   : > { %v6842_v39 = vpop.f32.mrb[10].mxu1 }
 0x1b8   : > { %v6844_v41 = vpop.f32.mrb[11].mxu1 }
 0x1bb   : > { %v6846_v42 = vpop.f32.mrb[12].mxu1 }
 0x1bc   : > { %v6848_v43 = vpop.f32.mrb[13].mxu1 }
 0x1bf   : > { %v6850_v44 = vpop.f32.mrb[14].mxu1 }
 0x1c0   : > { %v6852_v45 = vpop.f32.mrb[15].mxu1 }
 0x1c4   : > { %v5389_v46 = vpop.f32.mrb[0].mxu0 }
 0x1c5   : > { %v5511_v48 = vadd.f32 %v5389_v46, %v5109_v25  ;;  %v3425_v49 = vpop.f32.mrb[1].mxu0 }
 0x1c6   : > { %v5512_v50 = vadd.f32 %v3425_v49, %v1465_v27 }
 0x1c7   : > { %v6860_v51 = vadd.f32 %v5511_v48, %v6857_v47 }
 0x1c8   : > { %v6863_v52 = vadd.f32 %v5512_v50, %v6857_v47  ;;  %v5392_v53 = vpop.f32.mrb[2].mxu0 }
 0x1c9   : > { %v4574_v54 = vmul.f32 -1.442695, %v6860_v51  ;;  %v5513_v55 = vadd.f32 %v5392_v53, %v5112_v29  ;;  %v3435_v56 = vpop.f32.mrb[3].mxu0 }
 0x1ca   : > { %v4573_v57 = vmul.f32 -1.442695, %v6863_v52  ;;  %v5514_v58 = vadd.f32 %v3435_v56, %v1475_v7 }
 0x1cb   : > { %5775 = vpow2.f32 %v4574_v54  ;;  %v6868_v59 = vadd.f32 %v5513_v55, %v6857_v47 }
 0x1cc   : > { %5777 = vpow2.f32 %v4573_v57  ;;  %v6871_v60 = vadd.f32 %v5514_v58, %v6857_v47  ;;  %v5395_v61 = vpop.f32.mrb[4].mxu0 }
 0x1cd   : > { %v4576_v62 = vmul.f32 -1.442695, %v6868_v59  ;;  %v5515_v63 = vadd.f32 %v5395_v61, %v5115_v31  ;;  %v3445_v0 = vpop.f32.mrb[5].mxu0 }
 0x1ce   : > { %v4575_v1 = vmul.f32 -1.442695, %v6871_v60  ;;  %v5516_v2 = vadd.f32 %v3445_v0, %v1485_v33 }
 0x1cf   : > { %5779 = vpow2.f32 %v4576_v62  ;;  %v6876_v3 = vadd.f32 %v5515_v63, %v6857_v47 }
 0x1d0   : > { %5781 = vpow2.f32 %v4575_v1  ;;  %v6879_v4 = vadd.f32 %v5516_v2, %v6857_v47  ;;  %v5398_v6 = vpop.f32.mrb[6].mxu0 }
 0x1d1   : > { %v4578_v8 = vmul.f32 -1.442695, %v6876_v3  ;;  %v5517_v9 = vadd.f32 %v5398_v6, %v5118_v35  ;;  %v3455_v10 = vpop.f32.mrb[7].mxu0 }
 0x1d2   : > { %v4577_v13 = vmul.f32 -1.442695, %v6879_v4  ;;  %v5518_v16 = vadd.f32 %v3455_v10, %v1495_v12 }
 0x1d3   : > { %5783 = vpow2.f32 %v4578_v8  ;;  %v6884_v18 = vadd.f32 %v5517_v9, %v6857_v47 }
 0x1d4   : > { %5785 = vpow2.f32 %v4577_v13  ;;  %v6889_v20 = vadd.f32 %v5518_v16, %v6857_v47  ;;  %v5401_v22 = vpop.f32.mrb[8].mxu0 }
 0x1d5   : > { %v5776_v24 = vpop.eup %5775  ;;  %v4580_v26 = vmul.f32 -1.442695, %v6884_v18  ;;  %v5519_v28 = vadd.f32 %v5401_v22, %v5121_v40  ;;  %v3465_v30 = vpop.f32.mrb[9].mxu0 }
 0x1d6   : > { %v5778_v32 = vpop.eup %5777  ;;  %v3752_v34 = vadd.f32 1.0, %v5776_v24  ;;  %v4579_v5 = vmul.f32 -1.442695, %v6889_v20  ;;  %v5520_v36 = vadd.f32 %v3465_v30, %v1505_v37 }
 0x1d7   : > { %v3751_v38 = vadd.f32 1.0, %v5778_v32  ;;  %5787 = vpow2.f32 %v4580_v26  ;;  %v6894_v11 = vadd.f32 %v5519_v28, %v6857_v47 }
 0x1d8   : > { %5789 = vrcp.f32 %v3752_v34  ;;  %v6897_v15 = vadd.f32 %v5520_v36, %v6857_v47  ;;  %v5404_v14 = vpop.f32.mrb[10].mxu0 }
 0x1d9   : > { %v5780_v17 = vpop.eup %5779  ;;  %5791 = vrcp.f32 %v3751_v38  ;;  %v4582_v19 = vmul.f32 -1.442695, %v6894_v11  ;;  %v5521_v21 = vadd.f32 %v5404_v14, %v6842_v39  ;;  %v3475_v23 = vpop.f32.mrb[11].mxu0 }
 0x1da   : > { %v5782_v25 = vpop.eup %5781  ;;  %v3754_v27 = vadd.f32 1.0, %v5780_v17  ;;  %5793 = vpow2.f32 %v4579_v5  ;;  %v4581_v29 = vmul.f32 -1.442695, %v6897_v15  ;;  %v5522_v7 = vadd.f32 %v3475_v23, %v6844_v41 }
 0x1db   : > { %v3753_v31 = vadd.f32 1.0, %v5782_v25  ;;  %5795 = vpow2.f32 %v4582_v19  ;;  %v6907_v33 = vadd.f32 %v5521_v21, %v6857_v47 }
 0x1dc   : > { %5797 = vrcp.f32 %v3754_v27  ;;  %v6910_v35 = vadd.f32 %v5522_v7, %v6857_v47  ;;  %v5407_v12 = vpop.f32.mrb[12].mxu0 }
 0x1dd   : > { %v5784_v40 = vpop.eup %5783  ;;  %5799 = vrcp.f32 %v3753_v31  ;;  %v4584_v37 = vmul.f32 -1.442695, %v6907_v33  ;;  %v5523_v39 = vadd.f32 %v5407_v12, %v6846_v42  ;;  %v3485_v41 = vpop.f32.mrb[13].mxu0 }
 0x1de   : > { %v5786_v46 = vpop.eup %5785  ;;  %v3756_v48 = vadd.f32 1.0, %v5784_v40  ;;  %5801 = vpow2.f32 %v4581_v29  ;;  %v4583_v49 = vmul.f32 -1.442695, %v6910_v35  ;;  %v5524_v50 = vadd.f32 %v3485_v41, %v6848_v43 }
 0x1df   : > { %v3755_v53 = vadd.f32 1.0, %v5786_v46  ;;  %5803 = vpow2.f32 %v4584_v37  ;;  %v6918_v54 = vadd.f32 %v5523_v39, %v6857_v47 }
 0x1e0   : > { %5805 = vrcp.f32 %v3756_v48  ;;  %v6921_v55 = vadd.f32 %v5524_v50, %v6857_v47  ;;  %v5410_v56 = vpop.f32.mrb[14].mxu0 }
 0x1e1   : > { %v5788_v42 = vpop.eup %5787  ;;  %5807 = vrcp.f32 %v3755_v53  ;;  %v4586_v57 = vmul.f32 -1.442695, %v6918_v54  ;;  %v5525_v58 = vadd.f32 %v5410_v56, %v6850_v44  ;;  %v3495_v61 = vpop.f32.mrb[15].mxu0 }
 0x1e2   : > { %v5790_v62 = vpop.eup %5789  ;;  %v3758_v43 = vadd.f32 1.0, %v5788_v42  ;;  %5809 = vpow2.f32 %v4583_v49  ;;  %v4585_v63 = vmul.f32 -1.442695, %v6921_v55  ;;  %v5526_v0 = vadd.f32 %v3495_v61, %v6852_v45 }
 0x1e3   : > { %v5792_v1 = vpop.eup %5791  ;;  %v3848_v2 = vmul.f32 %v5790_v62, %v6860_v51  ;;  %5811 = vpow2.f32 %v4586_v57  ;;  %v6934_v44 = vadd.f32 %v5525_v58, %v6857_v47  ;;  %v5189_v6 = vpop.f32.mrb[16].mxu1 }
 0x1e4   : > { %v5794_v8 = vpop.eup %5793  ;;  %v3847_v9 = vmul.f32 %v5792_v1, %v6863_v52  ;;  %5813 = vrcp.f32 %v3758_v43  ;;  %v6938_v10 = vadd.f32 %v5526_v0, %v6857_v47  ;;  %v5413_v13 = vpop.f32.mrb[16].mxu0 }
 0x1e5   : > { %v1937_v16 = vpop.f32.mrb[17].mxu1  ;;  %v5796_v22 = vpop.eup %5795  ;;  %3880 = vst.msk [vmem:[%s6928_s21 + $0x8] sm:$0xff] %vm229_vm0, %v3848_v2  ;;  %v3757_v45 = vadd.f32 1.0, %v5794_v8  ;;  %5815 = vpow2.f32 %v4585_v63  ;;  %v4588_v51 = vmul.f32 -1.442695, %v6934_v44  ;;  %v5527_v24 = vadd.f32 %v5413_v13, %v5189_v6 }
 0x1e6   : > { %v3505_v26 = vpop.f32.mrb[17].mxu0  ;;  %v5798_v28 = vpop.eup %5797  ;;  %3879 = vst.msk [vmem:[%s6928_s21] sm:$0xff] %vm229_vm0, %v3847_v9  ;;  %v3760_v52 = vadd.f32 1.0, %v5796_v22  ;;  %v4587_v30 = vmul.f32 -1.442695, %v6938_v10 }
 0x1e7   : > { %v5528_v32 = vadd.f32 %v3505_v26, %v1937_v16  ;;  %v5800_v34 = vpop.eup %5799  ;;  %v3850_v5 = vmul.f32 %v5798_v28, %v6868_v59  ;;  %5817 = vrcp.f32 %v3757_v45  ;;  %v6948_v36 = vadd.f32 %v5527_v24, %v6857_v47  ;;  %v5192_v38 = vpop.f32.mrb[18].mxu1 }
 0x1e8   : > { %v5802_v14 = vpop.eup %5801  ;;  %v3849_v17 = vmul.f32 %v5800_v34, %v6871_v60  ;;  %5819 = vrcp.f32 %v3760_v52  ;;  %v5416_v21 = vpop.f32.mrb[18].mxu0 }
 0x1e9   : > { %v6952_v19 = vadd.f32 %v5528_v32, %v6857_v47  ;;  %v1947_v23 = vpop.f32.mrb[19].mxu1  ;;  %v5804_v25 = vpop.eup %5803  ;;  %3882 = vst.msk [vmem:[%s6928_s21 + $0x18] sm:$0xff] %vm229_vm0, %v3850_v5  ;;  %v3759_v27 = vadd.f32 1.0, %v5802_v14  ;;  %5821 = vpow2.f32 %v4588_v51  ;;  %v4590_v59 = vmul.f32 -1.442695, %v6948_v36 }
 0x1ea   : > { %v5529_v29 = vadd.f32 %v5416_v21, %v5192_v38  ;;  %v3515_v7 = vpop.f32.mrb[19].mxu0  ;;  %v5806_v31 = vpop.eup %5805  ;;  %3881 = vst.msk [vmem:[%s6928_s21 + $0x10] sm:$0xff] %vm229_vm0, %v3849_v17  ;;  %v3762_v12 = vadd.f32 1.0, %v5804_v25  ;;  %5823 = vpow2.f32 %v4587_v30 }
 0x1eb   : > { %v4589_v60 = vmul.f32 -1.442695, %v6952_v19  ;;  %v5530_v40 = vadd.f32 %v3515_v7, %v1947_v23  ;;  %v5808_v37 = vpop.eup %5807  ;;  %v3852_v39 = vmul.f32 %v5806_v31, %v6876_v3  ;;  %5825 = vrcp.f32 %v3759_v27  ;;  %v5195_v46 = vpop.f32.mrb[20].mxu1 }
 0x1ec   : > { %v6962_v41 = vadd.f32 %v5529_v29, %v6857_v47  ;;  %v5810_v48 = vpop.eup %5809  ;;  %v3851_v49 = vmul.f32 %v5808_v37, %v6879_v4  ;;  %5827 = vrcp.f32 %v3762_v12  ;;  %v5419_v53 = vpop.f32.mrb[20].mxu0 }
 0x1ed   : > { %v6966_v50 = vadd.f32 %v5530_v40, %v6857_v47  ;;  %v1957_v56 = vpop.f32.mrb[21].mxu1  ;;  %v5812_v42 = vpop.eup %5811  ;;  %3884 = vst.msk [vmem:[%s6928_s21 + $0x28] sm:$0xff] %vm229_vm0, %v3852_v39  ;;  %v3761_v57 = vadd.f32 1.0, %v5810_v48  ;;  %5829 = vpow2.f32 %v4590_v59  ;;  %v5531_v58 = vadd.f32 %v5419_v53, %v5195_v46 }
 0x1ee   : > { %v4592_v3 = vmul.f32 -1.442695, %v6962_v41  ;;  %v3525_v61 = vpop.f32.mrb[21].mxu0  ;;  %v5814_v62 = vpop.eup %5813  ;;  %3883 = vst.msk [vmem:[%s6928_s21 + $0x20] sm:$0xff] %vm229_vm0, %v3851_v49  ;;  %v3764_v4 = vadd.f32 1.0, %v5812_v42  ;;  %5831 = vpow2.f32 %v4589_v60 }
 0x1ef   : > { %v5532_v43 = vadd.f32 %v3525_v61, %v1957_v56  ;;  %v5816_v63 = vpop.eup %5815  ;;  %v3854_v0 = vmul.f32 %v5814_v62, %v6884_v18  ;;  %5833 = vrcp.f32 %v3761_v57  ;;  %v4591_v1 = vmul.f32 -1.442695, %v6966_v50  ;;  %v5198_v6 = vpop.f32.mrb[22].mxu1 }
 0x1f0   : > { %v6976_v2 = vadd.f32 %v5531_v58, %v6857_v47  ;;  %5835 = vrcp.f32 %v3764_v4  ;;  %v3763_v8 = vadd.f32 1.0, %v5816_v63  ;;  %v5422_v13 = vpop.f32.mrb[22].mxu0  ;;  %v1967_v16 = vpop.f32.mrb[23].mxu1 }
 0x1f1   : > { %v6979_v9 = vadd.f32 %v5532_v43, %v6857_v47  ;;  %v5818_v22 = vpop.eup %5817  ;;  %3886 = vst.msk [vmem:[%s6928_s21 + $0x38] sm:$0xff] %vm229_vm0, %v3854_v0  ;;  %5837 = vpow2.f32 %v4592_v3  ;;  %v5533_v45 = vadd.f32 %v5422_v13, %v5198_v6  ;;  %v3535_v51 = vpop.f32.mrb[23].mxu0 }
 0x1f2   : > { %v4594_v18 = vmul.f32 -1.442695, %v6976_v2  ;;  %v5820_v24 = vpop.eup %5819  ;;  %v3853_v26 = vmul.f32 %v5818_v22, %v6889_v20  ;;  %5839 = vrcp.f32 %v3763_v8  ;;  %v5534_v52 = vadd.f32 %v3535_v51, %v1967_v16 }
 0x1f3   : > { %v4593_v28 = vmul.f32 -1.442695, %v6979_v9  ;;  %v5822_v30 = vpop.eup %5821  ;;  %v3856_v32 = vmul.f32 %v5820_v24, %v6894_v11  ;;  %5841 = vpow2.f32 %v4591_v1  ;;  %v6988_v34 = vadd.f32 %v5533_v45, %v6857_v47  ;;  %v5201_v5 = vpop.f32.mrb[24].mxu1 }
 0x1f4   : > { %v5824_v38 = vpop.eup %5823  ;;  %3885 = vst.msk [vmem:[%s6928_s21 + $0x30] sm:$0xff] %vm229_vm0, %v3853_v26  ;;  %v3766_v14 = vadd.f32 1.0, %v5822_v30  ;;  %5843 = vpow2.f32 %v4594_v18  ;;  %v6993_v20 = vadd.f32 %v5534_v52, %v6857_v47  ;;  %v5425_v17 = vpop.f32.mrb[24].mxu0 }
 0x1f5   : > { %v1977_v21 = vpop.f32.mrb[25].mxu1  ;;  %v5826_v23 = vpop.eup %5825  ;;  %3888 = vst.msk [vmem:[%s6928_s21 + $0x48] sm:$0xff] %vm229_vm0, %v3856_v32  ;;  %v3765_v25 = vadd.f32 1.0, %v5824_v38  ;;  %5845 = vpow2.f32 %v4593_v28  ;;  %v4596_v11 = vmul.f32 -1.442695, %v6988_v34  ;;  %v5535_v27 = vadd.f32 %v5425_v17, %v5201_v5 }
 0x1f6   : > { %v3545_v59 = vpop.f32.mrb[25].mxu0  ;;  %v5828_v29 = vpop.eup %5827  ;;  %v3855_v7 = vmul.f32 %v5826_v23, %v6897_v15  ;;  %5847 = vrcp.f32 %v3766_v14  ;;  %v4595_v31 = vmul.f32 -1.442695, %v6993_v20 }
 0x1f7   : > { %v5536_v12 = vadd.f32 %v3545_v59, %v1977_v21  ;;  %v5830_v60 = vpop.eup %5829  ;;  %v3858_v40 = vmul.f32 %v5828_v29, %v6907_v33  ;;  %5849 = vrcp.f32 %v3765_v25  ;;  %v7002_v37 = vadd.f32 %v5535_v27, %v6857_v47  ;;  %v5204_v39 = vpop.f32.mrb[26].mxu1 }
 0x1f8   : > { %v5832_v46 = vpop.eup %5831  ;;  %3887 = vst.msk [vmem:[%s6928_s21 + $0x40] sm:$0xff] %vm229_vm0, %v3855_v7  ;;  %v3768_v48 = vadd.f32 1.0, %v5830_v60  ;;  %5851 = vpow2.f32 %v4596_v11  ;;  %v5428_v49 = vpop.f32.mrb[26].mxu0 }
 0x1f9   : > { %v7007_v15 = vadd.f32 %v5536_v12, %v6857_v47  ;;  %v1987_v53 = vpop.f32.mrb[27].mxu1  ;;  %v5834_v56 = vpop.eup %5833  ;;  %3890 = vst.msk [vmem:[%s6928_s21 + $0x58] sm:$0xff] %vm229_vm0, %v3858_v40  ;;  %v3767_v42 = vadd.f32 1.0, %v5832_v46  ;;  %5853 = vpow2.f32 %v4595_v31  ;;  %v4598_v33 = vmul.f32 -1.442695, %v7002_v37 }
 0x1fa   : > { %v5537_v57 = vadd.f32 %v5428_v49, %v5204_v39  ;;  %v3555_v3 = vpop.f32.mrb[27].mxu0  ;;  %v5836_v58 = vpop.eup %5835  ;;  %v3857_v61 = vmul.f32 %v5834_v56, %v6910_v35  ;;  %5855 = vrcp.f32 %v3768_v48 }
 0x1fb   : > { %v4597_v62 = vmul.f32 -1.442695, %v7007_v15  ;;  %v5538_v4 = vadd.f32 %v3555_v3, %v1987_v53  ;;  %v5838_v43 = vpop.eup %5837  ;;  %v3860_v63 = vmul.f32 %v5836_v58, %v6918_v54  ;;  %5857 = vrcp.f32 %v3767_v42  ;;  %v5207_v1 = vpop.f32.mrb[28].mxu1 }
 0x1fc   : > { %v7016_v0 = vadd.f32 %v5537_v57, %v6857_v47  ;;  %v5840_v6 = vpop.eup %5839  ;;  %3889 = vst.msk [vmem:[%s6928_s21 + $0x50] sm:$0xff] %vm229_vm0, %v3857_v61  ;;  %v3770_v8 = vadd.f32 1.0, %v5838_v43  ;;  %5859 = vpow2.f32 %v4598_v33  ;;  %v5431_v13 = vpop.f32.mrb[28].mxu0 }
 0x1fd   : > { %v7021_v35 = vadd.f32 %v5538_v4, %v6857_v47  ;;  %v1997_v16 = vpop.f32.mrb[29].mxu1  ;;  %v5842_v22 = vpop.eup %5841  ;;  %3892 = vst.msk [vmem:[%s6928_s21 + $0x68] sm:$0xff] %vm229_vm0, %v3860_v63  ;;  %v3859_v54 = vmul.f32 %v5840_v6, %v6921_v55  ;;  %5861 = vpow2.f32 %v4597_v62  ;;  %v5539_v45 = vadd.f32 %v5431_v13, %v5207_v1 }
 0x1fe   : > { %v4600_v18 = vmul.f32 -1.442695, %v7016_v0  ;;  %v3565_v51 = vpop.f32.mrb[29].mxu0  ;;  %v5844_v24 = vpop.eup %5843  ;;  %5863 = vrcp.f32 %v3770_v8  ;;  %v3769_v26 = vadd.f32 1.0, %v5842_v22 }
 0x1ff   : > { %v5540_v28 = vadd.f32 %v3565_v51, %v1997_v16  ;;  %v5846_v52 = vpop.eup %5845  ;;  %3891 = vst.msk [vmem:[%s6928_s21 + $0x60] sm:$0xff] %vm229_vm0, %v3859_v54  ;;  %v3772_v30 = vadd.f32 1.0, %v5844_v24  ;;  %v4599_v32 = vmul.f32 -1.442695, %v7021_v35  ;;  %v7031_v5 = vadd.f32 %v5539_v45, %v6857_v47  ;;  %v5210_v55 = vpop.f32.mrb[30].mxu1 }
 0x200   : > { %5865 = vpow2.f32 %v4600_v18  ;;  %v5848_v38 = vpop.eup %5847  ;;  %v3771_v14 = vadd.f32 1.0, %v5846_v52  ;;  %v5434_v21 = vpop.f32.mrb[30].mxu0 }
 0x201   : > { %5867 = vrcp.f32 %v3769_v26  ;;  %v7034_v17 = vadd.f32 %v5540_v28, %v6857_v47  ;;  %v2007_v23 = vpop.f32.mrb[31].mxu1  ;;  %v5850_v25 = vpop.eup %5849  ;;  %v3862_v11 = vmul.f32 %v5848_v38, %v6934_v44  ;;  %v4602_v27 = vmul.f32 -1.442695, %v7031_v5 }
 0x202   : > { %5869 = vrcp.f32 %v3772_v30  ;;  %v5541_v59 = vadd.f32 %v5434_v21, %v5210_v55  ;;  %v3575_v29 = vpop.f32.mrb[31].mxu0  ;;  %v5852_v7 = vpop.eup %5851  ;;  %v3861_v31 = vmul.f32 %v5850_v25, %v6938_v10 }
 0x203   : > { %5871 = vrcp.f32 %v3771_v14  ;;  %v5542_v12 = vadd.f32 %v3575_v29, %v2007_v23  ;;  %v5854_v60 = vpop.eup %5853  ;;  %3894 = vst.msk [vmem:[%s6928_s21 + $0x78] sm:$0xff] %vm229_vm0, %v3862_v11  ;;  %v3774_v40 = vadd.f32 1.0, %v5852_v7  ;;  %v4601_v39 = vmul.f32 -1.442695, %v7034_v17 }
 0x204   : > { %5873 = vpow2.f32 %v4599_v32  ;;  %v7043_v44 = vadd.f32 %v5541_v59, %v6857_v47  ;;  %v5856_v46 = vpop.eup %5855  ;;  %3893 = vst.msk [vmem:[%s6928_s21 + $0x70] sm:$0xff] %vm229_vm0, %v3861_v31  ;;  %v3773_v48 = vadd.f32 1.0, %v5854_v60 }
 0x205   : > { %5875 = vpow2.f32 %v4602_v27  ;;  %v7048_v10 = vadd.f32 %v5542_v12, %v6857_v47  ;;  %v5858_v49 = vpop.eup %5857  ;;  %v3864_v53 = vmul.f32 %v5856_v46, %v6948_v36 }
 0x206   : > { %5877 = vrcp.f32 %v3774_v40  ;;  %v4604_v56 = vmul.f32 -1.442695, %v7043_v44  ;;  %v5860_v42 = vpop.eup %5859  ;;  %v3863_v33 = vmul.f32 %v5858_v49, %v6952_v19 }
 0x207   : > { %5879 = vrcp.f32 %v3773_v48  ;;  %v5862_v57 = vpop.eup %5861  ;;  %3896 = vst.msk [vmem:[%s6928_s21 + $0x88] sm:$0xff] %vm229_vm0, %v3864_v53  ;;  %v3776_v3 = vadd.f32 1.0, %v5860_v42  ;;  %v4603_v58 = vmul.f32 -1.442695, %v7048_v10 }
 0x208   : > { %5881 = vpow2.f32 %v4601_v39  ;;  %v5864_v47 = vpop.eup %5863  ;;  %3895 = vst.msk [vmem:[%s6928_s21 + $0x80] sm:$0xff] %vm229_vm0, %v3863_v33  ;;  %v3775_v61 = vadd.f32 1.0, %v5862_v57 }
 0x209   : > { %5883 = vpow2.f32 %v4604_v56  ;;  %v3866_v62 = vmul.f32 %v5864_v47, %v6962_v41 }
 0x20a   : > { %v5866_v36 = vpop.eup %5865  ;;  %5885 = vrcp.f32 %v3776_v3 }
 0x20b   : > { %v5868_v19 = vpop.eup %5867  ;;  %5887 = vrcp.f32 %v3775_v61  ;;  %v3778_v4 = vadd.f32 1.0, %v5866_v36  ;;  %3898 = vst.msk [vmem:[%s6928_s21 + $0x98] sm:$0xff] %vm229_vm0, %v3866_v62 }
 0x20c   : > { %v5870_v43 = vpop.eup %5869  ;;  %v3865_v63 = vmul.f32 %v5868_v19, %v6966_v50  ;;  %5889 = vpow2.f32 %v4603_v58 }
 0x20d   : > { %v5872_v1 = vpop.eup %5871  ;;  %v3868_v6 = vmul.f32 %v5870_v43, %v6976_v2  ;;  %5891 = vrcp.f32 %v3778_v4 }
 0x20e   : > { %v5874_v8 = vpop.eup %5873  ;;  %3897 = vst.msk [vmem:[%s6928_s21 + $0x90] sm:$0xff] %vm229_vm0, %v3865_v63  ;;  %v3867_v41 = vmul.f32 %v5872_v1, %v6979_v9 }
 0x20f   : > { %v5876_v13 = vpop.eup %5875  ;;  %3900 = vst.msk [vmem:[%s6928_s21 + $0xa8] sm:$0xff] %vm229_vm0, %v3868_v6  ;;  %v3777_v16 = vadd.f32 1.0, %v5874_v8 }
 0x210   : > { %v5878_v22 = vpop.eup %5877  ;;  %3899 = vst.msk [vmem:[%s6928_s21 + $0xa0] sm:$0xff] %vm229_vm0, %v3867_v41  ;;  %v3780_v50 = vadd.f32 1.0, %v5876_v13 }
 0x211   : > { %v5880_v54 = vpop.eup %5879  ;;  %v3870_v18 = vmul.f32 %v5878_v22, %v6988_v34  ;;  %5893 = vrcp.f32 %v3777_v16 }
 0x212   : > { %v5882_v2 = vpop.eup %5881  ;;  %v3869_v45 = vmul.f32 %v5880_v54, %v6993_v20  ;;  %5895 = vrcp.f32 %v3780_v50 }
 0x213   : > { %v5884_v9 = vpop.eup %5883  ;;  %3902 = vst.msk [vmem:[%s6928_s21 + $0xb8] sm:$0xff] %vm229_vm0, %v3870_v18  ;;  %v3779_v51 = vadd.f32 1.0, %v5882_v2 }
 0x214   : > { %v5886_v24 = vpop.eup %5885  ;;  %3901 = vst.msk [vmem:[%s6928_s21 + $0xb0] sm:$0xff] %vm229_vm0, %v3869_v45  ;;  %v3782_v26 = vadd.f32 1.0, %v5884_v9 }
 0x215   : > { %v5888_v28 = vpop.eup %5887  ;;  %v3872_v52 = vmul.f32 %v5886_v24, %v7002_v37  ;;  %5897 = vrcp.f32 %v3779_v51 }
 0x216   : > { %v5890_v34 = vpop.eup %5889  ;;  %v3871_v20 = vmul.f32 %v5888_v28, %v7007_v15  ;;  %5899 = vrcp.f32 %v3782_v26 }
 0x217   : > { %v5892_v30 = vpop.eup %5891  ;;  %3904 = vst.msk [vmem:[%s6928_s21 + $0xc8] sm:$0xff] %vm229_vm0, %v3872_v52  ;;  %v3781_v32 = vadd.f32 1.0, %v5890_v34 }
 0x218   : > { %3903 = vst.msk [vmem:[%s6928_s21 + $0xc0] sm:$0xff] %vm229_vm0, %v3871_v20  ;;  %v3874_v55 = vmul.f32 %v5892_v30, %v7016_v0 }
 0x219   : > { %5901 = vrcp.f32 %v3781_v32 }
 0x21a   : > { %3906 = vst.msk [vmem:[%s6928_s21 + $0xd8] sm:$0xff] %vm229_vm0, %v3874_v55 }
 0x21b   : > { %v5894_v37 = vpop.eup %5893 }
 0x21c   : > { %v5896_v38 = vpop.eup %5895  ;;  %v3873_v14 = vmul.f32 %v5894_v37, %v7021_v35 }
 0x21d   : > { %v3876_v15 = vmul.f32 %v5896_v38, %v7031_v5 }
 0x21e   : > { %3905 = vst.msk [vmem:[%s6928_s21 + $0xd0] sm:$0xff] %vm229_vm0, %v3873_v14 }
 0x21f   : > { %v5898_v21 = vpop.eup %5897  ;;  %3908 = vst.msk [vmem:[%s6928_s21 + $0xe8] sm:$0xff] %vm229_vm0, %v3876_v15 }
 0x220   : > { %v5900_v23 = vpop.eup %5899  ;;  %v3875_v25 = vmul.f32 %v5898_v21, %v7034_v17 }
 0x221   : > { %v3878_v0 = vmul.f32 %v5900_v23, %v7043_v44 }
 0x222   : > { %3907 = vst.msk [vmem:[%s6928_s21 + $0xe0] sm:$0xff] %vm229_vm0, %v3875_v25 }
 0x223   : > { %v5902_v11 = vpop.eup %5901  ;;  %3910 = vst.msk [vmem:[%s6928_s21 + $0xf8] sm:$0xff] %vm229_vm0, %v3878_v0 }
 0x224   : > { %v3877_v27 = vmul.f32 %v5902_v11, %v7048_v10 }
 0x226   : > { %3909 = vst.msk [vmem:[%s6928_s21 + $0xf0] sm:$0xff] %vm229_vm0, %v3877_v27 }
 0x227 PF: > { %s13_s12 = sadd.s32 1, %s5909_s12  }
 0x228   : > { %p10_p4 = scmp.ge.s32.totalorder %s13_s12, 5  }
 0x22a   :  { %12 = sbr.rel (!%p10_p4) target bundleno = 1 (0x1), region = 76 }

// kernel: vae_forward.12
= control target key start
LH: loop header
LB: loop body
LE: loop exit
PB: predicated region body
PF: predicated region fallthrough
CT: control target
= control target key end

     0   :  { %s5548_s12 = smov 0   ;;  %s6576_s0 = inlined_call_operand.vmem [shape: f32[806,32], index: 0, kind: input, shape index: {}]   ;;  %s6577_s1 = inlined_call_operand.vmem [shape: f32[9,32,3], index: 1, kind: input, shape index: {}]   ;;  %s6578_s2 = inlined_call_operand.vmem [shape: f32[1,3], index: 2, kind: input, shape index: {}]   ;;  %s6579_s3 = inlined_call_operand.vmem [shape: f32[768,3], index: 3, kind: output, shape index: {}]  }
   0x1 LB: > { %s3758_s13 = sadd.s32 4294967295, %s5526_s12   ;;  %p3761_p0 = scmp.ge.s32.totalorder %s5526_s12, 1  ;;  %s5526_s12 = sphi %s5548_s12, %s13_s12  }
   0x2   : > { %p127_p1 = scmp.lt.s32.totalorder %s5526_s12, 4 }
   0x4   : > { %p128_p2 = pnand %p3761_p0, %p127_p1 }
   0x5   : > { %v3798_v0 = vld [vmem:[%s6577_s1 + $0x20] sm:$0xff] (!%p128_p2)  ;;  %v3799_v1 = vld [vmem:[%s6577_s1 + $0x28] sm:$0xff] (!%p128_p2)  ;;  %s3764_s20 = sshll.u32 (!%p128_p2), %s3758_s13, 8  ;;  %vm229_vm0 = vcmask (!%p128_p2), 261120   ;;  %v3800_v5 = vld [vmem:[%s6577_s1 + $0x30] sm:$0xff] (!%p128_p2)  ;;  %s3762_s17 = sshll.u32 (!%p128_p2), %s3758_s13, 5 }
   0x6   : > { %131 = sbr.rel (%p128_p2) target bundleno = 519 (0x207), region = 32  ;;  %v4037_v2 = vld [vmem:[%s6577_s1 + $0x80] sm:$0xff] (!%p128_p2)  ;;  %v5180_v3 = vpack.c.bf16 (!%p128_p2), %v3799_v1, %v3798_v0  ;;  %v4038_v4 = vld [vmem:[%s6577_s1 + $0x88] sm:$0xff] (!%p128_p2)  ;;  %v3801_v6 = vld [vmem:[%s6577_s1 + $0x38] sm:$0xff] (!%p128_p2)  ;;  %s5579_s29 = scalar_lea.vmem (!%p128_p2), %s6576_s0, %s3764_s20  ;;  %vm3655_vm1 = vcmask (!%p128_p2), 23552  }
   0x7   : > { %v5581_v7 = vpack.c.bf16 (!%p128_p2), %v4038_v4, %v4037_v2  ;;  %v5184_v8 = vpack.c.bf16 (!%p128_p2), %v3801_v6, %v3800_v5  ;;  %v4039_v9 = vld [vmem:[%s6577_s1 + $0x90] sm:$0xff] (!%p128_p2)  ;;  %v4040_v10 = vld [vmem:[%s6577_s1 + $0x98] sm:$0xff] (!%p128_p2)  ;;  %v3766_v11 = vld [vmem:[%s5579_s29 + $0x1] sm:$0xff] (!%p128_p2)  ;;  %p147_p3 = scmp.lt.s32.totalorder (!%p128_p2), %s3762_s17, 95 }
   0x8   : > { %5181 = vmatprep.subr.bf16.mxu1 (!%p128_p2), %v5180_v3  ;;  %v5590_v12 = vpack.c.bf16 (!%p128_p2), %v4040_v10, %v4039_v9  ;;  %4684 = vmatprep.mubr.msk.f32.mxu1 (!%p128_p2), %vm229_vm0, %v3766_v11  ;;  %v4005_v13 = vld [vmem:[%s5579_s29 + $0x13] sm:$0xff] (!%p128_p2)  ;;  %v186_v14 = vld [vmem:[%s6577_s1] sm:$0xff] (!%p128_p2)  ;;  %v187_v15 = vld [vmem:[%s6577_s1 + $0x8] sm:$0xff] (!%p128_p2) }
   0x9   : > { %5213 = vmatprep.subr.bf16.mxu0 (!%p128_p2), %v5581_v7  ;;  %5183 = vmatpush3.bf16.msra.mxu1 (!%p128_p2), %v5180_v3  ;;  %v4106_v16 = vld [vmem:[%s6577_s1 + $0xa0] sm:$0xff] (!%p128_p2)  ;;  %v5188_v17 = vpack.c.bf16 (!%p128_p2), %v187_v15, %v186_v14  ;;  %v4107_v18 = vld [vmem:[%s6577_s1 + $0xa8] sm:$0xff] (!%p128_p2)  ;;  %v3768_v22 = vld [vmem:[%s5579_s29 + $0x11] sm:$0xff] (!%p128_p2) }
   0xa   : > { %5215 = vmatpush3.bf16.msra.mxu0 (!%p128_p2), %v5581_v7  ;;  %5185 = vmatprep.subr.bf16.mxu1 (!%p128_p2), %v5184_v8  ;;  %v5220_v19 = vpack.c.bf16 (!%p128_p2), %v4107_v18, %v4106_v16  ;;  %v3767_v20 = vld [vmem:[%s5579_s29 + $0x9] sm:$0xff] (!%p128_p2)  ;;  %v4006_v21 = vld [vmem:[%s5579_s29 + $0x1b] sm:$0xff] (!%p128_p2)  ;;  %v4009_v30 = vld [vmem:[%s5579_s29 + $0x33] sm:$0xff] (!%p128_p2) }
   0xb   : > { %5217 = vmatprep.subr.bf16.mxu0 (!%p128_p2), %v5590_v12  ;;  %4908 = vmatprep.mubr.msk.f32.mxu0 (!%p128_p2), %vm229_vm0, %v4005_v13  ;;  %v4108_v23 = vld [vmem:[%s6577_s1 + $0xb0] sm:$0xff] (!%p128_p2)  ;;  %v4007_v24 = vld [vmem:[%s5579_s29 + $0x23] sm:$0xff] (!%p128_p2)  ;;  %v4109_v25 = vld [vmem:[%s6577_s1 + $0xb8] sm:$0xff] (!%p128_p2) }
   0xc   : > { %v3769_v26 = vld [vmem:[%s5579_s29 + $0x19] sm:$0xff] (!%p128_p2)  ;;  %v5224_v27 = vpack.c.bf16 (!%p128_p2), %v4109_v25, %v4108_v23  ;;  %v4008_v28 = vld [vmem:[%s5579_s29 + $0x2b] sm:$0xff] (!%p128_p2)  ;;  %v3770_v29 = vld [vmem:[%s5579_s29 + $0x21] sm:$0xff] (!%p128_p2) }
   0xd   : > { %5187 = vmatpush3.bf16.msra.mxu1 %v5184_v8  ;;  %v3771_v31 = vld [vmem:[%s5579_s29 + $0x29] sm:$0xff]  ;;  %v4010_v32 = vld [vmem:[%s5579_s29 + $0x3b] sm:$0xff]  ;;  %v3772_v35 = vld [vmem:[%s5579_s29 + $0x31] sm:$0xff]  ;;  %s6581_s17 = smov (!%p147_p3, %s3762_s17), 95 }
   0xe   : > { %5219 = vmatpush3.bf16.msra.mxu0 %v5590_v12  ;;  %5189 = vmatprep.subr.bf16.mxu1 %v5188_v17  ;;  %v188_v33 = vld [vmem:[%s6577_s1 + $0x10] sm:$0xff]  ;;  %v189_v34 = vld [vmem:[%s6577_s1 + $0x18] sm:$0xff]  ;;  %v4175_v37 = vld [vmem:[%s6577_s1 + $0xc0] sm:$0xff] }
   0xf   : > { %5221 = vmatprep.subr.bf16.mxu0 %v5220_v19  ;;  %v5192_v36 = vpack.c.bf16 %v189_v34, %v188_v33  ;;  %v4176_v38 = vld [vmem:[%s6577_s1 + $0xc8] sm:$0xff]  ;;  %v3773_v41 = vld [vmem:[%s5579_s29 + $0x39] sm:$0xff]  ;;  %v3776_v47 = vld [vmem:[%s5579_s29 + $0x51] sm:$0xff] }
  0x10   : > { %4685 = vmatmul.mubr.msk.f32.vlgmr.msra.gmra.mrb[0].mxu1 %vm229_vm0, %v3767_v20  ;;  %v4011_v39 = vld [vmem:[%s5579_s29 + $0x43] sm:$0xff]  ;;  %v5649_v40 = vpack.c.bf16 %v4176_v38, %v4175_v37  ;;  %v4012_v42 = vld [vmem:[%s5579_s29 + $0x4b] sm:$0xff]  ;;  %v4013_v44 = vld [vmem:[%s5579_s29 + $0x53] sm:$0xff] }
  0x11   : > { %4909 = vmatmul.mubr.msk.f32.vlgmr.msra.gmra.mrb[0].mxu0 %vm229_vm0, %v4006_v21  ;;  %5191 = vmatpush3.bf16.msra.mxu1 %v5188_v17  ;;  %v3774_v43 = vld [vmem:[%s5579_s29 + $0x41] sm:$0xff]  ;;  %v3775_v45 = vld [vmem:[%s5579_s29 + $0x49] sm:$0xff]  ;;  %v3777_v49 = vld [vmem:[%s5579_s29 + $0x59] sm:$0xff] }
  0x12   : > { %5223 = vmatpush3.bf16.msra.mxu0 %v5220_v19  ;;  %4687 = vmatprep.mubr.msk.f32.mxu1 %vm229_vm0, %v3768_v22  ;;  %v4014_v46 = vld [vmem:[%s5579_s29 + $0x5b] sm:$0xff]  ;;  %v4015_v48 = vld [vmem:[%s5579_s29 + $0x63] sm:$0xff]  ;;  %v4016_v52 = vld [vmem:[%s5579_s29 + $0x6b] sm:$0xff] }
  0x13   : > { %4911 = vmatprep.mubr.msk.f32.mxu0 %vm229_vm0, %v4007_v24  ;;  %5225 = vmatprep.subr.bf16.mxu0 %v5224_v27  ;;  %v3899_v50 = vld [vmem:[%s6577_s1 + $0x40] sm:$0xff]  ;;  %v3900_v51 = vld [vmem:[%s6577_s1 + $0x48] sm:$0xff]  ;;  %v4017_v55 = vld [vmem:[%s5579_s29 + $0x73] sm:$0xff] }
  0x14   : > { %4688 = vmatmul.mubr.msk.f32.gmra.mrb[2].mxu1 %vm229_vm0, %v3769_v26  ;;  %5193 = vmatprep.subr.bf16.mxu1 %v5192_v36  ;;  %v3778_v53 = vld [vmem:[%s5579_s29 + $0x61] sm:$0xff]  ;;  %v5681_v54 = vpack.c.bf16 %v3900_v51, %v3899_v50  ;;  %v3779_v56 = vld [vmem:[%s5579_s29 + $0x69] sm:$0xff]  ;;  %v3780_v58 = vld [vmem:[%s5579_s29 + $0x71] sm:$0xff] }
  0x15   : > { %4912 = vmatmul.mubr.msk.f32.gmra.mrb[2].mxu0 %vm229_vm0, %v4008_v28  ;;  %4690 = vmatprep.mubr.msk.f32.mxu1 %vm229_vm0, %v3770_v29  ;;  %v4018_v57 = vld [vmem:[%s5579_s29 + $0x7b] sm:$0xff]  ;;  %v4019_v59 = vld [vmem:[%s5579_s29 + $0x83] sm:$0xff]  ;;  %v4020_v61 = vld [vmem:[%s5579_s29 + $0x8b] sm:$0xff] }
  0x16   : > { %4914 = vmatprep.mubr.msk.f32.mxu0 %vm229_vm0, %v4009_v30  ;;  %5227 = vmatpush3.bf16.msra.mxu0 %v5224_v27  ;;  %v3781_v60 = vld [vmem:[%s5579_s29 + $0x79] sm:$0xff]  ;;  %v3782_v62 = vld [vmem:[%s5579_s29 + $0x81] sm:$0xff]  ;;  %v4177_v0 = vld [vmem:[%s6577_s1 + $0xd0] sm:$0xff] }
  0x17   : > { %5229 = vmatprep.subr.bf16.mxu0 %v5649_v40  ;;  %5195 = vmatpush3.bf16.msra.mxu1 %v5192_v36  ;;  %v4074_v63 = vld [vmem:[%s5579_s29 + $0x14] sm:$0xff]  ;;  %v3783_v2 = vld [vmem:[%s5579_s29 + $0x89] sm:$0xff]  ;;  %v4075_v3 = vld [vmem:[%s5579_s29 + $0x1c] sm:$0xff] }
  0x18   : > { %4691 = vmatmul.mubr.msk.f32.gmra.mrb[4].mxu1 %vm229_vm0, %v3771_v31  ;;  %5197 = vmatprep.subr.bf16.mxu1 %v5681_v54  ;;  %v4178_v1 = vld [vmem:[%s6577_s1 + $0xd8] sm:$0xff]  ;;  %v5715_v5 = vld [vmem:[%s5579_s29 + $0x24] sm:$0xff]  ;;  %v5731_v11 = vld [vmem:[%s5579_s29 + $0x2c] sm:$0xff] }
  0x19   : > { %4915 = vmatmul.mubr.msk.f32.gmra.mrb[4].mxu0 %vm229_vm0, %v4010_v32  ;;  %4693 = vmatprep.mubr.msk.f32.mxu1 %vm229_vm0, %v3772_v35  ;;  %v3784_v4 = vld [vmem:[%s5579_s29 + $0x91] sm:$0xff]  ;;  %v5232_v6 = vpack.c.bf16 %v4178_v1, %v4177_v0  ;;  %v4244_v8 = vld [vmem:[%s6577_s1 + $0xe0] sm:$0xff]  ;;  %v4245_v9 = vld [vmem:[%s6577_s1 + $0xe8] sm:$0xff] }
  0x1a   : > { %4917 = vmatprep.mubr.msk.f32.mxu0 %vm229_vm0, %v4011_v39  ;;  %v3785_v10 = vld [vmem:[%s5579_s29 + $0x99] sm:$0xff]  ;;  %v3786_v13 = vld [vmem:[%s5579_s29 + $0xa1] sm:$0xff]  ;;  %v5737_v15 = vpack.c.bf16 %v4245_v9, %v4244_v8  ;;  %v3787_v16 = vld [vmem:[%s5579_s29 + $0xa9] sm:$0xff] }
  0x1b   : > { %v5735_v14 = vld [vmem:[%s5579_s29 + $0x34] sm:$0xff]  ;;  %v5747_v17 = vld [vmem:[%s5579_s29 + $0x3c] sm:$0xff]  ;;  %v5751_v19 = vld [vmem:[%s5579_s29 + $0x44] sm:$0xff] }
  0x1c   : > { %4694 = vmatmul.mubr.msk.f32.gmra.mrb[6].mxu1 %vm229_vm0, %v3773_v41  ;;  %v3788_v18 = vld [vmem:[%s5579_s29 + $0xb1] sm:$0xff]  ;;  %v3789_v20 = vld [vmem:[%s5579_s29 + $0xb9] sm:$0xff]  ;;  %v3790_v22 = vld [vmem:[%s5579_s29 + $0xc1] sm:$0xff] }
  0x1d   : > { %4918 = vmatmul.mubr.msk.f32.gmra.mrb[6].mxu0 %vm229_vm0, %v4012_v42  ;;  %4696 = vmatprep.mubr.msk.f32.mxu1 %vm229_vm0, %v3774_v43  ;;  %v5762_v21 = vld [vmem:[%s5579_s29 + $0x4c] sm:$0xff]  ;;  %v5766_v23 = vld [vmem:[%s5579_s29 + $0x54] sm:$0xff]  ;;  %v5776_v25 = vld [vmem:[%s5579_s29 + $0x5c] sm:$0xff] }
  0x1e   : > { %4920 = vmatprep.mubr.msk.f32.mxu0 %vm229_vm0, %v4013_v44  ;;  %v3791_v24 = vld [vmem:[%s5579_s29 + $0xc9] sm:$0xff]  ;;  %v3792_v26 = vld [vmem:[%s5579_s29 + $0xd1] sm:$0xff]  ;;  %v3793_v28 = vld [vmem:[%s5579_s29 + $0xd9] sm:$0xff] }
  0x1f   : > { %v5780_v27 = vld [vmem:[%s5579_s29 + $0x64] sm:$0xff]  ;;  %v5790_v29 = vld [vmem:[%s5579_s29 + $0x6c] sm:$0xff]  ;;  %v5794_v31 = vld [vmem:[%s5579_s29 + $0x74] sm:$0xff] }
  0x20   : > { %4697 = vmatmul.mubr.msk.f32.gmra.mrb[8].mxu1 %vm229_vm0, %v3775_v45  ;;  %v3794_v30 = vld [vmem:[%s5579_s29 + $0xe1] sm:$0xff]  ;;  %v3795_v32 = vld [vmem:[%s5579_s29 + $0xe9] sm:$0xff]  ;;  %v3796_v34 = vld [vmem:[%s5579_s29 + $0xf1] sm:$0xff] }
  0x21   : > { %4921 = vmatmul.mubr.msk.f32.gmra.mrb[8].mxu0 %vm229_vm0, %v4014_v46  ;;  %4699 = vmatprep.mubr.msk.f32.mxu1 %vm229_vm0, %v3776_v47  ;;  %v5804_v33 = vld [vmem:[%s5579_s29 + $0x7c] sm:$0xff]  ;;  %v5808_v35 = vld [vmem:[%s5579_s29 + $0x84] sm:$0xff]  ;;  %v5818_v37 = vld [vmem:[%s5579_s29 + $0x8c] sm:$0xff] }
  0x22   : > { %4923 = vmatprep.mubr.msk.f32.mxu0 %vm229_vm0, %v4015_v48  ;;  %v3797_v36 = vld [vmem:[%s5579_s29 + $0xf9] sm:$0xff]  ;;  %v155_v42 = vld [vmem:[%s5579_s29 + $0x8] sm:$0xff]  ;;  %v156_v44 = vld [vmem:[%s5579_s29 + $0x10] sm:$0xff] }
  0x23   : > { %v154_v38 = vld [vmem:[%s5579_s29] sm:$0xff]  ;;  %v5822_v39 = vld [vmem:[%s5579_s29 + $0x94] sm:$0xff]  ;;  %v3969_v48 = vld [vmem:[%s6577_s1 + $0x68] sm:$0xff] }
  0x24   : > { %4700 = vmatmul.mubr.msk.f32.gmra.mrb[10].mxu1 %vm229_vm0, %v3777_v49  ;;  %v3902_v41 = vld [vmem:[%s6577_s1 + $0x58] sm:$0xff]  ;;  %v5842_v45 = vld [vmem:[%s5579_s29 + $0xa4] sm:$0xff]  ;;  %v5859_v50 = vld [vmem:[%s5579_s29 + $0xac] sm:$0xff] }
  0x25   : > { %4924 = vmatmul.mubr.msk.f32.gmra.mrb[10].mxu0 %vm229_vm0, %v4016_v52  ;;  %4702 = vmatprep.mubr.msk.f32.mxu1 %vm229_vm0, %v3778_v53  ;;  %v5838_v43 = vld [vmem:[%s5579_s29 + $0x9c] sm:$0xff]  ;;  %v5863_v52 = vld [vmem:[%s5579_s29 + $0xb4] sm:$0xff]  ;;  %v5908_v1 = vld [vmem:[%s5579_s29 + $0xe4] sm:$0xff] }
  0x26   : > { %4926 = vmatprep.mubr.msk.f32.mxu0 %vm229_vm0, %v4017_v55  ;;  %v3968_v47 = vld [vmem:[%s6577_s1 + $0x60] sm:$0xff]  ;;  %v157_v49 = vld [vmem:[%s5579_s29 + $0x18] sm:$0xff]  ;;  %v164_v0 = vld [vmem:[%s5579_s29 + $0x50] sm:$0xff] }
  0x27   : > { %v158_v51 = vld [vmem:[%s5579_s29 + $0x20] sm:$0xff]  ;;  %v5865_v53 = vpack.c.bf16 %v3969_v48, %v3968_v47  ;;  %v167_v8 = vld [vmem:[%s5579_s29 + $0x68] sm:$0xff] }
  0x28   : > { %4703 = vmatmul.mubr.msk.f32.gmra.mrb[12].mxu1 %vm229_vm0, %v3779_v56  ;;  %v5875_v55 = vld [vmem:[%s5579_s29 + $0xbc] sm:$0xff]  ;;  %v160_v56 = vld [vmem:[%s5579_s29 + $0x30] sm:$0xff] }
  0x29   : > { %4927 = vmatmul.mubr.msk.f32.gmra.mrb[12].mxu0 %vm229_vm0, %v4018_v57  ;;  %4705 = vmatprep.mubr.msk.f32.mxu1 %vm229_vm0, %v3780_v58  ;;  %v5879_v57 = vld [vmem:[%s5579_s29 + $0xc4] sm:$0xff]  ;;  %v161_v58 = vld [vmem:[%s5579_s29 + $0x38] sm:$0xff] }
  0x2a   : > { %4929 = vmatprep.mubr.msk.f32.mxu0 %vm229_vm0, %v4019_v59  ;;  %v5890_v59 = vld [vmem:[%s5579_s29 + $0xcc] sm:$0xff]  ;;  %v5932_v9 = vld [vmem:[%s5579_s29 + $0xfc] sm:$0xff] }
  0x2b   : > { %v6086_v47 = vld [vmem:[%s5579_s29 + $0x42] sm:$0xff]  ;;  %v6095_v48 = vld [vmem:[%s5579_s29 + $0x4a] sm:$0xff] }
  0x2c   : > { %4706 = vmatmul.mubr.msk.f32.gmra.mrb[14].mxu1 %vm229_vm0, %v3781_v60  ;;  %v162_v60 = vld [vmem:[%s5579_s29 + $0x40] sm:$0xff] }
  0x2d   : > { %4930 = vmatmul.mubr.msk.f32.gmra.mrb[14].mxu0 %vm229_vm0, %v4020_v61  ;;  %4708 = vmatprep.mubr.msk.f32.mxu1 %vm229_vm0, %v3782_v62  ;;  %v5894_v61 = vld [vmem:[%s5579_s29 + $0xd4] sm:$0xff]  ;;  %v163_v62 = vld [vmem:[%s5579_s29 + $0x48] sm:$0xff] }
  0x2e   : > { %4964 = vmatprep.mubr.msk.f32.mxu0 %vm229_vm0, %v4074_v63  ;;  %v5904_v63 = vld [vmem:[%s5579_s29 + $0xdc] sm:$0xff] }
  0x30   : > { %4709 = vmatmul.mubr.msk.f32.gmra.mrb[16].mxu1 %vm229_vm0, %v3783_v2  ;;  %v165_v2 = vld [vmem:[%s5579_s29 + $0x58] sm:$0xff] }
  0x31   : > { %4965 = vmatmul.mubr.msk.f32.vlgmr.msra.gmra.mrb[0].mxu0 %vm229_vm0, %v4075_v3  ;;  %4711 = vmatprep.mubr.msk.f32.mxu1 %vm229_vm0, %v3784_v4  ;;  %v5918_v3 = vld [vmem:[%s5579_s29 + $0xec] sm:$0xff]  ;;  %v166_v4 = vld [vmem:[%s5579_s29 + $0x60] sm:$0xff] }
  0x32   : > { %5231 = vmatpush3.bf16.msra.mxu0 %v5649_v40  ;;  %4967 = vmatprep.mubr.msk.f32.mxu0 %vm229_vm0, %v5715_v5  ;;  %v3901_v40 = vld [vmem:[%s6577_s1 + $0x50] sm:$0xff] }
  0x33   : > { %5233 = vmatprep.subr.bf16.mxu0 %v5232_v6  ;;  %v5200_v46 = vpack.c.bf16 %v3902_v41, %v3901_v40  ;;  %v3971_v40 = vld [vmem:[%s6577_s1 + $0x78] sm:$0xff] }
  0x34   : > { %4712 = vmatmul.mubr.msk.f32.gmra.mrb[18].mxu1 %vm229_vm0, %v3785_v10  ;;  %v168_v10 = vld [vmem:[%s5579_s29 + $0x70] sm:$0xff] }
  0x35   : > { %4968 = vmatmul.mubr.msk.f32.gmra.mrb[2].mxu0 %vm229_vm0, %v5731_v11  ;;  %4714 = vmatprep.mubr.msk.f32.mxu1 %vm229_vm0, %v3786_v13  ;;  %v5936_v13 = vld [vmem:[%s5579_s29 + $0x104] sm:$0xff] }
  0x36   : > { %4970 = vmatprep.mubr.msk.f32.mxu0 %vm229_vm0, %v5735_v14  ;;  %5235 = vmatpush3.bf16.msra.mxu0 %v5232_v6  ;;  %v5922_v6 = vld [vmem:[%s5579_s29 + $0xf4] sm:$0xff] }
  0x37   : > { %5237 = vmatprep.subr.bf16.mxu0 %v5737_v15 }
  0x38   : > { %4715 = vmatmul.mubr.msk.f32.gmra.mrb[20].mxu1 %vm229_vm0, %v3787_v16  ;;  %v169_v16 = vld [vmem:[%s5579_s29 + $0x78] sm:$0xff] }
  0x39   : > { %4971 = vmatmul.mubr.msk.f32.gmra.mrb[4].mxu0 %vm229_vm0, %v5747_v17  ;;  %4717 = vmatprep.mubr.msk.f32.mxu1 %vm229_vm0, %v3788_v18  ;;  %v5946_v18 = vld [vmem:[%s5579_s29 + $0x10c] sm:$0xff] }
  0x3a   : > { %4973 = vmatprep.mubr.msk.f32.mxu0 %vm229_vm0, %v5751_v19 }
  0x3c   : > { %4718 = vmatmul.mubr.msk.f32.gmra.mrb[22].mxu1 %vm229_vm0, %v3789_v20  ;;  %v170_v20 = vld [vmem:[%s5579_s29 + $0x80] sm:$0xff] }
  0x3d   : > { %4974 = vmatmul.mubr.msk.f32.gmra.mrb[6].mxu0 %vm229_vm0, %v5762_v21  ;;  %4720 = vmatprep.mubr.msk.f32.mxu1 %vm229_vm0, %v3790_v22  ;;  %v4246_v22 = vld [vmem:[%s6577_s1 + $0xf0] sm:$0xff] }
  0x3e   : > { %4976 = vmatprep.mubr.msk.f32.mxu0 %vm229_vm0, %v5766_v23 }
  0x40   : > { %4721 = vmatmul.mubr.msk.f32.gmra.mrb[24].mxu1 %vm229_vm0, %v3791_v24  ;;  %v4247_v24 = vld [vmem:[%s6577_s1 + $0xf8] sm:$0xff] }
  0x41   : > { %4977 = vmatmul.mubr.msk.f32.gmra.mrb[8].mxu0 %vm229_vm0, %v5776_v25  ;;  %4723 = vmatprep.mubr.msk.f32.mxu1 %vm229_vm0, %v3792_v26  ;;  %v171_v26 = vld [vmem:[%s5579_s29 + $0x88] sm:$0xff] }
  0x42   : > { %4979 = vmatprep.mubr.msk.f32.mxu0 %vm229_vm0, %v5780_v27 }
  0x44   : > { %4724 = vmatmul.mubr.msk.f32.gmra.mrb[26].mxu1 %vm229_vm0, %v3793_v28  ;;  %v172_v28 = vld [vmem:[%s5579_s29 + $0x90] sm:$0xff] }
  0x45   : > { %4980 = vmatmul.mubr.msk.f32.gmra.mrb[10].mxu0 %vm229_vm0, %v5790_v29  ;;  %4726 = vmatprep.mubr.msk.f32.mxu1 %vm229_vm0, %v3794_v30  ;;  %v5240_v30 = vpack.c.bf16 %v4247_v24, %v4246_v22  ;;  %v4220_v22 = vld [vmem:[%s5579_s29 + $0x65] sm:$0xff] }
  0x46   : > { %4982 = vmatprep.mubr.msk.f32.mxu0 %vm229_vm0, %v5794_v31  ;;  %v6215_v24 = vld [vmem:[%s5579_s29 + $0xca] sm:$0xff] }
  0x48   : > { %4727 = vmatmul.mubr.msk.f32.gmra.mrb[28].mxu1 %vm229_vm0, %v3795_v32  ;;  %v4313_v32 = vld [vmem:[%s6577_s1 + $0x100] sm:$0xff] }
  0x49   : > { %4983 = vmatmul.mubr.msk.f32.gmra.mrb[12].mxu0 %vm229_vm0, %v5804_v33  ;;  %4729 = vmatprep.mubr.msk.f32.mxu1 %vm229_vm0, %v3796_v34  ;;  %v4314_v34 = vld [vmem:[%s6577_s1 + $0x108] sm:$0xff] }
  0x4a   : > { %4985 = vmatprep.mubr.msk.f32.mxu0 %vm229_vm0, %v5808_v35 }
  0x4c   : > { %4730 = vmatmul.mubr.msk.f32.gmra.mrb[30].mxu1 %vm229_vm0, %v3797_v36  ;;  %v174_v36 = vld [vmem:[%s5579_s29 + $0xa0] sm:$0xff] }
  0x4d   : > { %4986 = vmatmul.mubr.msk.f32.gmra.mrb[14].mxu0 %vm229_vm0, %v5818_v37  ;;  %4740 = vmatprep.mubr.msk.f32.mxu1 %vm229_vm0, %v154_v38  ;;  %v5978_v38 = vpack.c.bf16 %v4314_v34, %v4313_v32  ;;  %v6229_v32 = vld [vmem:[%s5579_s29 + $0xda] sm:$0xff] }
  0x4e   : > { %4988 = vmatprep.mubr.msk.f32.mxu0 %vm229_vm0, %v5822_v39  ;;  %v4223_v34 = vld [vmem:[%s5579_s29 + $0x7d] sm:$0xff] }
  0x50   : > { %4741 = vmatmul.mubr.msk.f32.vlgmr.msra.gmra.mrb[0].mxu1 %vm229_vm0, %v155_v42  ;;  %v6050_v42 = vld [vmem:[%s5579_s29 + $0x1a] sm:$0xff] }
  0x51   : > { %4989 = vmatmul.mubr.msk.f32.gmra.mrb[16].mxu0 %vm229_vm0, %v5838_v43  ;;  %5199 = vmatpush3.bf16.msra.mxu1 %v5681_v54  ;;  %v159_v54 = vld [vmem:[%s5579_s29 + $0x28] sm:$0xff] }
  0x52   : > { %4743 = vmatprep.mubr.msk.f32.mxu1 %vm229_vm0, %v156_v44  ;;  %4991 = vmatprep.mubr.msk.f32.mxu0 %vm229_vm0, %v5842_v45  ;;  %v6066_v44 = vld [vmem:[%s5579_s29 + $0x2a] sm:$0xff] }
  0x53   : > { %5201 = vmatprep.subr.bf16.mxu1 %v5200_v46 }
  0x54   : > { %4744 = vmatmul.mubr.msk.f32.gmra.mrb[2].mxu1 %vm229_vm0, %v157_v49  ;;  %v6100_v49 = vld [vmem:[%s5579_s29 + $0x52] sm:$0xff] }
  0x55   : > { %4992 = vmatmul.mubr.msk.f32.gmra.mrb[18].mxu0 %vm229_vm0, %v5859_v50  ;;  %4746 = vmatprep.mubr.msk.f32.mxu1 %vm229_vm0, %v158_v51  ;;  %v6114_v51 = vld [vmem:[%s5579_s29 + $0x62] sm:$0xff] }
  0x56   : > { %4994 = vmatprep.mubr.msk.f32.mxu0 %vm229_vm0, %v5863_v52  ;;  %5203 = vmatpush3.bf16.msra.mxu1 %v5200_v46  ;;  %v6081_v46 = vld [vmem:[%s5579_s29 + $0x3a] sm:$0xff] }
  0x57   : > { %5205 = vmatprep.subr.bf16.mxu1 %v5865_v53 }
  0x58   : > { %4747 = vmatmul.mubr.msk.f32.gmra.mrb[4].mxu1 %vm229_vm0, %v159_v54  ;;  %v4173_v54 = vld [vmem:[%s5579_s29 + $0x114] sm:$0xff] }
  0x59   : > { %4995 = vmatmul.mubr.msk.f32.gmra.mrb[20].mxu0 %vm229_vm0, %v5875_v55  ;;  %4749 = vmatprep.mubr.msk.f32.mxu1 %vm229_vm0, %v160_v56  ;;  %v4174_v56 = vld [vmem:[%s5579_s29 + $0x11c] sm:$0xff] }
  0x5a   : > { %4997 = vmatprep.mubr.msk.f32.mxu0 %vm229_vm0, %v5879_v57 }
  0x5c   : > { %4750 = vmatmul.mubr.msk.f32.gmra.mrb[6].mxu1 %vm229_vm0, %v161_v58  ;;  %v4212_v58 = vld [vmem:[%s5579_s29 + $0x25] sm:$0xff] }
  0x5d   : > { %4998 = vmatmul.mubr.msk.f32.gmra.mrb[22].mxu0 %vm229_vm0, %v5890_v59  ;;  %4752 = vmatprep.mubr.msk.f32.mxu1 %vm229_vm0, %v162_v60  ;;  %v4316_v60 = vld [vmem:[%s6577_s1 + $0x118] sm:$0xff] }
  0x5e   : > { %5000 = vmatprep.mubr.msk.f32.mxu0 %vm229_vm0, %v5894_v61 }
  0x60   : > { %4753 = vmatmul.mubr.msk.f32.gmra.mrb[8].mxu1 %vm229_vm0, %v163_v62  ;;  %v4213_v62 = vld [vmem:[%s5579_s29 + $0x2d] sm:$0xff] }
  0x61   : > { %5001 = vmatmul.mubr.msk.f32.gmra.mrb[24].mxu0 %vm229_vm0, %v5904_v63  ;;  %4755 = vmatprep.mubr.msk.f32.mxu1 %vm229_vm0, %v164_v0  ;;  %v4214_v0 = vld [vmem:[%s5579_s29 + $0x35] sm:$0xff] }
  0x62   : > { %5003 = vmatprep.mubr.msk.f32.mxu0 %vm229_vm0, %v5908_v1 }
  0x64   : > { %4756 = vmatmul.mubr.msk.f32.gmra.mrb[10].mxu1 %vm229_vm0, %v165_v2  ;;  %v6172_v2 = vld [vmem:[%s5579_s29 + $0x9a] sm:$0xff] }
  0x65   : > { %5004 = vmatmul.mubr.msk.f32.gmra.mrb[26].mxu0 %vm229_vm0, %v5918_v3  ;;  %4758 = vmatprep.mubr.msk.f32.mxu1 %vm229_vm0, %v166_v4  ;;  %v6178_v4 = vld [vmem:[%s5579_s29 + $0xa2] sm:$0xff] }
  0x66   : > { %5006 = vmatprep.mubr.msk.f32.mxu0 %vm229_vm0, %v5922_v6 }
  0x68   : > { %4759 = vmatmul.mubr.msk.f32.gmra.mrb[12].mxu1 %vm229_vm0, %v167_v8  ;;  %v6187_v8 = vld [vmem:[%s5579_s29 + $0xaa] sm:$0xff] }
  0x69   : > { %5007 = vmatmul.mubr.msk.f32.gmra.mrb[28].mxu0 %vm229_vm0, %v5932_v9  ;;  %4761 = vmatprep.mubr.msk.f32.mxu1 %vm229_vm0, %v168_v10  ;;  %v6192_v10 = vld [vmem:[%s5579_s29 + $0xb2] sm:$0xff] }
  0x6a   : > { %5009 = vmatprep.mubr.msk.f32.mxu0 %vm229_vm0, %v5936_v13 }
  0x6c   : > { %4762 = vmatmul.mubr.msk.f32.gmra.mrb[14].mxu1 %vm229_vm0, %v169_v16  ;;  %v6201_v16 = vld [vmem:[%s5579_s29 + $0xba] sm:$0xff] }
  0x6d   : > { %5010 = vmatmul.mubr.msk.f32.gmra.mrb[30].mxu0 %vm229_vm0, %v5946_v18  ;;  %4764 = vmatprep.mubr.msk.f32.mxu1 %vm229_vm0, %v170_v20  ;;  %v6206_v20 = vld [vmem:[%s5579_s29 + $0xc2] sm:$0xff] }
  0x6e   : > { %5020 = vmatprep.mubr.msk.f32.mxu0 %vm229_vm0, %v5715_v5  ;;  %v173_v5 = vld [vmem:[%s5579_s29 + $0x98] sm:$0xff] }
  0x70   : > { %4765 = vmatmul.mubr.msk.f32.gmra.mrb[16].mxu1 %vm229_vm0, %v171_v26  ;;  %v4221_v26 = vld [vmem:[%s5579_s29 + $0x6d] sm:$0xff] }
  0x71   : > { %5021 = vmatmul.mubr.msk.f32.vlgmr.msra.gmra.mrb[0].mxu0 %vm229_vm0, %v5731_v11  ;;  %4767 = vmatprep.mubr.msk.f32.mxu1 %vm229_vm0, %v172_v28  ;;  %v175_v11 = vld [vmem:[%s5579_s29 + $0xa8] sm:$0xff]  ;;  %v6220_v28 = vld [vmem:[%s5579_s29 + $0xd2] sm:$0xff] }
  0x72   : > { %5239 = vmatpush3.bf16.msra.mxu0 %v5737_v15  ;;  %5023 = vmatprep.mubr.msk.f32.mxu0 %vm229_vm0, %v5735_v14  ;;  %v176_v15 = vld [vmem:[%s5579_s29 + $0xb0] sm:$0xff]  ;;  %v177_v14 = vld [vmem:[%s5579_s29 + $0xb8] sm:$0xff] }
  0x73   : > { %5241 = vmatprep.subr.bf16.mxu0 %v5240_v30 }
  0x74   : > { %4768 = vmatmul.mubr.msk.f32.gmra.mrb[18].mxu1 %vm229_vm0, %v173_v5  ;;  %v6234_v5 = vld [vmem:[%s5579_s29 + $0xe2] sm:$0xff] }
  0x75   : > { %5024 = vmatmul.mubr.msk.f32.gmra.mrb[2].mxu0 %vm229_vm0, %v5747_v17  ;;  %4770 = vmatprep.mubr.msk.f32.mxu1 %vm229_vm0, %v174_v36  ;;  %v178_v17 = vld [vmem:[%s5579_s29 + $0xc0] sm:$0xff] }
  0x76   : > { %5026 = vmatprep.mubr.msk.f32.mxu0 %vm229_vm0, %v5751_v19  ;;  %5243 = vmatpush3.bf16.msra.mxu0 %v5240_v30  ;;  %v179_v19 = vld [vmem:[%s5579_s29 + $0xc8] sm:$0xff]  ;;  %v4222_v30 = vld [vmem:[%s5579_s29 + $0x75] sm:$0xff] }
  0x77   : > { %5245 = vmatprep.subr.bf16.mxu0 %v5978_v38  ;;  %v4224_v36 = vld [vmem:[%s5579_s29 + $0x85] sm:$0xff] }
  0x78   : > { %4771 = vmatmul.mubr.msk.f32.gmra.mrb[20].mxu1 %vm229_vm0, %v175_v11  ;;  %v4225_v11 = vld [vmem:[%s5579_s29 + $0x8d] sm:$0xff] }
  0x79   : > { %5027 = vmatmul.mubr.msk.f32.gmra.mrb[4].mxu0 %vm229_vm0, %v5762_v21  ;;  %4773 = vmatprep.mubr.msk.f32.mxu1 %vm229_vm0, %v176_v15  ;;  %v180_v21 = vld [vmem:[%s5579_s29 + $0xd0] sm:$0xff] }
  0x7a   : > { %5029 = vmatprep.mubr.msk.f32.mxu0 %vm229_vm0, %v5766_v23  ;;  %v181_v23 = vld [vmem:[%s5579_s29 + $0xd8] sm:$0xff] }
  0x7b   : > { %v6248_v15 = vld [vmem:[%s5579_s29 + $0xf2] sm:$0xff] }
  0x7c   : > { %4774 = vmatmul.mubr.msk.f32.gmra.mrb[22].mxu1 %vm229_vm0, %v177_v14  ;;  %v4226_v14 = vld [vmem:[%s5579_s29 + $0x95] sm:$0xff] }
  0x7d   : > { %5030 = vmatmul.mubr.msk.f32.gmra.mrb[6].mxu0 %vm229_vm0, %v5776_v25  ;;  %4776 = vmatprep.mubr.msk.f32.mxu1 %vm229_vm0, %v178_v17  ;;  %v182_v25 = vld [vmem:[%s5579_s29 + $0xe0] sm:$0xff] }
  0x7e   : > { %5032 = vmatprep.mubr.msk.f32.mxu0 %vm229_vm0, %v5780_v27  ;;  %v183_v27 = vld [vmem:[%s5579_s29 + $0xe8] sm:$0xff]  ;;  %v6257_v17 = vld [vmem:[%s5579_s29 + $0xfa] sm:$0xff] }
  0x80   : > { %4777 = vmatmul.mubr.msk.f32.gmra.mrb[24].mxu1 %vm229_vm0, %v179_v19  ;;  %v4227_v19 = vld [vmem:[%s5579_s29 + $0x9d] sm:$0xff] }
  0x81   : > { %5033 = vmatmul.mubr.msk.f32.gmra.mrb[8].mxu0 %vm229_vm0, %v5790_v29  ;;  %4779 = vmatprep.mubr.msk.f32.mxu1 %vm229_vm0, %v180_v21  ;;  %v184_v29 = vld [vmem:[%s5579_s29 + $0xf0] sm:$0xff]  ;;  %v4228_v21 = vld [vmem:[%s5579_s29 + $0xa5] sm:$0xff] }
  0x82   : > { %5035 = vmatprep.mubr.msk.f32.mxu0 %vm229_vm0, %v5794_v31  ;;  %v185_v31 = vld [vmem:[%s5579_s29 + $0xf8] sm:$0xff] }
  0x84   : > { %4780 = vmatmul.mubr.msk.f32.gmra.mrb[26].mxu1 %vm229_vm0, %v181_v23  ;;  %v4229_v23 = vld [vmem:[%s5579_s29 + $0xad] sm:$0xff] }
  0x85   : > { %5036 = vmatmul.mubr.msk.f32.gmra.mrb[10].mxu0 %vm229_vm0, %v5804_v33  ;;  %4782 = vmatprep.mubr.msk.f32.mxu1 %vm229_vm0, %v182_v25  ;;  %v3867_v33 = vld [vmem:[%s5579_s29 + $0x2] sm:$0xff]  ;;  %v4230_v25 = vld [vmem:[%s5579_s29 + $0xb5] sm:$0xff] }
  0x86   : > { %5038 = vmatprep.mubr.msk.f32.mxu0 %vm229_vm0, %v5808_v35  ;;  %v3970_v35 = vld [vmem:[%s6577_s1 + $0x70] sm:$0xff] }
  0x87   : > { %v5208_v41 = vpack.c.bf16 %v3971_v40, %v3970_v35  ;;  %v4236_v35 = vld [vmem:[%s5579_s29 + $0xe5] sm:$0xff]  ;;  %v4238_v40 = vld [vmem:[%s5579_s29 + $0xf5] sm:$0xff] }
  0x88   : > { %4783 = vmatmul.mubr.msk.f32.gmra.mrb[28].mxu1 %vm229_vm0, %v183_v27  ;;  %v4231_v27 = vld [vmem:[%s5579_s29 + $0xbd] sm:$0xff] }
  0x89   : > { %5039 = vmatmul.mubr.msk.f32.gmra.mrb[12].mxu0 %vm229_vm0, %v5818_v37  ;;  %4785 = vmatprep.mubr.msk.f32.mxu1 %vm229_vm0, %v184_v29  ;;  %v3868_v37 = vld [vmem:[%s5579_s29 + $0xa] sm:$0xff] }
  0x8a   : > { %5041 = vmatprep.mubr.msk.f32.mxu0 %vm229_vm0, %v5822_v39  ;;  %v6043_v39 = vld [vmem:[%s5579_s29 + $0x12] sm:$0xff]  ;;  %v4232_v29 = vld [vmem:[%s5579_s29 + $0xc5] sm:$0xff] }
  0x8c   : > { %4786 = vmatmul.mubr.msk.f32.gmra.mrb[30].mxu1 %vm229_vm0, %v185_v31  ;;  %v4234_v31 = vld [vmem:[%s5579_s29 + $0xd5] sm:$0xff] }
  0x8d   : > { %5042 = vmatmul.mubr.msk.f32.gmra.mrb[14].mxu0 %vm229_vm0, %v5838_v43  ;;  %4796 = vmatprep.mubr.msk.f32.mxu1 %vm229_vm0, %v3867_v33  ;;  %v6057_v43 = vld [vmem:[%s5579_s29 + $0x22] sm:$0xff] }
  0x8e   : > { %5044 = vmatprep.mubr.msk.f32.mxu0 %vm229_vm0, %v5842_v45  ;;  %v6071_v45 = vld [vmem:[%s5579_s29 + $0x32] sm:$0xff]  ;;  %v4235_v33 = vld [vmem:[%s5579_s29 + $0xdd] sm:$0xff] }
  0x90   : > { %4797 = vmatmul.mubr.msk.f32.vlgmr.msra.gmra.mrb[0].mxu1 %vm229_vm0, %v3868_v37  ;;  %v4239_v37 = vld [vmem:[%s5579_s29 + $0xfd] sm:$0xff] }
  0x91   : > { %5045 = vmatmul.mubr.msk.f32.gmra.mrb[16].mxu0 %vm229_vm0, %v5859_v50  ;;  %5207 = vmatpush3.bf16.msra.mxu1 %v5865_v53  ;;  %v6109_v50 = vld [vmem:[%s5579_s29 + $0x5a] sm:$0xff]  ;;  %v6128_v53 = vld [vmem:[%s5579_s29 + $0x72] sm:$0xff] }
  0x92   : > { %4799 = vmatprep.mubr.msk.f32.mxu1 %vm229_vm0, %v6043_v39  ;;  %5047 = vmatprep.mubr.msk.f32.mxu0 %vm229_vm0, %v5863_v52  ;;  %v6123_v52 = vld [vmem:[%s5579_s29 + $0x6a] sm:$0xff] }
  0x93   : > { %5209 = vmatprep.subr.bf16.mxu1 %v5208_v41 }
  0x94   : > { %4800 = vmatmul.mubr.msk.f32.gmra.mrb[2].mxu1 %vm229_vm0, %v6050_v42 }
  0x95   : > { %5048 = vmatmul.mubr.msk.f32.gmra.mrb[18].mxu0 %vm229_vm0, %v5875_v55  ;;  %4802 = vmatprep.mubr.msk.f32.mxu1 %vm229_vm0, %v6057_v43  ;;  %v6138_v55 = vld [vmem:[%s5579_s29 + $0x7a] sm:$0xff] }
  0x96   : > { %5050 = vmatprep.mubr.msk.f32.mxu0 %vm229_vm0, %v5879_v57  ;;  %5211 = vmatpush3.bf16.msra.mxu1 %v5208_v41  ;;  %v6143_v57 = vld [vmem:[%s5579_s29 + $0x82] sm:$0xff]  ;;  %v4241_v41 = vld [vmem:[%s5579_s29 + $0x10d] sm:$0xff] }
  0x97   : > { %5252 = vmatprep.subr.bf16.mxu1 %v5581_v7 }
  0x98   : > { %4803 = vmatmul.mubr.msk.f32.gmra.mrb[4].mxu1 %vm229_vm0, %v6066_v44 }
  0x99   : > { %5051 = vmatmul.mubr.msk.f32.gmra.mrb[20].mxu0 %vm229_vm0, %v5890_v59  ;;  %4805 = vmatprep.mubr.msk.f32.mxu1 %vm229_vm0, %v6071_v45  ;;  %v4315_v59 = vld [vmem:[%s6577_s1 + $0x110] sm:$0xff] }
  0x9a   : > { %5053 = vmatprep.mubr.msk.f32.mxu0 %vm229_vm0, %v5894_v61  ;;  %v6158_v61 = vld [vmem:[%s5579_s29 + $0x8a] sm:$0xff] }
  0x9c   : > { %4806 = vmatmul.mubr.msk.f32.gmra.mrb[6].mxu1 %vm229_vm0, %v6081_v46 }
  0x9d   : > { %5054 = vmatmul.mubr.msk.f32.gmra.mrb[22].mxu0 %vm229_vm0, %v5904_v63  ;;  %4808 = vmatprep.mubr.msk.f32.mxu1 %vm229_vm0, %v6086_v47  ;;  %v6163_v63 = vld [vmem:[%s5579_s29 + $0x92] sm:$0xff] }
  0x9e   : > { %5056 = vmatprep.mubr.msk.f32.mxu0 %vm229_vm0, %v5908_v1  ;;  %v5248_v1 = vpack.c.bf16 %v4316_v60, %v4315_v59  ;;  %v4295_v59 = vld [vmem:[%s5579_s29 + $0x96] sm:$0xff]  ;;  %v3967_v60 = vld [vmem:[%s5579_s29 + $0x10a] sm:$0xff] }
  0xa0   : > { %4809 = vmatmul.mubr.msk.f32.gmra.mrb[8].mxu1 %vm229_vm0, %v6095_v48 }
  0xa1   : > { %5057 = vmatmul.mubr.msk.f32.gmra.mrb[24].mxu0 %vm229_vm0, %v5918_v3  ;;  %4811 = vmatprep.mubr.msk.f32.mxu1 %vm229_vm0, %v6100_v49  ;;  %v4215_v3 = vld [vmem:[%s5579_s29 + $0x3d] sm:$0xff] }
  0xa2   : > { %5059 = vmatprep.mubr.msk.f32.mxu0 %vm229_vm0, %v5922_v6  ;;  %v4216_v6 = vld [vmem:[%s5579_s29 + $0x45] sm:$0xff] }
  0xa4   : > { %4812 = vmatmul.mubr.msk.f32.gmra.mrb[10].mxu1 %vm229_vm0, %v6109_v50 }
  0xa5   : > { %5060 = vmatmul.mubr.msk.f32.gmra.mrb[26].mxu0 %vm229_vm0, %v5932_v9  ;;  %4814 = vmatprep.mubr.msk.f32.mxu1 %vm229_vm0, %v6114_v51  ;;  %v4217_v9 = vld [vmem:[%s5579_s29 + $0x4d] sm:$0xff] }
  0xa6   : > { %5062 = vmatprep.mubr.msk.f32.mxu0 %vm229_vm0, %v5936_v13  ;;  %v4218_v13 = vld [vmem:[%s5579_s29 + $0x55] sm:$0xff] }
  0xa8   : > { %4815 = vmatmul.mubr.msk.f32.gmra.mrb[12].mxu1 %vm229_vm0, %v6123_v52 }
  0xa9   : > { %5063 = vmatmul.mubr.msk.f32.gmra.mrb[28].mxu0 %vm229_vm0, %v5946_v18  ;;  %4817 = vmatprep.mubr.msk.f32.mxu1 %vm229_vm0, %v6128_v53  ;;  %v4219_v18 = vld [vmem:[%s5579_s29 + $0x5d] sm:$0xff] }
  0xaa   : > { %5065 = vmatprep.mubr.msk.f32.mxu0 %vm229_vm0, %v4173_v54  ;;  %v4291_v54 = vld [vmem:[%s5579_s29 + $0x76] sm:$0xff] }
  0xac   : > { %4818 = vmatmul.mubr.msk.f32.gmra.mrb[14].mxu1 %vm229_vm0, %v6138_v55 }
  0xad   : > { %5066 = vmatmul.mubr.msk.f32.gmra.mrb[30].mxu0 %vm229_vm0, %v4174_v56  ;;  %4820 = vmatprep.mubr.msk.f32.mxu1 %vm229_vm0, %v6143_v57  ;;  %v4293_v56 = vld [vmem:[%s5579_s29 + $0x86] sm:$0xff] }
  0xae   : > { %5076 = vmatprep.mubr.msk.f32.mxu0 %vm229_vm0, %v4212_v58  ;;  %v3966_v58 = vld [vmem:[%s5579_s29 + $0x102] sm:$0xff] }
  0xb0   : > { %4821 = vmatmul.mubr.msk.f32.gmra.mrb[16].mxu1 %vm229_vm0, %v6158_v61 }
  0xb1   : > { %5077 = vmatmul.mubr.msk.f32.vlgmr.msra.gmra.mrb[0].mxu0 %vm229_vm0, %v4213_v62  ;;  %4823 = vmatprep.mubr.msk.f32.mxu1 %vm229_vm0, %v6163_v63  ;;  %v4021_v62 = vld [vmem:[%s5579_s29 + $0x93] sm:$0xff] }
  0xb2   : > { %5247 = vmatpush3.bf16.msra.mxu0 %v5978_v38  ;;  %5079 = vmatprep.mubr.msk.f32.mxu0 %vm229_vm0, %v4214_v0  ;;  %v6243_v38 = vld [vmem:[%s5579_s29 + $0xea] sm:$0xff]  ;;  %v4022_v0 = vld [vmem:[%s5579_s29 + $0x9b] sm:$0xff] }
  0xb3   : > { %5249 = vmatprep.subr.bf16.mxu0 %v5248_v1 }
  0xb4   : > { %4824 = vmatmul.mubr.msk.f32.gmra.mrb[18].mxu1 %vm229_vm0, %v6172_v2 }
  0xb5   : > { %5080 = vmatmul.mubr.msk.f32.gmra.mrb[2].mxu0 %vm229_vm0, %v4215_v3  ;;  %4826 = vmatprep.mubr.msk.f32.mxu1 %vm229_vm0, %v6178_v4  ;;  %v4299_v3 = vld [vmem:[%s5579_s29 + $0xb6] sm:$0xff] }
  0xb6   : > { %5082 = vmatprep.mubr.msk.f32.mxu0 %vm229_vm0, %v4216_v6  ;;  %5251 = vmatpush3.bf16.msra.mxu0 %v5248_v1  ;;  %v4298_v1 = vld [vmem:[%s5579_s29 + $0xae] sm:$0xff]  ;;  %v4300_v6 = vld [vmem:[%s5579_s29 + $0xbe] sm:$0xff] }
  0xb8   : > { %4827 = vmatmul.mubr.msk.f32.gmra.mrb[20].mxu1 %vm229_vm0, %v6187_v8 }
  0xb9   : > { %5083 = vmatmul.mubr.msk.f32.gmra.mrb[4].mxu0 %vm229_vm0, %v4217_v9  ;;  %4829 = vmatprep.mubr.msk.f32.mxu1 %vm229_vm0, %v6192_v10  ;;  %v4301_v9 = vld [vmem:[%s5579_s29 + $0xc6] sm:$0xff] }
  0xba   : > { %5085 = vmatprep.mubr.msk.f32.mxu0 %vm229_vm0, %v4218_v13  ;;  %v4302_v13 = vld [vmem:[%s5579_s29 + $0xce] sm:$0xff] }
  0xbc   : > { %4830 = vmatmul.mubr.msk.f32.gmra.mrb[22].mxu1 %vm229_vm0, %v6201_v16 }
  0xbd   : > { %5086 = vmatmul.mubr.msk.f32.gmra.mrb[6].mxu0 %vm229_vm0, %v4219_v18  ;;  %4832 = vmatprep.mubr.msk.f32.mxu1 %vm229_vm0, %v6206_v20  ;;  %v4303_v18 = vld [vmem:[%s5579_s29 + $0xd6] sm:$0xff] }
  0xbe   : > { %5088 = vmatprep.mubr.msk.f32.mxu0 %vm229_vm0, %v4220_v22  ;;  %v4304_v22 = vld [vmem:[%s5579_s29 + $0xde] sm:$0xff] }
  0xc0   : > { %4833 = vmatmul.mubr.msk.f32.gmra.mrb[24].mxu1 %vm229_vm0, %v6215_v24 }
  0xc1   : > { %5089 = vmatmul.mubr.msk.f32.gmra.mrb[8].mxu0 %vm229_vm0, %v4221_v26  ;;  %4835 = vmatprep.mubr.msk.f32.mxu1 %vm229_vm0, %v6220_v28  ;;  %v4305_v26 = vld [vmem:[%s5579_s29 + $0xe6] sm:$0xff] }
  0xc2   : > { %5091 = vmatprep.mubr.msk.f32.mxu0 %vm229_vm0, %v4222_v30  ;;  %v4306_v30 = vld [vmem:[%s5579_s29 + $0xee] sm:$0xff] }
  0xc4   : > { %4836 = vmatmul.mubr.msk.f32.gmra.mrb[26].mxu1 %vm229_vm0, %v6229_v32 }
  0xc5   : > { %5092 = vmatmul.mubr.msk.f32.gmra.mrb[10].mxu0 %vm229_vm0, %v4223_v34  ;;  %4838 = vmatprep.mubr.msk.f32.mxu1 %vm229_vm0, %v6234_v5  ;;  %v4307_v34 = vld [vmem:[%s5579_s29 + $0xf6] sm:$0xff] }
  0xc6   : > { %5094 = vmatprep.mubr.msk.f32.mxu0 %vm229_vm0, %v4224_v36  ;;  %v4308_v36 = vld [vmem:[%s5579_s29 + $0xfe] sm:$0xff] }
  0xc8   : > { %4839 = vmatmul.mubr.msk.f32.gmra.mrb[28].mxu1 %vm229_vm0, %v6243_v38 }
  0xc9   : > { %5095 = vmatmul.mubr.msk.f32.gmra.mrb[12].mxu0 %vm229_vm0, %v4225_v11  ;;  %4841 = vmatprep.mubr.msk.f32.mxu1 %vm229_vm0, %v6248_v15  ;;  %v4309_v11 = vld [vmem:[%s5579_s29 + $0x106] sm:$0xff] }
  0xca   : > { %5097 = vmatprep.mubr.msk.f32.mxu0 %vm229_vm0, %v4226_v14  ;;  %v4310_v14 = vld [vmem:[%s5579_s29 + $0x10e] sm:$0xff] }
  0xcc   : > { %4842 = vmatmul.mubr.msk.f32.gmra.mrb[30].mxu1 %vm229_vm0, %v6257_v17 }
  0xcd   : > { %5098 = vmatmul.mubr.msk.f32.gmra.mrb[14].mxu0 %vm229_vm0, %v4227_v19  ;;  %4852 = vmatprep.mubr.msk.f32.mxu1 %vm229_vm0, %v6043_v39  ;;  %v4240_v39 = vld [vmem:[%s5579_s29 + $0x105] sm:$0xff]  ;;  %v4311_v19 = vld [vmem:[%s5579_s29 + $0x116] sm:$0xff] }
  0xce   : > { %5100 = vmatprep.mubr.msk.f32.mxu0 %vm229_vm0, %v4228_v21  ;;  %v4036_v21 = vld [vmem:[%s5579_s29 + $0x10b] sm:$0xff] }
  0xd0   : > { %4853 = vmatmul.mubr.msk.f32.vlgmr.msra.gmra.mrb[0].mxu1 %vm229_vm0, %v6050_v42  ;;  %v4242_v42 = vld [vmem:[%s5579_s29 + $0x115] sm:$0xff] }
  0xd1   : > { %5101 = vmatmul.mubr.msk.f32.gmra.mrb[16].mxu0 %vm229_vm0, %v4229_v23  ;;  %5254 = vmatpush3.bf16.msra.mxu1 %v5581_v7  ;;  %v4233_v7 = vld [vmem:[%s5579_s29 + $0xcd] sm:$0xff]  ;;  %v4312_v23 = vld [vmem:[%s5579_s29 + $0x11e] sm:$0xff] }
  0xd2   : > { %4855 = vmatprep.mubr.msk.f32.mxu1 %vm229_vm0, %v6057_v43  ;;  %5103 = vmatprep.mubr.msk.f32.mxu0 %vm229_vm0, %v4230_v25  ;;  %v4243_v43 = vld [vmem:[%s5579_s29 + $0x11d] sm:$0xff] }
  0xd3   : > { %5253 = vmatprep.subr.bf16.mxu1 %v5590_v12 }
  0xd4   : > { %4856 = vmatmul.mubr.msk.f32.gmra.mrb[2].mxu1 %vm229_vm0, %v6066_v44  ;;  %v4281_v44 = vld [vmem:[%s5579_s29 + $0x26] sm:$0xff] }
  0xd5   : > { %5104 = vmatmul.mubr.msk.f32.gmra.mrb[18].mxu0 %vm229_vm0, %v4231_v27  ;;  %4858 = vmatprep.mubr.msk.f32.mxu1 %vm229_vm0, %v6071_v45  ;;  %v4282_v45 = vld [vmem:[%s5579_s29 + $0x2e] sm:$0xff] }
  0xd6   : > { %5106 = vmatprep.mubr.msk.f32.mxu0 %vm229_vm0, %v4232_v29  ;;  %5255 = vmatpush3.bf16.msra.mxu1 %v5590_v12  ;;  %v4237_v12 = vld [vmem:[%s5579_s29 + $0xed] sm:$0xff] }
  0xd8   : > { %4859 = vmatmul.mubr.msk.f32.gmra.mrb[4].mxu1 %vm229_vm0, %v6081_v46  ;;  %v4283_v46 = vld [vmem:[%s5579_s29 + $0x36] sm:$0xff] }
  0xd9   : > { %5107 = vmatmul.mubr.msk.f32.gmra.mrb[20].mxu0 %vm229_vm0, %v4233_v7  ;;  %4861 = vmatprep.mubr.msk.f32.mxu1 %vm229_vm0, %v6086_v47  ;;  %v4284_v47 = vld [vmem:[%s5579_s29 + $0x3e] sm:$0xff] }
  0xda   : > { %5109 = vmatprep.mubr.msk.f32.mxu0 %vm229_vm0, %v4234_v31 }
  0xdc   : > { %4862 = vmatmul.mubr.msk.f32.gmra.mrb[6].mxu1 %vm229_vm0, %v6095_v48  ;;  %v4285_v48 = vld [vmem:[%s5579_s29 + $0x46] sm:$0xff] }
  0xdd   : > { %5110 = vmatmul.mubr.msk.f32.gmra.mrb[22].mxu0 %vm229_vm0, %v4235_v33  ;;  %4864 = vmatprep.mubr.msk.f32.mxu1 %vm229_vm0, %v6100_v49  ;;  %v4286_v49 = vld [vmem:[%s5579_s29 + $0x4e] sm:$0xff] }
  0xde   : > { %5112 = vmatprep.mubr.msk.f32.mxu0 %vm229_vm0, %v4236_v35 }
  0xe0   : > { %4865 = vmatmul.mubr.msk.f32.gmra.mrb[8].mxu1 %vm229_vm0, %v6109_v50  ;;  %v4287_v50 = vld [vmem:[%s5579_s29 + $0x56] sm:$0xff] }
  0xe1   : > { %5113 = vmatmul.mubr.msk.f32.gmra.mrb[24].mxu0 %vm229_vm0, %v4237_v12  ;;  %4867 = vmatprep.mubr.msk.f32.mxu1 %vm229_vm0, %v6114_v51  ;;  %v4288_v51 = vld [vmem:[%s5579_s29 + $0x5e] sm:$0xff] }
  0xe2   : > { %5115 = vmatprep.mubr.msk.f32.mxu0 %vm229_vm0, %v4238_v40 }
  0xe4   : > { %4868 = vmatmul.mubr.msk.f32.gmra.mrb[10].mxu1 %vm229_vm0, %v6123_v52  ;;  %v4289_v52 = vld [vmem:[%s5579_s29 + $0x66] sm:$0xff] }
  0xe5   : > { %5116 = vmatmul.mubr.msk.f32.gmra.mrb[26].mxu0 %vm229_vm0, %v4239_v37  ;;  %4870 = vmatprep.mubr.msk.f32.mxu1 %vm229_vm0, %v6128_v53  ;;  %v4290_v53 = vld [vmem:[%s5579_s29 + $0x6e] sm:$0xff] }
  0xe6   : > { %5118 = vmatprep.mubr.msk.f32.mxu0 %vm229_vm0, %v4240_v39 }
  0xe8   : > { %4871 = vmatmul.mubr.msk.f32.gmra.mrb[12].mxu1 %vm229_vm0, %v6138_v55  ;;  %v4292_v55 = vld [vmem:[%s5579_s29 + $0x7e] sm:$0xff] }
  0xe9   : > { %5119 = vmatmul.mubr.msk.f32.gmra.mrb[28].mxu0 %vm229_vm0, %v4241_v41  ;;  %4873 = vmatprep.mubr.msk.f32.mxu1 %vm229_vm0, %v6143_v57  ;;  %v4294_v57 = vld [vmem:[%s5579_s29 + $0x8e] sm:$0xff] }
  0xea   : > { %5121 = vmatprep.mubr.msk.f32.mxu0 %vm229_vm0, %v4242_v42 }
  0xec   : > { %4874 = vmatmul.mubr.msk.f32.gmra.mrb[14].mxu1 %vm229_vm0, %v6158_v61  ;;  %v4296_v61 = vld [vmem:[%s5579_s29 + $0x9e] sm:$0xff] }
  0xed   : > { %5122 = vmatmul.mubr.msk.f32.gmra.mrb[30].mxu0 %vm229_vm0, %v4243_v43  ;;  %4876 = vmatprep.mubr.msk.f32.mxu1 %vm229_vm0, %v6163_v63  ;;  %v4297_v63 = vld [vmem:[%s5579_s29 + $0xa6] sm:$0xff] }
  0xee   : > { %5132 = vmatprep.mubr.msk.f32.mxu0 %vm229_vm0, %v4281_v44 }
  0xf0   : > { %4877 = vmatmul.mubr.msk.f32.gmra.mrb[16].mxu1 %vm229_vm0, %v6172_v2  ;;  %v4023_v2 = vld [vmem:[%s5579_s29 + $0xa3] sm:$0xff] }
  0xf1   : > { %5133 = vmatmul.mubr.msk.f32.vlgmr.msra.gmra.mrb[0].mxu0 %vm229_vm0, %v4282_v45  ;;  %4879 = vmatprep.mubr.msk.f32.mxu1 %vm229_vm0, %v6178_v4  ;;  %v4024_v4 = vld [vmem:[%s5579_s29 + $0xab] sm:$0xff] }
  0xf2   : > { %5135 = vmatprep.mubr.msk.f32.mxu0 %vm229_vm0, %v4283_v46 }
  0xf4   : > { %4880 = vmatmul.mubr.msk.f32.gmra.mrb[18].mxu1 %vm229_vm0, %v6187_v8  ;;  %v4025_v8 = vld [vmem:[%s5579_s29 + $0xb3] sm:$0xff] }
  0xf5   : > { %5136 = vmatmul.mubr.msk.f32.gmra.mrb[2].mxu0 %vm229_vm0, %v4284_v47  ;;  %4882 = vmatprep.mubr.msk.f32.mxu1 %vm229_vm0, %v6192_v10  ;;  %v4026_v10 = vld [vmem:[%s5579_s29 + $0xbb] sm:$0xff] }
  0xf6   : > { %5138 = vmatprep.mubr.msk.f32.mxu0 %vm229_vm0, %v4285_v48  ;;  %v6468_v47 = vld [vmem:[%s6578_s2] ss:$0 sm:$0xff] }
  0xf8   : > { %4883 = vmatmul.mubr.msk.f32.gmra.mrb[20].mxu1 %vm229_vm0, %v6201_v16  ;;  %v4027_v16 = vld [vmem:[%s5579_s29 + $0xc3] sm:$0xff] }
  0xf9   : > { %5139 = vmatmul.mubr.msk.f32.gmra.mrb[4].mxu0 %vm229_vm0, %v4286_v49  ;;  %4885 = vmatprep.mubr.msk.f32.mxu1 %vm229_vm0, %v6206_v20  ;;  %v4028_v20 = vld [vmem:[%s5579_s29 + $0xcb] sm:$0xff] }
  0xfa   : > { %5141 = vmatprep.mubr.msk.f32.mxu0 %vm229_vm0, %v4287_v50 }
  0xfc   : > { %4886 = vmatmul.mubr.msk.f32.gmra.mrb[22].mxu1 %vm229_vm0, %v6215_v24  ;;  %v4029_v24 = vld [vmem:[%s5579_s29 + $0xd3] sm:$0xff] }
  0xfd   : > { %5142 = vmatmul.mubr.msk.f32.gmra.mrb[6].mxu0 %vm229_vm0, %v4288_v51  ;;  %4888 = vmatprep.mubr.msk.f32.mxu1 %vm229_vm0, %v6220_v28  ;;  %v4030_v28 = vld [vmem:[%s5579_s29 + $0xdb] sm:$0xff] }
  0xfe   : > { %5144 = vmatprep.mubr.msk.f32.mxu0 %vm229_vm0, %v4289_v52 }
 0x100   : > { %4889 = vmatmul.mubr.msk.f32.gmra.mrb[24].mxu1 %vm229_vm0, %v6229_v32  ;;  %v4031_v32 = vld [vmem:[%s5579_s29 + $0xe3] sm:$0xff] }
 0x101   : > { %5145 = vmatmul.mubr.msk.f32.gmra.mrb[8].mxu0 %vm229_vm0, %v4290_v53  ;;  %4891 = vmatprep.mubr.msk.f32.mxu1 %vm229_vm0, %v6234_v5  ;;  %v4032_v5 = vld [vmem:[%s5579_s29 + $0xeb] sm:$0xff] }
 0x102   : > { %5147 = vmatprep.mubr.msk.f32.mxu0 %vm229_vm0, %v4291_v54 }
 0x104   : > { %4892 = vmatmul.mubr.msk.f32.gmra.mrb[26].mxu1 %vm229_vm0, %v6243_v38  ;;  %v4033_v38 = vld [vmem:[%s5579_s29 + $0xf3] sm:$0xff] }
 0x105   : > { %5148 = vmatmul.mubr.msk.f32.gmra.mrb[10].mxu0 %vm229_vm0, %v4292_v55  ;;  %4894 = vmatprep.mubr.msk.f32.mxu1 %vm229_vm0, %v6248_v15  ;;  %v4034_v15 = vld [vmem:[%s5579_s29 + $0xfb] sm:$0xff] }
 0x106   : > { %5150 = vmatprep.mubr.msk.f32.mxu0 %vm229_vm0, %v4293_v56 }
 0x108   : > { %4895 = vmatmul.mubr.msk.f32.gmra.mrb[28].mxu1 %vm229_vm0, %v6257_v17  ;;  %v4035_v17 = vld [vmem:[%s5579_s29 + $0x103] sm:$0xff]  ;;  %s3763_s29 = sshll.u32 %s6581_s17, 3 }
 0x109   : > { %5151 = vmatmul.mubr.msk.f32.gmra.mrb[12].mxu0 %vm229_vm0, %v4294_v57  ;;  %4897 = vmatprep.mubr.msk.f32.mxu1 %vm229_vm0, %v3966_v58  ;;  %s6473_s13 = scalar_lea.vmem %s6579_s3, %s3763_s29 }
 0x10a   : > { %5153 = vmatprep.mubr.msk.f32.mxu0 %vm229_vm0, %v4295_v59 }
 0x10c   : > { %4898 = vmatmul.mubr.msk.f32.gmra.mrb[30].mxu1 %vm229_vm0, %v3967_v60 }
 0x10d   : > { %5154 = vmatmul.mubr.msk.f32.gmra.mrb[14].mxu0 %vm229_vm0, %v4296_v61  ;;  %4932 = vmatprep.mubr.msk.f32.mxu1 %vm229_vm0, %v4021_v62 }
 0x10e   : > { %5156 = vmatprep.mubr.msk.f32.mxu0 %vm229_vm0, %v4297_v63 }
 0x110   : > { %4933 = vmatmul.mubr.msk.f32.vlgmr.msra.gmra.mrb[16].mxu1 %vm229_vm0, %v4022_v0 }
 0x111   : > { %5157 = vmatmul.mubr.msk.f32.gmra.mrb[16].mxu0 %vm229_vm0, %v4298_v1  ;;  %4935 = vmatprep.mubr.msk.f32.mxu1 %vm229_vm0, %v4023_v2 }
 0x112   : > { %5159 = vmatprep.mubr.msk.f32.mxu0 %vm229_vm0, %v4299_v3 }
 0x114   : > { %4936 = vmatmul.mubr.msk.f32.gmra.mrb[18].mxu1 %vm229_vm0, %v4024_v4 }
 0x115   : > { %5160 = vmatmul.mubr.msk.f32.gmra.mrb[18].mxu0 %vm229_vm0, %v4300_v6  ;;  %4938 = vmatprep.mubr.msk.f32.mxu1 %vm229_vm0, %v4025_v8 }
 0x116   : > { %5162 = vmatprep.mubr.msk.f32.mxu0 %vm229_vm0, %v4301_v9 }
 0x118   : > { %4939 = vmatmul.mubr.msk.f32.gmra.mrb[20].mxu1 %vm229_vm0, %v4026_v10 }
 0x119   : > { %5163 = vmatmul.mubr.msk.f32.gmra.mrb[20].mxu0 %vm229_vm0, %v4302_v13  ;;  %4941 = vmatprep.mubr.msk.f32.mxu1 %vm229_vm0, %v4027_v16 }
 0x11a   : > { %5165 = vmatprep.mubr.msk.f32.mxu0 %vm229_vm0, %v4303_v18 }
 0x11c   : > { %4942 = vmatmul.mubr.msk.f32.gmra.mrb[22].mxu1 %vm229_vm0, %v4028_v20 }
 0x11d   : > { %5166 = vmatmul.mubr.msk.f32.gmra.mrb[22].mxu0 %vm229_vm0, %v4304_v22  ;;  %4944 = vmatprep.mubr.msk.f32.mxu1 %vm229_vm0, %v4029_v24 }
 0x11e   : > { %5168 = vmatprep.mubr.msk.f32.mxu0 %vm229_vm0, %v4305_v26 }
 0x120   : > { %4945 = vmatmul.mubr.msk.f32.gmra.mrb[24].mxu1 %vm229_vm0, %v4030_v28 }
 0x121   : > { %5169 = vmatmul.mubr.msk.f32.gmra.mrb[24].mxu0 %vm229_vm0, %v4306_v30  ;;  %4947 = vmatprep.mubr.msk.f32.mxu1 %vm229_vm0, %v4031_v32 }
 0x122   : > { %5171 = vmatprep.mubr.msk.f32.mxu0 %vm229_vm0, %v4307_v34 }
 0x124   : > { %4948 = vmatmul.mubr.msk.f32.gmra.mrb[26].mxu1 %vm229_vm0, %v4032_v5 }
 0x125   : > { %5172 = vmatmul.mubr.msk.f32.gmra.mrb[26].mxu0 %vm229_vm0, %v4308_v36  ;;  %4950 = vmatprep.mubr.msk.f32.mxu1 %vm229_vm0, %v4033_v38 }
 0x126   : > { %5174 = vmatprep.mubr.msk.f32.mxu0 %vm229_vm0, %v4309_v11 }
 0x128   : > { %4951 = vmatmul.mubr.msk.f32.gmra.mrb[28].mxu1 %vm229_vm0, %v4034_v15 }
 0x129   : > { %5175 = vmatmul.mubr.msk.f32.gmra.mrb[28].mxu0 %vm229_vm0, %v4310_v14  ;;  %4953 = vmatprep.mubr.msk.f32.mxu1 %vm229_vm0, %v4035_v17 }
 0x12a   : > { %5177 = vmatprep.mubr.msk.f32.mxu0 %vm229_vm0, %v4311_v19 }
 0x12c   : > { %4954 = vmatmul.mubr.msk.f32.gmra.mrb[30].mxu1 %vm229_vm0, %v4036_v21 }
 0x12d   : > { %5178 = vmatmul.mubr.msk.f32.gmra.mrb[30].mxu0 %vm229_vm0, %v4312_v23 }
 0x1a3   : > { %v4854_v25 = vpop.f32.mrb[0].mxu1 }
 0x1a4   : > { %v1465_v27 = vpop.f32.mrb[1].mxu1 }
 0x1a7   : > { %v4857_v29 = vpop.f32.mrb[2].mxu1 }
 0x1a8   : > { %v1475_v7 = vpop.f32.mrb[3].mxu1 }
 0x1ab   : > { %v4860_v31 = vpop.f32.mrb[4].mxu1 }
 0x1ac   : > { %v1485_v33 = vpop.f32.mrb[5].mxu1 }
 0x1af   : > { %v4863_v35 = vpop.f32.mrb[6].mxu1 }
 0x1b0   : > { %v1495_v12 = vpop.f32.mrb[7].mxu1 }
 0x1b3   : > { %v4866_v40 = vpop.f32.mrb[8].mxu1 }
 0x1b4   : > { %v1505_v37 = vpop.f32.mrb[9].mxu1 }
 0x1b7   : > { %v4869_v39 = vpop.f32.mrb[10].mxu1 }
 0x1b8   : > { %v1515_v41 = vpop.f32.mrb[11].mxu1 }
 0x1bb   : > { %v4872_v42 = vpop.f32.mrb[12].mxu1 }
 0x1bc   : > { %v1525_v43 = vpop.f32.mrb[13].mxu1 }
 0x1bf   : > { %v6461_v44 = vpop.f32.mrb[14].mxu1 }
 0x1c0   : > { %v6463_v45 = vpop.f32.mrb[15].mxu1 }
 0x1c4   : > { %v5134_v46 = vpop.f32.mrb[0].mxu0 }
 0x1c5   : > { %v5256_v48 = vadd.f32 %v5134_v46, %v4854_v25  ;;  %v3425_v49 = vpop.f32.mrb[1].mxu0 }
 0x1c6   : > { %v5257_v50 = vadd.f32 %v3425_v49, %v1465_v27 }
 0x1c7   : > { %v3624_v51 = vadd.f32 %v5256_v48, %v6468_v47 }
 0x1c8   : > { %v3623_v52 = vadd.f32 %v5257_v50, %v6468_v47  ;;  %v5137_v53 = vpop.f32.mrb[2].mxu0 }
 0x1c9   : > { %3657 = vst.msk [vmem:[%s6473_s13 + $0x8] sm:$0xff] %vm3655_vm1, %v3624_v51  ;;  %v5258_v54 = vadd.f32 %v5137_v53, %v4857_v29  ;;  %v3435_v55 = vpop.f32.mrb[3].mxu0 }
 0x1ca   : > { %3656 = vst.msk [vmem:[%s6473_s13] sm:$0xff] %vm3655_vm1, %v3623_v52  ;;  %v5259_v56 = vadd.f32 %v3435_v55, %v1475_v7 }
 0x1cb   : > { %v3626_v57 = vadd.f32 %v5258_v54, %v6468_v47 }
 0x1cc   : > { %v3625_v58 = vadd.f32 %v5259_v56, %v6468_v47  ;;  %v5140_v59 = vpop.f32.mrb[4].mxu0 }
 0x1cd   : > { %3659 = vst.msk [vmem:[%s6473_s13 + $0x18] sm:$0xff] %vm3655_vm1, %v3626_v57  ;;  %v5260_v60 = vadd.f32 %v5140_v59, %v4860_v31  ;;  %v3445_v61 = vpop.f32.mrb[5].mxu0 }
 0x1ce   : > { %3658 = vst.msk [vmem:[%s6473_s13 + $0x10] sm:$0xff] %vm3655_vm1, %v3625_v58  ;;  %v5261_v62 = vadd.f32 %v3445_v61, %v1485_v33 }
 0x1cf   : > { %v3628_v63 = vadd.f32 %v5260_v60, %v6468_v47 }
 0x1d0   : > { %v3627_v0 = vadd.f32 %v5261_v62, %v6468_v47  ;;  %v5143_v1 = vpop.f32.mrb[6].mxu0 }
 0x1d1   : > { %3661 = vst.msk [vmem:[%s6473_s13 + $0x28] sm:$0xff] %vm3655_vm1, %v3628_v63  ;;  %v5262_v2 = vadd.f32 %v5143_v1, %v4863_v35  ;;  %v3455_v3 = vpop.f32.mrb[7].mxu0 }
 0x1d2   : > { %3660 = vst.msk [vmem:[%s6473_s13 + $0x20] sm:$0xff] %vm3655_vm1, %v3627_v0  ;;  %v5263_v4 = vadd.f32 %v3455_v3, %v1495_v12 }
 0x1d3   : > { %v3630_v6 = vadd.f32 %v5262_v2, %v6468_v47 }
 0x1d4   : > { %v3629_v8 = vadd.f32 %v5263_v4, %v6468_v47  ;;  %v5146_v9 = vpop.f32.mrb[8].mxu0 }
 0x1d5   : > { %3663 = vst.msk [vmem:[%s6473_s13 + $0x38] sm:$0xff] %vm3655_vm1, %v3630_v6  ;;  %v5264_v10 = vadd.f32 %v5146_v9, %v4866_v40  ;;  %v3465_v13 = vpop.f32.mrb[9].mxu0 }
 0x1d6   : > { %3662 = vst.msk [vmem:[%s6473_s13 + $0x30] sm:$0xff] %vm3655_vm1, %v3629_v8  ;;  %v5265_v16 = vadd.f32 %v3465_v13, %v1505_v37 }
 0x1d7   : > { %v3632_v18 = vadd.f32 %v5264_v10, %v6468_v47 }
 0x1d8   : > { %v3631_v20 = vadd.f32 %v5265_v16, %v6468_v47  ;;  %v5149_v22 = vpop.f32.mrb[10].mxu0 }
 0x1d9   : > { %3665 = vst.msk [vmem:[%s6473_s13 + $0x48] sm:$0xff] %vm3655_vm1, %v3632_v18  ;;  %v5266_v24 = vadd.f32 %v5149_v22, %v4869_v39  ;;  %v3475_v26 = vpop.f32.mrb[11].mxu0 }
 0x1da   : > { %3664 = vst.msk [vmem:[%s6473_s13 + $0x40] sm:$0xff] %vm3655_vm1, %v3631_v20  ;;  %v5267_v28 = vadd.f32 %v3475_v26, %v1515_v41 }
 0x1db   : > { %v3634_v30 = vadd.f32 %v5266_v24, %v6468_v47 }
 0x1dc   : > { %v3633_v32 = vadd.f32 %v5267_v28, %v6468_v47  ;;  %v5152_v34 = vpop.f32.mrb[12].mxu0 }
 0x1dd   : > { %3667 = vst.msk [vmem:[%s6473_s13 + $0x58] sm:$0xff] %vm3655_vm1, %v3634_v30  ;;  %v5268_v5 = vadd.f32 %v5152_v34, %v4872_v42  ;;  %v3485_v36 = vpop.f32.mrb[13].mxu0 }
 0x1de   : > { %3666 = vst.msk [vmem:[%s6473_s13 + $0x50] sm:$0xff] %vm3655_vm1, %v3633_v32  ;;  %v5269_v38 = vadd.f32 %v3485_v36, %v1525_v43 }
 0x1df   : > { %v3636_v11 = vadd.f32 %v5268_v5, %v6468_v47 }
 0x1e0   : > { %v3635_v15 = vadd.f32 %v5269_v38, %v6468_v47  ;;  %v5155_v14 = vpop.f32.mrb[14].mxu0 }
 0x1e1   : > { %3669 = vst.msk [vmem:[%s6473_s13 + $0x68] sm:$0xff] %vm3655_vm1, %v3636_v11  ;;  %v5270_v17 = vadd.f32 %v5155_v14, %v6461_v44  ;;  %v3495_v19 = vpop.f32.mrb[15].mxu0 }
 0x1e2   : > { %3668 = vst.msk [vmem:[%s6473_s13 + $0x60] sm:$0xff] %vm3655_vm1, %v3635_v15  ;;  %v5271_v21 = vadd.f32 %v3495_v19, %v6463_v45 }
 0x1e3   : > { %v3638_v23 = vadd.f32 %v5270_v17, %v6468_v47  ;;  %v4934_v25 = vpop.f32.mrb[16].mxu1 }
 0x1e4   : > { %v3637_v27 = vadd.f32 %v5271_v21, %v6468_v47  ;;  %v5158_v29 = vpop.f32.mrb[16].mxu0  ;;  %v1937_v7 = vpop.f32.mrb[17].mxu1 }
 0x1e5   : > { %3671 = vst.msk [vmem:[%s6473_s13 + $0x78] sm:$0xff] %vm3655_vm1, %v3638_v23  ;;  %v5272_v31 = vadd.f32 %v5158_v29, %v4934_v25  ;;  %v3505_v33 = vpop.f32.mrb[17].mxu0 }
 0x1e6   : > { %3670 = vst.msk [vmem:[%s6473_s13 + $0x70] sm:$0xff] %vm3655_vm1, %v3637_v27  ;;  %v5273_v35 = vadd.f32 %v3505_v33, %v1937_v7 }
 0x1e7   : > { %v3640_v12 = vadd.f32 %v5272_v31, %v6468_v47  ;;  %v4937_v40 = vpop.f32.mrb[18].mxu1 }
 0x1e8   : > { %v3639_v37 = vadd.f32 %v5273_v35, %v6468_v47  ;;  %v5161_v39 = vpop.f32.mrb[18].mxu0  ;;  %v1947_v41 = vpop.f32.mrb[19].mxu1 }
 0x1e9   : > { %3673 = vst.msk [vmem:[%s6473_s13 + $0x88] sm:$0xff] %vm3655_vm1, %v3640_v12  ;;  %v5274_v42 = vadd.f32 %v5161_v39, %v4937_v40  ;;  %v3515_v43 = vpop.f32.mrb[19].mxu0 }
 0x1ea   : > { %3672 = vst.msk [vmem:[%s6473_s13 + $0x80] sm:$0xff] %vm3655_vm1, %v3639_v37  ;;  %v5275_v44 = vadd.f32 %v3515_v43, %v1947_v41 }
 0x1eb   : > { %v3642_v45 = vadd.f32 %v5274_v42, %v6468_v47  ;;  %v4940_v46 = vpop.f32.mrb[20].mxu1 }
 0x1ec   : > { %v3641_v48 = vadd.f32 %v5275_v44, %v6468_v47  ;;  %v5164_v49 = vpop.f32.mrb[20].mxu0  ;;  %v1957_v50 = vpop.f32.mrb[21].mxu1 }
 0x1ed   : > { %3675 = vst.msk [vmem:[%s6473_s13 + $0x98] sm:$0xff] %vm3655_vm1, %v3642_v45  ;;  %v5276_v51 = vadd.f32 %v5164_v49, %v4940_v46  ;;  %v3525_v52 = vpop.f32.mrb[21].mxu0 }
 0x1ee   : > { %3674 = vst.msk [vmem:[%s6473_s13 + $0x90] sm:$0xff] %vm3655_vm1, %v3641_v48  ;;  %v5277_v53 = vadd.f32 %v3525_v52, %v1957_v50 }
 0x1ef   : > { %v3644_v54 = vadd.f32 %v5276_v51, %v6468_v47  ;;  %v4943_v55 = vpop.f32.mrb[22].mxu1 }
 0x1f0   : > { %v3643_v56 = vadd.f32 %v5277_v53, %v6468_v47  ;;  %v5167_v57 = vpop.f32.mrb[22].mxu0  ;;  %v1967_v58 = vpop.f32.mrb[23].mxu1 }
 0x1f1   : > { %3677 = vst.msk [vmem:[%s6473_s13 + $0xa8] sm:$0xff] %vm3655_vm1, %v3644_v54  ;;  %v5278_v59 = vadd.f32 %v5167_v57, %v4943_v55  ;;  %v3535_v60 = vpop.f32.mrb[23].mxu0 }
 0x1f2   : > { %3676 = vst.msk [vmem:[%s6473_s13 + $0xa0] sm:$0xff] %vm3655_vm1, %v3643_v56  ;;  %v5279_v61 = vadd.f32 %v3535_v60, %v1967_v58 }
 0x1f3   : > { %v3646_v62 = vadd.f32 %v5278_v59, %v6468_v47  ;;  %v4946_v63 = vpop.f32.mrb[24].mxu1 }
 0x1f4   : > { %v3645_v0 = vadd.f32 %v5279_v61, %v6468_v47  ;;  %v5170_v1 = vpop.f32.mrb[24].mxu0  ;;  %v1977_v2 = vpop.f32.mrb[25].mxu1 }
 0x1f5   : > { %3679 = vst.msk [vmem:[%s6473_s13 + $0xb8] sm:$0xff] %vm3655_vm1, %v3646_v62  ;;  %v5280_v3 = vadd.f32 %v5170_v1, %v4946_v63  ;;  %v3545_v4 = vpop.f32.mrb[25].mxu0 }
 0x1f6   : > { %3678 = vst.msk [vmem:[%s6473_s13 + $0xb0] sm:$0xff] %vm3655_vm1, %v3645_v0  ;;  %v5281_v6 = vadd.f32 %v3545_v4, %v1977_v2 }
 0x1f7   : > { %v3648_v8 = vadd.f32 %v5280_v3, %v6468_v47  ;;  %v4949_v9 = vpop.f32.mrb[26].mxu1 }
 0x1f8   : > { %v3647_v10 = vadd.f32 %v5281_v6, %v6468_v47  ;;  %v5173_v13 = vpop.f32.mrb[26].mxu0  ;;  %v1987_v16 = vpop.f32.mrb[27].mxu1 }
 0x1f9   : > { %3681 = vst.msk [vmem:[%s6473_s13 + $0xc8] sm:$0xff] %vm3655_vm1, %v3648_v8  ;;  %v5282_v18 = vadd.f32 %v5173_v13, %v4949_v9  ;;  %v3555_v20 = vpop.f32.mrb[27].mxu0 }
 0x1fa   : > { %3680 = vst.msk [vmem:[%s6473_s13 + $0xc0] sm:$0xff] %vm3655_vm1, %v3647_v10  ;;  %v5283_v22 = vadd.f32 %v3555_v20, %v1987_v16 }
 0x1fb   : > { %v3650_v24 = vadd.f32 %v5282_v18, %v6468_v47  ;;  %v4952_v26 = vpop.f32.mrb[28].mxu1 }
 0x1fc   : > { %v3649_v28 = vadd.f32 %v5283_v22, %v6468_v47  ;;  %v5176_v30 = vpop.f32.mrb[28].mxu0  ;;  %v1997_v32 = vpop.f32.mrb[29].mxu1 }
 0x1fd   : > { %3683 = vst.msk [vmem:[%s6473_s13 + $0xd8] sm:$0xff] %vm3655_vm1, %v3650_v24  ;;  %v5284_v34 = vadd.f32 %v5176_v30, %v4952_v26  ;;  %v3565_v5 = vpop.f32.mrb[29].mxu0 }
 0x1fe   : > { %3682 = vst.msk [vmem:[%s6473_s13 + $0xd0] sm:$0xff] %vm3655_vm1, %v3649_v28  ;;  %v5285_v36 = vadd.f32 %v3565_v5, %v1997_v32 }
 0x1ff   : > { %v3652_v38 = vadd.f32 %v5284_v34, %v6468_v47  ;;  %v4955_v11 = vpop.f32.mrb[30].mxu1 }
 0x200   : > { %v3651_v15 = vadd.f32 %v5285_v36, %v6468_v47  ;;  %v5179_v14 = vpop.f32.mrb[30].mxu0  ;;  %v2007_v17 = vpop.f32.mrb[31].mxu1 }
 0x201   : > { %3685 = vst.msk [vmem:[%s6473_s13 + $0xe8] sm:$0xff] %vm3655_vm1, %v3652_v38  ;;  %v5286_v19 = vadd.f32 %v5179_v14, %v4955_v11  ;;  %v3575_v21 = vpop.f32.mrb[31].mxu0 }
 0x202   : > { %3684 = vst.msk [vmem:[%s6473_s13 + $0xe0] sm:$0xff] %vm3655_vm1, %v3651_v15  ;;  %v5287_v23 = vadd.f32 %v3575_v21, %v2007_v17 }
 0x203   : > { %v3654_v25 = vadd.f32 %v5286_v19, %v6468_v47 }
 0x204   : > { %v3653_v27 = vadd.f32 %v5287_v23, %v6468_v47 }
 0x205   : > { %3687 = vst.msk [vmem:[%s6473_s13 + $0xf8] sm:$0xff] %vm3655_vm1, %v3654_v25 }
 0x206   : > { %3686 = vst.msk [vmem:[%s6473_s13 + $0xf0] sm:$0xff] %vm3655_vm1, %v3653_v27 }
 0x207 PF: > { %s13_s12 = sadd.s32 1, %s5526_s12  }
 0x208   : > { %p10_p4 = scmp.ge.s32.totalorder %s13_s12, 5  }
 0x20a   :  { %12 = sbr.rel (!%p10_p4) target bundleno = 1 (0x1), region = 76 }

// kernel: vae_forward.13
= control target key start
LH: loop header
LB: loop body
LE: loop exit
PB: predicated region body
PF: predicated region fallthrough
CT: control target
= control target key end

     0   :  { %9 = vsyncpa [#allocation5], 0  ;;  %s475_s15 = smov 0   ;;  %s530_s0 = inlined_call_operand.vmem [shape: f32[16,128], index: 0, kind: input, shape index: {}]   ;;  %s531_s1 = inlined_call_operand.vmem [shape: f32[16,128], index: 1, kind: input, shape index: {}]   ;;  %s532_s2 = inlined_call_operand.vmem [shape: f32[16,128], index: 2, kind: input, shape index: {}]   ;;  %s533_s3 = inlined_call_operand.vmem [shape: f32[16,128], index: 3, kind: input, shape index: {}]   ;;  %s534_s4 = inlined_call_operand.hbm [shape: f32[1,1], index: 4, kind: output, shape index: {}]  }
   0x1 LB: > { %s481_s16 = sadd.s32 4294967295, %s446_s15   ;;  %p376_p0 = scmp.ge.s32.totalorder %s446_s15, 1  ;;  %s446_s15 = sphi %s475_s15, %s15_s15  }
   0x2   : > { %p184_p1 = scmp.lt.s32.totalorder %s446_s15, 3 }
   0x4   : > { %p185_p2 = pnand %p376_p0, %p184_p1 }
   0x5   : > { %p216_p3 = scmp.lt.s32.totalorder (!%p185_p2), %s481_s16, 1  ;;  %p381_p4 = scmp.ne.s32.totalorder (!%p185_p2), %s481_s16, 0 }
   0x6   : > { %188 = sbr.rel (%p185_p2) target bundleno = 296 (0x128), region = 36 }
   0xd   : > { %s217_s17 = scalar_select %p216_p3, %s481_s16, 1 }
   0xe   : > { %235 = sbr.rel (%p381_p4) target bundleno = 21 (0x15), region = 40  ;;  %vm236_vm0 = vcmask (!%p381_p4), 0   ;;  %v448_v0 = vmov (!%p381_p4), 0.0  }
   0xf   : > { %s377_s18 = sshll.u32 %s217_s17, 3  ;;  %237 = vst.msk [vmem:[#allocation2] sm:$0x1] (!%p381_p4), %vm236_vm0, %v448_v0  ;;  %238 = vst.msk [vmem:[#allocation3] sm:$0x1] (!%p381_p4), %vm236_vm0, %v448_v0 }
  0x10   : > { %s219_s21 = scalar_lea.vmem %s530_s0, %s377_s18  ;;  %s223_s24 = scalar_lea.vmem %s531_s1, %s377_s18 }
  0x11   : > { %s227_s27 = scalar_lea.vmem %s532_s2, %s377_s18  ;;  %s231_s30 = scalar_lea.vmem %s533_s3, %s377_s18 }
  0x15 PF: > { %v240_v1 = vld [vmem:[%s219_s21] sm:$0xff]  ;;  %vm255_vm1 = vcmask 0   ;;  %p383_p5 = scmp.ne.s32.totalorder %s481_s16, 1 }
  0x16   : > { %v241_v2 = vld [vmem:[%s223_s24] sm:$0xff] }
  0x17   : > { %v257_v3 = vld [vmem:[%s231_s30] sm:$0xff]  ;;  %v242_v4 = vsub.f32 %v240_v1, %v241_v2 }
  0x18   : > { %v258_v5 = vmax.f32 %v257_v3, -30.0  ;;  %v260_v9 = vld [vmem:[%s227_s27] sm:$0xff] }
  0x19   : > { %v243_v6 = vand.u32 2147483647, %v242_v4  ;;  %v262_v10 = vmul.f32 %v260_v9, %v260_v9  ;;  %v239_v29 = vld [vmem:[#allocation2] sm:$0x1]  ;;  %v261_v32 = vld [vmem:[#allocation3] sm:$0x1] }
  0x1a   : > { %v259_v7 = vmin.f32 %v258_v5, 20.0 }
  0x1b   : > { %244 = vadd.xlane.f32.xlu0 %v243_v6 }
  0x1c   : > { %v263_v8 = vmul.f32 1.442695, %v259_v7 }
  0x1e   : > { %408 = vpow2.f32 %v263_v8 }
  0x28   : > { %v409_v11 = vpop.eup %408 }
  0x29   : > { %v265_v12 = vadd.f32 %v409_v11, %v262_v10 }
  0x2b   : > { %v382_v13 = vadd.f32 -1.0, %v265_v12 }
  0x2d   : > { %v267_v14 = vsub.f32 %v382_v13, %v259_v7 }
  0x2f   : > { %268 = vadd.xlane.f32.xlu0 %v267_v14 }
  0xa8   : > { %v245_v15 = vpop.xlane.xlu0 %244 }
  0xa9   : > { %v246_v16 = vrot.slane %v245_v15, 4 }
  0xab   : > { %v247_v17 = vadd.f32 %v246_v16, %v245_v15 }
  0xad   : > { %v248_v18 = vrot.slane %v247_v17, 2 }
  0xaf   : > { %v249_v19 = vadd.f32 %v248_v18, %v247_v17 }
  0xb1   : > { %v250_v20 = vrot.slane %v249_v19, 1 }
  0xb3   : > { %v251_v21 = vadd.f32 %v250_v20, %v249_v19 }
  0xb5   : > { %388 = vpush %v251_v21 }
  0xbc   : > { %v269_v22 = vpop.xlane.xlu0 %268 }
  0xbd   : > { %v270_v23 = vrot.slane %v269_v22, 4 }
  0xbf   : > { %v271_v24 = vadd.f32 %v270_v23, %v269_v22 }
  0xc1   : > { %v272_v25 = vrot.slane %v271_v24, 2 }
  0xc3   : > { %v273_v26 = vadd.f32 %v272_v25, %v271_v24 }
  0xc5   : > { %v274_v27 = vrot.slane %v273_v26, 1 }
  0xc7   : > { %v275_v28 = vadd.f32 %v274_v27, %v273_v26 }
  0xc9   : > { %390 = vpush %v275_v28 }
  0xe6   : > { %s389_s5 = spop %388 }
  0xe7   : > { %v253_v30 = vstv %s389_s5 }
  0xe8   : > { %v254_v31 = vadd.f32 %v253_v30, %v239_v29 }
  0xea   : > { %256 = vst.msk [vmem:[#allocation2] sm:$0x1] %vm255_vm1, %v254_v31 }
  0xf1   : > { %v285_v35 = vld [vmem:[#allocation2] sm:$0x1] (!%p383_p5) }
  0xfa   : > { %s391_s6 = spop %390  ;;  %284 = sbr.rel (%p383_p5) target bundleno = 271 (0x10f), region = 44 }
  0xfb   : > { %s277_s7 = smul.f32 0.5, %s391_s6 }
  0xfd   : > { %v278_v33 = vstv %s277_s7 }
  0xfe   : > { %v279_v34 = vadd.f32 %v278_v33, %v261_v32 }
 0x100   : > { %280 = vst.msk [vmem:[#allocation3] sm:$0x1] %vm255_vm1, %v279_v34 }
 0x107   : > { %v286_v36 = vld [vmem:[#allocation3] sm:$0x1] }
 0x108   : > { %v287_v37 = vmul.f32 1e-06, %v286_v36 }
 0x10a   : > { %v288_v38 = vadd.f32 %v287_v37, %v285_v35 }
 0x10c   : > { %v289_v39 = vmul.f32 0.5, %v288_v38 }
 0x10e   : > { %290 = vst.msk [vmem:[#allocation4] sm:$0x1] %vm255_vm1, %v289_v39 }
 0x10f PF: > { %p396_p6 = scmp.eq.s32.totalorder %s481_s16, 1  ;;  %s449_s8 = smov [#allocation4]  }
 0x110   : > { %s298_s9 = sshll.u32 %s449_s8, 4  ;;  %s299_s9 = int_to_ptr.vmem [resolvable:$true] %s298_s9 }
 0x111   : > { %s410_s10 = scalar_lea.vmem %s299_s9, 16  ;;  %s416_s11 = scalar_lea.vmem %s299_s9, 32 }
 0x112   : > { %p411_p7 = scmp.ne.s32.totalorder %s299_s9, %s410_s10  ;;  %p417_p10 = scmp.lt.s32.totalorder %s299_s9, %s299_s9 }
 0x113   : > { %p418_p11 = scmp.lt.s32.totalorder %s416_s11, %s410_s10 }
 0x114   : > { %p412_p8 = pnand %p411_p7, %p396_p6 }
 0x115   : > { %p419_p12 = por %p418_p11, %p417_p10 }
 0x116   : > { %p413_p9 = pneg %p412_p8 }
 0x118   : > { %p420_p13 = pnand %p419_p12, %p413_p9 }
 0x11a   : > { %423 = shalt.err (!%p420_p13)
}
 0x11b   : > { %s424_s14 = scalar_lea.hbm %s534_s4, 16 }
 0x11c   : > { %p425_p0 = scmp.ne.s32.totalorder %s534_s4, %s424_s14  ;;  %p430_p3 = scmp.lt.u32.totalorder %s424_s14, %s534_s4 }
 0x11e   : > { %p426_p1 = pnand %p425_p0, %p396_p6 }
 0x120   : > { %p427_p2 = pneg %p426_p1 }
 0x122   : > { %p432_p4 = pnand %p430_p3, %p427_p2 }
 0x124   : > { %435 = shalt.err (!%p432_p4)
}
 0x125   : > { %393 = dma.vmem_to_hbm [thread:$0]  (%p396_p6), %s299_s9, 16, %s534_s4, [#allocation5]  }
 0x126   : > { %441 = dma.done.wait (%p396_p6), [#allocation5], 16  }
 0x127   : > { %443 = vsyncadd (%p396_p6), [#allocation5], 4294967280 }
 0x128 PF: > { %s15_s15 = sadd.s32 1, %s446_s15  }
 0x129   : > { %p12_p5 = scmp.ge.s32.totalorder %s15_s15, 4  }
 0x12b   :  { %14 = sbr.rel (!%p12_p5) target bundleno = 1 (0x1), region = 80 }
 0x132   :  { %311 = vsyncpa [#allocation5], 1 }
 0x133   :  { %313 = vsyncpa [#allocation5 + $0x1], 1 }

</bundles_post_ra>
